<compile_context>
chip_gen: v5e
topology: v5e:2x2
jax: 0.10.0
libtpu: 0.0.40
codegen_flags: <defaults>
</compile_context>

<pallas_src>
import functools
import math

import numpy as np
import jax
import jax.numpy as jnp
from jax.experimental import pallas as pl
from jax.experimental.pallas import tpu as pltpu

# ---------------------------------------------------------------- config ----
BATCH = 2
SEQ = 8
HIDDEN = 32        # args['hiddenSize']
EMB = 16           # args['embeddingSize']
VOCAB = 50         # args['vocabularySize']
NCLASS = 3

_VMEM = pl.BlockSpec(memory_space=pltpu.MemorySpace.VMEM)

_LOG_PRIOR0 = math.log(0.9999)
_LOG_PRIOR1 = math.log(0.0001)


# ------------------------------------------------------------ fused kernel --
def _fused_forward_kernel(
    ids_ref, lab_ref, prev_ref, pick_ref, pickt_ref, tsel_ref,
    table0_ref,
    whh0A_ref, wt1A_ref, wr1A_ref, b1A_ref, whh1A_ref,
    bM0_ref, whh0M_ref, wt1M_ref, wr1M_ref, b1M_ref, whh1M_ref,
    m0_ref, m1_ref, x2z_w_ref, x2z_b_ref,
    fea_w_ref, fea_b_ref, cls_w_ref, cls_b_ref,
    feat_ref, misc_ref,
    tA_scr, uA_scr, tM_scr, uM_scr,
    *, batch, seq, hidden, vocab, nclass):
  """Entire LSTM_IB_GAN forward (eval mode) in one kernel.

  Sequence activations are flat & time-major: row r = t*batch + b.
  Gate layout is gate-major: [i-block | f-block | o-block | g-block], each
  block holding D direction sub-blocks of width H (D = #stacked directions).
  Backward-direction columns are stored with time pre-reversed so every
  stacked direction uses the same step -> row mapping.
  """
  B, S, H, V, C = batch, seq, hidden, vocab, nclass
  f32 = jnp.float32
  eps = 1e-6

  ids2 = ids_ref[...]                       # [S*B, 2] int32 (ordered | reversed)
  ids = ids2[:, 0:1]
  ids_rev = ids2[:, 1:2]
  mask_tm = (ids != 0).astype(f32)          # pad mask, time-major column

  p_rev = prev_ref[...]                     # [S*B, S*B] row-block time reversal
  pick = pick_ref[...]                      # [B, S*B]   sum-over-time matrix
  pickt = pickt_ref[...]                    # [S*B, B]   broadcast-over-time matrix
  tsel = tsel_ref[...]                      # [S*B, S]   one-hot time index

  # ---- fused embedding + all layer-0 input projections: ONE matmul ---------
  col = jax.lax.broadcasted_iota(jnp.int32, (S * B, 2 * V), 1)
  onehot2 = (col == ids).astype(f32) + (col == ids_rev + V).astype(f32)
  x0 = jnp.dot(onehot2, table0_ref[...], preferred_element_type=f32)  # [S*B,32H]
  gxA = x0[:, 0:16 * H]          # enc_all + enc_select gate inputs (bias folded,
                                 # backward columns already time-reversed)
  xw_mf = x0[:, 16 * H:24 * H]   # enc_mask fwd dir x@W_ih (no bias, time order)
  xw_mb = x0[:, 24 * H:32 * H]   # enc_mask bwd dir x@W_ih (no bias, time order)

  # ---- stacked multi-direction LSTM recurrence ------------------------------
  def stacked_lstm(gx, whh, seq_scr, D):
    DH = D * H
    h = jnp.zeros((B, DH), f32)
    c = jnp.zeros((B, DH), f32)
    for s in range(S):                                  # statically unrolled
      g = gx[s * B:(s + 1) * B, :] + jnp.dot(h, whh, preferred_element_type=f32)
      sg = jax.nn.sigmoid(g[:, 0:3 * DH])               # (i | f | o) one EUP pass
      gg = jnp.tanh(g[:, 3 * DH:4 * DH])
      c = sg[:, DH:2 * DH] * c + sg[:, 0:DH] * gg
      h = sg[:, 2 * DH:3 * DH] * jnp.tanh(c)
      seq_scr[pl.ds(s * B, B), :] = h                   # direct VMEM placement
    return seq_scr[...], h                              # ([S*B,DH], final [B,DH])

  # per-batch max over time:  [S*B, F] -> [B, F]   (B is tiny & static)
  def time_max(x):
    parts = [jnp.max(jnp.where(pickt[:, b:b + 1] > 0.5, x, -1e30),
                     axis=0, keepdims=True) for b in range(B)]
    return jnp.concatenate(parts, axis=0)

  # ========== encoder_all + encoder_select, stacked dirs [af, sf, ab, sb] ====
  T_A, hfin0 = stacked_lstm(gxA, whh0A_ref[...], tA_scr, 4)
  R_A = jnp.dot(p_rev, T_A, preferred_element_type=f32)
  gx1A = (jnp.dot(T_A, wt1A_ref[...], preferred_element_type=f32)
          + jnp.dot(R_A, wr1A_ref[...], preferred_element_type=f32)
          + b1A_ref[...])                                              # [S*B,16H]
  U_A, hfin1 = stacked_lstm(gx1A, whh1A_ref[...], uA_scr, 4)
  UR_A = jnp.dot(p_rev, U_A, preferred_element_type=f32)

  seq_a1 = jnp.concatenate([U_A[:, 0:H], UR_A[:, 2 * H:3 * H]], axis=1)  # [S*B,2H]
  seq_s1 = jnp.concatenate([U_A[:, H:2 * H], UR_A[:, 3 * H:4 * H]], axis=1)

  # ---- attention pooling over encoder_all outputs -> z_nero_best ------------
  # v = attm @ en_hidden, attm pre-routed host-side to the stacked final-hidden
  # layouts (m0 <- layer-0 finals, m1 <- layer-1 finals).
  v = (jnp.dot(hfin0, m0_ref[...], preferred_element_type=f32)
       + jnp.dot(hfin1, m1_ref[...], preferred_element_type=f32))        # [B,2H]
  scores = jnp.sum(seq_a1 * jnp.dot(pickt, v, preferred_element_type=f32),
                   axis=1, keepdims=True)                                # [S*B,1]
  smax = time_max(scores)                                                # [B,1]
  e = jnp.exp(scores - jnp.dot(pickt, smax, preferred_element_type=f32))
  den = jnp.dot(pick, e, preferred_element_type=f32)                     # [B,1]
  att = e * jnp.dot(pickt, pl.reciprocal(den, approx=True),
                    preferred_element_type=f32)                          # [S*B,1]
  z_best = jnp.dot(pick, att * seq_a1, preferred_element_type=f32)       # [B,2H]

  # ---- rationale gate from encoder_select (log-softmax, eval sampling) ------
  z_logit = (jnp.dot(seq_s1, x2z_w_ref[...], preferred_element_type=f32)
             + x2z_b_ref[...])                                           # [S*B,2]
  zsh = z_logit - jnp.max(z_logit, axis=1, keepdims=True)
  logp = zsh - jnp.log(jnp.sum(jnp.exp(zsh), axis=1, keepdims=True))
  p = jnp.exp(logp)
  p0, p1 = p[:, 0:1], p[:, 1:2]
  logp0, logp1 = logp[:, 0:1], logp[:, 1:2]
  gate = (p1 > 0.5).astype(f32) * mask_tm     # deterministic eval-mode sampling

  # ========== encoder_mask over rationale-gated embeddings ===================
  gxM = (gate * xw_mf
         + jnp.dot(p_rev, gate * xw_mb, preferred_element_type=f32)
         + bM0_ref[...])                                                 # [S*B,8H]
  T_M, _ = stacked_lstm(gxM, whh0M_ref[...], tM_scr, 2)
  R_M = jnp.dot(p_rev, T_M, preferred_element_type=f32)
  gx1M = (jnp.dot(T_M, wt1M_ref[...], preferred_element_type=f32)
          + jnp.dot(R_M, wr1M_ref[...], preferred_element_type=f32)
          + b1M_ref[...])
  U_M, _ = stacked_lstm(gx1M, whh1M_ref[...], uM_scr, 2)
  UR_M = jnp.dot(p_rev, U_M, preferred_element_type=f32)
  seq_m1 = jnp.concatenate([U_M[:, 0:H], UR_M[:, H:2 * H]], axis=1)      # [S*B,2H]

  s_w = (jnp.dot(seq_m1, fea_w_ref[...], preferred_element_type=f32)
         + fea_b_ref[...])
  z_samp = time_max(s_w)                      # max over sequence; dropout = id

  # ========== regularizer terms ==============================================
  logpz_col = jnp.where(gate == 0.0, logp0, logp1) * mask_tm             # [S*B,1]
  logpz_bt = jnp.dot(pick, logpz_col * tsel, preferred_element_type=f32) # [B,S]

  ixz_row = mask_tm * (p0 * (logp0 - _LOG_PRIOR0)
                       + p1 * (logp1 - _LOG_PRIOR1)) + 2.0 * eps
  i_x_z = jnp.dot(pick, ixz_row, preferred_element_type=f32) * 0.01      # [B,1]

  dgate = jnp.abs(gate[B:, :] - gate[:-B, :])                            # [(S-1)B,1]
  omega = jnp.sum(dgate, axis=0, keepdims=True) * (1.0 / B)              # [1,1]
  omega_b = jnp.zeros((B, 1), f32) + omega                               # [B,1]

  # ========== classifier on both pooled features (stacked) ===================
  z_stack = jnp.concatenate([z_best, z_samp], axis=0)                    # [2B,2H]
  logits = (jnp.dot(z_stack, cls_w_ref[...], preferred_element_type=f32)
            + cls_b_ref[...])                                            # [2B,C]
  lsh = logits - jnp.max(logits, axis=1, keepdims=True)
  logprob = lsh - jnp.log(jnp.sum(jnp.exp(lsh), axis=1, keepdims=True))
  lab = lab_ref[...]                                                     # [B,1]
  lab_oh = (lab == jax.lax.broadcasted_iota(jnp.int32, (B, C), 1)).astype(f32)
  lab_oh2 = jnp.concatenate([lab_oh, lab_oh], axis=0)                    # [2B,C]
  nll = -jnp.sum(logprob * lab_oh2, axis=1, keepdims=True)               # [2B,1]
  recon_all = nll[0:B, :]          # NLL(classifier(z_nero_best))
  recon = nll[B:2 * B, :]          # NLL(classifier(z_nero_sampled))

  feat_ref[...] = z_stack          # rows 0:B -> z_nero_best, B:2B -> z_nero_sampled
  misc_ref[...] = jnp.concatenate(
      [logpz_bt, recon, recon_all, i_x_z, omega_b], axis=1)              # [B, S+4]


# -------------------------------------------------------- host-side packing --
def _scatter_gate_major(w, d, ndirs, H):
  """[R, 4H] per-direction weight (gate order i,f,o,g) -> [R, 4*ndirs*H]
  gate-major layout, direction d occupying its H columns in each gate block."""
  out = jnp.zeros((w.shape[0], 4 * ndirs * H), jnp.float32)
  for k in range(4):
    out = out.at[:, k * ndirs * H + d * H:k * ndirs * H + (d + 1) * H].set(
        w[:, k * H:(k + 1) * H])
  return out


def _block_diag_recurrent(whh_list, H):
  D = len(whh_list)
  out = jnp.zeros((D * H, 4 * D * H), jnp.float32)
  for d, w in enumerate(whh_list):
    out = out.at[d * H:(d + 1) * H, :].set(_scatter_gate_major(w, d, D, H))
  return out


def _pack_layer1(w1_list, b1_list, routing, H):
  """Route layer-1 W_ih blocks onto the stacked layer-0 outputs T (as stored)
  and R = P_rev @ T so that gx1 = T@WT + R@WR + b is correct for every dir."""
  D = len(w1_list)
  WT = jnp.zeros((D * H, 4 * D * H), jnp.float32)
  WR = jnp.zeros((D * H, 4 * D * H), jnp.float32)
  for d1, src_fwd, src_bwd in routing:
    w = w1_list[d1]
    for (which, blk), rows in ((src_fwd, w[0:H, :]), (src_bwd, w[H:2 * H, :])):
      gm = _scatter_gate_major(rows, d1, D, H)
      if which == 'T':
        WT = WT.at[blk * H:(blk + 1) * H, :].add(gm)
      else:
        WR = WR.at[blk * H:(blk + 1) * H, :].add(gm)
  b = sum(_scatter_gate_major(b1_list[d1], d1, D, H) for d1 in range(D))
  return WT, WR, b


def _init_dir(key, in_dim, hidden):
  k1, k2, k3 = jax.random.split(key, 3)
  s = 1.0 / math.sqrt(hidden)
  return {
      'wih': jax.random.uniform(k1, (in_dim, 4 * hidden), jnp.float32, -s, s),
      'whh': jax.random.uniform(k2, (hidden, 4 * hidden), jnp.float32, -s, s),
      'b': jax.random.uniform(k3, (1, 4 * hidden), jnp.float32, -s, s),
  }


def init_params(key):
  """Raw per-direction parameters (PyTorch-module-equivalent structure)."""
  H, E, V, C = HIDDEN, EMB, VOCAB, NCLASS
  keys = jax.random.split(key, 32)
  ki = iter(range(32))
  enc = {}
  for name in ('all', 'sel', 'msk'):
    enc[name] = {
        'l0f': _init_dir(keys[next(ki)], E, H),
        'l0b': _init_dir(keys[next(ki)], E, H),
        'l1f': _init_dir(keys[next(ki)], 2 * H, H),
        'l1b': _init_dir(keys[next(ki)], 2 * H, H),
    }
  s2 = 1.0 / math.sqrt(2 * H)
  return {
      'enc': enc,
      'embedding': 0.1 * jax.random.normal(keys[next(ki)], (V, E), jnp.float32),
      'attm': jax.random.uniform(keys[next(ki)], (2 * H, 4 * H), jnp.float32,
                                 0.0, 1.0),
      'x2z_w': jax.random.uniform(keys[next(ki)], (2 * H, 2), jnp.float32, -s2, s2),
      'x2z_b': jax.random.uniform(keys[next(ki)], (1, 2), jnp.float32, -s2, s2),
      'fea_w': jax.random.uniform(keys[next(ki)], (2 * H, 2 * H), jnp.float32,
                                  -s2, s2),
      'fea_b': jnp.zeros((1, 2 * H), jnp.float32),
      'cls_w': jax.random.uniform(keys[next(ki)], (2 * H, C), jnp.float32, -s2, s2),
      'cls_b': jnp.zeros((1, C), jnp.float32),
  }


def pack_params(raw):
  """Build the fused one-hot table, block-diagonal recurrences and routed
  layer-1 / attention matrices consumed by the kernel."""
  H, V = HIDDEN, VOCAB
  enc, emb = raw['enc'], raw['embedding']

  # stacked direction order: group A = [all_f, sel_f, all_b, sel_b]
  a0 = [enc['all']['l0f'], enc['sel']['l0f'], enc['all']['l0b'], enc['sel']['l0b']]
  a1 = [enc['all']['l1f'], enc['sel']['l1f'], enc['all']['l1b'], enc['sel']['l1b']]
  m0d = [enc['msk']['l0f'], enc['msk']['l0b']]
  m1d = [enc['msk']['l1f'], enc['msk']['l1b']]

  # fused embedding @ layer-0 W_ih table: [2V, 32H]
  tbl = jnp.zeros((2 * V, 32 * H), jnp.float32)
  for d, p in enumerate(a0):
    proj = emb @ p['wih'] + p['b']        # bias folded (one-hot rows sum to 1)
    roff = 0 if d < 2 else V              # bwd dirs read the reversed one-hot half
    tbl = tbl.at[roff:roff + V, 0:16 * H].add(_scatter_gate_major(proj, d, 4, H))
  tbl = tbl.at[0:V, 16 * H:24 * H].add(
      _scatter_gate_major(emb @ m0d[0]['wih'], 0, 2, H))   # mask fwd, no bias
  tbl = tbl.at[0:V, 24 * H:32 * H].add(
      _scatter_gate_major(emb @ m0d[1]['wih'], 1, 2, H))   # mask bwd, no bias

  routing_A = [(0, ('T', 0), ('R', 2)), (1, ('T', 1), ('R', 3)),
               (2, ('R', 0), ('T', 2)), (3, ('R', 1), ('T', 3))]
  routing_M = [(0, ('T', 0), ('R', 1)), (1, ('R', 0), ('T', 1))]
  wt1A, wr1A, b1A = _pack_layer1([p['wih'] for p in a1], [p['b'] for p in a1],
                                 routing_A, H)
  wt1M, wr1M, b1M = _pack_layer1([p['wih'] for p in m1d], [p['b'] for p in m1d],
                                 routing_M, H)

  # attm routed onto the stacked final-hidden layouts [af | sf | ab | sb]
  attmT = raw['attm'].T                                    # [4H, 2H]
  m0 = (jnp.zeros((4 * H, 2 * H), jnp.float32)
        .at[0:H].set(attmT[0:H]).at[2 * H:3 * H].set(attmT[H:2 * H]))
  m1 = (jnp.zeros((4 * H, 2 * H), jnp.float32)
        .at[0:H].set(attmT[2 * H:3 * H]).at[2 * H:3 * H].set(attmT[3 * H:4 * H]))

  return {
      'table0': tbl,
      'whh0A': _block_diag_recurrent([p['whh'] for p in a0], H),
      'wt1A': wt1A, 'wr1A': wr1A, 'b1A': b1A,
      'whh1A': _block_diag_recurrent([p['whh'] for p in a1], H),
      'bM0': (_scatter_gate_major(m0d[0]['b'], 0, 2, H)
              + _scatter_gate_major(m0d[1]['b'], 1, 2, H)),
      'whh0M': _block_diag_recurrent([p['whh'] for p in m0d], H),
      'wt1M': wt1M, 'wr1M': wr1M, 'b1M': b1M,
      'whh1M': _block_diag_recurrent([p['whh'] for p in m1d], H),
      'attm_m0': m0, 'attm_m1': m1,
      'x2z_w': raw['x2z_w'], 'x2z_b': raw['x2z_b'],
      'fea_w': raw['fea_w'], 'fea_b': raw['fea_b'],
      'cls_w': raw['cls_w'], 'cls_b': raw['cls_b'],
  }


def _index_constants(B, S):
  """Tiny constant matrices: time reversal / per-batch sum / broadcast / time
  one-hot — used so all reductions & broadcasts become MXU matmuls."""
  SB = S * B
  r = np.arange(SB)
  t, b = r // B, r % B
  p_rev = np.zeros((SB, SB), np.float32)
  p_rev[r, (S - 1 - t) * B + b] = 1.0
  pick = np.zeros((B, SB), np.float32)
  pick[b, r] = 1.0
  tsel = np.zeros((SB, S), np.float32)
  tsel[r, t] = 1.0
  return (jnp.asarray(p_rev), jnp.asarray(pick),
          jnp.asarray(pick.T), jnp.asarray(tsel))


# ---------------------------------------------------------------- forward ---
def model_forward(packed, consts, enc_input, labels):
  """Returns (losses, losses_best, I, om, z_nero_best, z_nero_sampled,
  logpz, optional) like LSTM_IB_GAN_Model.forward (eval mode)."""
  B, S = enc_input.shape
  H = HIDDEN
  p_rev, pick, pickt, tsel = consts

  ids_tm = enc_input.T.reshape(S * B, 1)
  ids_rev_tm = enc_input[:, ::-1].T.reshape(S * B, 1)
  ids2 = jnp.concatenate([ids_tm, ids_rev_tm], axis=1).astype(jnp.int32)
  lab2 = labels.reshape(B, 1).astype(jnp.int32)

  kern = functools.partial(_fused_forward_kernel, batch=B, seq=S, hidden=H,
                           vocab=VOCAB, nclass=NCLASS)
  feat, misc = pl.pallas_call(
      kern,
      out_shape=(jax.ShapeDtypeStruct((2 * B, 2 * H), jnp.float32),
                 jax.ShapeDtypeStruct((B, S + 4), jnp.float32)),
      in_specs=[_VMEM] * 26,
      out_specs=(_VMEM, _VMEM),
      scratch_shapes=[pltpu.VMEM((S * B, 4 * H), jnp.float32),   # group-A layer0
                      pltpu.VMEM((S * B, 4 * H), jnp.float32),   # group-A layer1
                      pltpu.VMEM((S * B, 2 * H), jnp.float32),   # mask layer0
                      pltpu.VMEM((S * B, 2 * H), jnp.float32)],  # mask layer1
  )(ids2, lab2, p_rev, pick, pickt, tsel,
    packed['table0'],
    packed['whh0A'], packed['wt1A'], packed['wr1A'], packed['b1A'],
    packed['whh1A'],
    packed['bM0'], packed['whh0M'], packed['wt1M'], packed['wr1M'],
    packed['b1M'], packed['whh1M'],
    packed['attm_m0'], packed['attm_m1'],
    packed['x2z_w'], packed['x2z_b'],
    packed['fea_w'], packed['fea_b'],
    packed['cls_w'], packed['cls_b'])

  z_best = feat[0:B]
  z_samp = feat[B:2 * B]
  logpz = misc[:, 0:S]                  # already [B, S]
  recon = misc[:, S]
  recon_all = misc[:, S + 1]
  i_x_z = misc[:, S + 2]
  omega = misc[0, S + 3]

  optional = {
      'recon_loss': jnp.mean(recon),
      'recon_best': jnp.mean(recon_all),
      'I_x_z': jnp.mean(i_x_z),
      'zdiff': omega,
  }
  return (recon, recon_all, 0.0003 * i_x_z, 0.005 * omega,
          z_best, z_samp, logpz, optional)


# ------------------------------------------------------------------- main ---
if __name__ == "__main__":
  key = jax.random.PRNGKey(0)
  k_in, k_lab = jax.random.split(key)
  enc_input = jax.random.randint(k_in, (BATCH, SEQ), 1, VOCAB, dtype=jnp.int32)
  enc_input = enc_input.at[1, -2:].set(0)          # a couple of pad tokens
  labels = jax.random.randint(k_lab, (BATCH,), 0, NCLASS, dtype=jnp.int32)

  raw = init_params(jax.random.PRNGKey(42))
  packed = pack_params(raw)
  consts = _index_constants(BATCH, SEQ)

  fwd = jax.jit(functools.partial(model_forward, packed, consts))
  out = fwd(enc_input, labels)
  jax.block_until_ready(out)

  losses, losses_best, I, om, z_best, z_samp, logpz, optional = out
  assert losses.shape == (BATCH,)
  assert losses_best.shape == (BATCH,)
  assert I.shape == (BATCH,)
  assert z_best.shape == (BATCH, 2 * HIDDEN)
  assert z_samp.shape == (BATCH, 2 * HIDDEN)
  assert logpz.shape == (BATCH, SEQ)
  print("KERNEL_OK")
</pallas_src>

<mosaic_0001>
module attributes {stable_mosaic.version = 11 : i64} {
  func.func @_fused_forward_kernel(%arg0: memref<16x2xi32, #tpu.memory_space<vmem>>, %arg1: memref<2x1xi32, #tpu.memory_space<vmem>>, %arg2: memref<16x16xf32, #tpu.memory_space<vmem>>, %arg3: memref<2x16xf32, #tpu.memory_space<vmem>>, %arg4: memref<16x2xf32, #tpu.memory_space<vmem>>, %arg5: memref<16x8xf32, #tpu.memory_space<vmem>>, %arg6: memref<100x1024xf32, #tpu.memory_space<vmem>>, %arg7: memref<128x512xf32, #tpu.memory_space<vmem>>, %arg8: memref<128x512xf32, #tpu.memory_space<vmem>>, %arg9: memref<128x512xf32, #tpu.memory_space<vmem>>, %arg10: memref<1x512xf32, #tpu.memory_space<vmem>>, %arg11: memref<128x512xf32, #tpu.memory_space<vmem>>, %arg12: memref<1x256xf32, #tpu.memory_space<vmem>>, %arg13: memref<64x256xf32, #tpu.memory_space<vmem>>, %arg14: memref<64x256xf32, #tpu.memory_space<vmem>>, %arg15: memref<64x256xf32, #tpu.memory_space<vmem>>, %arg16: memref<1x256xf32, #tpu.memory_space<vmem>>, %arg17: memref<64x256xf32, #tpu.memory_space<vmem>>, %arg18: memref<128x64xf32, #tpu.memory_space<vmem>>, %arg19: memref<128x64xf32, #tpu.memory_space<vmem>>, %arg20: memref<64x2xf32, #tpu.memory_space<vmem>>, %arg21: memref<1x2xf32, #tpu.memory_space<vmem>>, %arg22: memref<64x64xf32, #tpu.memory_space<vmem>>, %arg23: memref<1x64xf32, #tpu.memory_space<vmem>>, %arg24: memref<64x3xf32, #tpu.memory_space<vmem>>, %arg25: memref<1x3xf32, #tpu.memory_space<vmem>>, %arg26: memref<4x64xf32, #tpu.memory_space<vmem>>, %arg27: memref<2x12xf32, #tpu.memory_space<vmem>>, %arg28: memref<16x128xf32, #tpu.memory_space<vmem>>, %arg29: memref<16x128xf32, #tpu.memory_space<vmem>>, %arg30: memref<16x64xf32, #tpu.memory_space<vmem>>, %arg31: memref<16x64xf32, #tpu.memory_space<vmem>>) attributes {dimension_semantics = [], scalar_prefetch = 0 : i64, scratch_operands = 4 : i64, tpu.core_type = #tpu.core_type<tc>} {
    %c0 = arith.constant 0 : index
    %c0_0 = arith.constant 0 : index
    %0 = vector.load %arg0[%c0, %c0_0] : memref<16x2xi32, #tpu.memory_space<vmem>>, vector<16x2xi32>
    %1 = vector.extract_strided_slice %0 {offsets = [0, 0], sizes = [16, 1], strides = [1, 1]} : vector<16x2xi32> to vector<16x1xi32>
    %2 = vector.extract_strided_slice %0 {offsets = [0, 1], sizes = [16, 1], strides = [1, 1]} : vector<16x2xi32> to vector<16x1xi32>
    %c0_i32 = arith.constant 0 : i32
    %3 = vector.broadcast %c0_i32 : i32 to vector<16x1xi32>
    %4 = arith.cmpi ne, %1, %3 : vector<16x1xi32>
    %5 = arith.extui %4 : vector<16x1xi1> to vector<16x1xi32>
    %6 = arith.sitofp %5 : vector<16x1xi32> to vector<16x1xf32>
    %c0_1 = arith.constant 0 : index
    %c0_2 = arith.constant 0 : index
    %7 = vector.load %arg2[%c0_1, %c0_2] : memref<16x16xf32, #tpu.memory_space<vmem>>, vector<16x16xf32>
    %c0_3 = arith.constant 0 : index
    %c0_4 = arith.constant 0 : index
    %8 = vector.load %arg3[%c0_3, %c0_4] : memref<2x16xf32, #tpu.memory_space<vmem>>, vector<2x16xf32>
    %c0_5 = arith.constant 0 : index
    %c0_6 = arith.constant 0 : index
    %9 = vector.load %arg4[%c0_5, %c0_6] : memref<16x2xf32, #tpu.memory_space<vmem>>, vector<16x2xf32>
    %c0_7 = arith.constant 0 : index
    %c0_8 = arith.constant 0 : index
    %10 = vector.load %arg5[%c0_7, %c0_8] : memref<16x8xf32, #tpu.memory_space<vmem>>, vector<16x8xf32>
    %11 = tpu.iota {dimensions = array<i32: 1>} : vector<16x100xi32>
    %12 = vector.broadcast %1 : vector<16x1xi32> to vector<16x100xi32>
    %13 = arith.cmpi eq, %11, %12 : vector<16x100xi32>
    %14 = arith.extui %13 : vector<16x100xi1> to vector<16x100xi32>
    %15 = arith.sitofp %14 : vector<16x100xi32> to vector<16x100xf32>
    %c50_i32 = arith.constant 50 : i32
    %16 = vector.broadcast %c50_i32 : i32 to vector<16x1xi32>
    %17 = arith.addi %2, %16 : vector<16x1xi32>
    %18 = vector.broadcast %17 : vector<16x1xi32> to vector<16x100xi32>
    %19 = arith.cmpi eq, %11, %18 : vector<16x100xi32>
    %20 = arith.extui %19 : vector<16x100xi1> to vector<16x100xi32>
    %21 = arith.sitofp %20 : vector<16x100xi32> to vector<16x100xf32>
    %22 = arith.addf %15, %21 : vector<16x100xf32>
    %c0_9 = arith.constant 0 : index
    %c0_10 = arith.constant 0 : index
    %23 = vector.load %arg6[%c0_9, %c0_10] : memref<100x1024xf32, #tpu.memory_space<vmem>>, vector<100x1024xf32>
    %cst = arith.constant dense<0.000000e+00> : vector<16x1024xf32>
    %24 = tpu.matmul %22, %23, %cst {dimension_numbers = #tpu.dot_dimension_numbers<[1], [0], [0], [1], [0, 0, 1, 1], [], []>} : vector<16x100xf32>, vector<100x1024xf32>, vector<16x1024xf32> -> vector<16x1024xf32>
    %25 = vector.extract_strided_slice %24 {offsets = [0, 0], sizes = [16, 512], strides = [1, 1]} : vector<16x1024xf32> to vector<16x512xf32>
    %26 = vector.extract_strided_slice %24 {offsets = [0, 512], sizes = [16, 256], strides = [1, 1]} : vector<16x1024xf32> to vector<16x256xf32>
    %27 = vector.extract_strided_slice %24 {offsets = [0, 768], sizes = [16, 256], strides = [1, 1]} : vector<16x1024xf32> to vector<16x256xf32>
    %c0_11 = arith.constant 0 : index
    %c0_12 = arith.constant 0 : index
    %28 = vector.load %arg7[%c0_11, %c0_12] : memref<128x512xf32, #tpu.memory_space<vmem>>, vector<128x512xf32>
    %cst_13 = arith.constant 0.000000e+00 : f32
    %29 = vector.broadcast %cst_13 : f32 to vector<2x128xf32>
    %cst_14 = arith.constant 0.000000e+00 : f32
    %30 = vector.broadcast %cst_14 : f32 to vector<2x128xf32>
    %31 = vector.extract_strided_slice %25 {offsets = [0, 0], sizes = [2, 512], strides = [1, 1]} : vector<16x512xf32> to vector<2x512xf32>
    %cst_15 = arith.constant dense<0.000000e+00> : vector<2x512xf32>
    %32 = tpu.matmul %29, %28, %cst_15 {dimension_numbers = #tpu.dot_dimension_numbers<[1], [0], [0], [1], [0, 0, 1, 1], [], []>} : vector<2x128xf32>, vector<128x512xf32>, vector<2x512xf32> -> vector<2x512xf32>
    %33 = arith.addf %31, %32 : vector<2x512xf32>
    %34 = vector.extract_strided_slice %33 {offsets = [0, 0], sizes = [2, 384], strides = [1, 1]} : vector<2x512xf32> to vector<2x384xf32>
    %35 = arith.negf %34 : vector<2x384xf32>
    %36 = math.exp %35 : vector<2x384xf32>
    %cst_16 = arith.constant 1.000000e+00 : f32
    %37 = vector.broadcast %cst_16 : f32 to vector<2x384xf32>
    %38 = arith.addf %37, %36 : vector<2x384xf32>
    %39 = arith.divf %37, %38 : vector<2x384xf32>
    %40 = vector.extract_strided_slice %33 {offsets = [0, 384], sizes = [2, 128], strides = [1, 1]} : vector<2x512xf32> to vector<2x128xf32>
    %41 = math.tanh %40 : vector<2x128xf32>
    %42 = vector.extract_strided_slice %39 {offsets = [0, 128], sizes = [2, 128], strides = [1, 1]} : vector<2x384xf32> to vector<2x128xf32>
    %43 = arith.mulf %42, %30 : vector<2x128xf32>
    %44 = vector.extract_strided_slice %39 {offsets = [0, 0], sizes = [2, 128], strides = [1, 1]} : vector<2x384xf32> to vector<2x128xf32>
    %45 = arith.mulf %44, %41 : vector<2x128xf32>
    %46 = arith.addf %43, %45 : vector<2x128xf32>
    %47 = vector.extract_strided_slice %39 {offsets = [0, 256], sizes = [2, 128], strides = [1, 1]} : vector<2x384xf32> to vector<2x128xf32>
    %48 = math.tanh %46 : vector<2x128xf32>
    %49 = arith.mulf %47, %48 : vector<2x128xf32>
    %c0_17 = arith.constant 0 : index
    %c0_18 = arith.constant 0 : index
    %50 = vector.load %arg28[%c0_17, %c0_18] : memref<16x128xf32, #tpu.memory_space<vmem>>, vector<2x128xf32>
    tpu.vector_store %arg28[%c0_17, %c0_18], %49 {strides = array<i32>} : memref<16x128xf32, #tpu.memory_space<vmem>>, vector<2x128xf32>,
    %51 = vector.extract_strided_slice %25 {offsets = [2, 0], sizes = [2, 512], strides = [1, 1]} : vector<16x512xf32> to vector<2x512xf32>
    %cst_19 = arith.constant dense<0.000000e+00> : vector<2x512xf32>
    %52 = tpu.matmul %49, %28, %cst_19 {dimension_numbers = #tpu.dot_dimension_numbers<[1], [0], [0], [1], [0, 0, 1, 1], [], []>} : vector<2x128xf32>, vector<128x512xf32>, vector<2x512xf32> -> vector<2x512xf32>
    %53 = arith.addf %51, %52 : vector<2x512xf32>
    %54 = vector.extract_strided_slice %53 {offsets = [0, 0], sizes = [2, 384], strides = [1, 1]} : vector<2x512xf32> to vector<2x384xf32>
    %55 = arith.negf %54 : vector<2x384xf32>
    %56 = math.exp %55 : vector<2x384xf32>
    %cst_20 = arith.constant 1.000000e+00 : f32
    %57 = vector.broadcast %cst_20 : f32 to vector<2x384xf32>
    %58 = arith.addf %57, %56 : vector<2x384xf32>
    %59 = arith.divf %57, %58 : vector<2x384xf32>
    %60 = vector.extract_strided_slice %53 {offsets = [0, 384], sizes = [2, 128], strides = [1, 1]} : vector<2x512xf32> to vector<2x128xf32>
    %61 = math.tanh %60 : vector<2x128xf32>
    %62 = vector.extract_strided_slice %59 {offsets = [0, 128], sizes = [2, 128], strides = [1, 1]} : vector<2x384xf32> to vector<2x128xf32>
    %63 = arith.mulf %62, %46 : vector<2x128xf32>
    %64 = vector.extract_strided_slice %59 {offsets = [0, 0], sizes = [2, 128], strides = [1, 1]} : vector<2x384xf32> to vector<2x128xf32>
    %65 = arith.mulf %64, %61 : vector<2x128xf32>
    %66 = arith.addf %63, %65 : vector<2x128xf32>
    %67 = vector.extract_strided_slice %59 {offsets = [0, 256], sizes = [2, 128], strides = [1, 1]} : vector<2x384xf32> to vector<2x128xf32>
    %68 = math.tanh %66 : vector<2x128xf32>
    %69 = arith.mulf %67, %68 : vector<2x128xf32>
    %c2 = arith.constant 2 : index
    %c0_21 = arith.constant 0 : index
    %70 = vector.load %arg28[%c2, %c0_21] : memref<16x128xf32, #tpu.memory_space<vmem>>, vector<2x128xf32>
    tpu.vector_store %arg28[%c2, %c0_21], %69 {strides = array<i32>} : memref<16x128xf32, #tpu.memory_space<vmem>>, vector<2x128xf32>,
    %71 = vector.extract_strided_slice %25 {offsets = [4, 0], sizes = [2, 512], strides = [1, 1]} : vector<16x512xf32> to vector<2x512xf32>
    %cst_22 = arith.constant dense<0.000000e+00> : vector<2x512xf32>
    %72 = tpu.matmul %69, %28, %cst_22 {dimension_numbers = #tpu.dot_dimension_numbers<[1], [0], [0], [1], [0, 0, 1, 1], [], []>} : vector<2x128xf32>, vector<128x512xf32>, vector<2x512xf32> -> vector<2x512xf32>
    %73 = arith.addf %71, %72 : vector<2x512xf32>
    %74 = vector.extract_strided_slice %73 {offsets = [0, 0], sizes = [2, 384], strides = [1, 1]} : vector<2x512xf32> to vector<2x384xf32>
    %75 = arith.negf %74 : vector<2x384xf32>
    %76 = math.exp %75 : vector<2x384xf32>
    %cst_23 = arith.constant 1.000000e+00 : f32
    %77 = vector.broadcast %cst_23 : f32 to vector<2x384xf32>
    %78 = arith.addf %77, %76 : vector<2x384xf32>
    %79 = arith.divf %77, %78 : vector<2x384xf32>
    %80 = vector.extract_strided_slice %73 {offsets = [0, 384], sizes = [2, 128], strides = [1, 1]} : vector<2x512xf32> to vector<2x128xf32>
    %81 = math.tanh %80 : vector<2x128xf32>
    %82 = vector.extract_strided_slice %79 {offsets = [0, 128], sizes = [2, 128], strides = [1, 1]} : vector<2x384xf32> to vector<2x128xf32>
    %83 = arith.mulf %82, %66 : vector<2x128xf32>
    %84 = vector.extract_strided_slice %79 {offsets = [0, 0], sizes = [2, 128], strides = [1, 1]} : vector<2x384xf32> to vector<2x128xf32>
    %85 = arith.mulf %84, %81 : vector<2x128xf32>
    %86 = arith.addf %83, %85 : vector<2x128xf32>
    %87 = vector.extract_strided_slice %79 {offsets = [0, 256], sizes = [2, 128], strides = [1, 1]} : vector<2x384xf32> to vector<2x128xf32>
    %88 = math.tanh %86 : vector<2x128xf32>
    %89 = arith.mulf %87, %88 : vector<2x128xf32>
    %c4 = arith.constant 4 : index
    %c0_24 = arith.constant 0 : index
    %90 = vector.load %arg28[%c4, %c0_24] : memref<16x128xf32, #tpu.memory_space<vmem>>, vector<2x128xf32>
    tpu.vector_store %arg28[%c4, %c0_24], %89 {strides = array<i32>} : memref<16x128xf32, #tpu.memory_space<vmem>>, vector<2x128xf32>,
    %91 = vector.extract_strided_slice %25 {offsets = [6, 0], sizes = [2, 512], strides = [1, 1]} : vector<16x512xf32> to vector<2x512xf32>
    %cst_25 = arith.constant dense<0.000000e+00> : vector<2x512xf32>
    %92 = tpu.matmul %89, %28, %cst_25 {dimension_numbers = #tpu.dot_dimension_numbers<[1], [0], [0], [1], [0, 0, 1, 1], [], []>} : vector<2x128xf32>, vector<128x512xf32>, vector<2x512xf32> -> vector<2x512xf32>
    %93 = arith.addf %91, %92 : vector<2x512xf32>
    %94 = vector.extract_strided_slice %93 {offsets = [0, 0], sizes = [2, 384], strides = [1, 1]} : vector<2x512xf32> to vector<2x384xf32>
    %95 = arith.negf %94 : vector<2x384xf32>
    %96 = math.exp %95 : vector<2x384xf32>
    %cst_26 = arith.constant 1.000000e+00 : f32
    %97 = vector.broadcast %cst_26 : f32 to vector<2x384xf32>
    %98 = arith.addf %97, %96 : vector<2x384xf32>
    %99 = arith.divf %97, %98 : vector<2x384xf32>
    %100 = vector.extract_strided_slice %93 {offsets = [0, 384], sizes = [2, 128], strides = [1, 1]} : vector<2x512xf32> to vector<2x128xf32>
    %101 = math.tanh %100 : vector<2x128xf32>
    %102 = vector.extract_strided_slice %99 {offsets = [0, 128], sizes = [2, 128], strides = [1, 1]} : vector<2x384xf32> to vector<2x128xf32>
    %103 = arith.mulf %102, %86 : vector<2x128xf32>
    %104 = vector.extract_strided_slice %99 {offsets = [0, 0], sizes = [2, 128], strides = [1, 1]} : vector<2x384xf32> to vector<2x128xf32>
    %105 = arith.mulf %104, %101 : vector<2x128xf32>
    %106 = arith.addf %103, %105 : vector<2x128xf32>
    %107 = vector.extract_strided_slice %99 {offsets = [0, 256], sizes = [2, 128], strides = [1, 1]} : vector<2x384xf32> to vector<2x128xf32>
    %108 = math.tanh %106 : vector<2x128xf32>
    %109 = arith.mulf %107, %108 : vector<2x128xf32>
    %c6 = arith.constant 6 : index
    %c0_27 = arith.constant 0 : index
    %110 = vector.load %arg28[%c6, %c0_27] : memref<16x128xf32, #tpu.memory_space<vmem>>, vector<2x128xf32>
    tpu.vector_store %arg28[%c6, %c0_27], %109 {strides = array<i32>} : memref<16x128xf32, #tpu.memory_space<vmem>>, vector<2x128xf32>,
    %111 = vector.extract_strided_slice %25 {offsets = [8, 0], sizes = [2, 512], strides = [1, 1]} : vector<16x512xf32> to vector<2x512xf32>
    %cst_28 = arith.constant dense<0.000000e+00> : vector<2x512xf32>
    %112 = tpu.matmul %109, %28, %cst_28 {dimension_numbers = #tpu.dot_dimension_numbers<[1], [0], [0], [1], [0, 0, 1, 1], [], []>} : vector<2x128xf32>, vector<128x512xf32>, vector<2x512xf32> -> vector<2x512xf32>
    %113 = arith.addf %111, %112 : vector<2x512xf32>
    %114 = vector.extract_strided_slice %113 {offsets = [0, 0], sizes = [2, 384], strides = [1, 1]} : vector<2x512xf32> to vector<2x384xf32>
    %115 = arith.negf %114 : vector<2x384xf32>
    %116 = math.exp %115 : vector<2x384xf32>
    %cst_29 = arith.constant 1.000000e+00 : f32
    %117 = vector.broadcast %cst_29 : f32 to vector<2x384xf32>
    %118 = arith.addf %117, %116 : vector<2x384xf32>
    %119 = arith.divf %117, %118 : vector<2x384xf32>
    %120 = vector.extract_strided_slice %113 {offsets = [0, 384], sizes = [2, 128], strides = [1, 1]} : vector<2x512xf32> to vector<2x128xf32>
    %121 = math.tanh %120 : vector<2x128xf32>
    %122 = vector.extract_strided_slice %119 {offsets = [0, 128], sizes = [2, 128], strides = [1, 1]} : vector<2x384xf32> to vector<2x128xf32>
    %123 = arith.mulf %122, %106 : vector<2x128xf32>
    %124 = vector.extract_strided_slice %119 {offsets = [0, 0], sizes = [2, 128], strides = [1, 1]} : vector<2x384xf32> to vector<2x128xf32>
    %125 = arith.mulf %124, %121 : vector<2x128xf32>
    %126 = arith.addf %123, %125 : vector<2x128xf32>
    %127 = vector.extract_strided_slice %119 {offsets = [0, 256], sizes = [2, 128], strides = [1, 1]} : vector<2x384xf32> to vector<2x128xf32>
    %128 = math.tanh %126 : vector<2x128xf32>
    %129 = arith.mulf %127, %128 : vector<2x128xf32>
    %c8 = arith.constant 8 : index
    %c0_30 = arith.constant 0 : index
    %130 = vector.load %arg28[%c8, %c0_30] : memref<16x128xf32, #tpu.memory_space<vmem>>, vector<2x128xf32>
    tpu.vector_store %arg28[%c8, %c0_30], %129 {strides = array<i32>} : memref<16x128xf32, #tpu.memory_space<vmem>>, vector<2x128xf32>,
    %131 = vector.extract_strided_slice %25 {offsets = [10, 0], sizes = [2, 512], strides = [1, 1]} : vector<16x512xf32> to vector<2x512xf32>
    %cst_31 = arith.constant dense<0.000000e+00> : vector<2x512xf32>
    %132 = tpu.matmul %129, %28, %cst_31 {dimension_numbers = #tpu.dot_dimension_numbers<[1], [0], [0], [1], [0, 0, 1, 1], [], []>} : vector<2x128xf32>, vector<128x512xf32>, vector<2x512xf32> -> vector<2x512xf32>
    %133 = arith.addf %131, %132 : vector<2x512xf32>
    %134 = vector.extract_strided_slice %133 {offsets = [0, 0], sizes = [2, 384], strides = [1, 1]} : vector<2x512xf32> to vector<2x384xf32>
    %135 = arith.negf %134 : vector<2x384xf32>
    %136 = math.exp %135 : vector<2x384xf32>
    %cst_32 = arith.constant 1.000000e+00 : f32
    %137 = vector.broadcast %cst_32 : f32 to vector<2x384xf32>
    %138 = arith.addf %137, %136 : vector<2x384xf32>
    %139 = arith.divf %137, %138 : vector<2x384xf32>
    %140 = vector.extract_strided_slice %133 {offsets = [0, 384], sizes = [2, 128], strides = [1, 1]} : vector<2x512xf32> to vector<2x128xf32>
    %141 = math.tanh %140 : vector<2x128xf32>
    %142 = vector.extract_strided_slice %139 {offsets = [0, 128], sizes = [2, 128], strides = [1, 1]} : vector<2x384xf32> to vector<2x128xf32>
    %143 = arith.mulf %142, %126 : vector<2x128xf32>
    %144 = vector.extract_strided_slice %139 {offsets = [0, 0], sizes = [2, 128], strides = [1, 1]} : vector<2x384xf32> to vector<2x128xf32>
    %145 = arith.mulf %144, %141 : vector<2x128xf32>
    %146 = arith.addf %143, %145 : vector<2x128xf32>
    %147 = vector.extract_strided_slice %139 {offsets = [0, 256], sizes = [2, 128], strides = [1, 1]} : vector<2x384xf32> to vector<2x128xf32>
    %148 = math.tanh %146 : vector<2x128xf32>
    %149 = arith.mulf %147, %148 : vector<2x128xf32>
    %c10 = arith.constant 10 : index
    %c0_33 = arith.constant 0 : index
    %150 = vector.load %arg28[%c10, %c0_33] : memref<16x128xf32, #tpu.memory_space<vmem>>, vector<2x128xf32>
    tpu.vector_store %arg28[%c10, %c0_33], %149 {strides = array<i32>} : memref<16x128xf32, #tpu.memory_space<vmem>>, vector<2x128xf32>,
    %151 = vector.extract_strided_slice %25 {offsets = [12, 0], sizes = [2, 512], strides = [1, 1]} : vector<16x512xf32> to vector<2x512xf32>
    %cst_34 = arith.constant dense<0.000000e+00> : vector<2x512xf32>
    %152 = tpu.matmul %149, %28, %cst_34 {dimension_numbers = #tpu.dot_dimension_numbers<[1], [0], [0], [1], [0, 0, 1, 1], [], []>} : vector<2x128xf32>, vector<128x512xf32>, vector<2x512xf32> -> vector<2x512xf32>
    %153 = arith.addf %151, %152 : vector<2x512xf32>
    %154 = vector.extract_strided_slice %153 {offsets = [0, 0], sizes = [2, 384], strides = [1, 1]} : vector<2x512xf32> to vector<2x384xf32>
    %155 = arith.negf %154 : vector<2x384xf32>
    %156 = math.exp %155 : vector<2x384xf32>
    %cst_35 = arith.constant 1.000000e+00 : f32
    %157 = vector.broadcast %cst_35 : f32 to vector<2x384xf32>
    %158 = arith.addf %157, %156 : vector<2x384xf32>
    %159 = arith.divf %157, %158 : vector<2x384xf32>
    %160 = vector.extract_strided_slice %153 {offsets = [0, 384], sizes = [2, 128], strides = [1, 1]} : vector<2x512xf32> to vector<2x128xf32>
    %161 = math.tanh %160 : vector<2x128xf32>
    %162 = vector.extract_strided_slice %159 {offsets = [0, 128], sizes = [2, 128], strides = [1, 1]} : vector<2x384xf32> to vector<2x128xf32>
    %163 = arith.mulf %162, %146 : vector<2x128xf32>
    %164 = vector.extract_strided_slice %159 {offsets = [0, 0], sizes = [2, 128], strides = [1, 1]} : vector<2x384xf32> to vector<2x128xf32>
    %165 = arith.mulf %164, %161 : vector<2x128xf32>
    %166 = arith.addf %163, %165 : vector<2x128xf32>
    %167 = vector.extract_strided_slice %159 {offsets = [0, 256], sizes = [2, 128], strides = [1, 1]} : vector<2x384xf32> to vector<2x128xf32>
    %168 = math.tanh %166 : vector<2x128xf32>
    %169 = arith.mulf %167, %168 : vector<2x128xf32>
    %c12 = arith.constant 12 : index
    %c0_36 = arith.constant 0 : index
    %170 = vector.load %arg28[%c12, %c0_36] : memref<16x128xf32, #tpu.memory_space<vmem>>, vector<2x128xf32>
    tpu.vector_store %arg28[%c12, %c0_36], %169 {strides = array<i32>} : memref<16x128xf32, #tpu.memory_space<vmem>>, vector<2x128xf32>,
    %171 = vector.extract_strided_slice %25 {offsets = [14, 0], sizes = [2, 512], strides = [1, 1]} : vector<16x512xf32> to vector<2x512xf32>
    %cst_37 = arith.constant dense<0.000000e+00> : vector<2x512xf32>
    %172 = tpu.matmul %169, %28, %cst_37 {dimension_numbers = #tpu.dot_dimension_numbers<[1], [0], [0], [1], [0, 0, 1, 1], [], []>} : vector<2x128xf32>, vector<128x512xf32>, vector<2x512xf32> -> vector<2x512xf32>
    %173 = arith.addf %171, %172 : vector<2x512xf32>
    %174 = vector.extract_strided_slice %173 {offsets = [0, 0], sizes = [2, 384], strides = [1, 1]} : vector<2x512xf32> to vector<2x384xf32>
    %175 = arith.negf %174 : vector<2x384xf32>
    %176 = math.exp %175 : vector<2x384xf32>
    %cst_38 = arith.constant 1.000000e+00 : f32
    %177 = vector.broadcast %cst_38 : f32 to vector<2x384xf32>
    %178 = arith.addf %177, %176 : vector<2x384xf32>
    %179 = arith.divf %177, %178 : vector<2x384xf32>
    %180 = vector.extract_strided_slice %173 {offsets = [0, 384], sizes = [2, 128], strides = [1, 1]} : vector<2x512xf32> to vector<2x128xf32>
    %181 = math.tanh %180 : vector<2x128xf32>
    %182 = vector.extract_strided_slice %179 {offsets = [0, 128], sizes = [2, 128], strides = [1, 1]} : vector<2x384xf32> to vector<2x128xf32>
    %183 = arith.mulf %182, %166 : vector<2x128xf32>
    %184 = vector.extract_strided_slice %179 {offsets = [0, 0], sizes = [2, 128], strides = [1, 1]} : vector<2x384xf32> to vector<2x128xf32>
    %185 = arith.mulf %184, %181 : vector<2x128xf32>
    %186 = arith.addf %183, %185 : vector<2x128xf32>
    %187 = vector.extract_strided_slice %179 {offsets = [0, 256], sizes = [2, 128], strides = [1, 1]} : vector<2x384xf32> to vector<2x128xf32>
    %188 = math.tanh %186 : vector<2x128xf32>
    %189 = arith.mulf %187, %188 : vector<2x128xf32>
    %c14 = arith.constant 14 : index
    %c0_39 = arith.constant 0 : index
    %190 = vector.load %arg28[%c14, %c0_39] : memref<16x128xf32, #tpu.memory_space<vmem>>, vector<2x128xf32>
    tpu.vector_store %arg28[%c14, %c0_39], %189 {strides = array<i32>} : memref<16x128xf32, #tpu.memory_space<vmem>>, vector<2x128xf32>,
    %c0_40 = arith.constant 0 : index
    %c0_41 = arith.constant 0 : index
    %191 = vector.load %arg28[%c0_40, %c0_41] : memref<16x128xf32, #tpu.memory_space<vmem>>, vector<16x128xf32>
    %cst_42 = arith.constant dense<0.000000e+00> : vector<16x128xf32>
    %192 = tpu.matmul %7, %191, %cst_42 {dimension_numbers = #tpu.dot_dimension_numbers<[1], [0], [0], [1], [0, 0, 1, 1], [], []>} : vector<16x16xf32>, vector<16x128xf32>, vector<16x128xf32> -> vector<16x128xf32>
    %c0_43 = arith.constant 0 : index
    %c0_44 = arith.constant 0 : index
    %193 = vector.load %arg8[%c0_43, %c0_44] : memref<128x512xf32, #tpu.memory_space<vmem>>, vector<128x512xf32>
    %cst_45 = arith.constant dense<0.000000e+00> : vector<16x512xf32>
    %194 = tpu.matmul %191, %193, %cst_45 {dimension_numbers = #tpu.dot_dimension_numbers<[1], [0], [0], [1], [0, 0, 1, 1], [], []>} : vector<16x128xf32>, vector<128x512xf32>, vector<16x512xf32> -> vector<16x512xf32>
    %c0_46 = arith.constant 0 : index
    %c0_47 = arith.constant 0 : index
    %195 = vector.load %arg9[%c0_46, %c0_47] : memref<128x512xf32, #tpu.memory_space<vmem>>, vector<128x512xf32>
    %cst_48 = arith.constant dense<0.000000e+00> : vector<16x512xf32>
    %196 = tpu.matmul %192, %195, %cst_48 {dimension_numbers = #tpu.dot_dimension_numbers<[1], [0], [0], [1], [0, 0, 1, 1], [], []>} : vector<16x128xf32>, vector<128x512xf32>, vector<16x512xf32> -> vector<16x512xf32>
    %197 = arith.addf %194, %196 : vector<16x512xf32>
    %c0_49 = arith.constant 0 : index
    %c0_50 = arith.constant 0 : index
    %198 = vector.load %arg10[%c0_49, %c0_50] : memref<1x512xf32, #tpu.memory_space<vmem>>, vector<1x512xf32>
    %199 = vector.broadcast %198 : vector<1x512xf32> to vector<16x512xf32>
    %200 = arith.addf %197, %199 : vector<16x512xf32>
    %c0_51 = arith.constant 0 : index
    %c0_52 = arith.constant 0 : index
    %201 = vector.load %arg11[%c0_51, %c0_52] : memref<128x512xf32, #tpu.memory_space<vmem>>, vector<128x512xf32>
    %cst_53 = arith.constant 0.000000e+00 : f32
    %202 = vector.broadcast %cst_53 : f32 to vector<2x128xf32>
    %cst_54 = arith.constant 0.000000e+00 : f32
    %203 = vector.broadcast %cst_54 : f32 to vector<2x128xf32>
    %204 = vector.extract_strided_slice %200 {offsets = [0, 0], sizes = [2, 512], strides = [1, 1]} : vector<16x512xf32> to vector<2x512xf32>
    %cst_55 = arith.constant dense<0.000000e+00> : vector<2x512xf32>
    %205 = tpu.matmul %202, %201, %cst_55 {dimension_numbers = #tpu.dot_dimension_numbers<[1], [0], [0], [1], [0, 0, 1, 1], [], []>} : vector<2x128xf32>, vector<128x512xf32>, vector<2x512xf32> -> vector<2x512xf32>
    %206 = arith.addf %204, %205 : vector<2x512xf32>
    %207 = vector.extract_strided_slice %206 {offsets = [0, 0], sizes = [2, 384], strides = [1, 1]} : vector<2x512xf32> to vector<2x384xf32>
    %208 = arith.negf %207 : vector<2x384xf32>
    %209 = math.exp %208 : vector<2x384xf32>
    %cst_56 = arith.constant 1.000000e+00 : f32
    %210 = vector.broadcast %cst_56 : f32 to vector<2x384xf32>
    %211 = arith.addf %210, %209 : vector<2x384xf32>
    %212 = arith.divf %210, %211 : vector<2x384xf32>
    %213 = vector.extract_strided_slice %206 {offsets = [0, 384], sizes = [2, 128], strides = [1, 1]} : vector<2x512xf32> to vector<2x128xf32>
    %214 = math.tanh %213 : vector<2x128xf32>
    %215 = vector.extract_strided_slice %212 {offsets = [0, 128], sizes = [2, 128], strides = [1, 1]} : vector<2x384xf32> to vector<2x128xf32>
    %216 = arith.mulf %215, %203 : vector<2x128xf32>
    %217 = vector.extract_strided_slice %212 {offsets = [0, 0], sizes = [2, 128], strides = [1, 1]} : vector<2x384xf32> to vector<2x128xf32>
    %218 = arith.mulf %217, %214 : vector<2x128xf32>
    %219 = arith.addf %216, %218 : vector<2x128xf32>
    %220 = vector.extract_strided_slice %212 {offsets = [0, 256], sizes = [2, 128], strides = [1, 1]} : vector<2x384xf32> to vector<2x128xf32>
    %221 = math.tanh %219 : vector<2x128xf32>
    %222 = arith.mulf %220, %221 : vector<2x128xf32>
    %c0_57 = arith.constant 0 : index
    %c0_58 = arith.constant 0 : index
    %223 = vector.load %arg29[%c0_57, %c0_58] : memref<16x128xf32, #tpu.memory_space<vmem>>, vector<2x128xf32>
    tpu.vector_store %arg29[%c0_57, %c0_58], %222 {strides = array<i32>} : memref<16x128xf32, #tpu.memory_space<vmem>>, vector<2x128xf32>,
    %224 = vector.extract_strided_slice %200 {offsets = [2, 0], sizes = [2, 512], strides = [1, 1]} : vector<16x512xf32> to vector<2x512xf32>
    %cst_59 = arith.constant dense<0.000000e+00> : vector<2x512xf32>
    %225 = tpu.matmul %222, %201, %cst_59 {dimension_numbers = #tpu.dot_dimension_numbers<[1], [0], [0], [1], [0, 0, 1, 1], [], []>} : vector<2x128xf32>, vector<128x512xf32>, vector<2x512xf32> -> vector<2x512xf32>
    %226 = arith.addf %224, %225 : vector<2x512xf32>
    %227 = vector.extract_strided_slice %226 {offsets = [0, 0], sizes = [2, 384], strides = [1, 1]} : vector<2x512xf32> to vector<2x384xf32>
    %228 = arith.negf %227 : vector<2x384xf32>
    %229 = math.exp %228 : vector<2x384xf32>
    %cst_60 = arith.constant 1.000000e+00 : f32
    %230 = vector.broadcast %cst_60 : f32 to vector<2x384xf32>
    %231 = arith.addf %230, %229 : vector<2x384xf32>
    %232 = arith.divf %230, %231 : vector<2x384xf32>
    %233 = vector.extract_strided_slice %226 {offsets = [0, 384], sizes = [2, 128], strides = [1, 1]} : vector<2x512xf32> to vector<2x128xf32>
    %234 = math.tanh %233 : vector<2x128xf32>
    %235 = vector.extract_strided_slice %232 {offsets = [0, 128], sizes = [2, 128], strides = [1, 1]} : vector<2x384xf32> to vector<2x128xf32>
    %236 = arith.mulf %235, %219 : vector<2x128xf32>
    %237 = vector.extract_strided_slice %232 {offsets = [0, 0], sizes = [2, 128], strides = [1, 1]} : vector<2x384xf32> to vector<2x128xf32>
    %238 = arith.mulf %237, %234 : vector<2x128xf32>
    %239 = arith.addf %236, %238 : vector<2x128xf32>
    %240 = vector.extract_strided_slice %232 {offsets = [0, 256], sizes = [2, 128], strides = [1, 1]} : vector<2x384xf32> to vector<2x128xf32>
    %241 = math.tanh %239 : vector<2x128xf32>
    %242 = arith.mulf %240, %241 : vector<2x128xf32>
    %c2_61 = arith.constant 2 : index
    %c0_62 = arith.constant 0 : index
    %243 = vector.load %arg29[%c2_61, %c0_62] : memref<16x128xf32, #tpu.memory_space<vmem>>, vector<2x128xf32>
    tpu.vector_store %arg29[%c2_61, %c0_62], %242 {strides = array<i32>} : memref<16x128xf32, #tpu.memory_space<vmem>>, vector<2x128xf32>,
    %244 = vector.extract_strided_slice %200 {offsets = [4, 0], sizes = [2, 512], strides = [1, 1]} : vector<16x512xf32> to vector<2x512xf32>
    %cst_63 = arith.constant dense<0.000000e+00> : vector<2x512xf32>
    %245 = tpu.matmul %242, %201, %cst_63 {dimension_numbers = #tpu.dot_dimension_numbers<[1], [0], [0], [1], [0, 0, 1, 1], [], []>} : vector<2x128xf32>, vector<128x512xf32>, vector<2x512xf32> -> vector<2x512xf32>
    %246 = arith.addf %244, %245 : vector<2x512xf32>
    %247 = vector.extract_strided_slice %246 {offsets = [0, 0], sizes = [2, 384], strides = [1, 1]} : vector<2x512xf32> to vector<2x384xf32>
    %248 = arith.negf %247 : vector<2x384xf32>
    %249 = math.exp %248 : vector<2x384xf32>
    %cst_64 = arith.constant 1.000000e+00 : f32
    %250 = vector.broadcast %cst_64 : f32 to vector<2x384xf32>
    %251 = arith.addf %250, %249 : vector<2x384xf32>
    %252 = arith.divf %250, %251 : vector<2x384xf32>
    %253 = vector.extract_strided_slice %246 {offsets = [0, 384], sizes = [2, 128], strides = [1, 1]} : vector<2x512xf32> to vector<2x128xf32>
    %254 = math.tanh %253 : vector<2x128xf32>
    %255 = vector.extract_strided_slice %252 {offsets = [0, 128], sizes = [2, 128], strides = [1, 1]} : vector<2x384xf32> to vector<2x128xf32>
    %256 = arith.mulf %255, %239 : vector<2x128xf32>
    %257 = vector.extract_strided_slice %252 {offsets = [0, 0], sizes = [2, 128], strides = [1, 1]} : vector<2x384xf32> to vector<2x128xf32>
    %258 = arith.mulf %257, %254 : vector<2x128xf32>
    %259 = arith.addf %256, %258 : vector<2x128xf32>
    %260 = vector.extract_strided_slice %252 {offsets = [0, 256], sizes = [2, 128], strides = [1, 1]} : vector<2x384xf32> to vector<2x128xf32>
    %261 = math.tanh %259 : vector<2x128xf32>
    %262 = arith.mulf %260, %261 : vector<2x128xf32>
    %c4_65 = arith.constant 4 : index
    %c0_66 = arith.constant 0 : index
    %263 = vector.load %arg29[%c4_65, %c0_66] : memref<16x128xf32, #tpu.memory_space<vmem>>, vector<2x128xf32>
    tpu.vector_store %arg29[%c4_65, %c0_66], %262 {strides = array<i32>} : memref<16x128xf32, #tpu.memory_space<vmem>>, vector<2x128xf32>,
    %264 = vector.extract_strided_slice %200 {offsets = [6, 0], sizes = [2, 512], strides = [1, 1]} : vector<16x512xf32> to vector<2x512xf32>
    %cst_67 = arith.constant dense<0.000000e+00> : vector<2x512xf32>
    %265 = tpu.matmul %262, %201, %cst_67 {dimension_numbers = #tpu.dot_dimension_numbers<[1], [0], [0], [1], [0, 0, 1, 1], [], []>} : vector<2x128xf32>, vector<128x512xf32>, vector<2x512xf32> -> vector<2x512xf32>
    %266 = arith.addf %264, %265 : vector<2x512xf32>
    %267 = vector.extract_strided_slice %266 {offsets = [0, 0], sizes = [2, 384], strides = [1, 1]} : vector<2x512xf32> to vector<2x384xf32>
    %268 = arith.negf %267 : vector<2x384xf32>
    %269 = math.exp %268 : vector<2x384xf32>
    %cst_68 = arith.constant 1.000000e+00 : f32
    %270 = vector.broadcast %cst_68 : f32 to vector<2x384xf32>
    %271 = arith.addf %270, %269 : vector<2x384xf32>
    %272 = arith.divf %270, %271 : vector<2x384xf32>
    %273 = vector.extract_strided_slice %266 {offsets = [0, 384], sizes = [2, 128], strides = [1, 1]} : vector<2x512xf32> to vector<2x128xf32>
    %274 = math.tanh %273 : vector<2x128xf32>
    %275 = vector.extract_strided_slice %272 {offsets = [0, 128], sizes = [2, 128], strides = [1, 1]} : vector<2x384xf32> to vector<2x128xf32>
    %276 = arith.mulf %275, %259 : vector<2x128xf32>
    %277 = vector.extract_strided_slice %272 {offsets = [0, 0], sizes = [2, 128], strides = [1, 1]} : vector<2x384xf32> to vector<2x128xf32>
    %278 = arith.mulf %277, %274 : vector<2x128xf32>
    %279 = arith.addf %276, %278 : vector<2x128xf32>
    %280 = vector.extract_strided_slice %272 {offsets = [0, 256], sizes = [2, 128], strides = [1, 1]} : vector<2x384xf32> to vector<2x128xf32>
    %281 = math.tanh %279 : vector<2x128xf32>
    %282 = arith.mulf %280, %281 : vector<2x128xf32>
    %c6_69 = arith.constant 6 : index
    %c0_70 = arith.constant 0 : index
    %283 = vector.load %arg29[%c6_69, %c0_70] : memref<16x128xf32, #tpu.memory_space<vmem>>, vector<2x128xf32>
    tpu.vector_store %arg29[%c6_69, %c0_70], %282 {strides = array<i32>} : memref<16x128xf32, #tpu.memory_space<vmem>>, vector<2x128xf32>,
    %284 = vector.extract_strided_slice %200 {offsets = [8, 0], sizes = [2, 512], strides = [1, 1]} : vector<16x512xf32> to vector<2x512xf32>
    %cst_71 = arith.constant dense<0.000000e+00> : vector<2x512xf32>
    %285 = tpu.matmul %282, %201, %cst_71 {dimension_numbers = #tpu.dot_dimension_numbers<[1], [0], [0], [1], [0, 0, 1, 1], [], []>} : vector<2x128xf32>, vector<128x512xf32>, vector<2x512xf32> -> vector<2x512xf32>
    %286 = arith.addf %284, %285 : vector<2x512xf32>
    %287 = vector.extract_strided_slice %286 {offsets = [0, 0], sizes = [2, 384], strides = [1, 1]} : vector<2x512xf32> to vector<2x384xf32>
    %288 = arith.negf %287 : vector<2x384xf32>
    %289 = math.exp %288 : vector<2x384xf32>
    %cst_72 = arith.constant 1.000000e+00 : f32
    %290 = vector.broadcast %cst_72 : f32 to vector<2x384xf32>
    %291 = arith.addf %290, %289 : vector<2x384xf32>
    %292 = arith.divf %290, %291 : vector<2x384xf32>
    %293 = vector.extract_strided_slice %286 {offsets = [0, 384], sizes = [2, 128], strides = [1, 1]} : vector<2x512xf32> to vector<2x128xf32>
    %294 = math.tanh %293 : vector<2x128xf32>
    %295 = vector.extract_strided_slice %292 {offsets = [0, 128], sizes = [2, 128], strides = [1, 1]} : vector<2x384xf32> to vector<2x128xf32>
    %296 = arith.mulf %295, %279 : vector<2x128xf32>
    %297 = vector.extract_strided_slice %292 {offsets = [0, 0], sizes = [2, 128], strides = [1, 1]} : vector<2x384xf32> to vector<2x128xf32>
    %298 = arith.mulf %297, %294 : vector<2x128xf32>
    %299 = arith.addf %296, %298 : vector<2x128xf32>
    %300 = vector.extract_strided_slice %292 {offsets = [0, 256], sizes = [2, 128], strides = [1, 1]} : vector<2x384xf32> to vector<2x128xf32>
    %301 = math.tanh %299 : vector<2x128xf32>
    %302 = arith.mulf %300, %301 : vector<2x128xf32>
    %c8_73 = arith.constant 8 : index
    %c0_74 = arith.constant 0 : index
    %303 = vector.load %arg29[%c8_73, %c0_74] : memref<16x128xf32, #tpu.memory_space<vmem>>, vector<2x128xf32>
    tpu.vector_store %arg29[%c8_73, %c0_74], %302 {strides = array<i32>} : memref<16x128xf32, #tpu.memory_space<vmem>>, vector<2x128xf32>,
    %304 = vector.extract_strided_slice %200 {offsets = [10, 0], sizes = [2, 512], strides = [1, 1]} : vector<16x512xf32> to vector<2x512xf32>
    %cst_75 = arith.constant dense<0.000000e+00> : vector<2x512xf32>
    %305 = tpu.matmul %302, %201, %cst_75 {dimension_numbers = #tpu.dot_dimension_numbers<[1], [0], [0], [1], [0, 0, 1, 1], [], []>} : vector<2x128xf32>, vector<128x512xf32>, vector<2x512xf32> -> vector<2x512xf32>
    %306 = arith.addf %304, %305 : vector<2x512xf32>
    %307 = vector.extract_strided_slice %306 {offsets = [0, 0], sizes = [2, 384], strides = [1, 1]} : vector<2x512xf32> to vector<2x384xf32>
    %308 = arith.negf %307 : vector<2x384xf32>
    %309 = math.exp %308 : vector<2x384xf32>
    %cst_76 = arith.constant 1.000000e+00 : f32
    %310 = vector.broadcast %cst_76 : f32 to vector<2x384xf32>
    %311 = arith.addf %310, %309 : vector<2x384xf32>
    %312 = arith.divf %310, %311 : vector<2x384xf32>
    %313 = vector.extract_strided_slice %306 {offsets = [0, 384], sizes = [2, 128], strides = [1, 1]} : vector<2x512xf32> to vector<2x128xf32>
    %314 = math.tanh %313 : vector<2x128xf32>
    %315 = vector.extract_strided_slice %312 {offsets = [0, 128], sizes = [2, 128], strides = [1, 1]} : vector<2x384xf32> to vector<2x128xf32>
    %316 = arith.mulf %315, %299 : vector<2x128xf32>
    %317 = vector.extract_strided_slice %312 {offsets = [0, 0], sizes = [2, 128], strides = [1, 1]} : vector<2x384xf32> to vector<2x128xf32>
    %318 = arith.mulf %317, %314 : vector<2x128xf32>
    %319 = arith.addf %316, %318 : vector<2x128xf32>
    %320 = vector.extract_strided_slice %312 {offsets = [0, 256], sizes = [2, 128], strides = [1, 1]} : vector<2x384xf32> to vector<2x128xf32>
    %321 = math.tanh %319 : vector<2x128xf32>
    %322 = arith.mulf %320, %321 : vector<2x128xf32>
    %c10_77 = arith.constant 10 : index
    %c0_78 = arith.constant 0 : index
    %323 = vector.load %arg29[%c10_77, %c0_78] : memref<16x128xf32, #tpu.memory_space<vmem>>, vector<2x128xf32>
    tpu.vector_store %arg29[%c10_77, %c0_78], %322 {strides = array<i32>} : memref<16x128xf32, #tpu.memory_space<vmem>>, vector<2x128xf32>,
    %324 = vector.extract_strided_slice %200 {offsets = [12, 0], sizes = [2, 512], strides = [1, 1]} : vector<16x512xf32> to vector<2x512xf32>
    %cst_79 = arith.constant dense<0.000000e+00> : vector<2x512xf32>
    %325 = tpu.matmul %322, %201, %cst_79 {dimension_numbers = #tpu.dot_dimension_numbers<[1], [0], [0], [1], [0, 0, 1, 1], [], []>} : vector<2x128xf32>, vector<128x512xf32>, vector<2x512xf32> -> vector<2x512xf32>
    %326 = arith.addf %324, %325 : vector<2x512xf32>
    %327 = vector.extract_strided_slice %326 {offsets = [0, 0], sizes = [2, 384], strides = [1, 1]} : vector<2x512xf32> to vector<2x384xf32>
    %328 = arith.negf %327 : vector<2x384xf32>
    %329 = math.exp %328 : vector<2x384xf32>
    %cst_80 = arith.constant 1.000000e+00 : f32
    %330 = vector.broadcast %cst_80 : f32 to vector<2x384xf32>
    %331 = arith.addf %330, %329 : vector<2x384xf32>
    %332 = arith.divf %330, %331 : vector<2x384xf32>
    %333 = vector.extract_strided_slice %326 {offsets = [0, 384], sizes = [2, 128], strides = [1, 1]} : vector<2x512xf32> to vector<2x128xf32>
    %334 = math.tanh %333 : vector<2x128xf32>
    %335 = vector.extract_strided_slice %332 {offsets = [0, 128], sizes = [2, 128], strides = [1, 1]} : vector<2x384xf32> to vector<2x128xf32>
    %336 = arith.mulf %335, %319 : vector<2x128xf32>
    %337 = vector.extract_strided_slice %332 {offsets = [0, 0], sizes = [2, 128], strides = [1, 1]} : vector<2x384xf32> to vector<2x128xf32>
    %338 = arith.mulf %337, %334 : vector<2x128xf32>
    %339 = arith.addf %336, %338 : vector<2x128xf32>
    %340 = vector.extract_strided_slice %332 {offsets = [0, 256], sizes = [2, 128], strides = [1, 1]} : vector<2x384xf32> to vector<2x128xf32>
    %341 = math.tanh %339 : vector<2x128xf32>
    %342 = arith.mulf %340, %341 : vector<2x128xf32>
    %c12_81 = arith.constant 12 : index
    %c0_82 = arith.constant 0 : index
    %343 = vector.load %arg29[%c12_81, %c0_82] : memref<16x128xf32, #tpu.memory_space<vmem>>, vector<2x128xf32>
    tpu.vector_store %arg29[%c12_81, %c0_82], %342 {strides = array<i32>} : memref<16x128xf32, #tpu.memory_space<vmem>>, vector<2x128xf32>,
    %344 = vector.extract_strided_slice %200 {offsets = [14, 0], sizes = [2, 512], strides = [1, 1]} : vector<16x512xf32> to vector<2x512xf32>
    %cst_83 = arith.constant dense<0.000000e+00> : vector<2x512xf32>
    %345 = tpu.matmul %342, %201, %cst_83 {dimension_numbers = #tpu.dot_dimension_numbers<[1], [0], [0], [1], [0, 0, 1, 1], [], []>} : vector<2x128xf32>, vector<128x512xf32>, vector<2x512xf32> -> vector<2x512xf32>
    %346 = arith.addf %344, %345 : vector<2x512xf32>
    %347 = vector.extract_strided_slice %346 {offsets = [0, 0], sizes = [2, 384], strides = [1, 1]} : vector<2x512xf32> to vector<2x384xf32>
    %348 = arith.negf %347 : vector<2x384xf32>
    %349 = math.exp %348 : vector<2x384xf32>
    %cst_84 = arith.constant 1.000000e+00 : f32
    %350 = vector.broadcast %cst_84 : f32 to vector<2x384xf32>
    %351 = arith.addf %350, %349 : vector<2x384xf32>
    %352 = arith.divf %350, %351 : vector<2x384xf32>
    %353 = vector.extract_strided_slice %346 {offsets = [0, 384], sizes = [2, 128], strides = [1, 1]} : vector<2x512xf32> to vector<2x128xf32>
    %354 = math.tanh %353 : vector<2x128xf32>
    %355 = vector.extract_strided_slice %352 {offsets = [0, 128], sizes = [2, 128], strides = [1, 1]} : vector<2x384xf32> to vector<2x128xf32>
    %356 = arith.mulf %355, %339 : vector<2x128xf32>
    %357 = vector.extract_strided_slice %352 {offsets = [0, 0], sizes = [2, 128], strides = [1, 1]} : vector<2x384xf32> to vector<2x128xf32>
    %358 = arith.mulf %357, %354 : vector<2x128xf32>
    %359 = arith.addf %356, %358 : vector<2x128xf32>
    %360 = vector.extract_strided_slice %352 {offsets = [0, 256], sizes = [2, 128], strides = [1, 1]} : vector<2x384xf32> to vector<2x128xf32>
    %361 = math.tanh %359 : vector<2x128xf32>
    %362 = arith.mulf %360, %361 : vector<2x128xf32>
    %c14_85 = arith.constant 14 : index
    %c0_86 = arith.constant 0 : index
    %363 = vector.load %arg29[%c14_85, %c0_86] : memref<16x128xf32, #tpu.memory_space<vmem>>, vector<2x128xf32>
    tpu.vector_store %arg29[%c14_85, %c0_86], %362 {strides = array<i32>} : memref<16x128xf32, #tpu.memory_space<vmem>>, vector<2x128xf32>,
    %c0_87 = arith.constant 0 : index
    %c0_88 = arith.constant 0 : index
    %364 = vector.load %arg29[%c0_87, %c0_88] : memref<16x128xf32, #tpu.memory_space<vmem>>, vector<16x128xf32>
    %cst_89 = arith.constant dense<0.000000e+00> : vector<16x128xf32>
    %365 = tpu.matmul %7, %364, %cst_89 {dimension_numbers = #tpu.dot_dimension_numbers<[1], [0], [0], [1], [0, 0, 1, 1], [], []>} : vector<16x16xf32>, vector<16x128xf32>, vector<16x128xf32> -> vector<16x128xf32>
    %366 = vector.extract_strided_slice %364 {offsets = [0, 0], sizes = [16, 32], strides = [1, 1]} : vector<16x128xf32> to vector<16x32xf32>
    %367 = vector.extract_strided_slice %365 {offsets = [0, 64], sizes = [16, 32], strides = [1, 1]} : vector<16x128xf32> to vector<16x32xf32>
    %368 = tpu.concatenate %366, %367 in 1 : vector<16x32xf32>, vector<16x32xf32> -> vector<16x64xf32>
    %369 = vector.extract_strided_slice %364 {offsets = [0, 32], sizes = [16, 32], strides = [1, 1]} : vector<16x128xf32> to vector<16x32xf32>
    %370 = vector.extract_strided_slice %365 {offsets = [0, 96], sizes = [16, 32], strides = [1, 1]} : vector<16x128xf32> to vector<16x32xf32>
    %371 = tpu.concatenate %369, %370 in 1 : vector<16x32xf32>, vector<16x32xf32> -> vector<16x64xf32>
    %c0_90 = arith.constant 0 : index
    %c0_91 = arith.constant 0 : index
    %372 = vector.load %arg18[%c0_90, %c0_91] : memref<128x64xf32, #tpu.memory_space<vmem>>, vector<128x64xf32>
    %cst_92 = arith.constant dense<0.000000e+00> : vector<2x64xf32>
    %373 = tpu.matmul %189, %372, %cst_92 {dimension_numbers = #tpu.dot_dimension_numbers<[1], [0], [0], [1], [0, 0, 1, 1], [], []>} : vector<2x128xf32>, vector<128x64xf32>, vector<2x64xf32> -> vector<2x64xf32>
    %c0_93 = arith.constant 0 : index
    %c0_94 = arith.constant 0 : index
    %374 = vector.load %arg19[%c0_93, %c0_94] : memref<128x64xf32, #tpu.memory_space<vmem>>, vector<128x64xf32>
    %cst_95 = arith.constant dense<0.000000e+00> : vector<2x64xf32>
    %375 = tpu.matmul %362, %374, %cst_95 {dimension_numbers = #tpu.dot_dimension_numbers<[1], [0], [0], [1], [0, 0, 1, 1], [], []>} : vector<2x128xf32>, vector<128x64xf32>, vector<2x64xf32> -> vector<2x64xf32>
    %376 = arith.addf %373, %375 : vector<2x64xf32>
    %cst_96 = arith.constant dense<0.000000e+00> : vector<16x64xf32>
    %377 = tpu.matmul %9, %376, %cst_96 {dimension_numbers = #tpu.dot_dimension_numbers<[1], [0], [0], [1], [0, 0, 1, 1], [], []>} : vector<16x2xf32>, vector<2x64xf32>, vector<16x64xf32> -> vector<16x64xf32>
    %378 = arith.mulf %368, %377 : vector<16x64xf32>
    %cst_97 = arith.constant dense<0.000000e+00> : vector<16xf32>
    %379 = vector.multi_reduction <add>, %378, %cst_97 [1] : vector<16x64xf32> to vector<16xf32>
    %380 = vector.shape_cast %379 : vector<16xf32> to vector<16x1xf32>
    %381 = vector.extract_strided_slice %9 {offsets = [0, 0], sizes = [16, 1], strides = [1, 1]} : vector<16x2xf32> to vector<16x1xf32>
    %cst_98 = arith.constant 5.000000e-01 : f32
    %382 = vector.broadcast %cst_98 : f32 to vector<16x1xf32>
    %383 = arith.cmpf ogt, %381, %382 : vector<16x1xf32>
    %cst_99 = arith.constant -1.000000e+30 : f32
    %384 = vector.broadcast %cst_99 : f32 to vector<16x1xf32>
    %385 = arith.select %383, %380, %384 : vector<16x1xi1>, vector<16x1xf32>
    %cst_100 = arith.constant dense<0xFF800000> : vector<1xf32>
    %386 = vector.multi_reduction <maximumf>, %385, %cst_100 [0] : vector<16x1xf32> to vector<1xf32>
    %387 = vector.shape_cast %386 : vector<1xf32> to vector<1x1xf32>
    %388 = vector.extract_strided_slice %9 {offsets = [0, 1], sizes = [16, 1], strides = [1, 1]} : vector<16x2xf32> to vector<16x1xf32>
    %cst_101 = arith.constant 5.000000e-01 : f32
    %389 = vector.broadcast %cst_101 : f32 to vector<16x1xf32>
    %390 = arith.cmpf ogt, %388, %389 : vector<16x1xf32>
    %cst_102 = arith.constant -1.000000e+30 : f32
    %391 = vector.broadcast %cst_102 : f32 to vector<16x1xf32>
    %392 = arith.select %390, %380, %391 : vector<16x1xi1>, vector<16x1xf32>
    %cst_103 = arith.constant dense<0xFF800000> : vector<1xf32>
    %393 = vector.multi_reduction <maximumf>, %392, %cst_103 [0] : vector<16x1xf32> to vector<1xf32>
    %394 = vector.shape_cast %393 : vector<1xf32> to vector<1x1xf32>
    %395 = tpu.concatenate %387, %394 in 0 : vector<1x1xf32>, vector<1x1xf32> -> vector<2x1xf32>
    %cst_104 = arith.constant dense<0.000000e+00> : vector<16x1xf32>
    %396 = tpu.matmul %9, %395, %cst_104 {dimension_numbers = #tpu.dot_dimension_numbers<[1], [0], [0], [1], [0, 0, 1, 1], [], []>} : vector<16x2xf32>, vector<2x1xf32>, vector<16x1xf32> -> vector<16x1xf32>
    %397 = arith.subf %380, %396 : vector<16x1xf32>
    %398 = math.exp %397 : vector<16x1xf32>
    %cst_105 = arith.constant dense<0.000000e+00> : vector<2x1xf32>
    %399 = tpu.matmul %8, %398, %cst_105 {dimension_numbers = #tpu.dot_dimension_numbers<[1], [0], [0], [1], [0, 0, 1, 1], [], []>} : vector<2x16xf32>, vector<16x1xf32>, vector<2x1xf32> -> vector<2x1xf32>
    %400 = tpu.reciprocal %399 {approx = true} : vector<2x1xf32> -> vector<2x1xf32>
    %cst_106 = arith.constant dense<0.000000e+00> : vector<16x1xf32>
    %401 = tpu.matmul %9, %400, %cst_106 {dimension_numbers = #tpu.dot_dimension_numbers<[1], [0], [0], [1], [0, 0, 1, 1], [], []>} : vector<16x2xf32>, vector<2x1xf32>, vector<16x1xf32> -> vector<16x1xf32>
    %402 = arith.mulf %398, %401 : vector<16x1xf32>
    %403 = vector.broadcast %402 : vector<16x1xf32> to vector<16x64xf32>
    %404 = arith.mulf %403, %368 : vector<16x64xf32>
    %cst_107 = arith.constant dense<0.000000e+00> : vector<2x64xf32>
    %405 = tpu.matmul %8, %404, %cst_107 {dimension_numbers = #tpu.dot_dimension_numbers<[1], [0], [0], [1], [0, 0, 1, 1], [], []>} : vector<2x16xf32>, vector<16x64xf32>, vector<2x64xf32> -> vector<2x64xf32>
    %c0_108 = arith.constant 0 : index
    %c0_109 = arith.constant 0 : index
    %406 = vector.load %arg20[%c0_108, %c0_109] : memref<64x2xf32, #tpu.memory_space<vmem>>, vector<64x2xf32>
    %cst_110 = arith.constant dense<0.000000e+00> : vector<16x2xf32>
    %407 = tpu.matmul %371, %406, %cst_110 {dimension_numbers = #tpu.dot_dimension_numbers<[1], [0], [0], [1], [0, 0, 1, 1], [], []>} : vector<16x64xf32>, vector<64x2xf32>, vector<16x2xf32> -> vector<16x2xf32>
    %c0_111 = arith.constant 0 : index
    %c0_112 = arith.constant 0 : index
    %408 = vector.load %arg21[%c0_111, %c0_112] : memref<1x2xf32, #tpu.memory_space<vmem>>, vector<1x2xf32>
    %409 = vector.broadcast %408 : vector<1x2xf32> to vector<16x2xf32>
    %410 = arith.addf %407, %409 : vector<16x2xf32>
    %cst_113 = arith.constant dense<0xFF800000> : vector<16xf32>
    %411 = vector.multi_reduction <maximumf>, %410, %cst_113 [1] : vector<16x2xf32> to vector<16xf32>
    %412 = vector.shape_cast %411 : vector<16xf32> to vector<16x1xf32>
    %413 = vector.broadcast %412 : vector<16x1xf32> to vector<16x2xf32>
    %414 = arith.subf %410, %413 : vector<16x2xf32>
    %415 = math.exp %414 : vector<16x2xf32>
    %cst_114 = arith.constant dense<0.000000e+00> : vector<16xf32>
    %416 = vector.multi_reduction <add>, %415, %cst_114 [1] : vector<16x2xf32> to vector<16xf32>
    %417 = vector.shape_cast %416 : vector<16xf32> to vector<16x1xf32>
    %418 = math.log %417 : vector<16x1xf32>
    %419 = vector.broadcast %418 : vector<16x1xf32> to vector<16x2xf32>
    %420 = arith.subf %414, %419 : vector<16x2xf32>
    %421 = math.exp %420 : vector<16x2xf32>
    %422 = vector.extract_strided_slice %421 {offsets = [0, 0], sizes = [16, 1], strides = [1, 1]} : vector<16x2xf32> to vector<16x1xf32>
    %423 = vector.extract_strided_slice %421 {offsets = [0, 1], sizes = [16, 1], strides = [1, 1]} : vector<16x2xf32> to vector<16x1xf32>
    %424 = vector.extract_strided_slice %420 {offsets = [0, 0], sizes = [16, 1], strides = [1, 1]} : vector<16x2xf32> to vector<16x1xf32>
    %425 = vector.extract_strided_slice %420 {offsets = [0, 1], sizes = [16, 1], strides = [1, 1]} : vector<16x2xf32> to vector<16x1xf32>
    %cst_115 = arith.constant 5.000000e-01 : f32
    %426 = vector.broadcast %cst_115 : f32 to vector<16x1xf32>
    %427 = arith.cmpf ogt, %423, %426 : vector<16x1xf32>
    %428 = arith.extui %427 : vector<16x1xi1> to vector<16x1xi32>
    %429 = arith.sitofp %428 : vector<16x1xi32> to vector<16x1xf32>
    %430 = arith.mulf %429, %6 : vector<16x1xf32>
    %431 = vector.broadcast %430 : vector<16x1xf32> to vector<16x256xf32>
    %432 = arith.mulf %431, %26 : vector<16x256xf32>
    %433 = vector.broadcast %430 : vector<16x1xf32> to vector<16x256xf32>
    %434 = arith.mulf %433, %27 : vector<16x256xf32>
    %cst_116 = arith.constant dense<0.000000e+00> : vector<16x256xf32>
    %435 = tpu.matmul %7, %434, %cst_116 {dimension_numbers = #tpu.dot_dimension_numbers<[1], [0], [0], [1], [0, 0, 1, 1], [], []>} : vector<16x16xf32>, vector<16x256xf32>, vector<16x256xf32> -> vector<16x256xf32>
    %436 = arith.addf %432, %435 : vector<16x256xf32>
    %c0_117 = arith.constant 0 : index
    %c0_118 = arith.constant 0 : index
    %437 = vector.load %arg12[%c0_117, %c0_118] : memref<1x256xf32, #tpu.memory_space<vmem>>, vector<1x256xf32>
    %438 = vector.broadcast %437 : vector<1x256xf32> to vector<16x256xf32>
    %439 = arith.addf %436, %438 : vector<16x256xf32>
    %c0_119 = arith.constant 0 : index
    %c0_120 = arith.constant 0 : index
    %440 = vector.load %arg13[%c0_119, %c0_120] : memref<64x256xf32, #tpu.memory_space<vmem>>, vector<64x256xf32>
    %cst_121 = arith.constant 0.000000e+00 : f32
    %441 = vector.broadcast %cst_121 : f32 to vector<2x64xf32>
    %cst_122 = arith.constant 0.000000e+00 : f32
    %442 = vector.broadcast %cst_122 : f32 to vector<2x64xf32>
    %443 = vector.extract_strided_slice %439 {offsets = [0, 0], sizes = [2, 256], strides = [1, 1]} : vector<16x256xf32> to vector<2x256xf32>
    %cst_123 = arith.constant dense<0.000000e+00> : vector<2x256xf32>
    %444 = tpu.matmul %441, %440, %cst_123 {dimension_numbers = #tpu.dot_dimension_numbers<[1], [0], [0], [1], [0, 0, 1, 1], [], []>} : vector<2x64xf32>, vector<64x256xf32>, vector<2x256xf32> -> vector<2x256xf32>
    %445 = arith.addf %443, %444 : vector<2x256xf32>
    %446 = vector.extract_strided_slice %445 {offsets = [0, 0], sizes = [2, 192], strides = [1, 1]} : vector<2x256xf32> to vector<2x192xf32>
    %447 = arith.negf %446 : vector<2x192xf32>
    %448 = math.exp %447 : vector<2x192xf32>
    %cst_124 = arith.constant 1.000000e+00 : f32
    %449 = vector.broadcast %cst_124 : f32 to vector<2x192xf32>
    %450 = arith.addf %449, %448 : vector<2x192xf32>
    %451 = arith.divf %449, %450 : vector<2x192xf32>
    %452 = vector.extract_strided_slice %445 {offsets = [0, 192], sizes = [2, 64], strides = [1, 1]} : vector<2x256xf32> to vector<2x64xf32>
    %453 = math.tanh %452 : vector<2x64xf32>
    %454 = vector.extract_strided_slice %451 {offsets = [0, 64], sizes = [2, 64], strides = [1, 1]} : vector<2x192xf32> to vector<2x64xf32>
    %455 = arith.mulf %454, %442 : vector<2x64xf32>
    %456 = vector.extract_strided_slice %451 {offsets = [0, 0], sizes = [2, 64], strides = [1, 1]} : vector<2x192xf32> to vector<2x64xf32>
    %457 = arith.mulf %456, %453 : vector<2x64xf32>
    %458 = arith.addf %455, %457 : vector<2x64xf32>
    %459 = vector.extract_strided_slice %451 {offsets = [0, 128], sizes = [2, 64], strides = [1, 1]} : vector<2x192xf32> to vector<2x64xf32>
    %460 = math.tanh %458 : vector<2x64xf32>
    %461 = arith.mulf %459, %460 : vector<2x64xf32>
    %c0_125 = arith.constant 0 : index
    %c0_126 = arith.constant 0 : index
    %462 = vector.load %arg30[%c0_125, %c0_126] : memref<16x64xf32, #tpu.memory_space<vmem>>, vector<2x64xf32>
    tpu.vector_store %arg30[%c0_125, %c0_126], %461 {strides = array<i32>} : memref<16x64xf32, #tpu.memory_space<vmem>>, vector<2x64xf32>,
    %463 = vector.extract_strided_slice %439 {offsets = [2, 0], sizes = [2, 256], strides = [1, 1]} : vector<16x256xf32> to vector<2x256xf32>
    %cst_127 = arith.constant dense<0.000000e+00> : vector<2x256xf32>
    %464 = tpu.matmul %461, %440, %cst_127 {dimension_numbers = #tpu.dot_dimension_numbers<[1], [0], [0], [1], [0, 0, 1, 1], [], []>} : vector<2x64xf32>, vector<64x256xf32>, vector<2x256xf32> -> vector<2x256xf32>
    %465 = arith.addf %463, %464 : vector<2x256xf32>
    %466 = vector.extract_strided_slice %465 {offsets = [0, 0], sizes = [2, 192], strides = [1, 1]} : vector<2x256xf32> to vector<2x192xf32>
    %467 = arith.negf %466 : vector<2x192xf32>
    %468 = math.exp %467 : vector<2x192xf32>
    %cst_128 = arith.constant 1.000000e+00 : f32
    %469 = vector.broadcast %cst_128 : f32 to vector<2x192xf32>
    %470 = arith.addf %469, %468 : vector<2x192xf32>
    %471 = arith.divf %469, %470 : vector<2x192xf32>
    %472 = vector.extract_strided_slice %465 {offsets = [0, 192], sizes = [2, 64], strides = [1, 1]} : vector<2x256xf32> to vector<2x64xf32>
    %473 = math.tanh %472 : vector<2x64xf32>
    %474 = vector.extract_strided_slice %471 {offsets = [0, 64], sizes = [2, 64], strides = [1, 1]} : vector<2x192xf32> to vector<2x64xf32>
    %475 = arith.mulf %474, %458 : vector<2x64xf32>
    %476 = vector.extract_strided_slice %471 {offsets = [0, 0], sizes = [2, 64], strides = [1, 1]} : vector<2x192xf32> to vector<2x64xf32>
    %477 = arith.mulf %476, %473 : vector<2x64xf32>
    %478 = arith.addf %475, %477 : vector<2x64xf32>
    %479 = vector.extract_strided_slice %471 {offsets = [0, 128], sizes = [2, 64], strides = [1, 1]} : vector<2x192xf32> to vector<2x64xf32>
    %480 = math.tanh %478 : vector<2x64xf32>
    %481 = arith.mulf %479, %480 : vector<2x64xf32>
    %c2_129 = arith.constant 2 : index
    %c0_130 = arith.constant 0 : index
    %482 = vector.load %arg30[%c2_129, %c0_130] : memref<16x64xf32, #tpu.memory_space<vmem>>, vector<2x64xf32>
    tpu.vector_store %arg30[%c2_129, %c0_130], %481 {strides = array<i32>} : memref<16x64xf32, #tpu.memory_space<vmem>>, vector<2x64xf32>,
    %483 = vector.extract_strided_slice %439 {offsets = [4, 0], sizes = [2, 256], strides = [1, 1]} : vector<16x256xf32> to vector<2x256xf32>
    %cst_131 = arith.constant dense<0.000000e+00> : vector<2x256xf32>
    %484 = tpu.matmul %481, %440, %cst_131 {dimension_numbers = #tpu.dot_dimension_numbers<[1], [0], [0], [1], [0, 0, 1, 1], [], []>} : vector<2x64xf32>, vector<64x256xf32>, vector<2x256xf32> -> vector<2x256xf32>
    %485 = arith.addf %483, %484 : vector<2x256xf32>
    %486 = vector.extract_strided_slice %485 {offsets = [0, 0], sizes = [2, 192], strides = [1, 1]} : vector<2x256xf32> to vector<2x192xf32>
    %487 = arith.negf %486 : vector<2x192xf32>
    %488 = math.exp %487 : vector<2x192xf32>
    %cst_132 = arith.constant 1.000000e+00 : f32
    %489 = vector.broadcast %cst_132 : f32 to vector<2x192xf32>
    %490 = arith.addf %489, %488 : vector<2x192xf32>
    %491 = arith.divf %489, %490 : vector<2x192xf32>
    %492 = vector.extract_strided_slice %485 {offsets = [0, 192], sizes = [2, 64], strides = [1, 1]} : vector<2x256xf32> to vector<2x64xf32>
    %493 = math.tanh %492 : vector<2x64xf32>
    %494 = vector.extract_strided_slice %491 {offsets = [0, 64], sizes = [2, 64], strides = [1, 1]} : vector<2x192xf32> to vector<2x64xf32>
    %495 = arith.mulf %494, %478 : vector<2x64xf32>
    %496 = vector.extract_strided_slice %491 {offsets = [0, 0], sizes = [2, 64], strides = [1, 1]} : vector<2x192xf32> to vector<2x64xf32>
    %497 = arith.mulf %496, %493 : vector<2x64xf32>
    %498 = arith.addf %495, %497 : vector<2x64xf32>
    %499 = vector.extract_strided_slice %491 {offsets = [0, 128], sizes = [2, 64], strides = [1, 1]} : vector<2x192xf32> to vector<2x64xf32>
    %500 = math.tanh %498 : vector<2x64xf32>
    %501 = arith.mulf %499, %500 : vector<2x64xf32>
    %c4_133 = arith.constant 4 : index
    %c0_134 = arith.constant 0 : index
    %502 = vector.load %arg30[%c4_133, %c0_134] : memref<16x64xf32, #tpu.memory_space<vmem>>, vector<2x64xf32>
    tpu.vector_store %arg30[%c4_133, %c0_134], %501 {strides = array<i32>} : memref<16x64xf32, #tpu.memory_space<vmem>>, vector<2x64xf32>,
    %503 = vector.extract_strided_slice %439 {offsets = [6, 0], sizes = [2, 256], strides = [1, 1]} : vector<16x256xf32> to vector<2x256xf32>
    %cst_135 = arith.constant dense<0.000000e+00> : vector<2x256xf32>
    %504 = tpu.matmul %501, %440, %cst_135 {dimension_numbers = #tpu.dot_dimension_numbers<[1], [0], [0], [1], [0, 0, 1, 1], [], []>} : vector<2x64xf32>, vector<64x256xf32>, vector<2x256xf32> -> vector<2x256xf32>
    %505 = arith.addf %503, %504 : vector<2x256xf32>
    %506 = vector.extract_strided_slice %505 {offsets = [0, 0], sizes = [2, 192], strides = [1, 1]} : vector<2x256xf32> to vector<2x192xf32>
    %507 = arith.negf %506 : vector<2x192xf32>
    %508 = math.exp %507 : vector<2x192xf32>
    %cst_136 = arith.constant 1.000000e+00 : f32
    %509 = vector.broadcast %cst_136 : f32 to vector<2x192xf32>
    %510 = arith.addf %509, %508 : vector<2x192xf32>
    %511 = arith.divf %509, %510 : vector<2x192xf32>
    %512 = vector.extract_strided_slice %505 {offsets = [0, 192], sizes = [2, 64], strides = [1, 1]} : vector<2x256xf32> to vector<2x64xf32>
    %513 = math.tanh %512 : vector<2x64xf32>
    %514 = vector.extract_strided_slice %511 {offsets = [0, 64], sizes = [2, 64], strides = [1, 1]} : vector<2x192xf32> to vector<2x64xf32>
    %515 = arith.mulf %514, %498 : vector<2x64xf32>
    %516 = vector.extract_strided_slice %511 {offsets = [0, 0], sizes = [2, 64], strides = [1, 1]} : vector<2x192xf32> to vector<2x64xf32>
    %517 = arith.mulf %516, %513 : vector<2x64xf32>
    %518 = arith.addf %515, %517 : vector<2x64xf32>
    %519 = vector.extract_strided_slice %511 {offsets = [0, 128], sizes = [2, 64], strides = [1, 1]} : vector<2x192xf32> to vector<2x64xf32>
    %520 = math.tanh %518 : vector<2x64xf32>
    %521 = arith.mulf %519, %520 : vector<2x64xf32>
    %c6_137 = arith.constant 6 : index
    %c0_138 = arith.constant 0 : index
    %522 = vector.load %arg30[%c6_137, %c0_138] : memref<16x64xf32, #tpu.memory_space<vmem>>, vector<2x64xf32>
    tpu.vector_store %arg30[%c6_137, %c0_138], %521 {strides = array<i32>} : memref<16x64xf32, #tpu.memory_space<vmem>>, vector<2x64xf32>,
    %523 = vector.extract_strided_slice %439 {offsets = [8, 0], sizes = [2, 256], strides = [1, 1]} : vector<16x256xf32> to vector<2x256xf32>
    %cst_139 = arith.constant dense<0.000000e+00> : vector<2x256xf32>
    %524 = tpu.matmul %521, %440, %cst_139 {dimension_numbers = #tpu.dot_dimension_numbers<[1], [0], [0], [1], [0, 0, 1, 1], [], []>} : vector<2x64xf32>, vector<64x256xf32>, vector<2x256xf32> -> vector<2x256xf32>
    %525 = arith.addf %523, %524 : vector<2x256xf32>
    %526 = vector.extract_strided_slice %525 {offsets = [0, 0], sizes = [2, 192], strides = [1, 1]} : vector<2x256xf32> to vector<2x192xf32>
    %527 = arith.negf %526 : vector<2x192xf32>
    %528 = math.exp %527 : vector<2x192xf32>
    %cst_140 = arith.constant 1.000000e+00 : f32
    %529 = vector.broadcast %cst_140 : f32 to vector<2x192xf32>
    %530 = arith.addf %529, %528 : vector<2x192xf32>
    %531 = arith.divf %529, %530 : vector<2x192xf32>
    %532 = vector.extract_strided_slice %525 {offsets = [0, 192], sizes = [2, 64], strides = [1, 1]} : vector<2x256xf32> to vector<2x64xf32>
    %533 = math.tanh %532 : vector<2x64xf32>
    %534 = vector.extract_strided_slice %531 {offsets = [0, 64], sizes = [2, 64], strides = [1, 1]} : vector<2x192xf32> to vector<2x64xf32>
    %535 = arith.mulf %534, %518 : vector<2x64xf32>
    %536 = vector.extract_strided_slice %531 {offsets = [0, 0], sizes = [2, 64], strides = [1, 1]} : vector<2x192xf32> to vector<2x64xf32>
    %537 = arith.mulf %536, %533 : vector<2x64xf32>
    %538 = arith.addf %535, %537 : vector<2x64xf32>
    %539 = vector.extract_strided_slice %531 {offsets = [0, 128], sizes = [2, 64], strides = [1, 1]} : vector<2x192xf32> to vector<2x64xf32>
    %540 = math.tanh %538 : vector<2x64xf32>
    %541 = arith.mulf %539, %540 : vector<2x64xf32>
    %c8_141 = arith.constant 8 : index
    %c0_142 = arith.constant 0 : index
    %542 = vector.load %arg30[%c8_141, %c0_142] : memref<16x64xf32, #tpu.memory_space<vmem>>, vector<2x64xf32>
    tpu.vector_store %arg30[%c8_141, %c0_142], %541 {strides = array<i32>} : memref<16x64xf32, #tpu.memory_space<vmem>>, vector<2x64xf32>,
    %543 = vector.extract_strided_slice %439 {offsets = [10, 0], sizes = [2, 256], strides = [1, 1]} : vector<16x256xf32> to vector<2x256xf32>
    %cst_143 = arith.constant dense<0.000000e+00> : vector<2x256xf32>
    %544 = tpu.matmul %541, %440, %cst_143 {dimension_numbers = #tpu.dot_dimension_numbers<[1], [0], [0], [1], [0, 0, 1, 1], [], []>} : vector<2x64xf32>, vector<64x256xf32>, vector<2x256xf32> -> vector<2x256xf32>
    %545 = arith.addf %543, %544 : vector<2x256xf32>
    %546 = vector.extract_strided_slice %545 {offsets = [0, 0], sizes = [2, 192], strides = [1, 1]} : vector<2x256xf32> to vector<2x192xf32>
    %547 = arith.negf %546 : vector<2x192xf32>
    %548 = math.exp %547 : vector<2x192xf32>
    %cst_144 = arith.constant 1.000000e+00 : f32
    %549 = vector.broadcast %cst_144 : f32 to vector<2x192xf32>
    %550 = arith.addf %549, %548 : vector<2x192xf32>
    %551 = arith.divf %549, %550 : vector<2x192xf32>
    %552 = vector.extract_strided_slice %545 {offsets = [0, 192], sizes = [2, 64], strides = [1, 1]} : vector<2x256xf32> to vector<2x64xf32>
    %553 = math.tanh %552 : vector<2x64xf32>
    %554 = vector.extract_strided_slice %551 {offsets = [0, 64], sizes = [2, 64], strides = [1, 1]} : vector<2x192xf32> to vector<2x64xf32>
    %555 = arith.mulf %554, %538 : vector<2x64xf32>
    %556 = vector.extract_strided_slice %551 {offsets = [0, 0], sizes = [2, 64], strides = [1, 1]} : vector<2x192xf32> to vector<2x64xf32>
    %557 = arith.mulf %556, %553 : vector<2x64xf32>
    %558 = arith.addf %555, %557 : vector<2x64xf32>
    %559 = vector.extract_strided_slice %551 {offsets = [0, 128], sizes = [2, 64], strides = [1, 1]} : vector<2x192xf32> to vector<2x64xf32>
    %560 = math.tanh %558 : vector<2x64xf32>
    %561 = arith.mulf %559, %560 : vector<2x64xf32>
    %c10_145 = arith.constant 10 : index
    %c0_146 = arith.constant 0 : index
    %562 = vector.load %arg30[%c10_145, %c0_146] : memref<16x64xf32, #tpu.memory_space<vmem>>, vector<2x64xf32>
    tpu.vector_store %arg30[%c10_145, %c0_146], %561 {strides = array<i32>} : memref<16x64xf32, #tpu.memory_space<vmem>>, vector<2x64xf32>,
    %563 = vector.extract_strided_slice %439 {offsets = [12, 0], sizes = [2, 256], strides = [1, 1]} : vector<16x256xf32> to vector<2x256xf32>
    %cst_147 = arith.constant dense<0.000000e+00> : vector<2x256xf32>
    %564 = tpu.matmul %561, %440, %cst_147 {dimension_numbers = #tpu.dot_dimension_numbers<[1], [0], [0], [1], [0, 0, 1, 1], [], []>} : vector<2x64xf32>, vector<64x256xf32>, vector<2x256xf32> -> vector<2x256xf32>
    %565 = arith.addf %563, %564 : vector<2x256xf32>
    %566 = vector.extract_strided_slice %565 {offsets = [0, 0], sizes = [2, 192], strides = [1, 1]} : vector<2x256xf32> to vector<2x192xf32>
    %567 = arith.negf %566 : vector<2x192xf32>
    %568 = math.exp %567 : vector<2x192xf32>
    %cst_148 = arith.constant 1.000000e+00 : f32
    %569 = vector.broadcast %cst_148 : f32 to vector<2x192xf32>
    %570 = arith.addf %569, %568 : vector<2x192xf32>
    %571 = arith.divf %569, %570 : vector<2x192xf32>
    %572 = vector.extract_strided_slice %565 {offsets = [0, 192], sizes = [2, 64], strides = [1, 1]} : vector<2x256xf32> to vector<2x64xf32>
    %573 = math.tanh %572 : vector<2x64xf32>
    %574 = vector.extract_strided_slice %571 {offsets = [0, 64], sizes = [2, 64], strides = [1, 1]} : vector<2x192xf32> to vector<2x64xf32>
    %575 = arith.mulf %574, %558 : vector<2x64xf32>
    %576 = vector.extract_strided_slice %571 {offsets = [0, 0], sizes = [2, 64], strides = [1, 1]} : vector<2x192xf32> to vector<2x64xf32>
    %577 = arith.mulf %576, %573 : vector<2x64xf32>
    %578 = arith.addf %575, %577 : vector<2x64xf32>
    %579 = vector.extract_strided_slice %571 {offsets = [0, 128], sizes = [2, 64], strides = [1, 1]} : vector<2x192xf32> to vector<2x64xf32>
    %580 = math.tanh %578 : vector<2x64xf32>
    %581 = arith.mulf %579, %580 : vector<2x64xf32>
    %c12_149 = arith.constant 12 : index
    %c0_150 = arith.constant 0 : index
    %582 = vector.load %arg30[%c12_149, %c0_150] : memref<16x64xf32, #tpu.memory_space<vmem>>, vector<2x64xf32>
    tpu.vector_store %arg30[%c12_149, %c0_150], %581 {strides = array<i32>} : memref<16x64xf32, #tpu.memory_space<vmem>>, vector<2x64xf32>,
    %583 = vector.extract_strided_slice %439 {offsets = [14, 0], sizes = [2, 256], strides = [1, 1]} : vector<16x256xf32> to vector<2x256xf32>
    %cst_151 = arith.constant dense<0.000000e+00> : vector<2x256xf32>
    %584 = tpu.matmul %581, %440, %cst_151 {dimension_numbers = #tpu.dot_dimension_numbers<[1], [0], [0], [1], [0, 0, 1, 1], [], []>} : vector<2x64xf32>, vector<64x256xf32>, vector<2x256xf32> -> vector<2x256xf32>
    %585 = arith.addf %583, %584 : vector<2x256xf32>
    %586 = vector.extract_strided_slice %585 {offsets = [0, 0], sizes = [2, 192], strides = [1, 1]} : vector<2x256xf32> to vector<2x192xf32>
    %587 = arith.negf %586 : vector<2x192xf32>
    %588 = math.exp %587 : vector<2x192xf32>
    %cst_152 = arith.constant 1.000000e+00 : f32
    %589 = vector.broadcast %cst_152 : f32 to vector<2x192xf32>
    %590 = arith.addf %589, %588 : vector<2x192xf32>
    %591 = arith.divf %589, %590 : vector<2x192xf32>
    %592 = vector.extract_strided_slice %585 {offsets = [0, 192], sizes = [2, 64], strides = [1, 1]} : vector<2x256xf32> to vector<2x64xf32>
    %593 = math.tanh %592 : vector<2x64xf32>
    %594 = vector.extract_strided_slice %591 {offsets = [0, 64], sizes = [2, 64], strides = [1, 1]} : vector<2x192xf32> to vector<2x64xf32>
    %595 = arith.mulf %594, %578 : vector<2x64xf32>
    %596 = vector.extract_strided_slice %591 {offsets = [0, 0], sizes = [2, 64], strides = [1, 1]} : vector<2x192xf32> to vector<2x64xf32>
    %597 = arith.mulf %596, %593 : vector<2x64xf32>
    %598 = arith.addf %595, %597 : vector<2x64xf32>
    %599 = vector.extract_strided_slice %591 {offsets = [0, 128], sizes = [2, 64], strides = [1, 1]} : vector<2x192xf32> to vector<2x64xf32>
    %600 = math.tanh %598 : vector<2x64xf32>
    %601 = arith.mulf %599, %600 : vector<2x64xf32>
    %c14_153 = arith.constant 14 : index
    %c0_154 = arith.constant 0 : index
    %602 = vector.load %arg30[%c14_153, %c0_154] : memref<16x64xf32, #tpu.memory_space<vmem>>, vector<2x64xf32>
    tpu.vector_store %arg30[%c14_153, %c0_154], %601 {strides = array<i32>} : memref<16x64xf32, #tpu.memory_space<vmem>>, vector<2x64xf32>,
    %c0_155 = arith.constant 0 : index
    %c0_156 = arith.constant 0 : index
    %603 = vector.load %arg30[%c0_155, %c0_156] : memref<16x64xf32, #tpu.memory_space<vmem>>, vector<16x64xf32>
    %cst_157 = arith.constant dense<0.000000e+00> : vector<16x64xf32>
    %604 = tpu.matmul %7, %603, %cst_157 {dimension_numbers = #tpu.dot_dimension_numbers<[1], [0], [0], [1], [0, 0, 1, 1], [], []>} : vector<16x16xf32>, vector<16x64xf32>, vector<16x64xf32> -> vector<16x64xf32>
    %c0_158 = arith.constant 0 : index
    %c0_159 = arith.constant 0 : index
    %605 = vector.load %arg14[%c0_158, %c0_159] : memref<64x256xf32, #tpu.memory_space<vmem>>, vector<64x256xf32>
    %cst_160 = arith.constant dense<0.000000e+00> : vector<16x256xf32>
    %606 = tpu.matmul %603, %605, %cst_160 {dimension_numbers = #tpu.dot_dimension_numbers<[1], [0], [0], [1], [0, 0, 1, 1], [], []>} : vector<16x64xf32>, vector<64x256xf32>, vector<16x256xf32> -> vector<16x256xf32>
    %c0_161 = arith.constant 0 : index
    %c0_162 = arith.constant 0 : index
    %607 = vector.load %arg15[%c0_161, %c0_162] : memref<64x256xf32, #tpu.memory_space<vmem>>, vector<64x256xf32>
    %cst_163 = arith.constant dense<0.000000e+00> : vector<16x256xf32>
    %608 = tpu.matmul %604, %607, %cst_163 {dimension_numbers = #tpu.dot_dimension_numbers<[1], [0], [0], [1], [0, 0, 1, 1], [], []>} : vector<16x64xf32>, vector<64x256xf32>, vector<16x256xf32> -> vector<16x256xf32>
    %609 = arith.addf %606, %608 : vector<16x256xf32>
    %c0_164 = arith.constant 0 : index
    %c0_165 = arith.constant 0 : index
    %610 = vector.load %arg16[%c0_164, %c0_165] : memref<1x256xf32, #tpu.memory_space<vmem>>, vector<1x256xf32>
    %611 = vector.broadcast %610 : vector<1x256xf32> to vector<16x256xf32>
    %612 = arith.addf %609, %611 : vector<16x256xf32>
    %c0_166 = arith.constant 0 : index
    %c0_167 = arith.constant 0 : index
    %613 = vector.load %arg17[%c0_166, %c0_167] : memref<64x256xf32, #tpu.memory_space<vmem>>, vector<64x256xf32>
    %cst_168 = arith.constant 0.000000e+00 : f32
    %614 = vector.broadcast %cst_168 : f32 to vector<2x64xf32>
    %cst_169 = arith.constant 0.000000e+00 : f32
    %615 = vector.broadcast %cst_169 : f32 to vector<2x64xf32>
    %616 = vector.extract_strided_slice %612 {offsets = [0, 0], sizes = [2, 256], strides = [1, 1]} : vector<16x256xf32> to vector<2x256xf32>
    %cst_170 = arith.constant dense<0.000000e+00> : vector<2x256xf32>
    %617 = tpu.matmul %614, %613, %cst_170 {dimension_numbers = #tpu.dot_dimension_numbers<[1], [0], [0], [1], [0, 0, 1, 1], [], []>} : vector<2x64xf32>, vector<64x256xf32>, vector<2x256xf32> -> vector<2x256xf32>
    %618 = arith.addf %616, %617 : vector<2x256xf32>
    %619 = vector.extract_strided_slice %618 {offsets = [0, 0], sizes = [2, 192], strides = [1, 1]} : vector<2x256xf32> to vector<2x192xf32>
    %620 = arith.negf %619 : vector<2x192xf32>
    %621 = math.exp %620 : vector<2x192xf32>
    %cst_171 = arith.constant 1.000000e+00 : f32
    %622 = vector.broadcast %cst_171 : f32 to vector<2x192xf32>
    %623 = arith.addf %622, %621 : vector<2x192xf32>
    %624 = arith.divf %622, %623 : vector<2x192xf32>
    %625 = vector.extract_strided_slice %618 {offsets = [0, 192], sizes = [2, 64], strides = [1, 1]} : vector<2x256xf32> to vector<2x64xf32>
    %626 = math.tanh %625 : vector<2x64xf32>
    %627 = vector.extract_strided_slice %624 {offsets = [0, 64], sizes = [2, 64], strides = [1, 1]} : vector<2x192xf32> to vector<2x64xf32>
    %628 = arith.mulf %627, %615 : vector<2x64xf32>
    %629 = vector.extract_strided_slice %624 {offsets = [0, 0], sizes = [2, 64], strides = [1, 1]} : vector<2x192xf32> to vector<2x64xf32>
    %630 = arith.mulf %629, %626 : vector<2x64xf32>
    %631 = arith.addf %628, %630 : vector<2x64xf32>
    %632 = vector.extract_strided_slice %624 {offsets = [0, 128], sizes = [2, 64], strides = [1, 1]} : vector<2x192xf32> to vector<2x64xf32>
    %633 = math.tanh %631 : vector<2x64xf32>
    %634 = arith.mulf %632, %633 : vector<2x64xf32>
    %c0_172 = arith.constant 0 : index
    %c0_173 = arith.constant 0 : index
    %635 = vector.load %arg31[%c0_172, %c0_173] : memref<16x64xf32, #tpu.memory_space<vmem>>, vector<2x64xf32>
    tpu.vector_store %arg31[%c0_172, %c0_173], %634 {strides = array<i32>} : memref<16x64xf32, #tpu.memory_space<vmem>>, vector<2x64xf32>,
    %636 = vector.extract_strided_slice %612 {offsets = [2, 0], sizes = [2, 256], strides = [1, 1]} : vector<16x256xf32> to vector<2x256xf32>
    %cst_174 = arith.constant dense<0.000000e+00> : vector<2x256xf32>
    %637 = tpu.matmul %634, %613, %cst_174 {dimension_numbers = #tpu.dot_dimension_numbers<[1], [0], [0], [1], [0, 0, 1, 1], [], []>} : vector<2x64xf32>, vector<64x256xf32>, vector<2x256xf32> -> vector<2x256xf32>
    %638 = arith.addf %636, %637 : vector<2x256xf32>
    %639 = vector.extract_strided_slice %638 {offsets = [0, 0], sizes = [2, 192], strides = [1, 1]} : vector<2x256xf32> to vector<2x192xf32>
    %640 = arith.negf %639 : vector<2x192xf32>
    %641 = math.exp %640 : vector<2x192xf32>
    %cst_175 = arith.constant 1.000000e+00 : f32
    %642 = vector.broadcast %cst_175 : f32 to vector<2x192xf32>
    %643 = arith.addf %642, %641 : vector<2x192xf32>
    %644 = arith.divf %642, %643 : vector<2x192xf32>
    %645 = vector.extract_strided_slice %638 {offsets = [0, 192], sizes = [2, 64], strides = [1, 1]} : vector<2x256xf32> to vector<2x64xf32>
    %646 = math.tanh %645 : vector<2x64xf32>
    %647 = vector.extract_strided_slice %644 {offsets = [0, 64], sizes = [2, 64], strides = [1, 1]} : vector<2x192xf32> to vector<2x64xf32>
    %648 = arith.mulf %647, %631 : vector<2x64xf32>
    %649 = vector.extract_strided_slice %644 {offsets = [0, 0], sizes = [2, 64], strides = [1, 1]} : vector<2x192xf32> to vector<2x64xf32>
    %650 = arith.mulf %649, %646 : vector<2x64xf32>
    %651 = arith.addf %648, %650 : vector<2x64xf32>
    %652 = vector.extract_strided_slice %644 {offsets = [0, 128], sizes = [2, 64], strides = [1, 1]} : vector<2x192xf32> to vector<2x64xf32>
    %653 = math.tanh %651 : vector<2x64xf32>
    %654 = arith.mulf %652, %653 : vector<2x64xf32>
    %c2_176 = arith.constant 2 : index
    %c0_177 = arith.constant 0 : index
    %655 = vector.load %arg31[%c2_176, %c0_177] : memref<16x64xf32, #tpu.memory_space<vmem>>, vector<2x64xf32>
    tpu.vector_store %arg31[%c2_176, %c0_177], %654 {strides = array<i32>} : memref<16x64xf32, #tpu.memory_space<vmem>>, vector<2x64xf32>,
    %656 = vector.extract_strided_slice %612 {offsets = [4, 0], sizes = [2, 256], strides = [1, 1]} : vector<16x256xf32> to vector<2x256xf32>
    %cst_178 = arith.constant dense<0.000000e+00> : vector<2x256xf32>
    %657 = tpu.matmul %654, %613, %cst_178 {dimension_numbers = #tpu.dot_dimension_numbers<[1], [0], [0], [1], [0, 0, 1, 1], [], []>} : vector<2x64xf32>, vector<64x256xf32>, vector<2x256xf32> -> vector<2x256xf32>
    %658 = arith.addf %656, %657 : vector<2x256xf32>
    %659 = vector.extract_strided_slice %658 {offsets = [0, 0], sizes = [2, 192], strides = [1, 1]} : vector<2x256xf32> to vector<2x192xf32>
    %660 = arith.negf %659 : vector<2x192xf32>
    %661 = math.exp %660 : vector<2x192xf32>
    %cst_179 = arith.constant 1.000000e+00 : f32
    %662 = vector.broadcast %cst_179 : f32 to vector<2x192xf32>
    %663 = arith.addf %662, %661 : vector<2x192xf32>
    %664 = arith.divf %662, %663 : vector<2x192xf32>
    %665 = vector.extract_strided_slice %658 {offsets = [0, 192], sizes = [2, 64], strides = [1, 1]} : vector<2x256xf32> to vector<2x64xf32>
    %666 = math.tanh %665 : vector<2x64xf32>
    %667 = vector.extract_strided_slice %664 {offsets = [0, 64], sizes = [2, 64], strides = [1, 1]} : vector<2x192xf32> to vector<2x64xf32>
    %668 = arith.mulf %667, %651 : vector<2x64xf32>
    %669 = vector.extract_strided_slice %664 {offsets = [0, 0], sizes = [2, 64], strides = [1, 1]} : vector<2x192xf32> to vector<2x64xf32>
    %670 = arith.mulf %669, %666 : vector<2x64xf32>
    %671 = arith.addf %668, %670 : vector<2x64xf32>
    %672 = vector.extract_strided_slice %664 {offsets = [0, 128], sizes = [2, 64], strides = [1, 1]} : vector<2x192xf32> to vector<2x64xf32>
    %673 = math.tanh %671 : vector<2x64xf32>
    %674 = arith.mulf %672, %673 : vector<2x64xf32>
    %c4_180 = arith.constant 4 : index
    %c0_181 = arith.constant 0 : index
    %675 = vector.load %arg31[%c4_180, %c0_181] : memref<16x64xf32, #tpu.memory_space<vmem>>, vector<2x64xf32>
    tpu.vector_store %arg31[%c4_180, %c0_181], %674 {strides = array<i32>} : memref<16x64xf32, #tpu.memory_space<vmem>>, vector<2x64xf32>,
    %676 = vector.extract_strided_slice %612 {offsets = [6, 0], sizes = [2, 256], strides = [1, 1]} : vector<16x256xf32> to vector<2x256xf32>
    %cst_182 = arith.constant dense<0.000000e+00> : vector<2x256xf32>
    %677 = tpu.matmul %674, %613, %cst_182 {dimension_numbers = #tpu.dot_dimension_numbers<[1], [0], [0], [1], [0, 0, 1, 1], [], []>} : vector<2x64xf32>, vector<64x256xf32>, vector<2x256xf32> -> vector<2x256xf32>
    %678 = arith.addf %676, %677 : vector<2x256xf32>
    %679 = vector.extract_strided_slice %678 {offsets = [0, 0], sizes = [2, 192], strides = [1, 1]} : vector<2x256xf32> to vector<2x192xf32>
    %680 = arith.negf %679 : vector<2x192xf32>
    %681 = math.exp %680 : vector<2x192xf32>
    %cst_183 = arith.constant 1.000000e+00 : f32
    %682 = vector.broadcast %cst_183 : f32 to vector<2x192xf32>
    %683 = arith.addf %682, %681 : vector<2x192xf32>
    %684 = arith.divf %682, %683 : vector<2x192xf32>
    %685 = vector.extract_strided_slice %678 {offsets = [0, 192], sizes = [2, 64], strides = [1, 1]} : vector<2x256xf32> to vector<2x64xf32>
    %686 = math.tanh %685 : vector<2x64xf32>
    %687 = vector.extract_strided_slice %684 {offsets = [0, 64], sizes = [2, 64], strides = [1, 1]} : vector<2x192xf32> to vector<2x64xf32>
    %688 = arith.mulf %687, %671 : vector<2x64xf32>
    %689 = vector.extract_strided_slice %684 {offsets = [0, 0], sizes = [2, 64], strides = [1, 1]} : vector<2x192xf32> to vector<2x64xf32>
    %690 = arith.mulf %689, %686 : vector<2x64xf32>
    %691 = arith.addf %688, %690 : vector<2x64xf32>
    %692 = vector.extract_strided_slice %684 {offsets = [0, 128], sizes = [2, 64], strides = [1, 1]} : vector<2x192xf32> to vector<2x64xf32>
    %693 = math.tanh %691 : vector<2x64xf32>
    %694 = arith.mulf %692, %693 : vector<2x64xf32>
    %c6_184 = arith.constant 6 : index
    %c0_185 = arith.constant 0 : index
    %695 = vector.load %arg31[%c6_184, %c0_185] : memref<16x64xf32, #tpu.memory_space<vmem>>, vector<2x64xf32>
    tpu.vector_store %arg31[%c6_184, %c0_185], %694 {strides = array<i32>} : memref<16x64xf32, #tpu.memory_space<vmem>>, vector<2x64xf32>,
    %696 = vector.extract_strided_slice %612 {offsets = [8, 0], sizes = [2, 256], strides = [1, 1]} : vector<16x256xf32> to vector<2x256xf32>
    %cst_186 = arith.constant dense<0.000000e+00> : vector<2x256xf32>
    %697 = tpu.matmul %694, %613, %cst_186 {dimension_numbers = #tpu.dot_dimension_numbers<[1], [0], [0], [1], [0, 0, 1, 1], [], []>} : vector<2x64xf32>, vector<64x256xf32>, vector<2x256xf32> -> vector<2x256xf32>
    %698 = arith.addf %696, %697 : vector<2x256xf32>
    %699 = vector.extract_strided_slice %698 {offsets = [0, 0], sizes = [2, 192], strides = [1, 1]} : vector<2x256xf32> to vector<2x192xf32>
    %700 = arith.negf %699 : vector<2x192xf32>
    %701 = math.exp %700 : vector<2x192xf32>
    %cst_187 = arith.constant 1.000000e+00 : f32
    %702 = vector.broadcast %cst_187 : f32 to vector<2x192xf32>
    %703 = arith.addf %702, %701 : vector<2x192xf32>
    %704 = arith.divf %702, %703 : vector<2x192xf32>
    %705 = vector.extract_strided_slice %698 {offsets = [0, 192], sizes = [2, 64], strides = [1, 1]} : vector<2x256xf32> to vector<2x64xf32>
    %706 = math.tanh %705 : vector<2x64xf32>
    %707 = vector.extract_strided_slice %704 {offsets = [0, 64], sizes = [2, 64], strides = [1, 1]} : vector<2x192xf32> to vector<2x64xf32>
    %708 = arith.mulf %707, %691 : vector<2x64xf32>
    %709 = vector.extract_strided_slice %704 {offsets = [0, 0], sizes = [2, 64], strides = [1, 1]} : vector<2x192xf32> to vector<2x64xf32>
    %710 = arith.mulf %709, %706 : vector<2x64xf32>
    %711 = arith.addf %708, %710 : vector<2x64xf32>
    %712 = vector.extract_strided_slice %704 {offsets = [0, 128], sizes = [2, 64], strides = [1, 1]} : vector<2x192xf32> to vector<2x64xf32>
    %713 = math.tanh %711 : vector<2x64xf32>
    %714 = arith.mulf %712, %713 : vector<2x64xf32>
    %c8_188 = arith.constant 8 : index
    %c0_189 = arith.constant 0 : index
    %715 = vector.load %arg31[%c8_188, %c0_189] : memref<16x64xf32, #tpu.memory_space<vmem>>, vector<2x64xf32>
    tpu.vector_store %arg31[%c8_188, %c0_189], %714 {strides = array<i32>} : memref<16x64xf32, #tpu.memory_space<vmem>>, vector<2x64xf32>,
    %716 = vector.extract_strided_slice %612 {offsets = [10, 0], sizes = [2, 256], strides = [1, 1]} : vector<16x256xf32> to vector<2x256xf32>
    %cst_190 = arith.constant dense<0.000000e+00> : vector<2x256xf32>
    %717 = tpu.matmul %714, %613, %cst_190 {dimension_numbers = #tpu.dot_dimension_numbers<[1], [0], [0], [1], [0, 0, 1, 1], [], []>} : vector<2x64xf32>, vector<64x256xf32>, vector<2x256xf32> -> vector<2x256xf32>
    %718 = arith.addf %716, %717 : vector<2x256xf32>
    %719 = vector.extract_strided_slice %718 {offsets = [0, 0], sizes = [2, 192], strides = [1, 1]} : vector<2x256xf32> to vector<2x192xf32>
    %720 = arith.negf %719 : vector<2x192xf32>
    %721 = math.exp %720 : vector<2x192xf32>
    %cst_191 = arith.constant 1.000000e+00 : f32
    %722 = vector.broadcast %cst_191 : f32 to vector<2x192xf32>
    %723 = arith.addf %722, %721 : vector<2x192xf32>
    %724 = arith.divf %722, %723 : vector<2x192xf32>
    %725 = vector.extract_strided_slice %718 {offsets = [0, 192], sizes = [2, 64], strides = [1, 1]} : vector<2x256xf32> to vector<2x64xf32>
    %726 = math.tanh %725 : vector<2x64xf32>
    %727 = vector.extract_strided_slice %724 {offsets = [0, 64], sizes = [2, 64], strides = [1, 1]} : vector<2x192xf32> to vector<2x64xf32>
    %728 = arith.mulf %727, %711 : vector<2x64xf32>
    %729 = vector.extract_strided_slice %724 {offsets = [0, 0], sizes = [2, 64], strides = [1, 1]} : vector<2x192xf32> to vector<2x64xf32>
    %730 = arith.mulf %729, %726 : vector<2x64xf32>
    %731 = arith.addf %728, %730 : vector<2x64xf32>
    %732 = vector.extract_strided_slice %724 {offsets = [0, 128], sizes = [2, 64], strides = [1, 1]} : vector<2x192xf32> to vector<2x64xf32>
    %733 = math.tanh %731 : vector<2x64xf32>
    %734 = arith.mulf %732, %733 : vector<2x64xf32>
    %c10_192 = arith.constant 10 : index
    %c0_193 = arith.constant 0 : index
    %735 = vector.load %arg31[%c10_192, %c0_193] : memref<16x64xf32, #tpu.memory_space<vmem>>, vector<2x64xf32>
    tpu.vector_store %arg31[%c10_192, %c0_193], %734 {strides = array<i32>} : memref<16x64xf32, #tpu.memory_space<vmem>>, vector<2x64xf32>,
    %736 = vector.extract_strided_slice %612 {offsets = [12, 0], sizes = [2, 256], strides = [1, 1]} : vector<16x256xf32> to vector<2x256xf32>
    %cst_194 = arith.constant dense<0.000000e+00> : vector<2x256xf32>
    %737 = tpu.matmul %734, %613, %cst_194 {dimension_numbers = #tpu.dot_dimension_numbers<[1], [0], [0], [1], [0, 0, 1, 1], [], []>} : vector<2x64xf32>, vector<64x256xf32>, vector<2x256xf32> -> vector<2x256xf32>
    %738 = arith.addf %736, %737 : vector<2x256xf32>
    %739 = vector.extract_strided_slice %738 {offsets = [0, 0], sizes = [2, 192], strides = [1, 1]} : vector<2x256xf32> to vector<2x192xf32>
    %740 = arith.negf %739 : vector<2x192xf32>
    %741 = math.exp %740 : vector<2x192xf32>
    %cst_195 = arith.constant 1.000000e+00 : f32
    %742 = vector.broadcast %cst_195 : f32 to vector<2x192xf32>
    %743 = arith.addf %742, %741 : vector<2x192xf32>
    %744 = arith.divf %742, %743 : vector<2x192xf32>
    %745 = vector.extract_strided_slice %738 {offsets = [0, 192], sizes = [2, 64], strides = [1, 1]} : vector<2x256xf32> to vector<2x64xf32>
    %746 = math.tanh %745 : vector<2x64xf32>
    %747 = vector.extract_strided_slice %744 {offsets = [0, 64], sizes = [2, 64], strides = [1, 1]} : vector<2x192xf32> to vector<2x64xf32>
    %748 = arith.mulf %747, %731 : vector<2x64xf32>
    %749 = vector.extract_strided_slice %744 {offsets = [0, 0], sizes = [2, 64], strides = [1, 1]} : vector<2x192xf32> to vector<2x64xf32>
    %750 = arith.mulf %749, %746 : vector<2x64xf32>
    %751 = arith.addf %748, %750 : vector<2x64xf32>
    %752 = vector.extract_strided_slice %744 {offsets = [0, 128], sizes = [2, 64], strides = [1, 1]} : vector<2x192xf32> to vector<2x64xf32>
    %753 = math.tanh %751 : vector<2x64xf32>
    %754 = arith.mulf %752, %753 : vector<2x64xf32>
    %c12_196 = arith.constant 12 : index
    %c0_197 = arith.constant 0 : index
    %755 = vector.load %arg31[%c12_196, %c0_197] : memref<16x64xf32, #tpu.memory_space<vmem>>, vector<2x64xf32>
    tpu.vector_store %arg31[%c12_196, %c0_197], %754 {strides = array<i32>} : memref<16x64xf32, #tpu.memory_space<vmem>>, vector<2x64xf32>,
    %756 = vector.extract_strided_slice %612 {offsets = [14, 0], sizes = [2, 256], strides = [1, 1]} : vector<16x256xf32> to vector<2x256xf32>
    %cst_198 = arith.constant dense<0.000000e+00> : vector<2x256xf32>
    %757 = tpu.matmul %754, %613, %cst_198 {dimension_numbers = #tpu.dot_dimension_numbers<[1], [0], [0], [1], [0, 0, 1, 1], [], []>} : vector<2x64xf32>, vector<64x256xf32>, vector<2x256xf32> -> vector<2x256xf32>
    %758 = arith.addf %756, %757 : vector<2x256xf32>
    %759 = vector.extract_strided_slice %758 {offsets = [0, 0], sizes = [2, 192], strides = [1, 1]} : vector<2x256xf32> to vector<2x192xf32>
    %760 = arith.negf %759 : vector<2x192xf32>
    %761 = math.exp %760 : vector<2x192xf32>
    %cst_199 = arith.constant 1.000000e+00 : f32
    %762 = vector.broadcast %cst_199 : f32 to vector<2x192xf32>
    %763 = arith.addf %762, %761 : vector<2x192xf32>
    %764 = arith.divf %762, %763 : vector<2x192xf32>
    %765 = vector.extract_strided_slice %758 {offsets = [0, 192], sizes = [2, 64], strides = [1, 1]} : vector<2x256xf32> to vector<2x64xf32>
    %766 = math.tanh %765 : vector<2x64xf32>
    %767 = vector.extract_strided_slice %764 {offsets = [0, 64], sizes = [2, 64], strides = [1, 1]} : vector<2x192xf32> to vector<2x64xf32>
    %768 = arith.mulf %767, %751 : vector<2x64xf32>
    %769 = vector.extract_strided_slice %764 {offsets = [0, 0], sizes = [2, 64], strides = [1, 1]} : vector<2x192xf32> to vector<2x64xf32>
    %770 = arith.mulf %769, %766 : vector<2x64xf32>
    %771 = arith.addf %768, %770 : vector<2x64xf32>
    %772 = vector.extract_strided_slice %764 {offsets = [0, 128], sizes = [2, 64], strides = [1, 1]} : vector<2x192xf32> to vector<2x64xf32>
    %773 = math.tanh %771 : vector<2x64xf32>
    %774 = arith.mulf %772, %773 : vector<2x64xf32>
    %c14_200 = arith.constant 14 : index
    %c0_201 = arith.constant 0 : index
    %775 = vector.load %arg31[%c14_200, %c0_201] : memref<16x64xf32, #tpu.memory_space<vmem>>, vector<2x64xf32>
    tpu.vector_store %arg31[%c14_200, %c0_201], %774 {strides = array<i32>} : memref<16x64xf32, #tpu.memory_space<vmem>>, vector<2x64xf32>,
    %c0_202 = arith.constant 0 : index
    %c0_203 = arith.constant 0 : index
    %776 = vector.load %arg31[%c0_202, %c0_203] : memref<16x64xf32, #tpu.memory_space<vmem>>, vector<16x64xf32>
    %cst_204 = arith.constant dense<0.000000e+00> : vector<16x64xf32>
    %777 = tpu.matmul %7, %776, %cst_204 {dimension_numbers = #tpu.dot_dimension_numbers<[1], [0], [0], [1], [0, 0, 1, 1], [], []>} : vector<16x16xf32>, vector<16x64xf32>, vector<16x64xf32> -> vector<16x64xf32>
    %778 = vector.extract_strided_slice %776 {offsets = [0, 0], sizes = [16, 32], strides = [1, 1]} : vector<16x64xf32> to vector<16x32xf32>
    %779 = vector.extract_strided_slice %777 {offsets = [0, 32], sizes = [16, 32], strides = [1, 1]} : vector<16x64xf32> to vector<16x32xf32>
    %780 = tpu.concatenate %778, %779 in 1 : vector<16x32xf32>, vector<16x32xf32> -> vector<16x64xf32>
    %c0_205 = arith.constant 0 : index
    %c0_206 = arith.constant 0 : index
    %781 = vector.load %arg22[%c0_205, %c0_206] : memref<64x64xf32, #tpu.memory_space<vmem>>, vector<64x64xf32>
    %cst_207 = arith.constant dense<0.000000e+00> : vector<16x64xf32>
    %782 = tpu.matmul %780, %781, %cst_207 {dimension_numbers = #tpu.dot_dimension_numbers<[1], [0], [0], [1], [0, 0, 1, 1], [], []>} : vector<16x64xf32>, vector<64x64xf32>, vector<16x64xf32> -> vector<16x64xf32>
    %c0_208 = arith.constant 0 : index
    %c0_209 = arith.constant 0 : index
    %783 = vector.load %arg23[%c0_208, %c0_209] : memref<1x64xf32, #tpu.memory_space<vmem>>, vector<1x64xf32>
    %784 = vector.broadcast %783 : vector<1x64xf32> to vector<16x64xf32>
    %785 = arith.addf %782, %784 : vector<16x64xf32>
    %786 = vector.extract_strided_slice %9 {offsets = [0, 0], sizes = [16, 1], strides = [1, 1]} : vector<16x2xf32> to vector<16x1xf32>
    %cst_210 = arith.constant 5.000000e-01 : f32
    %787 = vector.broadcast %cst_210 : f32 to vector<16x1xf32>
    %788 = arith.cmpf ogt, %786, %787 : vector<16x1xf32>
    %cst_211 = arith.constant -1.000000e+30 : f32
    %789 = vector.shape_cast %788 : vector<16x1xi1> to vector<16x1xi1>
    %790 = vector.broadcast %789 : vector<16x1xi1> to vector<16x64xi1>
    %791 = vector.broadcast %cst_211 : f32 to vector<16x64xf32>
    %792 = arith.select %790, %785, %791 : vector<16x64xi1>, vector<16x64xf32>
    %cst_212 = arith.constant dense<0xFF800000> : vector<64xf32>
    %793 = vector.multi_reduction <maximumf>, %792, %cst_212 [0] : vector<16x64xf32> to vector<64xf32>
    %794 = vector.shape_cast %793 : vector<64xf32> to vector<1x64xf32>
    %795 = vector.extract_strided_slice %9 {offsets = [0, 1], sizes = [16, 1], strides = [1, 1]} : vector<16x2xf32> to vector<16x1xf32>
    %cst_213 = arith.constant 5.000000e-01 : f32
    %796 = vector.broadcast %cst_213 : f32 to vector<16x1xf32>
    %797 = arith.cmpf ogt, %795, %796 : vector<16x1xf32>
    %cst_214 = arith.constant -1.000000e+30 : f32
    %798 = vector.shape_cast %797 : vector<16x1xi1> to vector<16x1xi1>
    %799 = vector.broadcast %798 : vector<16x1xi1> to vector<16x64xi1>
    %800 = vector.broadcast %cst_214 : f32 to vector<16x64xf32>
    %801 = arith.select %799, %785, %800 : vector<16x64xi1>, vector<16x64xf32>
    %cst_215 = arith.constant dense<0xFF800000> : vector<64xf32>
    %802 = vector.multi_reduction <maximumf>, %801, %cst_215 [0] : vector<16x64xf32> to vector<64xf32>
    %803 = vector.shape_cast %802 : vector<64xf32> to vector<1x64xf32>
    %804 = tpu.concatenate %794, %803 in 0 : vector<1x64xf32>, vector<1x64xf32> -> vector<2x64xf32>
    %cst_216 = arith.constant 0.000000e+00 : f32
    %805 = vector.broadcast %cst_216 : f32 to vector<16x1xf32>
    %806 = arith.cmpf oeq, %430, %805 : vector<16x1xf32>
    %807 = arith.select %806, %424, %425 : vector<16x1xi1>, vector<16x1xf32>
    %808 = arith.mulf %807, %6 : vector<16x1xf32>
    %809 = vector.broadcast %808 : vector<16x1xf32> to vector<16x8xf32>
    %810 = arith.mulf %809, %10 : vector<16x8xf32>
    %cst_217 = arith.constant dense<0.000000e+00> : vector<2x8xf32>
    %811 = tpu.matmul %8, %810, %cst_217 {dimension_numbers = #tpu.dot_dimension_numbers<[1], [0], [0], [1], [0, 0, 1, 1], [], []>} : vector<2x16xf32>, vector<16x8xf32>, vector<2x8xf32> -> vector<2x8xf32>
    %cst_218 = arith.constant -1.000050e-04 : f32
    %812 = vector.broadcast %cst_218 : f32 to vector<16x1xf32>
    %813 = arith.subf %424, %812 : vector<16x1xf32>
    %814 = arith.mulf %422, %813 : vector<16x1xf32>
    %cst_219 = arith.constant -9.21034049 : f32
    %815 = vector.broadcast %cst_219 : f32 to vector<16x1xf32>
    %816 = arith.subf %425, %815 : vector<16x1xf32>
    %817 = arith.mulf %423, %816 : vector<16x1xf32>
    %818 = arith.addf %814, %817 : vector<16x1xf32>
    %819 = arith.mulf %6, %818 : vector<16x1xf32>
    %cst_220 = arith.constant 2.000000e-06 : f32
    %820 = vector.broadcast %cst_220 : f32 to vector<16x1xf32>
    %821 = arith.addf %819, %820 : vector<16x1xf32>
    %cst_221 = arith.constant dense<0.000000e+00> : vector<2x1xf32>
    %822 = tpu.matmul %8, %821, %cst_221 {dimension_numbers = #tpu.dot_dimension_numbers<[1], [0], [0], [1], [0, 0, 1, 1], [], []>} : vector<2x16xf32>, vector<16x1xf32>, vector<2x1xf32> -> vector<2x1xf32>
    %cst_222 = arith.constant 0.00999999977 : f32
    %823 = vector.broadcast %cst_222 : f32 to vector<2x1xf32>
    %824 = arith.mulf %822, %823 : vector<2x1xf32>
    %825 = vector.extract_strided_slice %430 {offsets = [2, 0], sizes = [14, 1], strides = [1, 1]} : vector<16x1xf32> to vector<14x1xf32>
    %826 = vector.extract_strided_slice %430 {offsets = [0, 0], sizes = [14, 1], strides = [1, 1]} : vector<16x1xf32> to vector<14x1xf32>
    %827 = arith.subf %825, %826 : vector<14x1xf32>
    %828 = math.absf %827 : vector<14x1xf32>
    %cst_223 = arith.constant dense<0.000000e+00> : vector<1xf32>
    %829 = vector.multi_reduction <add>, %828, %cst_223 [0] : vector<14x1xf32> to vector<1xf32>
    %830 = vector.shape_cast %829 : vector<1xf32> to vector<1x1xf32>
    %cst_224 = arith.constant 5.000000e-01 : f32
    %831 = vector.broadcast %cst_224 : f32 to vector<1x1xf32>
    %832 = arith.mulf %830, %831 : vector<1x1xf32>
    %cst_225 = arith.constant 0.000000e+00 : f32
    %833 = vector.broadcast %cst_225 : f32 to vector<2x1xf32>
    %834 = vector.broadcast %832 : vector<1x1xf32> to vector<2x1xf32>
    %835 = arith.addf %833, %834 : vector<2x1xf32>
    %836 = tpu.concatenate %405, %804 in 0 : vector<2x64xf32>, vector<2x64xf32> -> vector<4x64xf32>
    %c0_226 = arith.constant 0 : index
    %c0_227 = arith.constant 0 : index
    %837 = vector.load %arg24[%c0_226, %c0_227] : memref<64x3xf32, #tpu.memory_space<vmem>>, vector<64x3xf32>
    %cst_228 = arith.constant dense<0.000000e+00> : vector<4x3xf32>
    %838 = tpu.matmul %836, %837, %cst_228 {dimension_numbers = #tpu.dot_dimension_numbers<[1], [0], [0], [1], [0, 0, 1, 1], [], []>} : vector<4x64xf32>, vector<64x3xf32>, vector<4x3xf32> -> vector<4x3xf32>
    %c0_229 = arith.constant 0 : index
    %c0_230 = arith.constant 0 : index
    %839 = vector.load %arg25[%c0_229, %c0_230] : memref<1x3xf32, #tpu.memory_space<vmem>>, vector<1x3xf32>
    %840 = vector.broadcast %839 : vector<1x3xf32> to vector<4x3xf32>
    %841 = arith.addf %838, %840 : vector<4x3xf32>
    %cst_231 = arith.constant dense<0xFF800000> : vector<4xf32>
    %842 = vector.multi_reduction <maximumf>, %841, %cst_231 [1] : vector<4x3xf32> to vector<4xf32>
    %843 = vector.shape_cast %842 : vector<4xf32> to vector<4x1xf32>
    %844 = vector.broadcast %843 : vector<4x1xf32> to vector<4x3xf32>
    %845 = arith.subf %841, %844 : vector<4x3xf32>
    %846 = math.exp %845 : vector<4x3xf32>
    %cst_232 = arith.constant dense<0.000000e+00> : vector<4xf32>
    %847 = vector.multi_reduction <add>, %846, %cst_232 [1] : vector<4x3xf32> to vector<4xf32>
    %848 = vector.shape_cast %847 : vector<4xf32> to vector<4x1xf32>
    %849 = math.log %848 : vector<4x1xf32>
    %850 = vector.broadcast %849 : vector<4x1xf32> to vector<4x3xf32>
    %851 = arith.subf %845, %850 : vector<4x3xf32>
    %c0_233 = arith.constant 0 : index
    %c0_234 = arith.constant 0 : index
    %852 = vector.load %arg1[%c0_233, %c0_234] : memref<2x1xi32, #tpu.memory_space<vmem>>, vector<2x1xi32>
    %853 = tpu.iota {dimensions = array<i32: 1>} : vector<2x3xi32>
    %854 = vector.broadcast %852 : vector<2x1xi32> to vector<2x3xi32>
    %855 = arith.cmpi eq, %854, %853 : vector<2x3xi32>
    %856 = arith.extui %855 : vector<2x3xi1> to vector<2x3xi32>
    %857 = arith.sitofp %856 : vector<2x3xi32> to vector<2x3xf32>
    %858 = tpu.concatenate %857, %857 in 0 : vector<2x3xf32>, vector<2x3xf32> -> vector<4x3xf32>
    %859 = arith.mulf %851, %858 : vector<4x3xf32>
    %cst_235 = arith.constant dense<0.000000e+00> : vector<4xf32>
    %860 = vector.multi_reduction <add>, %859, %cst_235 [1] : vector<4x3xf32> to vector<4xf32>
    %861 = vector.shape_cast %860 : vector<4xf32> to vector<4x1xf32>
    %cst_236 = arith.constant 0.000000e+00 : f32
    %862 = vector.broadcast %cst_236 : f32 to vector<4x1xf32>
    %863 = arith.subf %862, %861 : vector<4x1xf32>
    %864 = vector.extract_strided_slice %863 {offsets = [0, 0], sizes = [2, 1], strides = [1, 1]} : vector<4x1xf32> to vector<2x1xf32>
    %865 = vector.extract_strided_slice %863 {offsets = [2, 0], sizes = [2, 1], strides = [1, 1]} : vector<4x1xf32> to vector<2x1xf32>
    %c0_237 = arith.constant 0 : index
    %c0_238 = arith.constant 0 : index
    %866 = vector.load %arg26[%c0_237, %c0_238] : memref<4x64xf32, #tpu.memory_space<vmem>>, vector<4x64xf32>
    tpu.vector_store %arg26[%c0_237, %c0_238], %836 {strides = array<i32>} : memref<4x64xf32, #tpu.memory_space<vmem>>, vector<4x64xf32>,
    %867 = tpu.concatenate %811, %865, %864, %824, %835 in 1 : vector<2x8xf32>, vector<2x1xf32>, vector<2x1xf32>, vector<2x1xf32>, vector<2x1xf32> -> vector<2x12xf32>
    %c0_239 = arith.constant 0 : index
    %c0_240 = arith.constant 0 : index
    %868 = vector.load %arg27[%c0_239, %c0_240] : memref<2x12xf32, #tpu.memory_space<vmem>>, vector<2x12xf32>
    tpu.vector_store %arg27[%c0_239, %c0_240], %867 {strides = array<i32>} : memref<2x12xf32, #tpu.memory_space<vmem>>, vector<2x12xf32>,
    return
  }
}

</mosaic_0001>

<bundles_post_ra>
// kernel: model_forward.1
= control target key start
LH: loop header
LB: loop body
LE: loop exit
PB: predicated region body
PF: predicated region fallthrough
CT: control target
= control target key end

     0   :  { %s10716_s0 = inlined_call_operand.vmem [shape: s32[16,2], index: 0, kind: input, shape index: {}]   ;;  %s10717_s1 = inlined_call_operand.vmem [shape: s32[2,1], index: 1, kind: input, shape index: {}]   ;;  %s10718_s2 = inlined_call_operand.hbm [shape: f32[16,16], index: 2, kind: input, shape index: {}]   ;;  %s10719_s3 = inlined_call_operand.vmem [shape: f32[2,16], index: 3, kind: input, shape index: {}]   ;;  %s10720_s4 = inlined_call_operand.hbm [shape: f32[16,2], index: 4, kind: input, shape index: {}]   ;;  %s10721_s5 = inlined_call_operand.hbm [shape: f32[16,8], index: 5, kind: input, shape index: {}]   ;;  %s10722_s6 = inlined_call_operand.hbm [shape: f32[100,1024], index: 6, kind: input, shape index: {}]   ;;  %s10723_s7 = inlined_call_operand.hbm [shape: f32[128,512], index: 7, kind: input, shape index: {}]   ;;  %s10724_s8 = inlined_call_operand.hbm [shape: f32[128,512], index: 8, kind: input, shape index: {}]   ;;  %s10725_s9 = inlined_call_operand.hbm [shape: f32[128,512], index: 9, kind: input, shape index: {}]   ;;  %s10726_s10 = inlined_call_operand.vmem [shape: f32[1,512], index: 10, kind: input, shape index: {}]   ;;  %s10727_s11 = inlined_call_operand.hbm [shape: f32[128,512], index: 11, kind: input, shape index: {}]   ;;  %s10728_s12 = inlined_call_operand.vmem [shape: f32[1,256], index: 12, kind: input, shape index: {}]   ;;  %s10729_s13 = inlined_call_operand.hbm [shape: f32[64,256], index: 13, kind: input, shape index: {}]   ;;  %s10730_s14 = inlined_call_operand.hbm [shape: f32[64,256], index: 14, kind: input, shape index: {}]   ;;  %s10731_s15 = inlined_call_operand.hbm [shape: f32[64,256], index: 15, kind: input, shape index: {}]   ;;  %s10732_s16 = inlined_call_operand.vmem [shape: f32[1,256], index: 16, kind: input, shape index: {}]   ;;  %s10733_s17 = inlined_call_operand.hbm [shape: f32[64,256], index: 17, kind: input, shape index: {}]   ;;  %s10734_s18 = inlined_call_operand.hbm [shape: f32[128,64], index: 18, kind: input, shape index: {}]   ;;  %s10735_s19 = inlined_call_operand.hbm [shape: f32[128,64], index: 19, kind: input, shape index: {}]   ;;  %s10736_s20 = inlined_call_operand.hbm [shape: f32[64,2], index: 20, kind: input, shape index: {}]   ;;  %s10737_s21 = inlined_call_operand.vmem [shape: f32[1,2], index: 21, kind: input, shape index: {}]   ;;  %s10738_s22 = inlined_call_operand.hbm [shape: f32[64,64], index: 22, kind: input, shape index: {}]   ;;  %s10739_s23 = inlined_call_operand.vmem [shape: f32[1,64], index: 23, kind: input, shape index: {}]   ;;  %s10740_s24 = inlined_call_operand.vmem [shape: f32[64,3], index: 24, kind: input, shape index: {}]   ;;  %s10741_s25 = inlined_call_operand.vmem [shape: f32[1,3], index: 25, kind: input, shape index: {}]   ;;  %s10742_s26 = inlined_call_operand.vmem [shape: f32[4,64], index: 26, kind: output, shape index: {0}]   ;;  %s10743_s27 = inlined_call_operand.vmem [shape: f32[2,12], index: 27, kind: output, shape index: {1}]  }
   0x1   :  { %11005 = sst [smem:[#allocation88_spill]] %s10716_s0 }
   0x2   :  { %11006 = sst [smem:[#allocation89_spill]] %s10717_s1 }
   0x3   :  { %11007 = sst [smem:[#allocation90_spill]] %s10718_s2 }
   0x4   :  { %11008 = sst [smem:[#allocation91_spill]] %s10719_s3 }
   0x5   :  { %11009 = sst [smem:[#allocation92_spill]] %s10720_s4 }
   0x6   :  { %11010 = sst [smem:[#allocation93_spill]] %s10721_s5 }
   0x7   :  { %11011 = sst [smem:[#allocation94_spill]] %s10722_s6 }
   0x8   :  { %11012 = sst [smem:[#allocation95_spill]] %s10723_s7 }
   0x9   :  { %11013 = sst [smem:[#allocation96_spill]] %s10724_s8 }
   0xa   :  { %11014 = sst [smem:[#allocation97_spill]] %s10725_s9 }
   0xb   :  { %11015 = sst [smem:[#allocation98_spill]] %s10726_s10 }
   0xc   :  { %11016 = sst [smem:[#allocation99_spill]] %s10727_s11 }
   0xd   :  { %11017 = sst [smem:[#allocation100_spill]] %s10741_s25 }
   0xe   :  { %11018 = sst [smem:[#allocation101_spill]] %s10742_s26 }
   0xf   :  { %11019 = sst [smem:[#allocation102_spill]] %s10743_s27 }
  0x10   :  { %33 = vsyncpa [#allocation7], 0 }
  0x11   :  { %34 = vsyncpa [#allocation9], 0 }
  0x12   :  { %35 = vsyncpa [#allocation12], 0 }
  0x13   :  { %36 = vsyncpa [#allocation15], 0 }
  0x14   :  { %37 = vsyncpa [#allocation18], 0 }
  0x15   :  { %38 = vsyncpa [#allocation21], 0 }
  0x16   :  { %39 = vsyncpa [#allocation24], 0 }
  0x17   :  { %40 = vsyncpa [#allocation27], 0 }
  0x18   :  { %41 = vsyncpa [#allocation30], 0  ;;  %s11020_s8 = sld [smem:[#allocation92_spill]]  ;;  %s7793_s9 = smov [#allocation8]  }
  0x19   :  { %s67_s5 = sshll.u32 %s7793_s9, 4  ;;  %s11021_s10 = sld [smem:[#allocation94_spill]]  ;;  %s68_s5 = int_to_ptr.vmem [resolvable:$true] %s67_s5 }
  0x1a   :  { %s10746_s1 = smov 128   ;;  %s7795_s6 = smov 8  }
  0x1b   :  { %s7796_s11 = smov [#allocation11]   ;;  %s7797_s3 = smov 1024  }
  0x1c   :  { %s93_s2 = sshll.u32 %s7796_s11, 4  ;;  %s10748_s7 = smov 64   ;;  %s94_s2 = int_to_ptr.vmem [resolvable:$true] %s93_s2 }
  0x1d   :  { %s11022_s9 = sld [smem:[#allocation96_spill]]  ;;  %s7799_s28 = smov [#allocation14]  }
  0x1e   :  { %s65_s30 = sshll.u32 %s11020_s8, 4  ;;  %s119_s0 = sshll.u32 %s7799_s28, 4  ;;  %s66_s30 = int_to_ptr.hbm [resolvable:$true] %s65_s30  ;;  %s120_s0 = int_to_ptr.vmem [resolvable:$true] %s119_s0 }
  0x1f   :  { %s91_s29 = sshll.u32 %s11021_s10, 4  ;;  %s11023_s26 = sld [smem:[#allocation99_spill]]  ;;  %s92_s29 = int_to_ptr.hbm [resolvable:$true] %s91_s29 }
  0x20   :  { %73 = dma.hbm_to_vmem [thread:$0]  %s66_s30, 256, %s68_s5, [#allocation9], %s10746_s1, %s10746_s1, %s7795_s6  }
  0x21   :  { %99 = dma.hbm_to_vmem [thread:$0]  %s92_s29, 13312, %s94_s2, [#allocation12], %s7797_s3, %s7797_s3, %s10748_s7  }
  0x22   :  { %s7800_s5 = smov 512   ;;  %s7801_s1 = smov 32  }
  0x23   :  { %s117_s27 = sshll.u32 %s11022_s9, 4  ;;  %s7802_s29 = smov [#allocation17]   ;;  %s118_s27 = int_to_ptr.hbm [resolvable:$true] %s117_s27 }
  0x24   :  { %125 = dma.hbm_to_vmem [thread:$0]  %s118_s27, 8192, %s120_s0, [#allocation15], %s7800_s5, %s7800_s5, %s7801_s1  }
  0x25   :  { %s145_s30 = sshll.u32 %s11023_s26, 4  ;;  %s147_s11 = sshll.u32 %s7802_s29, 4  ;;  %s146_s30 = int_to_ptr.hbm [resolvable:$true] %s145_s30  ;;  %s148_s11 = int_to_ptr.vmem [resolvable:$true] %s147_s11 }
  0x26   :  { %153 = dma.hbm_to_vmem [thread:$0]  %s146_s30, 8192, %s148_s11, [#allocation18], %s7800_s5, %s7800_s5, %s7801_s1  }
  0x27   :  { %s173_s4 = sshll.u32 %s10730_s14, 4  ;;  %s7803_s25 = smov [#allocation20]   ;;  %s174_s4 = int_to_ptr.hbm [resolvable:$true] %s173_s4 }
  0x28   :  { %s175_s26 = sshll.u32 %s7803_s25, 4  ;;  %s201_s27 = sshll.u32 %s10733_s17, 4  ;;  %s176_s26 = int_to_ptr.vmem [resolvable:$true] %s175_s26  ;;  %s202_s27 = int_to_ptr.hbm [resolvable:$true] %s201_s27 }
  0x29   :  { %s7804_s28 = smov 256   ;;  %s7805_s0 = smov 16  }
  0x2a   :  { %181 = dma.hbm_to_vmem [thread:$0]  %s174_s4, 2048, %s176_s26, [#allocation21], %s7804_s28, %s7804_s28, %s7805_s0  }
  0x2b   :  { %s7806_s10 = smov [#allocation23]   ;;  %s227_s14 = sshll.u32 %s10735_s19, 4  ;;  %s228_s14 = int_to_ptr.hbm [resolvable:$true] %s227_s14 }
  0x2c   :  { %s203_s30 = sshll.u32 %s7806_s10, 4  ;;  %s11024_s3 = sld [smem:[#allocation90_spill]]  ;;  %s204_s30 = int_to_ptr.vmem [resolvable:$true] %s203_s30 }
  0x2d   :  { %209 = dma.hbm_to_vmem [thread:$0]  %s202_s27, 2048, %s204_s30, [#allocation24], %s7804_s28, %s7804_s28, %s7805_s0  }
  0x2e   :  { %s7807_s8 = smov [#allocation26]   ;;  %s11025_s4 = smov 128  }
  0x2f   :  { %s229_s9 = sshll.u32 %s7807_s8, 4  ;;  %s7808_s26 = smov [#allocation6]   ;;  %s230_s9 = int_to_ptr.vmem [resolvable:$true] %s229_s9 }
  0x30   :  { %235 = dma.hbm_to_vmem [thread:$0]  %s228_s14, 2048, %s230_s9, [#allocation27], %s11025_s4, %s11025_s4, %s7795_s6  }
  0x31   :  { %s52_s19 = sshll.u32 %s7808_s26, 4  ;;  %s11026_s11 = sld [smem:[#allocation93_spill]]  ;;  %s53_s19 = int_to_ptr.vmem [resolvable:$true] %s52_s19 }
  0x32   :  { %s50_s25 = sshll.u32 %s11024_s3, 4  ;;  %s11027_s17 = sld [smem:[#allocation95_spill]]  ;;  %s51_s25 = int_to_ptr.hbm [resolvable:$true] %s50_s25 }
  0x33   :  { %58 = dma.hbm_to_vmem [thread:$0]  %s51_s25, 256, %s53_s19, [#allocation7], %s11025_s4, %s11025_s4, %s7795_s6  }
  0x34   :  { %s7809_s3 = smov [#allocation10]   ;;  %s7810_s14 = smov [#allocation13]  }
  0x35   :  { %s80_s8 = sshll.u32 %s7809_s3, 4  ;;  %s106_s9 = sshll.u32 %s7810_s14, 4  ;;  %s81_s8 = int_to_ptr.vmem [resolvable:$true] %s80_s8  ;;  %s107_s9 = int_to_ptr.vmem [resolvable:$true] %s106_s9 }
  0x36   :  { %s11028_s29 = sld [smem:[#allocation97_spill]]  ;;  %s160_s27 = sshll.u32 %s10729_s13, 4  ;;  %s161_s27 = int_to_ptr.hbm [resolvable:$true] %s160_s27 }
  0x37   :  { %s78_s7 = sshll.u32 %s11026_s11, 4  ;;  %s7811_s30 = smov [#allocation16]   ;;  %s79_s7 = int_to_ptr.hbm [resolvable:$true] %s78_s7 }
  0x38   :  { %s104_s2 = sshll.u32 %s11027_s17, 4  ;;  %s132_s17 = sshll.u32 %s7811_s30, 4  ;;  %s105_s2 = int_to_ptr.hbm [resolvable:$true] %s104_s2  ;;  %s133_s17 = int_to_ptr.vmem [resolvable:$true] %s132_s17 }
  0x39   :  { %86 = dma.hbm_to_vmem [thread:$0]  %s79_s7, 256, %s81_s8, [#allocation9], %s11025_s4, %s11025_s4, %s7795_s6  }
  0x3a   :  { %112 = dma.hbm_to_vmem [thread:$0]  %s105_s2, 8192, %s107_s9, [#allocation12], %s7800_s5, %s7800_s5, %s7801_s1  }
  0x3b   :  { %s7812_s7 = smov [#allocation19]   ;;  %s186_s26 = sshll.u32 %s10731_s15, 4  ;;  %s187_s26 = int_to_ptr.hbm [resolvable:$true] %s186_s26 }
  0x3c   :  { %s130_s11 = sshll.u32 %s11028_s29, 4  ;;  %s162_s3 = sshll.u32 %s7812_s7, 4  ;;  %s131_s11 = int_to_ptr.hbm [resolvable:$true] %s130_s11  ;;  %s163_s3 = int_to_ptr.vmem [resolvable:$true] %s162_s3 }
  0x3d   :  { %138 = dma.hbm_to_vmem [thread:$0]  %s131_s11, 8192, %s133_s17, [#allocation15], %s7800_s5, %s7800_s5, %s7801_s1  }
  0x3e   :  { %168 = dma.hbm_to_vmem [thread:$0]  %s161_s27, 2048, %s163_s3, [#allocation18], %s7804_s28, %s7804_s28, %s7805_s0  }
  0x3f   :  { %s214_s9 = sshll.u32 %s10734_s18, 4  ;;  %s7813_s10 = smov [#allocation22]   ;;  %s215_s9 = int_to_ptr.hbm [resolvable:$true] %s214_s9 }
  0x40   :  { %s188_s29 = sshll.u32 %s7813_s10, 4  ;;  %s7814_s1 = smov [#allocation25]   ;;  %s189_s29 = int_to_ptr.vmem [resolvable:$true] %s188_s29 }
  0x41   :  { %194 = dma.hbm_to_vmem [thread:$0]  %s187_s26, 2048, %s189_s29, [#allocation21], %s7804_s28, %s7804_s28, %s7805_s0  }
  0x42   :  { %s216_s15 = sshll.u32 %s7814_s1, 4  ;;  %s240_s25 = sshll.u32 %s10736_s20, 4  ;;  %s217_s15 = int_to_ptr.vmem [resolvable:$true] %s216_s15  ;;  %s241_s25 = int_to_ptr.hbm [resolvable:$true] %s240_s25 }
  0x43   :  { %222 = dma.hbm_to_vmem [thread:$0]  %s215_s9, 2048, %s217_s15, [#allocation24], %s11025_s4, %s11025_s4, %s7795_s6  }
  0x44   :  { %s255_s27 = sshll.u32 %s10738_s22, 4  ;;  %s7815_s30 = smov [#allocation28]   ;;  %s256_s27 = int_to_ptr.hbm [resolvable:$true] %s255_s27 }
  0x45   :  { %s242_s17 = sshll.u32 %s7815_s30, 4  ;;  %s7816_s28 = smov [#allocation29]   ;;  %s243_s17 = int_to_ptr.vmem [resolvable:$true] %s242_s17 }
  0x46   :  { %248 = dma.hbm_to_vmem [thread:$0]  %s241_s25, 1024, %s243_s17, [#allocation27], %s11025_s4, %s11025_s4, %s7795_s6  }
  0x47   :  { %s257_s20 = sshll.u32 %s7816_s28, 4  ;;  %s258_s20 = int_to_ptr.vmem [resolvable:$true] %s257_s20 }
  0x48   :  { %263 = dma.hbm_to_vmem [thread:$0]  %s256_s27, 1024, %s258_s20, [#allocation30], %s11025_s4, %s11025_s4, %s7795_s6  }
  0x49   :  { %7775 = dma.done.wait [#allocation7], 256  }
  0x4a   :  { %7776 = vsyncadd [#allocation7], 4294967040 }
  0x4b   :  { %7777 = dma.done.wait [#allocation9], 512  }
  0x4c   :  { %7778 = vsyncadd [#allocation9], 4294966784 }
  0x4d   :  { %7779 = dma.done.wait [#allocation12], 21504  }
  0x4e   :  { %7780 = vsyncadd [#allocation12], 4294945792 }
  0x4f   :  { %7781 = dma.done.wait [#allocation15], 16384  }
  0x50   :  { %7782 = vsyncadd [#allocation15], 4294950912 }
  0x51   :  { %7783 = dma.done.wait [#allocation18], 10240  }
  0x52   :  { %7784 = vsyncadd [#allocation18], 4294957056 }
  0x53   :  { %7785 = dma.done.wait [#allocation21], 4096  }
  0x54   :  { %7786 = vsyncadd [#allocation21], 4294963200 }
  0x55   :  { %7787 = dma.done.wait [#allocation24], 4096  }
  0x56   :  { %7788 = vsyncadd [#allocation24], 4294963200 }
  0x57   :  { %7789 = dma.done.wait [#allocation27], 3072  }
  0x58   :  { %7790 = vsyncadd [#allocation27], 4294964224 }
  0x59   :  { %7791 = dma.done.wait [#allocation30], 1024  }
  0x5a   :  { %7792 = vsyncadd [#allocation30], 4294966272  ;;  %v10752_v0 = vmov 0   ;;  %v10750_v1 = vmov 1   ;;  %vm490_vm0 = vcmask 1043456   ;;  %s11029_s0 = sld [smem:[#allocation88_spill]] }
  0x5b   :  { %6766 = vset.pattern.permute.xlu1 %v10752_v0  ;;  %6764 = vset.pattern.permute.xlu0 %v10752_v0  ;;  %v475_v4 = vld [vmem:[#allocation11 + $0x300] sm:$0xf]  ;;  %v476_v5 = vld [vmem:[#allocation11 + $0x308] sm:$0xf]  ;;  %v477_v6 = vld [vmem:[#allocation11 + $0x310] sm:$0xf] }
  0x5c   :  { %6773 = vset.pattern.permute.xlu2 %v10750_v1  ;;  %6556 = vmatpush.msk.msra.mxu0 %vm490_vm0, %v475_v4  ;;  %v478_v7 = vld [vmem:[#allocation11 + $0x318] sm:$0xf]  ;;  %v467_v8 = vld [vmem:[#allocation11 + $0x2c0] sm:$0xff]  ;;  %v468_v9 = vld [vmem:[#allocation11 + $0x2c8] sm:$0xff]  ;;  %vm483_vm3 = vcmask 818176   ;;  %s11249_s14 = sld [smem:[#allocation98_spill]] }
  0x5d   :  { %6559 = vmatpush.msk.msra.mxu1 %vm490_vm0, %v476_v5  ;;  %6562 = vmatpush.msk.msra.mxu2 %vm490_vm0, %v477_v6  ;;  %v469_v10 = vld [vmem:[#allocation11 + $0x2d0] sm:$0xff]  ;;  %v470_v11 = vld [vmem:[#allocation11 + $0x2d8] sm:$0xff]  ;;  %v459_v12 = vld [vmem:[#allocation11 + $0x280] sm:$0xff]  ;;  %s7820_s26 = smov 96   ;;  %s7821_s13 = smov 127  }
  0x5e   :  { %6565 = vmatpush.msk.msra.mxu3 %vm490_vm0, %v478_v7  ;;  %519 = vmatpush.msra.mxu0 %v467_v8  ;;  %v460_v13 = vld [vmem:[#allocation11 + $0x288] sm:$0xff]  ;;  %v461_v14 = vld [vmem:[#allocation11 + $0x290] sm:$0xff]  ;;  %v462_v15 = vld [vmem:[#allocation11 + $0x298] sm:$0xff]  ;;  %s11399_s2 = smov 64   ;;  %s11400_s15 = sld [smem:[#allocation91_spill]] }
  0x5f   :  { %542 = vmatpush.msra.mxu1 %v468_v9  ;;  %565 = vmatpush.msra.mxu2 %v469_v10  ;;  %v451_v16 = vld [vmem:[#allocation11 + $0x240] sm:$0xff]  ;;  %v452_v17 = vld [vmem:[#allocation11 + $0x248] sm:$0xff]  ;;  %v453_v20 = vld [vmem:[#allocation11 + $0x250] sm:$0xff]  ;;  %s7822_s18 = smov 1   ;;  %s11413_s25 = sld [smem:[#allocation100_spill]] }
  0x60   :  { %v335_v2 = vld [vmem:[%s11029_s0 + $0x8] sm:$0xff]  ;;  %v334_v3 = vld [vmem:[%s11029_s0] sm:$0xff]  ;;  %588 = vmatpush.msra.mxu3 %v470_v11  ;;  %520 = vmatpush.msra.mxu0 %v459_v12  ;;  %v443_v22 = vld [vmem:[#allocation11 + $0x200] sm:$0xff]  ;;  %s11414_s27 = sld [smem:[#allocation89_spill]] }
  0x61   :  { %355 = vperm.xlu1 %6766, %v335_v2   ;;  %352 = vperm.xlu0 %6764, %v334_v3   ;;  %v364_v18 = vadd.s32 50, %v335_v2  ;;  %v363_v19 = vadd.s32 50, %v334_v3  ;;  %v454_v21 = vld [vmem:[#allocation11 + $0x258] sm:$0xff]  ;;  %v444_v23 = vld [vmem:[#allocation11 + $0x208] sm:$0xff]  ;;  %v445_v24 = vld [vmem:[#allocation11 + $0x210] sm:$0xff]  ;;  %s11416_s17 = sld [smem:[#allocation102_spill]] }
  0x62   :  { %543 = vmatpush.msra.mxu1 %v460_v13  ;;  %566 = vmatpush.msra.mxu2 %v461_v14  ;;  %v446_v25 = vld [vmem:[#allocation11 + $0x218] sm:$0xff]  ;;  %v435_v26 = vld [vmem:[#allocation11 + $0x1c0] sm:$0xff]  ;;  %v436_v27 = vld [vmem:[#allocation11 + $0x1c8] sm:$0xff] }
  0x63   :  { %589 = vmatpush.msra.mxu3 %v462_v15  ;;  %521 = vmatpush.msra.mxu0 %v451_v16  ;;  %v437_v28 = vld [vmem:[#allocation11 + $0x1d0] sm:$0xff]  ;;  %v438_v29 = vld [vmem:[#allocation11 + $0x1d8] sm:$0xff]  ;;  %v427_v30 = vld [vmem:[#allocation11 + $0x180] sm:$0xff] }
  0x64   :  { %544 = vmatpush.msra.mxu1 %v452_v17  ;;  %567 = vmatpush.msra.mxu2 %v453_v20  ;;  %v428_v31 = vld [vmem:[#allocation11 + $0x188] sm:$0xff]  ;;  %v429_v32 = vld [vmem:[#allocation11 + $0x190] sm:$0xff]  ;;  %v430_v33 = vld [vmem:[#allocation11 + $0x198] sm:$0xff] }
  0x65   :  { %590 = vmatpush.msra.mxu3 %v454_v21  ;;  %522 = vmatpush.msra.mxu0 %v443_v22  ;;  %v419_v34 = vld [vmem:[#allocation11 + $0x140] sm:$0xff]  ;;  %v420_v35 = vld [vmem:[#allocation11 + $0x148] sm:$0xff]  ;;  %v421_v36 = vld [vmem:[#allocation11 + $0x150] sm:$0xff] }
  0x66   :  { %545 = vmatpush.msra.mxu1 %v444_v23  ;;  %568 = vmatpush.msra.mxu2 %v445_v24  ;;  %v422_v37 = vld [vmem:[#allocation11 + $0x158] sm:$0xff]  ;;  %v411_v38 = vld [vmem:[#allocation11 + $0x100] sm:$0xff]  ;;  %v412_v39 = vld [vmem:[#allocation11 + $0x108] sm:$0xff] }
  0x67   :  { %591 = vmatpush.msra.mxu3 %v446_v25  ;;  %523 = vmatpush.msra.mxu0 %v435_v26  ;;  %v413_v40 = vld [vmem:[#allocation11 + $0x110] sm:$0xff]  ;;  %v414_v41 = vld [vmem:[#allocation11 + $0x118] sm:$0xff]  ;;  %v403_v42 = vld [vmem:[#allocation11 + $0xc0] sm:$0xff] }
  0x68   :  { %546 = vmatpush.msra.mxu1 %v436_v27  ;;  %569 = vmatpush.msra.mxu2 %v437_v28  ;;  %v404_v43 = vld [vmem:[#allocation11 + $0xc8] sm:$0xff]  ;;  %v405_v44 = vld [vmem:[#allocation11 + $0xd0] sm:$0xff]  ;;  %v406_v45 = vld [vmem:[#allocation11 + $0xd8] sm:$0xff] }
  0x69   :  { %6767 = vset.pattern.permute.xlu1 %v10750_v1  ;;  %6765 = vset.pattern.permute.xlu0 %v10750_v1  ;;  %v395_v46 = vld [vmem:[#allocation11 + $0x80] sm:$0xff]  ;;  %v396_v47 = vld [vmem:[#allocation11 + $0x88] sm:$0xff]  ;;  %v397_v48 = vld [vmem:[#allocation11 + $0x90] sm:$0xff] }
  0x6a   :  { %369 = vperm.xlu1 %6767, %v364_v18   ;;  %366 = vperm.xlu0 %6765, %v363_v19   ;;  %v398_v49 = vld [vmem:[#allocation11 + $0x98] sm:$0xff]  ;;  %v387_v50 = vld [vmem:[#allocation11 + $0x40] sm:$0xff]  ;;  %v388_v51 = vld [vmem:[#allocation11 + $0x48] sm:$0xff] }
  0x6b   :  { %592 = vmatpush.msra.mxu3 %v438_v29  ;;  %524 = vmatpush.msra.mxu0 %v427_v30  ;;  %v389_v52 = vld [vmem:[#allocation11 + $0x50] sm:$0xff]  ;;  %v390_v53 = vld [vmem:[#allocation11 + $0x58] sm:$0xff]  ;;  %v379_v54 = vld [vmem:[#allocation11] sm:$0xff] }
  0x6c   :  { %547 = vmatpush.msra.mxu1 %v428_v31  ;;  %570 = vmatpush.msra.mxu2 %v429_v32  ;;  %v380_v55 = vld [vmem:[#allocation11 + $0x8] sm:$0xff]  ;;  %v381_v56 = vld [vmem:[#allocation11 + $0x10] sm:$0xff]  ;;  %v382_v57 = vld [vmem:[#allocation11 + $0x18] sm:$0xff] }
  0x6d   :  { %593 = vmatpush.msra.mxu3 %v430_v33  ;;  %525 = vmatpush.msra.mxu0 %v419_v34  ;;  %v479_v58 = vld [vmem:[#allocation11 + $0x320] sm:$0xf]  ;;  %v480_v59 = vld [vmem:[#allocation11 + $0x328] sm:$0xf]  ;;  %v481_v60 = vld [vmem:[#allocation11 + $0x330] sm:$0xf] }
  0x6e   :  { %548 = vmatpush.msra.mxu1 %v420_v35  ;;  %571 = vmatpush.msra.mxu2 %v421_v36  ;;  %v482_v61 = vld [vmem:[#allocation11 + $0x338] sm:$0xf]  ;;  %v471_v62 = vld [vmem:[#allocation11 + $0x2e0] sm:$0xff]  ;;  %v472_v63 = vld [vmem:[#allocation11 + $0x2e8] sm:$0xff] }
  0x6f   :  { %594 = vmatpush.msra.mxu3 %v422_v37  ;;  %526 = vmatpush.msra.mxu0 %v411_v38  ;;  %v473_v2 = vld [vmem:[#allocation11 + $0x2f0] sm:$0xff]  ;;  %v474_v3 = vld [vmem:[#allocation11 + $0x2f8] sm:$0xff]  ;;  %v463_v4 = vld [vmem:[#allocation11 + $0x2a0] sm:$0xff] }
  0x70   :  { %549 = vmatpush.msra.mxu1 %v412_v39  ;;  %572 = vmatpush.msra.mxu2 %v413_v40  ;;  %v464_v5 = vld [vmem:[#allocation11 + $0x2a8] sm:$0xff]  ;;  %v465_v6 = vld [vmem:[#allocation11 + $0x2b0] sm:$0xff]  ;;  %v466_v7 = vld [vmem:[#allocation11 + $0x2b8] sm:$0xff] }
  0x71   :  { %595 = vmatpush.msra.mxu3 %v414_v41  ;;  %527 = vmatpush.msra.mxu0 %v403_v42  ;;  %v455_v8 = vld [vmem:[#allocation11 + $0x260] sm:$0xff]  ;;  %v456_v9 = vld [vmem:[#allocation11 + $0x268] sm:$0xff]  ;;  %v457_v10 = vld [vmem:[#allocation11 + $0x270] sm:$0xff] }
  0x72   :  { %550 = vmatpush.msra.mxu1 %v404_v43  ;;  %573 = vmatpush.msra.mxu2 %v405_v44  ;;  %v458_v11 = vld [vmem:[#allocation11 + $0x278] sm:$0xff]  ;;  %v447_v12 = vld [vmem:[#allocation11 + $0x220] sm:$0xff]  ;;  %v448_v13 = vld [vmem:[#allocation11 + $0x228] sm:$0xff] }
  0x73   :  { %596 = vmatpush.msra.mxu3 %v406_v45  ;;  %528 = vmatpush.msra.mxu0 %v395_v46  ;;  %v449_v14 = vld [vmem:[#allocation11 + $0x230] sm:$0xff]  ;;  %v450_v15 = vld [vmem:[#allocation11 + $0x238] sm:$0xff]  ;;  %v439_v16 = vld [vmem:[#allocation11 + $0x1e0] sm:$0xff] }
  0x74   :  { %551 = vmatpush.msra.mxu1 %v396_v47  ;;  %574 = vmatpush.msra.mxu2 %v397_v48  ;;  %v440_v17 = vld [vmem:[#allocation11 + $0x1e8] sm:$0xff]  ;;  %v441_v18 = vld [vmem:[#allocation11 + $0x1f0] sm:$0xff]  ;;  %v442_v19 = vld [vmem:[#allocation11 + $0x1f8] sm:$0xff]  ;;  %v349_v48 = vlaneseq }
  0x75   :  { %597 = vmatpush.msra.mxu3 %v398_v49  ;;  %529 = vmatpush.msra.mxu0 %v387_v50  ;;  %v431_v20 = vld [vmem:[#allocation11 + $0x1a0] sm:$0xff]  ;;  %v432_v21 = vld [vmem:[#allocation11 + $0x1a8] sm:$0xff]  ;;  %v433_v22 = vld [vmem:[#allocation11 + $0x1b0] sm:$0xff] }
  0x76   :  { %552 = vmatpush.msra.mxu1 %v388_v51  ;;  %575 = vmatpush.msra.mxu2 %v389_v52  ;;  %v434_v23 = vld [vmem:[#allocation11 + $0x1b8] sm:$0xff]  ;;  %v423_v24 = vld [vmem:[#allocation11 + $0x160] sm:$0xff]  ;;  %v424_v25 = vld [vmem:[#allocation11 + $0x168] sm:$0xff]  ;;  %v8078_v51 = vand.u32 127, %v349_v48 }
  0x77   :  { %598 = vmatpush.msra.mxu3 %v390_v53  ;;  %530 = vmatpush.msra.mxu0 %v379_v54  ;;  %v425_v26 = vld [vmem:[#allocation11 + $0x170] sm:$0xff]  ;;  %v426_v27 = vld [vmem:[#allocation11 + $0x178] sm:$0xff]  ;;  %v415_v28 = vld [vmem:[#allocation11 + $0x120] sm:$0xff]  ;;  %v10754_v53 = vmov 0.0  }
  0x78   :  { %553 = vmatpush.msra.mxu1 %v380_v55  ;;  %576 = vmatpush.msra.mxu2 %v381_v56  ;;  %v416_v29 = vld [vmem:[#allocation11 + $0x128] sm:$0xff]  ;;  %v417_v30 = vld [vmem:[#allocation11 + $0x130] sm:$0xff]  ;;  %v418_v31 = vld [vmem:[#allocation11 + $0x138] sm:$0xff]  ;;  %11030 = vst [vmem:[#allocation40_spill] sm:$0xff] %v8078_v51 }
  0x79   :  { %599 = vmatpush.msra.mxu3 %v382_v57  ;;  %6568 = vmatpush.msk.msrb.mxu0 %vm490_vm0, %v479_v58  ;;  %v407_v32 = vld [vmem:[#allocation11 + $0xe0] sm:$0xff]  ;;  %v408_v33 = vld [vmem:[#allocation11 + $0xe8] sm:$0xff]  ;;  %v409_v34 = vld [vmem:[#allocation11 + $0xf0] sm:$0xff] }
  0x7a   :  { %6571 = vmatpush.msk.msrb.mxu1 %vm490_vm0, %v480_v59  ;;  %6574 = vmatpush.msk.msrb.mxu2 %vm490_vm0, %v481_v60  ;;  %v410_v35 = vld [vmem:[#allocation11 + $0xf8] sm:$0xff]  ;;  %v399_v36 = vld [vmem:[#allocation11 + $0xa0] sm:$0xff]  ;;  %v400_v37 = vld [vmem:[#allocation11 + $0xa8] sm:$0xff] }
  0x7b   :  { %6577 = vmatpush.msk.msrb.mxu3 %vm490_vm0, %v482_v61  ;;  %611 = vmatpush.msrb.mxu0 %v471_v62  ;;  %v401_v38 = vld [vmem:[#allocation11 + $0xb0] sm:$0xff]  ;;  %v402_v39 = vld [vmem:[#allocation11 + $0xb8] sm:$0xff]  ;;  %v391_v40 = vld [vmem:[#allocation11 + $0x60] sm:$0xff] }
  0x7c   :  { %634 = vmatpush.msrb.mxu1 %v472_v63  ;;  %657 = vmatpush.msrb.mxu2 %v473_v2  ;;  %v392_v41 = vld [vmem:[#allocation11 + $0x68] sm:$0xff]  ;;  %v393_v42 = vld [vmem:[#allocation11 + $0x70] sm:$0xff]  ;;  %v394_v43 = vld [vmem:[#allocation11 + $0x78] sm:$0xff] }
  0x7d   :  { %680 = vmatpush.msrb.mxu3 %v474_v3  ;;  %612 = vmatpush.msrb.mxu0 %v463_v4  ;;  %v383_v44 = vld [vmem:[#allocation11 + $0x20] sm:$0xff]  ;;  %v384_v45 = vld [vmem:[#allocation11 + $0x28] sm:$0xff]  ;;  %v385_v46 = vld [vmem:[#allocation11 + $0x30] sm:$0xff] }
  0x7e   :  { %635 = vmatpush.msrb.mxu1 %v464_v5  ;;  %658 = vmatpush.msrb.mxu2 %v465_v6  ;;  %v386_v47 = vld [vmem:[#allocation11 + $0x38] sm:$0xff]  ;;  %v8086_v58 = vld [vmem:[#allocation13 + $0x1e0] sm:$0xff]  ;;  %v8088_v59 = vld [vmem:[#allocation13 + $0x1e8] sm:$0xff] }
  0x7f   :  { %681 = vmatpush.msrb.mxu3 %v466_v7  ;;  %613 = vmatpush.msrb.mxu0 %v455_v8  ;;  %v8094_v60 = vld [vmem:[#allocation13 + $0x1f0] sm:$0xff]  ;;  %v8096_v61 = vld [vmem:[#allocation13 + $0x1f8] sm:$0xff]  ;;  %v8102_v62 = vld [vmem:[#allocation13 + $0x1c0] sm:$0xff] }
  0x80   :  { %636 = vmatpush.msrb.mxu1 %v456_v9  ;;  %659 = vmatpush.msrb.mxu2 %v457_v10  ;;  %v8104_v63 = vld [vmem:[#allocation13 + $0x1c8] sm:$0xff]  ;;  %v8110_v2 = vld [vmem:[#allocation13 + $0x1d0] sm:$0xff]  ;;  %v8112_v3 = vld [vmem:[#allocation13 + $0x1d8] sm:$0xff] }
  0x81   :  { %682 = vmatpush.msrb.mxu3 %v458_v11  ;;  %614 = vmatpush.msrb.mxu0 %v447_v12  ;;  %v8116_v4 = vld [vmem:[#allocation13 + $0x1a0] sm:$0xff]  ;;  %v8118_v5 = vld [vmem:[#allocation13 + $0x1a8] sm:$0xff]  ;;  %v8122_v6 = vld [vmem:[#allocation13 + $0x1b0] sm:$0xff] }
  0x82   :  { %637 = vmatpush.msrb.mxu1 %v448_v13  ;;  %660 = vmatpush.msrb.mxu2 %v449_v14  ;;  %v8124_v7 = vld [vmem:[#allocation13 + $0x1b8] sm:$0xff]  ;;  %v8130_v10 = vld [vmem:[#allocation13 + $0x180] sm:$0xff]  ;;  %v8132_v11 = vld [vmem:[#allocation13 + $0x188] sm:$0xff] }
  0x83   :  { %683 = vmatpush.msrb.mxu3 %v450_v15  ;;  %615 = vmatpush.msrb.mxu0 %v439_v16  ;;  %v8136_v12 = vld [vmem:[#allocation13 + $0x190] sm:$0xff]  ;;  %v8138_v13 = vld [vmem:[#allocation13 + $0x198] sm:$0xff]  ;;  %v8148_v15 = vld [vmem:[#allocation13 + $0x160] sm:$0xff] }
  0x84   :  { %638 = vmatpush.msrb.mxu1 %v440_v17  ;;  %661 = vmatpush.msrb.mxu2 %v441_v18  ;;  %v8150_v16 = vld [vmem:[#allocation13 + $0x168] sm:$0xff]  ;;  %v8156_v17 = vld [vmem:[#allocation13 + $0x170] sm:$0xff]  ;;  %v8158_v18 = vld [vmem:[#allocation13 + $0x178] sm:$0xff] }
  0x85   :  { %684 = vmatpush.msrb.mxu3 %v442_v19  ;;  %6776 = vset.pattern.permute.xlu0 %v10752_v0  ;;  %v8164_v19 = vld [vmem:[#allocation13 + $0x140] sm:$0xff]  ;;  %v8262_v48 = vld [vmem:[#allocation13 + $0x68] sm:$0xff] }
  0x86   :  { %616 = vmatpush.msrb.mxu0 %v431_v20  ;;  %639 = vmatpush.msrb.mxu1 %v432_v21  ;;  %v8166_v20 = vld [vmem:[#allocation13 + $0x148] sm:$0xff]  ;;  %v8170_v21 = vld [vmem:[#allocation13 + $0x150] sm:$0xff]  ;;  %11042 = vst [vmem:[#allocation52_spill] sm:$0xff] %v8262_v48  ;;  %v8300_v1 = vld [vmem:[#allocation13] sm:$0xff] }
  0x87   :  { %662 = vmatpush.msrb.mxu2 %v433_v22  ;;  %685 = vmatpush.msrb.mxu3 %v434_v23  ;;  %v8172_v22 = vld [vmem:[#allocation13 + $0x158] sm:$0xff]  ;;  %v8176_v23 = vld [vmem:[#allocation13 + $0x120] sm:$0xff]  ;;  %11053 = vst [vmem:[#allocation63_spill] sm:$0xff] %v8300_v1  ;;  %v8302_v0 = vld [vmem:[#allocation13 + $0x8] sm:$0xff] }
  0x88   :  { %617 = vmatpush.msrb.mxu0 %v423_v24  ;;  %640 = vmatpush.msrb.mxu1 %v424_v25  ;;  %v8178_v24 = vld [vmem:[#allocation13 + $0x128] sm:$0xff]  ;;  %v8182_v25 = vld [vmem:[#allocation13 + $0x130] sm:$0xff]  ;;  %11054 = vst [vmem:[#allocation64_spill] sm:$0xff] %v8302_v0 }
  0x89   :  { %663 = vmatpush.msrb.mxu2 %v425_v26  ;;  %686 = vmatpush.msrb.mxu3 %v426_v27  ;;  %v8184_v26 = vld [vmem:[#allocation13 + $0x138] sm:$0xff]  ;;  %v8188_v27 = vld [vmem:[#allocation13 + $0x100] sm:$0xff] }
  0x8a   :  { %618 = vmatpush.msrb.mxu0 %v415_v28  ;;  %641 = vmatpush.msrb.mxu1 %v416_v29  ;;  %v8190_v28 = vld [vmem:[#allocation13 + $0x108] sm:$0xff]  ;;  %v8194_v29 = vld [vmem:[#allocation13 + $0x110] sm:$0xff] }
  0x8b   :  { %664 = vmatpush.msrb.mxu2 %v417_v30  ;;  %687 = vmatpush.msrb.mxu3 %v418_v31  ;;  %v8196_v30 = vld [vmem:[#allocation13 + $0x118] sm:$0xff]  ;;  %v8204_v31 = vld [vmem:[#allocation13 + $0xe0] sm:$0xff] }
  0x8c   :  { %619 = vmatpush.msrb.mxu0 %v407_v32  ;;  %642 = vmatpush.msrb.mxu1 %v408_v33  ;;  %v8206_v32 = vld [vmem:[#allocation13 + $0xe8] sm:$0xff]  ;;  %v8212_v33 = vld [vmem:[#allocation13 + $0xf0] sm:$0xff] }
  0x8d   :  { %665 = vmatpush.msrb.mxu2 %v409_v34  ;;  %688 = vmatpush.msrb.mxu3 %v410_v35  ;;  %v8214_v34 = vld [vmem:[#allocation13 + $0xf8] sm:$0xff]  ;;  %v8220_v35 = vld [vmem:[#allocation13 + $0xc0] sm:$0xff] }
  0x8e   :  { %620 = vmatpush.msrb.mxu0 %v399_v36  ;;  %643 = vmatpush.msrb.mxu1 %v400_v37  ;;  %v8222_v36 = vld [vmem:[#allocation13 + $0xc8] sm:$0xff]  ;;  %v8226_v37 = vld [vmem:[#allocation13 + $0xd0] sm:$0xff] }
  0x8f   :  { %666 = vmatpush.msrb.mxu2 %v401_v38  ;;  %689 = vmatpush.msrb.mxu3 %v402_v39  ;;  %11031 = vst [vmem:[#allocation41_spill] sm:$0xff] %v8226_v37  ;;  %v8228_v38 = vld [vmem:[#allocation13 + $0xd8] sm:$0xff]  ;;  %v8232_v39 = vld [vmem:[#allocation13 + $0xa0] sm:$0xff] }
  0x90   :  { %621 = vmatpush.msrb.mxu0 %v391_v40  ;;  %644 = vmatpush.msrb.mxu1 %v392_v41  ;;  %11032 = vst [vmem:[#allocation42_spill] sm:$0xff] %v8228_v38  ;;  %v8234_v40 = vld [vmem:[#allocation13 + $0xa8] sm:$0xff]  ;;  %v8238_v41 = vld [vmem:[#allocation13 + $0xb0] sm:$0xff] }
  0x91   :  { %667 = vmatpush.msrb.mxu2 %v393_v42  ;;  %690 = vmatpush.msrb.mxu3 %v394_v43  ;;  %11033 = vst [vmem:[#allocation43_spill] sm:$0xff] %v8232_v39  ;;  %v8240_v42 = vld [vmem:[#allocation13 + $0xb8] sm:$0xff]  ;;  %v8244_v43 = vld [vmem:[#allocation13 + $0x80] sm:$0xff] }
  0x92   :  { %622 = vmatpush.msrb.mxu0 %v383_v44  ;;  %645 = vmatpush.msrb.mxu1 %v384_v45  ;;  %11034 = vst [vmem:[#allocation44_spill] sm:$0xff] %v8234_v40  ;;  %v8246_v44 = vld [vmem:[#allocation13 + $0x88] sm:$0xff]  ;;  %v8250_v45 = vld [vmem:[#allocation13 + $0x90] sm:$0xff] }
  0x93   :  { %668 = vmatpush.msrb.mxu2 %v385_v46  ;;  %691 = vmatpush.msrb.mxu3 %v386_v47  ;;  %11035 = vst [vmem:[#allocation45_spill] sm:$0xff] %v8238_v41  ;;  %v8252_v46 = vld [vmem:[#allocation13 + $0x98] sm:$0xff]  ;;  %v8260_v47 = vld [vmem:[#allocation13 + $0x60] sm:$0xff] }
  0x94   :  { %11036 = vst [vmem:[#allocation46_spill] sm:$0xff] %v8240_v42 }
  0x95   :  { %11037 = vst [vmem:[#allocation47_spill] sm:$0xff] %v8244_v43 }
  0x96   :  { %11038 = vst [vmem:[#allocation48_spill] sm:$0xff] %v8246_v44 }
  0x97   :  { %11039 = vst [vmem:[#allocation49_spill] sm:$0xff] %v8250_v45 }
  0x98   :  { %11040 = vst [vmem:[#allocation50_spill] sm:$0xff] %v8252_v46 }
  0x99   :  { %11041 = vst [vmem:[#allocation51_spill] sm:$0xff] %v8260_v47 }
  0xd3   :  { %v353_v49 = vpop.permute.xlu0 %352  ;;  %v356_v50 = vpop.permute.xlu1 %355 }
  0xd4   :  { %vm357_vm1 = vcmp.eq.s32.totalorder %v8078_v51, %v353_v49  ;;  %vm358_vm4 = vcmp.eq.s32.totalorder %v8078_v51, %v356_v50  ;;  %v8268_v49 = vld [vmem:[#allocation13 + $0x70] sm:$0xff]  ;;  %v8270_v50 = vld [vmem:[#allocation13 + $0x78] sm:$0xff] }
  0xd5   :  { %v6552_v54 = vsel %vm357_vm1, 1.0, %v10754_v53  ;;  %v6553_v8 = vsel %vm358_vm4, 1.0, %v10754_v53  ;;  %11043 = vst [vmem:[#allocation53_spill] sm:$0xff] %v8268_v49 }
  0xd6   :  { %11044 = vst [vmem:[#allocation54_spill] sm:$0xff] %v8270_v50 }
  0xdc   :  { %v367_v52 = vpop.permute.xlu0 %366  ;;  %v370_v57 = vpop.permute.xlu1 %369 }
  0xdd   :  { %vm371_vm2 = vcmp.eq.s32.totalorder %v8078_v51, %v367_v52  ;;  %vm372_vm5 = vcmp.eq.s32.totalorder %v8078_v51, %v370_v57  ;;  %v8276_v52 = vld [vmem:[#allocation13 + $0x40] sm:$0xff]  ;;  %v8308_v51 = vld [vmem:[#allocation13 + $0x18] sm:$0xff] }
  0xde   :  { %v6554_v55 = vsel %vm371_vm2, 1.0, %v10754_v53  ;;  %v6555_v9 = vsel %vm372_vm5, 1.0, %v10754_v53  ;;  %11045 = vst [vmem:[#allocation55_spill] sm:$0xff] %v8276_v52  ;;  %v8288_v57 = vld [vmem:[#allocation13 + $0x20] sm:$0xff]  ;;  %v8306_v53 = vld [vmem:[#allocation13 + $0x10] sm:$0xff] }
  0xdf   :  { %v8084_v56 = vadd.f32 %v6554_v55, %v6552_v54  ;;  %v8142_v14 = vadd.f32 %v6555_v9, %v6553_v8  ;;  %v8278_v54 = vld [vmem:[#allocation13 + $0x48] sm:$0xff]  ;;  %v8282_v55 = vld [vmem:[#allocation13 + $0x50] sm:$0xff]  ;;  %11049 = vst [vmem:[#allocation59_spill] sm:$0xff] %v8288_v57 }
  0xe0   :  { %11046 = vst [vmem:[#allocation56_spill] sm:$0xff] %v8278_v54  ;;  %v8290_v8 = vld [vmem:[#allocation13 + $0x28] sm:$0xff]  ;;  %v8294_v9 = vld [vmem:[#allocation13 + $0x30] sm:$0xff] }
  0xe1   :  { %6557 = vmatmul.msk.f32.vlgmr.msra.gmra.mxu0 %vm483_vm3, %v8084_v56  ;;  %6560 = vmatmul.msk.f32.vlgmr.msra.gmra.mxu1 %vm483_vm3, %v8084_v56  ;;  %11047 = vst [vmem:[#allocation57_spill] sm:$0xff] %v8282_v55 }
  0xe2   :  { %6563 = vmatmul.msk.f32.vlgmr.msra.gmra.mxu2 %vm483_vm3, %v8084_v56  ;;  %6566 = vmatmul.msk.f32.vlgmr.msra.gmra.mxu3 %vm483_vm3, %v8084_v56  ;;  %11050 = vst [vmem:[#allocation60_spill] sm:$0xff] %v8290_v8 }
  0xe3   :  { %763 = vmatpush.msra.mxu0 %v8086_v58  ;;  %783 = vmatpush.msra.mxu1 %v8088_v59  ;;  %11051 = vst [vmem:[#allocation61_spill] sm:$0xff] %v8294_v9 }
  0xe4   :  { %803 = vmatpush.msra.mxu2 %v8094_v60  ;;  %823 = vmatpush.msra.mxu3 %v8096_v61  ;;  %11055 = vst [vmem:[#allocation65_spill] sm:$0xff] %v8306_v53 }
  0xe5   :  { %764 = vmatpush.msra.mxu0 %v8102_v62  ;;  %784 = vmatpush.msra.mxu1 %v8104_v63  ;;  %11056 = vst [vmem:[#allocation66_spill] sm:$0xff] %v8308_v51 }
  0xe6   :  { %804 = vmatpush.msra.mxu2 %v8110_v2  ;;  %824 = vmatpush.msra.mxu3 %v8112_v3 }
  0xe7   :  { %765 = vmatpush.msra.mxu0 %v8116_v4  ;;  %785 = vmatpush.msra.mxu1 %v8118_v5 }
  0xe8   :  { %805 = vmatpush.msra.mxu2 %v8122_v6  ;;  %825 = vmatpush.msra.mxu3 %v8124_v7 }
  0xe9   :  { %766 = vmatpush.msra.mxu0 %v8130_v10  ;;  %786 = vmatpush.msra.mxu1 %v8132_v11 }
  0xea   :  { %806 = vmatpush.msra.mxu2 %v8136_v12  ;;  %826 = vmatpush.msra.mxu3 %v8138_v13 }
  0xeb   :  { %6558 = vmatmul.msk.f32.gmra.mxu0 %vm483_vm3, %v8142_v14  ;;  %6561 = vmatmul.msk.f32.gmra.mxu1 %vm483_vm3, %v8142_v14 }
  0xec   :  { %6564 = vmatmul.msk.f32.gmra.mxu2 %vm483_vm3, %v8142_v14  ;;  %6567 = vmatmul.msk.f32.gmra.mxu3 %vm483_vm3, %v8142_v14 }
  0xed   :  { %767 = vmatpush.msra.mxu0 %v8148_v15  ;;  %787 = vmatpush.msra.mxu1 %v8150_v16 }
  0xee   :  { %807 = vmatpush.msra.mxu2 %v8156_v17  ;;  %827 = vmatpush.msra.mxu3 %v8158_v18 }
  0xef   :  { %768 = vmatpush.msra.mxu0 %v8164_v19  ;;  %788 = vmatpush.msra.mxu1 %v8166_v20 }
  0xf0   :  { %808 = vmatpush.msra.mxu2 %v8170_v21  ;;  %828 = vmatpush.msra.mxu3 %v8172_v22 }
  0xf1   :  { %769 = vmatpush.msra.mxu0 %v8176_v23  ;;  %789 = vmatpush.msra.mxu1 %v8178_v24 }
  0xf2   :  { %809 = vmatpush.msra.mxu2 %v8182_v25  ;;  %829 = vmatpush.msra.mxu3 %v8184_v26 }
  0xf3   :  { %770 = vmatpush.msra.mxu0 %v8188_v27  ;;  %790 = vmatpush.msra.mxu1 %v8190_v28 }
  0xf4   :  { %810 = vmatpush.msra.mxu2 %v8194_v29  ;;  %830 = vmatpush.msra.mxu3 %v8196_v30 }
  0xf5   :  { %6569 = vmatmul.msk.f32.vlgmr.msrb.gmra.mxu0 %vm483_vm3, %v8084_v56  ;;  %6572 = vmatmul.msk.f32.vlgmr.msrb.gmra.mxu1 %vm483_vm3, %v8084_v56 }
  0xf6   :  { %6575 = vmatmul.msk.f32.vlgmr.msrb.gmra.mxu2 %vm483_vm3, %v8084_v56  ;;  %6578 = vmatmul.msk.f32.vlgmr.msrb.gmra.mxu3 %vm483_vm3, %v8084_v56  ;;  %v8284_v56 = vld [vmem:[#allocation13 + $0x58] sm:$0xff] }
  0xf7   :  { %771 = vmatpush.msra.mxu0 %v8204_v31  ;;  %791 = vmatpush.msra.mxu1 %v8206_v32  ;;  %11048 = vst [vmem:[#allocation58_spill] sm:$0xff] %v8284_v56 }
  0xf8   :  { %811 = vmatpush.msra.mxu2 %v8212_v33  ;;  %831 = vmatpush.msra.mxu3 %v8214_v34 }
  0xf9   :  { %772 = vmatpush.msra.mxu0 %v8220_v35  ;;  %792 = vmatpush.msra.mxu1 %v8222_v36 }
  0xfa   :  { %812 = vmatpush.msra.mxu2 %v8226_v37  ;;  %832 = vmatpush.msra.mxu3 %v8228_v38 }
  0xfb   :  { %773 = vmatpush.msra.mxu0 %v8232_v39  ;;  %793 = vmatpush.msra.mxu1 %v8234_v40 }
  0xfc   :  { %813 = vmatpush.msra.mxu2 %v8238_v41  ;;  %833 = vmatpush.msra.mxu3 %v8240_v42 }
  0xfd   :  { %774 = vmatpush.msra.mxu0 %v8244_v43  ;;  %794 = vmatpush.msra.mxu1 %v8246_v44 }
  0xfe   :  { %814 = vmatpush.msra.mxu2 %v8250_v45  ;;  %834 = vmatpush.msra.mxu3 %v8252_v46 }
  0xff   :  { %6570 = vmatmul.msk.f32.gmra.mxu0 %vm483_vm3, %v8142_v14  ;;  %6573 = vmatmul.msk.f32.gmra.mxu1 %vm483_vm3, %v8142_v14 }
 0x100   :  { %6576 = vmatmul.msk.f32.gmra.mxu2 %vm483_vm3, %v8142_v14  ;;  %6579 = vmatmul.msk.f32.gmra.mxu3 %vm483_vm3, %v8142_v14  ;;  %v8296_v14 = vld [vmem:[#allocation13 + $0x38] sm:$0xff] }
 0x101   :  { %775 = vmatpush.msra.mxu0 %v8260_v47  ;;  %795 = vmatpush.msra.mxu1 %v8262_v48  ;;  %11052 = vst [vmem:[#allocation62_spill] sm:$0xff] %v8296_v14 }
 0x102   :  { %815 = vmatpush.msra.mxu2 %v8268_v49  ;;  %835 = vmatpush.msra.mxu3 %v8270_v50 }
 0x103   :  { %776 = vmatpush.msra.mxu0 %v8276_v52  ;;  %796 = vmatpush.msra.mxu1 %v8278_v54 }
 0x104   :  { %816 = vmatpush.msra.mxu2 %v8282_v55  ;;  %836 = vmatpush.msra.mxu3 %v8284_v56  ;;  %v11057_v56 = vmov 0.0  }
 0x105   :  { %777 = vmatpush.msra.mxu0 %v8288_v57  ;;  %797 = vmatpush.msra.mxu1 %v8290_v8 }
 0x106   :  { %817 = vmatpush.msra.mxu2 %v8294_v9  ;;  %837 = vmatpush.msra.mxu3 %v8296_v14 }
 0x107   :  { %778 = vmatpush.msra.mxu0 %v8300_v1  ;;  %798 = vmatpush.msra.mxu1 %v8302_v0 }
 0x108   :  { %818 = vmatpush.msra.mxu2 %v8306_v53  ;;  %838 = vmatpush.msra.mxu3 %v8308_v51 }
 0x109   :  { %779 = vmatmul.f32.vlgmr.msra.gmra.mxu0 %v11057_v56  ;;  %799 = vmatmul.f32.vlgmr.msra.gmra.mxu1 %v11057_v56 }
 0x10a   :  { %819 = vmatmul.f32.vlgmr.msra.gmra.mxu2 %v11057_v56  ;;  %839 = vmatmul.f32.vlgmr.msra.gmra.mxu3 %v11057_v56  ;;  %v11058_v56 = vld [vmem:[#allocation58_spill] sm:$0xff] }
 0x10b   :  { %911 = vmatpush.msrb.mxu0 %v8086_v58  ;;  %931 = vmatpush.msrb.mxu1 %v8088_v59 }
 0x10c   :  { %951 = vmatpush.msrb.mxu2 %v8094_v60  ;;  %971 = vmatpush.msrb.mxu3 %v8096_v61 }
 0x10d   :  { %912 = vmatpush.msrb.mxu0 %v8102_v62  ;;  %932 = vmatpush.msrb.mxu1 %v8104_v63 }
 0x10e   :  { %952 = vmatpush.msrb.mxu2 %v8110_v2  ;;  %972 = vmatpush.msrb.mxu3 %v8112_v3 }
 0x10f   :  { %913 = vmatpush.msrb.mxu0 %v8116_v4  ;;  %933 = vmatpush.msrb.mxu1 %v8118_v5 }
 0x110   :  { %953 = vmatpush.msrb.mxu2 %v8122_v6  ;;  %973 = vmatpush.msrb.mxu3 %v8124_v7 }
 0x111   :  { %914 = vmatpush.msrb.mxu0 %v8130_v10  ;;  %934 = vmatpush.msrb.mxu1 %v8132_v11 }
 0x112   :  { %954 = vmatpush.msrb.mxu2 %v8136_v12  ;;  %974 = vmatpush.msrb.mxu3 %v8138_v13 }
 0x113   :  { %915 = vmatpush.msrb.mxu0 %v8148_v15  ;;  %935 = vmatpush.msrb.mxu1 %v8150_v16 }
 0x114   :  { %955 = vmatpush.msrb.mxu2 %v8156_v17  ;;  %975 = vmatpush.msrb.mxu3 %v8158_v18 }
 0x115   :  { %916 = vmatpush.msrb.mxu0 %v8164_v19  ;;  %936 = vmatpush.msrb.mxu1 %v8166_v20 }
 0x116   :  { %956 = vmatpush.msrb.mxu2 %v8170_v21  ;;  %976 = vmatpush.msrb.mxu3 %v8172_v22 }
 0x117   :  { %917 = vmatpush.msrb.mxu0 %v8176_v23  ;;  %937 = vmatpush.msrb.mxu1 %v8178_v24 }
 0x118   :  { %957 = vmatpush.msrb.mxu2 %v8182_v25  ;;  %977 = vmatpush.msrb.mxu3 %v8184_v26 }
 0x119   :  { %918 = vmatpush.msrb.mxu0 %v8188_v27  ;;  %938 = vmatpush.msrb.mxu1 %v8190_v28 }
 0x11a   :  { %958 = vmatpush.msrb.mxu2 %v8194_v29  ;;  %978 = vmatpush.msrb.mxu3 %v8196_v30 }
 0x11b   :  { %919 = vmatpush.msrb.mxu0 %v8204_v31  ;;  %939 = vmatpush.msrb.mxu1 %v8206_v32 }
 0x11c   :  { %959 = vmatpush.msrb.mxu2 %v8212_v33  ;;  %979 = vmatpush.msrb.mxu3 %v8214_v34 }
 0x11d   :  { %920 = vmatpush.msrb.mxu0 %v8220_v35  ;;  %940 = vmatpush.msrb.mxu1 %v8222_v36 }
 0x11e   :  { %960 = vmatpush.msrb.mxu2 %v8226_v37  ;;  %980 = vmatpush.msrb.mxu3 %v8228_v38 }
 0x11f   :  { %921 = vmatpush.msrb.mxu0 %v8232_v39  ;;  %941 = vmatpush.msrb.mxu1 %v8234_v40 }
 0x120   :  { %961 = vmatpush.msrb.mxu2 %v8238_v41  ;;  %981 = vmatpush.msrb.mxu3 %v8240_v42 }
 0x121   :  { %922 = vmatpush.msrb.mxu0 %v8244_v43  ;;  %942 = vmatpush.msrb.mxu1 %v8246_v44 }
 0x122   :  { %962 = vmatpush.msrb.mxu2 %v8250_v45  ;;  %982 = vmatpush.msrb.mxu3 %v8252_v46 }
 0x123   :  { %923 = vmatpush.msrb.mxu0 %v8260_v47  ;;  %943 = vmatpush.msrb.mxu1 %v8262_v48 }
 0x124   :  { %963 = vmatpush.msrb.mxu2 %v8268_v49  ;;  %983 = vmatpush.msrb.mxu3 %v8270_v50 }
 0x125   :  { %924 = vmatpush.msrb.mxu0 %v8276_v52  ;;  %944 = vmatpush.msrb.mxu1 %v8278_v54 }
 0x126   :  { %964 = vmatpush.msrb.mxu2 %v8282_v55  ;;  %984 = vmatpush.msrb.mxu3 %v11058_v56 }
 0x127   :  { %925 = vmatpush.msrb.mxu0 %v8288_v57  ;;  %945 = vmatpush.msrb.mxu1 %v8290_v8 }
 0x128   :  { %965 = vmatpush.msrb.mxu2 %v8294_v9  ;;  %985 = vmatpush.msrb.mxu3 %v8296_v14 }
 0x129   :  { %926 = vmatpush.msrb.mxu0 %v8300_v1  ;;  %946 = vmatpush.msrb.mxu1 %v8302_v0 }
 0x12a   :  { %966 = vmatpush.msrb.mxu2 %v8306_v53  ;;  %986 = vmatpush.msrb.mxu3 %v8308_v51 }
 0x12b   :  { %1077 = vmatpush.msra.mxu0 %v8086_v58  ;;  %1097 = vmatpush.msra.mxu1 %v8088_v59 }
 0x12c   :  { %1117 = vmatpush.msra.mxu2 %v8094_v60  ;;  %1137 = vmatpush.msra.mxu3 %v8096_v61 }
 0x12d   :  { %1078 = vmatpush.msra.mxu0 %v8102_v62  ;;  %1098 = vmatpush.msra.mxu1 %v8104_v63 }
 0x12e   :  { %1118 = vmatpush.msra.mxu2 %v8110_v2  ;;  %1138 = vmatpush.msra.mxu3 %v8112_v3 }
 0x12f   :  { %1079 = vmatpush.msra.mxu0 %v8116_v4  ;;  %1099 = vmatpush.msra.mxu1 %v8118_v5 }
 0x130   :  { %1119 = vmatpush.msra.mxu2 %v8122_v6  ;;  %1139 = vmatpush.msra.mxu3 %v8124_v7 }
 0x131   :  { %1080 = vmatpush.msra.mxu0 %v8130_v10  ;;  %1100 = vmatpush.msra.mxu1 %v8132_v11 }
 0x132   :  { %1120 = vmatpush.msra.mxu2 %v8136_v12  ;;  %1140 = vmatpush.msra.mxu3 %v8138_v13 }
 0x133   :  { %1081 = vmatpush.msra.mxu0 %v8148_v15  ;;  %1101 = vmatpush.msra.mxu1 %v8150_v16 }
 0x134   :  { %1121 = vmatpush.msra.mxu2 %v8156_v17  ;;  %1141 = vmatpush.msra.mxu3 %v8158_v18 }
 0x135   :  { %1082 = vmatpush.msra.mxu0 %v8164_v19  ;;  %1102 = vmatpush.msra.mxu1 %v8166_v20 }
 0x136   :  { %1122 = vmatpush.msra.mxu2 %v8170_v21  ;;  %1142 = vmatpush.msra.mxu3 %v8172_v22 }
 0x137   :  { %1083 = vmatpush.msra.mxu0 %v8176_v23  ;;  %1103 = vmatpush.msra.mxu1 %v8178_v24 }
 0x138   :  { %1123 = vmatpush.msra.mxu2 %v8182_v25  ;;  %1143 = vmatpush.msra.mxu3 %v8184_v26 }
 0x139   :  { %1084 = vmatpush.msra.mxu0 %v8188_v27  ;;  %1104 = vmatpush.msra.mxu1 %v8190_v28 }
 0x13a   :  { %1124 = vmatpush.msra.mxu2 %v8194_v29  ;;  %1144 = vmatpush.msra.mxu3 %v8196_v30 }
 0x13b   :  { %1085 = vmatpush.msra.mxu0 %v8204_v31  ;;  %1105 = vmatpush.msra.mxu1 %v8206_v32 }
 0x13c   :  { %1125 = vmatpush.msra.mxu2 %v8212_v33  ;;  %1145 = vmatpush.msra.mxu3 %v8214_v34 }
 0x13d   :  { %1086 = vmatpush.msra.mxu0 %v8220_v35  ;;  %1106 = vmatpush.msra.mxu1 %v8222_v36 }
 0x13e   :  { %1126 = vmatpush.msra.mxu2 %v8226_v37  ;;  %1146 = vmatpush.msra.mxu3 %v8228_v38 }
 0x13f   :  { %1087 = vmatpush.msra.mxu0 %v8232_v39  ;;  %1107 = vmatpush.msra.mxu1 %v8234_v40 }
 0x140   :  { %1127 = vmatpush.msra.mxu2 %v8238_v41  ;;  %1147 = vmatpush.msra.mxu3 %v8240_v42 }
 0x141   :  { %1088 = vmatpush.msra.mxu0 %v8244_v43  ;;  %1108 = vmatpush.msra.mxu1 %v8246_v44 }
 0x142   :  { %1128 = vmatpush.msra.mxu2 %v8250_v45  ;;  %1148 = vmatpush.msra.mxu3 %v8252_v46 }
 0x143   :  { %1089 = vmatpush.msra.mxu0 %v8260_v47  ;;  %1109 = vmatpush.msra.mxu1 %v8262_v48 }
 0x144   :  { %1129 = vmatpush.msra.mxu2 %v8268_v49  ;;  %1149 = vmatpush.msra.mxu3 %v8270_v50 }
 0x145   :  { %1090 = vmatpush.msra.mxu0 %v8276_v52  ;;  %1110 = vmatpush.msra.mxu1 %v8278_v54 }
 0x146   :  { %1130 = vmatpush.msra.mxu2 %v8282_v55  ;;  %1150 = vmatpush.msra.mxu3 %v11058_v56 }
 0x147   :  { %1091 = vmatpush.msra.mxu0 %v8288_v57  ;;  %1111 = vmatpush.msra.mxu1 %v8290_v8 }
 0x148   :  { %1131 = vmatpush.msra.mxu2 %v8294_v9  ;;  %1151 = vmatpush.msra.mxu3 %v8296_v14 }
 0x149   :  { %1092 = vmatpush.msra.mxu0 %v8300_v1  ;;  %1112 = vmatpush.msra.mxu1 %v8302_v0 }
 0x14a   :  { %1132 = vmatpush.msra.mxu2 %v8306_v53  ;;  %1152 = vmatpush.msra.mxu3 %v8308_v51 }
 0x15e   :  { %v8448_v54 = vpop.f32.mrf.mxu0  ;;  %v8450_v55 = vpop.f32.mrf.mxu1 }
 0x15f   :  { %11059 = vst [vmem:[#allocation67_spill] sm:$0xff] %v8448_v54 }
 0x160   :  { %11060 = vst [vmem:[#allocation68_spill] sm:$0xff] %v8450_v55 }
 0x165   :  { %v8452_v56 = vpop.f32.mrf.mxu2  ;;  %v8458_v9 = vpop.f32.mrf.mxu3 }
 0x166   :  { %11061 = vst [vmem:[#allocation69_spill] sm:$0xff] %v8452_v56 }
 0x167   :  { %11064 = vst [vmem:[#allocation72_spill] sm:$0xff] %v8458_v9 }
 0x168   :  { %v8454_v57 = vpop.f32.mrf.mxu0  ;;  %v8456_v8 = vpop.f32.mrf.mxu1 }
 0x169   :  { %11062 = vst [vmem:[#allocation70_spill] sm:$0xff] %v8454_v57 }
 0x16a   :  { %11063 = vst [vmem:[#allocation71_spill] sm:$0xff] %v8456_v8 }
 0x16f   :  { %v8460_v14 = vpop.f32.mrf.mxu2  ;;  %v8466_v53 = vpop.f32.mrf.mxu3 }
 0x170   :  { %11065 = vst [vmem:[#allocation73_spill] sm:$0xff] %v8460_v14 }
 0x171   :  { %11068 = vst [vmem:[#allocation76_spill] sm:$0xff] %v8466_v53 }
 0x172   :  { %v8462_v1 = vpop.f32.mrf.mxu0  ;;  %v8464_v0 = vpop.f32.mrf.mxu1 }
 0x173   :  { %11066 = vst [vmem:[#allocation74_spill] sm:$0xff] %v8462_v1 }
 0x174   :  { %11067 = vst [vmem:[#allocation75_spill] sm:$0xff] %v8464_v0 }
 0x179   :  { %v8468_v51 = vpop.f32.mrf.mxu2  ;;  %v8474_v49 = vpop.f32.mrf.mxu3 }
 0x17a   :  { %11069 = vst [vmem:[#allocation77_spill] sm:$0xff] %v8468_v51 }
 0x17b   :  { %11072 = vst [vmem:[#allocation80_spill] sm:$0xff] %v8474_v49 }
 0x17c   :  { %v8470_v52 = vpop.f32.mrf.mxu0  ;;  %v8472_v50 = vpop.f32.mrf.mxu1 }
 0x17d   :  { %11070 = vst [vmem:[#allocation78_spill] sm:$0xff] %v8470_v52 }
 0x17e   :  { %11071 = vst [vmem:[#allocation79_spill] sm:$0xff] %v8472_v50 }
 0x183   :  { %v8476_v57 = vpop.f32.mrf.mxu2  ;;  %v8480_v53 = vpop.f32.mrf.mxu3 }
 0x184   :  { %11073 = vst [vmem:[#allocation81_spill] sm:$0xff] %v8476_v57 }
 0x185   :  { %11074 = vst [vmem:[#allocation82_spill] sm:$0xff] %v8480_v53 }
 0x186   :  { %v780_v8 = vpop.f32.mrf.mxu0  ;;  %v800_v48 = vpop.f32.mrf.mxu1 }
 0x187   :  { %v843_v14 = vadd.f32 %v780_v8, %v8448_v54  ;;  %v844_v1 = vadd.f32 %v800_v48, %v8450_v55 }
 0x189   :  { %v6580_v47 = vmul.f32 -1.442695, %v843_v14  ;;  %v6581_v0 = vmul.f32 -1.442695, %v844_v1 }
 0x18b   :  { %6784 = vpow2.f32 %v6580_v47 }
 0x18c   :  { %6786 = vpow2.f32 %v6581_v0 }
 0x18d   :  { %v820_v51 = vpop.f32.mrf.mxu2  ;;  %v840_v8 = vpop.f32.mrf.mxu3 }
 0x18e   :  { %v845_v52 = vadd.f32 %v820_v51, %v8452_v56  ;;  %v846_v1 = vadd.f32 %v840_v8, %v8458_v9 }
 0x190   :  { %v6582_v50 = vmul.f32 -1.442695, %v845_v52 }
 0x191   :  { %v6785_v46 = vpop.eup %6784 }
 0x192   :  { %v6787_v49 = vpop.eup %6786  ;;  %v856_v45 = vadd.f32 1.0, %v6785_v46  ;;  %6788 = vpow2.f32 %v6582_v50 }
 0x193   :  { %v857_v57 = vadd.f32 1.0, %v6787_v49 }
 0x194   :  { %6790 = vrcp.f32 %v856_v45  ;;  %v870_v52 = vand.u32 2147483648, %v856_v45  ;;  %v868_v49 = vand.u32 2147483647, %v856_v45  ;;  %vm864_vm8 = vweird.f32 %v856_v45 }
 0x195   :  { %6792 = vrcp.f32 %v857_v57  ;;  %v885_v56 = vand.u32 2147483648, %v857_v57  ;;  %v883_v44 = vand.u32 2147483647, %v857_v57  ;;  %vm879_vm9 = vweird.f32 %v857_v57 }
 0x196   :  { %v871_v9 = vor.u32 1.1754944e-38, %v870_v52  ;;  %vm869_vm11 = vcmp.eq.f32.partialorder %v868_v49, 8.507059e+37  ;;  %v11093_v49 = vld [vmem:[#allocation59_spill] sm:$0xff] }
 0x197   :  { %v886_v41 = vor.u32 1.1754944e-38, %v885_v56  ;;  %vm884_vm13 = vcmp.eq.f32.partialorder %v883_v44, 8.507059e+37 }
 0x198   :  { %v6789_v54 = vpop.eup %6788 }
 0x199   :  { %v858_v48 = vadd.f32 1.0, %v6789_v54 }
 0x19a   :  { %v6791_v14 = vpop.eup %6790 }
 0x19b   :  { %v6793_v0 = vpop.eup %6792  ;;  %v860_v47 = vmul.f32 %v6791_v14, %v856_v45  ;;  %6794 = vrcp.f32 %v858_v48  ;;  %vm865_vm6 = vweird.f32 %v6791_v14  ;;  %vm894_vm15 = vweird.f32 %v858_v48 }
 0x19c   :  { %v875_v53 = vmul.f32 %v6793_v0, %v857_v57  ;;  %6796 = vtanh.f32 %v846_v1  ;;  %vm880_vm7 = vweird.f32 %v6793_v0  ;;  %vm866_vm10 = vmor %vm864_vm8, %vm865_vm6  ;;  %v900_v57 = vand.u32 2147483648, %v858_v48 }
 0x19d   :  { %v861_v55 = vsub.f32 1.0, %v860_v47  ;;  %vm881_vm12 = vmor %vm879_vm9, %vm880_vm7  ;;  %v898_v56 = vand.u32 2147483647, %v858_v48 }
 0x19e   :  { %v876_v51 = vsub.f32 1.0, %v875_v53  ;;  %v901_v52 = vor.u32 1.1754944e-38, %v900_v57 }
 0x19f   :  { %v862_v46 = vmul.f32 %v6791_v14, %v861_v55  ;;  %vm899_vm1 = vcmp.eq.f32.partialorder %v898_v56, 8.507059e+37 }
 0x1a0   :  { %v877_v50 = vmul.f32 %v6793_v0, %v876_v51 }
 0x1a1   :  { %v6795_v43 = vpop.eup %6794  ;;  %v863_v54 = vadd.f32 %v6791_v14, %v862_v46 }
 0x1a2   :  { %v890_v8 = vmul.f32 %v6795_v43, %v858_v48  ;;  %v878_v42 = vadd.f32 %v6793_v0, %v877_v50  ;;  %v6797_v53 = vpop.eup %6796  ;;  %vm895_vm14 = vweird.f32 %v6795_v43  ;;  %v11091_v48 = vld [vmem:[#allocation57_spill] sm:$0xff]  ;;  %v11094_v50 = vld [vmem:[#allocation60_spill] sm:$0xff] }
 0x1a3   :  { %v867_v47 = vsel %vm866_vm10, %v6791_v14, %v863_v54  ;;  %vm896_vm0 = vmor %vm894_vm15, %vm895_vm14  ;;  %v11095_v54 = vld [vmem:[#allocation61_spill] sm:$0xff] }
 0x1a4   :  { %v891_v1 = vsub.f32 1.0, %v890_v8  ;;  %v872_v55 = vsel %vm869_vm11, %v871_v9, %v867_v47  ;;  %v882_v40 = vsel %vm881_vm12, %v6793_v0, %v878_v42  ;;  %v11092_v0 = vld [vmem:[#allocation58_spill] sm:$0xff]  ;;  %v11097_v47 = vld [vmem:[#allocation63_spill] sm:$0xff] }
 0x1a5   :  { %v887_v51 = vsel %vm884_vm13, %v886_v41, %v882_v40  ;;  %v906_v39 = vmul.f32 %v6797_v53, %v872_v55  ;;  %v11088_v40 = vld [vmem:[#allocation54_spill] sm:$0xff]  ;;  %v11089_v41 = vld [vmem:[#allocation55_spill] sm:$0xff]  ;;  %v11098_v53 = vld [vmem:[#allocation64_spill] sm:$0xff] }
 0x1a6   :  { %v892_v38 = vmul.f32 %v6795_v43, %v891_v1  ;;  %v905_v37 = vmul.f32 0.0, %v887_v51  ;;  %v11096_v8 = vld [vmem:[#allocation62_spill] sm:$0xff]  ;;  %v11099_v1 = vld [vmem:[#allocation65_spill] sm:$0xff] }
 0x1a7   :  { %v11100_v55 = vld [vmem:[#allocation66_spill] sm:$0xff] }
 0x1a8   :  { %v8484_v46 = vadd.f32 %v906_v39, %v905_v37  ;;  %v893_v45 = vadd.f32 %v6795_v43, %v892_v38  ;;  %v11085_v37 = vld [vmem:[#allocation51_spill] sm:$0xff]  ;;  %v11086_v38 = vld [vmem:[#allocation52_spill] sm:$0xff]  ;;  %v11087_v39 = vld [vmem:[#allocation53_spill] sm:$0xff] }
 0x1aa   :  { %6798 = vtanh.f32 %v8484_v46  ;;  %v897_v14 = vsel %vm896_vm0, %v6795_v43, %v893_v45  ;;  %v11090_v43 = vld [vmem:[#allocation56_spill] sm:$0xff] }
 0x1ab   :  { %v902_v42 = vsel %vm899_vm1, %v901_v52, %v897_v14  ;;  %v11101_v14 = vld [vmem:[#allocation67_spill] sm:$0xff] }
 0x1b0   :  { %v6799_v9 = vpop.eup %6798 }
 0x1b1   :  { %v909_v44 = vmul.f32 %v6799_v9, %v902_v42  ;;  %v11102_v9 = vld [vmem:[#allocation68_spill] sm:$0xff] }
 0x1b3   :  { %910 = vst [vmem:[#allocation2] sm:$0x3] %v909_v44  ;;  %927 = vmatmul.f32.vlgmr.msrb.gmra.mxu0 %v909_v44  ;;  %947 = vmatmul.f32.vlgmr.msrb.gmra.mxu1 %v909_v44 }
 0x1b4   :  { %967 = vmatmul.f32.vlgmr.msrb.gmra.mxu2 %v909_v44  ;;  %987 = vmatmul.f32.vlgmr.msrb.gmra.mxu3 %v909_v44 }
 0x1b5   :  { %1243 = vmatpush.msrb.mxu0 %v8086_v58  ;;  %1263 = vmatpush.msrb.mxu1 %v8088_v59  ;;  %v11075_v58 = vld [vmem:[#allocation41_spill] sm:$0xff]  ;;  %v11076_v59 = vld [vmem:[#allocation42_spill] sm:$0xff] }
 0x1b6   :  { %1283 = vmatpush.msrb.mxu2 %v8094_v60  ;;  %1303 = vmatpush.msrb.mxu3 %v8096_v61  ;;  %v11077_v60 = vld [vmem:[#allocation43_spill] sm:$0xff]  ;;  %v11078_v61 = vld [vmem:[#allocation44_spill] sm:$0xff] }
 0x1b7   :  { %1244 = vmatpush.msrb.mxu0 %v8102_v62  ;;  %1264 = vmatpush.msrb.mxu1 %v8104_v63  ;;  %v11079_v62 = vld [vmem:[#allocation45_spill] sm:$0xff]  ;;  %v11080_v63 = vld [vmem:[#allocation46_spill] sm:$0xff] }
 0x1b8   :  { %1284 = vmatpush.msrb.mxu2 %v8110_v2  ;;  %1304 = vmatpush.msrb.mxu3 %v8112_v3  ;;  %v11081_v2 = vld [vmem:[#allocation47_spill] sm:$0xff]  ;;  %v11082_v3 = vld [vmem:[#allocation48_spill] sm:$0xff] }
 0x1b9   :  { %1245 = vmatpush.msrb.mxu0 %v8116_v4  ;;  %1265 = vmatpush.msrb.mxu1 %v8118_v5  ;;  %v11083_v4 = vld [vmem:[#allocation49_spill] sm:$0xff]  ;;  %v11084_v5 = vld [vmem:[#allocation50_spill] sm:$0xff] }
 0x1ba   :  { %1285 = vmatpush.msrb.mxu2 %v8122_v6  ;;  %1305 = vmatpush.msrb.mxu3 %v8124_v7 }
 0x1bb   :  { %1246 = vmatpush.msrb.mxu0 %v8130_v10  ;;  %1266 = vmatpush.msrb.mxu1 %v8132_v11 }
 0x1bc   :  { %1286 = vmatpush.msrb.mxu2 %v8136_v12  ;;  %1306 = vmatpush.msrb.mxu3 %v8138_v13 }
 0x1bd   :  { %1247 = vmatpush.msrb.mxu0 %v8148_v15  ;;  %1267 = vmatpush.msrb.mxu1 %v8150_v16 }
 0x1be   :  { %1287 = vmatpush.msrb.mxu2 %v8156_v17  ;;  %1307 = vmatpush.msrb.mxu3 %v8158_v18 }
 0x1bf   :  { %1248 = vmatpush.msrb.mxu0 %v8164_v19  ;;  %1268 = vmatpush.msrb.mxu1 %v8166_v20 }
 0x1c0   :  { %1288 = vmatpush.msrb.mxu2 %v8170_v21  ;;  %1308 = vmatpush.msrb.mxu3 %v8172_v22 }
 0x1c1   :  { %1249 = vmatpush.msrb.mxu0 %v8176_v23  ;;  %1269 = vmatpush.msrb.mxu1 %v8178_v24 }
 0x1c2   :  { %1289 = vmatpush.msrb.mxu2 %v8182_v25  ;;  %1309 = vmatpush.msrb.mxu3 %v8184_v26 }
 0x1c3   :  { %1250 = vmatpush.msrb.mxu0 %v8188_v27  ;;  %1270 = vmatpush.msrb.mxu1 %v8190_v28 }
 0x1c4   :  { %1290 = vmatpush.msrb.mxu2 %v8194_v29  ;;  %1310 = vmatpush.msrb.mxu3 %v8196_v30 }
 0x1c5   :  { %1251 = vmatpush.msrb.mxu0 %v8204_v31  ;;  %1271 = vmatpush.msrb.mxu1 %v8206_v32 }
 0x1c6   :  { %1291 = vmatpush.msrb.mxu2 %v8212_v33  ;;  %1311 = vmatpush.msrb.mxu3 %v8214_v34 }
 0x1c7   :  { %1252 = vmatpush.msrb.mxu0 %v8220_v35  ;;  %1272 = vmatpush.msrb.mxu1 %v8222_v36 }
 0x1c8   :  { %1292 = vmatpush.msrb.mxu2 %v11075_v58  ;;  %1312 = vmatpush.msrb.mxu3 %v11076_v59 }
 0x1c9   :  { %1253 = vmatpush.msrb.mxu0 %v11077_v60  ;;  %1273 = vmatpush.msrb.mxu1 %v11078_v61 }
 0x1ca   :  { %1293 = vmatpush.msrb.mxu2 %v11079_v62  ;;  %1313 = vmatpush.msrb.mxu3 %v11080_v63 }
 0x1cb   :  { %1254 = vmatpush.msrb.mxu0 %v11081_v2  ;;  %1274 = vmatpush.msrb.mxu1 %v11082_v3 }
 0x1cc   :  { %1294 = vmatpush.msrb.mxu2 %v11083_v4  ;;  %1314 = vmatpush.msrb.mxu3 %v11084_v5 }
 0x1cd   :  { %1255 = vmatpush.msrb.mxu0 %v11085_v37  ;;  %1275 = vmatpush.msrb.mxu1 %v11086_v38 }
 0x1ce   :  { %1295 = vmatpush.msrb.mxu2 %v11087_v39  ;;  %1315 = vmatpush.msrb.mxu3 %v11088_v40 }
 0x1cf   :  { %1256 = vmatpush.msrb.mxu0 %v11089_v41  ;;  %1276 = vmatpush.msrb.mxu1 %v11090_v43 }
 0x1d0   :  { %1296 = vmatpush.msrb.mxu2 %v11091_v48  ;;  %1316 = vmatpush.msrb.mxu3 %v11092_v0 }
 0x1d1   :  { %1257 = vmatpush.msrb.mxu0 %v11093_v49  ;;  %1277 = vmatpush.msrb.mxu1 %v11094_v50  ;;  %v11103_v50 = vld [vmem:[#allocation69_spill] sm:$0xff] }
 0x1d2   :  { %1297 = vmatpush.msrb.mxu2 %v11095_v54  ;;  %1317 = vmatpush.msrb.mxu3 %v11096_v8 }
 0x1d3   :  { %1258 = vmatpush.msrb.mxu0 %v11097_v47  ;;  %1278 = vmatpush.msrb.mxu1 %v11098_v53 }
 0x1d4   :  { %1298 = vmatpush.msrb.mxu2 %v11099_v1  ;;  %1318 = vmatpush.msrb.mxu3 %v11100_v55 }
 0x230   :  { %v928_v51 = vpop.f32.mrf.mxu0  ;;  %v948_v45 = vpop.f32.mrf.mxu1 }
 0x231   :  { %v995_v57 = vrot.slane %v928_v51, 6  ;;  %v996_v56 = vrot.slane %v948_v45, 6 }
 0x233   :  { %v1003_v52 = vadd.f32 %v995_v57, %v11101_v14  ;;  %v1004_v42 = vadd.f32 %v996_v56, %v11102_v9 }
 0x235   :  { %v6583_v44 = vmul.f32 -1.442695, %v1003_v52  ;;  %v6584_v54 = vmul.f32 -1.442695, %v1004_v42  ;;  %v11104_v42 = vld [vmem:[#allocation72_spill] sm:$0xff] }
 0x237   :  { %6800 = vpow2.f32 %v6583_v44  ;;  %v968_v8 = vpop.f32.mrf.mxu2  ;;  %v988_v51 = vpop.f32.mrf.mxu3 }
 0x238   :  { %6802 = vpow2.f32 %v6584_v54  ;;  %v997_v47 = vrot.slane %v968_v8, 6  ;;  %v998_v45 = vrot.slane %v988_v51, 6 }
 0x23a   :  { %v1005_v53 = vadd.f32 %v997_v47, %v11103_v50  ;;  %v1006_v44 = vadd.f32 %v998_v45, %v11104_v42 }
 0x23c   :  { %v6585_v49 = vmul.f32 -1.442695, %v1005_v53 }
 0x23d   :  { %v6801_v1 = vpop.eup %6800 }
 0x23e   :  { %v6803_v0 = vpop.eup %6802  ;;  %v1016_v55 = vadd.f32 1.0, %v6801_v1  ;;  %6804 = vpow2.f32 %v6585_v49 }
 0x23f   :  { %v1017_v48 = vadd.f32 1.0, %v6803_v0 }
 0x240   :  { %6806 = vrcp.f32 %v1016_v55  ;;  %v1030_v50 = vand.u32 2147483648, %v1016_v55  ;;  %v1028_v0 = vand.u32 2147483647, %v1016_v55  ;;  %vm1024_vm4 = vweird.f32 %v1016_v55 }
 0x241   :  { %6808 = vrcp.f32 %v1017_v48  ;;  %v1045_v1 = vand.u32 2147483648, %v1017_v48  ;;  %v1043_v51 = vand.u32 2147483647, %v1017_v48  ;;  %vm1039_vm5 = vweird.f32 %v1017_v48 }
 0x242   :  { %v1031_v42 = vor.u32 1.1754944e-38, %v1030_v50  ;;  %vm1029_vm8 = vcmp.eq.f32.partialorder %v1028_v0, 8.507059e+37  ;;  %v8580_v0 = vld [vmem:[#allocation13 + $0x1d8] sm:$0xff] }
 0x243   :  { %vm1044_vm9 = vcmp.eq.f32.partialorder %v1043_v51, 8.507059e+37  ;;  %v8583_v51 = vld [vmem:[#allocation13 + $0x1a0] sm:$0xff] }
 0x244   :  { %v6805_v57 = vpop.eup %6804 }
 0x245   :  { %v1018_v56 = vadd.f32 1.0, %v6805_v57 }
 0x246   :  { %v6807_v52 = vpop.eup %6806 }
 0x247   :  { %v6809_v9 = vpop.eup %6808  ;;  %v1020_v54 = vmul.f32 %v6807_v52, %v1016_v55  ;;  %6810 = vrcp.f32 %v1018_v56  ;;  %vm1025_vm2 = vweird.f32 %v6807_v52  ;;  %vm1054_vm11 = vweird.f32 %v1018_v56 }
 0x248   :  { %v1035_v8 = vmul.f32 %v6809_v9, %v1017_v48  ;;  %6812 = vtanh.f32 %v1006_v44  ;;  %vm1040_vm3 = vweird.f32 %v6809_v9  ;;  %vm1026_vm6 = vmor %vm1024_vm4, %vm1025_vm2  ;;  %v1058_v50 = vand.u32 2147483647, %v1018_v56 }
 0x249   :  { %v1021_v47 = vsub.f32 1.0, %v1020_v54  ;;  %v1066_v54 = vrot.slane %v8484_v46, 6  ;;  %vm1041_vm7 = vmor %vm1039_vm5, %vm1040_vm3  ;;  %v1060_v46 = vand.u32 2147483648, %v1018_v56 }
 0x24a   :  { %v1036_v53 = vsub.f32 1.0, %v1035_v8  ;;  %v1046_v8 = vor.u32 1.1754944e-38, %v1045_v1  ;;  %vm1059_vm13 = vcmp.eq.f32.partialorder %v1058_v50, 8.507059e+37  ;;  %v8577_v1 = vld [vmem:[#allocation13 + $0x1d0] sm:$0xff] }
 0x24b   :  { %v1022_v49 = vmul.f32 %v6807_v52, %v1021_v47 }
 0x24c   :  { %v1037_v14 = vmul.f32 %v6809_v9, %v1036_v53 }
 0x24d   :  { %v6811_v43 = vpop.eup %6810  ;;  %v1023_v57 = vadd.f32 %v6807_v52, %v1022_v49 }
 0x24e   :  { %v1050_v45 = vmul.f32 %v6811_v43, %v1018_v56  ;;  %v1038_v41 = vadd.f32 %v6809_v9, %v1037_v14  ;;  %v6813_v47 = vpop.eup %6812  ;;  %vm1055_vm10 = vweird.f32 %v6811_v43  ;;  %v8574_v56 = vld [vmem:[#allocation13 + $0x1c8] sm:$0xff] }
 0x24f   :  { %v1027_v44 = vsel %vm1026_vm6, %v6807_v52, %v1023_v57  ;;  %vm1056_vm12 = vmor %vm1054_vm11, %vm1055_vm10  ;;  %v1061_v52 = vor.u32 1.1754944e-38, %v1060_v46  ;;  %v8586_v57 = vld [vmem:[#allocation13 + $0x1a8] sm:$0xff] }
 0x250   :  { %v1051_v40 = vsub.f32 1.0, %v1050_v45  ;;  %v1032_v39 = vsel %vm1029_vm8, %v1031_v42, %v1027_v44  ;;  %v1042_v53 = vsel %vm1041_vm7, %v6809_v9, %v1038_v41 }
 0x251   :  { %v1047_v38 = vsel %vm1044_vm9, %v1046_v8, %v1042_v53  ;;  %v1069_v37 = vmul.f32 %v6813_v47, %v1032_v39  ;;  %v11125_v47 = vld [vmem:[#allocation72_spill] sm:$0xff] }
 0x252   :  { %v1068_v49 = vmul.f32 %v1066_v54, %v1047_v38  ;;  %v1052_v55 = vmul.f32 %v6811_v43, %v1051_v40  ;;  %v8562_v38 = vld [vmem:[#allocation13 + $0x1e8] sm:$0xff]  ;;  %v8568_v40 = vld [vmem:[#allocation13 + $0x1f8] sm:$0xff] }
 0x254   :  { %v8556_v48 = vadd.f32 %v1069_v37, %v1068_v49  ;;  %v1053_v5 = vadd.f32 %v6811_v43, %v1052_v55  ;;  %v8559_v37 = vld [vmem:[#allocation13 + $0x1e0] sm:$0xff] }
 0x256   :  { %6814 = vtanh.f32 %v8556_v48  ;;  %v1057_v14 = vsel %vm1056_vm12, %v6811_v43, %v1053_v5  ;;  %v8565_v5 = vld [vmem:[#allocation13 + $0x1f0] sm:$0xff]  ;;  %v8571_v43 = vld [vmem:[#allocation13 + $0x1c0] sm:$0xff] }
 0x257   :  { %v1062_v41 = vsel %vm1059_vm13, %v1061_v52, %v1057_v14 }
 0x25c   :  { %v6815_v42 = vpop.eup %6814 }
 0x25d   :  { %v1072_v9 = vmul.f32 %v6815_v42, %v1062_v41 }
 0x25f   :  { %1073 = vst [vmem:[#allocation2] sm:$0xc] %v1072_v9  ;;  %v1075_v39 = vrot.slane %v1072_v9, 2 }
 0x261   :  { %1093 = vmatmul.f32.vlgmr.msra.gmra.mxu0 %v1075_v39  ;;  %1113 = vmatmul.f32.vlgmr.msra.gmra.mxu1 %v1075_v39 }
 0x262   :  { %1133 = vmatmul.f32.vlgmr.msra.gmra.mxu2 %v1075_v39  ;;  %1153 = vmatmul.f32.vlgmr.msra.gmra.mxu3 %v1075_v39 }
 0x263   :  { %1409 = vmatpush.msra.mxu0 %v8559_v37  ;;  %1429 = vmatpush.msra.mxu1 %v8562_v38 }
 0x264   :  { %1449 = vmatpush.msra.mxu2 %v8565_v5  ;;  %1469 = vmatpush.msra.mxu3 %v8568_v40 }
 0x265   :  { %1410 = vmatpush.msra.mxu0 %v8571_v43  ;;  %1430 = vmatpush.msra.mxu1 %v8574_v56 }
 0x266   :  { %1450 = vmatpush.msra.mxu2 %v8577_v1  ;;  %1470 = vmatpush.msra.mxu3 %v8580_v0 }
 0x267   :  { %1411 = vmatpush.msra.mxu0 %v8583_v51  ;;  %1431 = vmatpush.msra.mxu1 %v8586_v57 }
 0x268   :  { %1451 = vmatpush.msra.mxu2 %v8122_v6  ;;  %1471 = vmatpush.msra.mxu3 %v8124_v7  ;;  %v11105_v6 = vld [vmem:[#allocation50_spill] sm:$0xff]  ;;  %v11106_v7 = vld [vmem:[#allocation51_spill] sm:$0xff] }
 0x269   :  { %1412 = vmatpush.msra.mxu0 %v8130_v10  ;;  %1432 = vmatpush.msra.mxu1 %v8132_v11  ;;  %v11107_v10 = vld [vmem:[#allocation52_spill] sm:$0xff]  ;;  %v11108_v11 = vld [vmem:[#allocation53_spill] sm:$0xff] }
 0x26a   :  { %1452 = vmatpush.msra.mxu2 %v8136_v12  ;;  %1472 = vmatpush.msra.mxu3 %v8138_v13  ;;  %v11109_v12 = vld [vmem:[#allocation54_spill] sm:$0xff]  ;;  %v11110_v13 = vld [vmem:[#allocation55_spill] sm:$0xff] }
 0x26b   :  { %1413 = vmatpush.msra.mxu0 %v8148_v15  ;;  %1433 = vmatpush.msra.mxu1 %v8150_v16  ;;  %v11111_v15 = vld [vmem:[#allocation56_spill] sm:$0xff]  ;;  %v11112_v16 = vld [vmem:[#allocation57_spill] sm:$0xff] }
 0x26c   :  { %1453 = vmatpush.msra.mxu2 %v8156_v17  ;;  %1473 = vmatpush.msra.mxu3 %v8158_v18  ;;  %v11113_v17 = vld [vmem:[#allocation58_spill] sm:$0xff]  ;;  %v11114_v18 = vld [vmem:[#allocation59_spill] sm:$0xff] }
 0x26d   :  { %1414 = vmatpush.msra.mxu0 %v8164_v19  ;;  %1434 = vmatpush.msra.mxu1 %v8166_v20  ;;  %v11115_v19 = vld [vmem:[#allocation60_spill] sm:$0xff]  ;;  %v11116_v20 = vld [vmem:[#allocation61_spill] sm:$0xff] }
 0x26e   :  { %1454 = vmatpush.msra.mxu2 %v8170_v21  ;;  %1474 = vmatpush.msra.mxu3 %v8172_v22  ;;  %v11117_v21 = vld [vmem:[#allocation62_spill] sm:$0xff]  ;;  %v11118_v22 = vld [vmem:[#allocation63_spill] sm:$0xff] }
 0x26f   :  { %1415 = vmatpush.msra.mxu0 %v8176_v23  ;;  %1435 = vmatpush.msra.mxu1 %v8178_v24  ;;  %v11119_v23 = vld [vmem:[#allocation64_spill] sm:$0xff]  ;;  %v11120_v24 = vld [vmem:[#allocation65_spill] sm:$0xff] }
 0x270   :  { %1455 = vmatpush.msra.mxu2 %v8182_v25  ;;  %1475 = vmatpush.msra.mxu3 %v8184_v26  ;;  %v11121_v25 = vld [vmem:[#allocation66_spill] sm:$0xff] }
 0x271   :  { %1416 = vmatpush.msra.mxu0 %v8188_v27  ;;  %1436 = vmatpush.msra.mxu1 %v8190_v28 }
 0x272   :  { %1456 = vmatpush.msra.mxu2 %v8194_v29  ;;  %1476 = vmatpush.msra.mxu3 %v8196_v30  ;;  %v11122_v30 = vld [vmem:[#allocation67_spill] sm:$0xff] }
 0x273   :  { %1417 = vmatpush.msra.mxu0 %v8204_v31  ;;  %1437 = vmatpush.msra.mxu1 %v8206_v32  ;;  %v11123_v32 = vld [vmem:[#allocation68_spill] sm:$0xff] }
 0x274   :  { %1457 = vmatpush.msra.mxu2 %v8212_v33  ;;  %1477 = vmatpush.msra.mxu3 %v8214_v34 }
 0x275   :  { %1418 = vmatpush.msra.mxu0 %v8220_v35  ;;  %1438 = vmatpush.msra.mxu1 %v8222_v36 }
 0x276   :  { %1458 = vmatpush.msra.mxu2 %v11075_v58  ;;  %1478 = vmatpush.msra.mxu3 %v11076_v59  ;;  %v11124_v59 = vld [vmem:[#allocation69_spill] sm:$0xff] }
 0x277   :  { %1419 = vmatpush.msra.mxu0 %v11077_v60  ;;  %1439 = vmatpush.msra.mxu1 %v11078_v61 }
 0x278   :  { %1459 = vmatpush.msra.mxu2 %v11079_v62  ;;  %1479 = vmatpush.msra.mxu3 %v11080_v63 }
 0x279   :  { %1420 = vmatpush.msra.mxu0 %v11081_v2  ;;  %1440 = vmatpush.msra.mxu1 %v11082_v3 }
 0x27a   :  { %1460 = vmatpush.msra.mxu2 %v11083_v4  ;;  %1480 = vmatpush.msra.mxu3 %v11105_v6 }
 0x27b   :  { %1421 = vmatpush.msra.mxu0 %v11106_v7  ;;  %1441 = vmatpush.msra.mxu1 %v11107_v10 }
 0x27c   :  { %1461 = vmatpush.msra.mxu2 %v11108_v11  ;;  %1481 = vmatpush.msra.mxu3 %v11109_v12 }
 0x27d   :  { %1422 = vmatpush.msra.mxu0 %v11110_v13  ;;  %1442 = vmatpush.msra.mxu1 %v11111_v15  ;;  %v1232_v15 = vrot.slane %v8556_v48, 6 }
 0x27e   :  { %1462 = vmatpush.msra.mxu2 %v11112_v16  ;;  %1482 = vmatpush.msra.mxu3 %v11113_v17 }
 0x27f   :  { %1423 = vmatpush.msra.mxu0 %v11114_v18  ;;  %1443 = vmatpush.msra.mxu1 %v11115_v19 }
 0x280   :  { %1463 = vmatpush.msra.mxu2 %v11116_v20  ;;  %1483 = vmatpush.msra.mxu3 %v11117_v21 }
 0x281   :  { %1424 = vmatpush.msra.mxu0 %v11118_v22  ;;  %1444 = vmatpush.msra.mxu1 %v11119_v23 }
 0x282   :  { %1464 = vmatpush.msra.mxu2 %v11120_v24  ;;  %1484 = vmatpush.msra.mxu3 %v11121_v25 }
 0x2de   :  { %v1094_v26 = vpop.f32.mrf.mxu0  ;;  %v1114_v27 = vpop.f32.mrf.mxu1 }
 0x2df   :  { %v1161_v28 = vrot.slane %v1094_v26, 4  ;;  %v1162_v29 = vrot.slane %v1114_v27, 4 }
 0x2e1   :  { %v1169_v31 = vadd.f32 %v1161_v28, %v11122_v30  ;;  %v1170_v33 = vadd.f32 %v1162_v29, %v11123_v32 }
 0x2e3   :  { %v6586_v34 = vmul.f32 -1.442695, %v1169_v31  ;;  %v6587_v35 = vmul.f32 -1.442695, %v1170_v33 }
 0x2e5   :  { %6816 = vpow2.f32 %v6586_v34  ;;  %v1134_v36 = vpop.f32.mrf.mxu2  ;;  %v1154_v4 = vpop.f32.mrf.mxu3 }
 0x2e6   :  { %6818 = vpow2.f32 %v6587_v35  ;;  %v1163_v58 = vrot.slane %v1134_v36, 4  ;;  %v1164_v45 = vrot.slane %v1154_v4, 4  ;;  %v8682_v4 = vld [vmem:[#allocation13 + $0x168] sm:$0xff] }
 0x2e8   :  { %v1171_v60 = vadd.f32 %v1163_v58, %v11124_v59  ;;  %v1172_v53 = vadd.f32 %v1164_v45, %v11125_v47  ;;  %v8661_v58 = vld [vmem:[#allocation13 + $0x1b0] sm:$0xff] }
 0x2e9   :  { %v8685_v45 = vld [vmem:[#allocation13 + $0x170] sm:$0xff] }
 0x2ea   :  { %v6588_v61 = vmul.f32 -1.442695, %v1171_v60  ;;  %v8664_v60 = vld [vmem:[#allocation13 + $0x1b8] sm:$0xff] }
 0x2eb   :  { %v6817_v62 = vpop.eup %6816 }
 0x2ec   :  { %v6819_v63 = vpop.eup %6818  ;;  %v1182_v2 = vadd.f32 1.0, %v6817_v62  ;;  %6820 = vpow2.f32 %v6588_v61  ;;  %v8667_v61 = vld [vmem:[#allocation13 + $0x180] sm:$0xff]  ;;  %v8670_v62 = vld [vmem:[#allocation13 + $0x188] sm:$0xff] }
 0x2ed   :  { %v1183_v3 = vadd.f32 1.0, %v6819_v63  ;;  %v8673_v63 = vld [vmem:[#allocation13 + $0x190] sm:$0xff] }
 0x2ee   :  { %6822 = vrcp.f32 %v1182_v2  ;;  %v1196_v52 = vand.u32 2147483648, %v1182_v2  ;;  %v1194_v9 = vand.u32 2147483647, %v1182_v2  ;;  %vm1190_vm0 = vweird.f32 %v1182_v2 }
 0x2ef   :  { %6824 = vrcp.f32 %v1183_v3  ;;  %v1211_v42 = vand.u32 2147483648, %v1183_v3  ;;  %v1209_v6 = vand.u32 2147483647, %v1183_v3  ;;  %vm1205_vm1 = vweird.f32 %v1183_v3 }
 0x2f0   :  { %v1197_v12 = vor.u32 1.1754944e-38, %v1196_v52  ;;  %vm1195_vm4 = vcmp.eq.f32.partialorder %v1194_v9, 8.507059e+37  ;;  %v8715_v52 = vld [vmem:[#allocation13 + $0x100] sm:$0xff]  ;;  %v8724_v9 = vld [vmem:[#allocation13 + $0x118] sm:$0xff] }
 0x2f1   :  { %v1212_v16 = vor.u32 1.1754944e-38, %v1211_v42  ;;  %vm1210_vm5 = vcmp.eq.f32.partialorder %v1209_v6, 8.507059e+37  ;;  %v8718_v42 = vld [vmem:[#allocation13 + $0x108] sm:$0xff] }
 0x2f2   :  { %v6821_v54 = vpop.eup %6820  ;;  %v8730_v6 = vld [vmem:[#allocation13 + $0xe8] sm:$0xff] }
 0x2f3   :  { %v1184_v8 = vadd.f32 1.0, %v6821_v54  ;;  %v8688_v54 = vld [vmem:[#allocation13 + $0x178] sm:$0xff] }
 0x2f4   :  { %v6823_v44 = vpop.eup %6822 }
 0x2f5   :  { %v6825_v49 = vpop.eup %6824  ;;  %v1186_v55 = vmul.f32 %v6823_v44, %v1182_v2  ;;  %6826 = vrcp.f32 %v1184_v8  ;;  %vm1191_vm14 = vweird.f32 %v6823_v44  ;;  %v1226_v48 = vand.u32 2147483648, %v1184_v8  ;;  %v8676_v2 = vld [vmem:[#allocation13 + $0x198] sm:$0xff] }
 0x2f6   :  { %v1201_v46 = vmul.f32 %v6825_v49, %v1183_v3  ;;  %6828 = vtanh.f32 %v1172_v53  ;;  %vm1206_vm15 = vweird.f32 %v6825_v49  ;;  %vm1192_vm2 = vmor %vm1190_vm0, %vm1191_vm14  ;;  %vm1220_vm7 = vweird.f32 %v1184_v8  ;;  %v8679_v3 = vld [vmem:[#allocation13 + $0x160] sm:$0xff]  ;;  %v8697_v53 = vld [vmem:[#allocation13 + $0x150] sm:$0xff] }
 0x2f7   :  { %v1187_v50 = vsub.f32 1.0, %v1186_v55  ;;  %vm1207_vm3 = vmor %vm1205_vm1, %vm1206_vm15  ;;  %v1224_v28 = vand.u32 2147483647, %v1184_v8  ;;  %v1227_v31 = vor.u32 1.1754944e-38, %v1226_v48  ;;  %v8703_v55 = vld [vmem:[#allocation13 + $0x120] sm:$0xff]  ;;  %v8784_v48 = vld [vmem:[#allocation13 + $0x78] sm:$0xff] }
 0x2f8   :  { %v1202_v14 = vsub.f32 1.0, %v1201_v46  ;;  %v8706_v46 = vld [vmem:[#allocation13 + $0x128] sm:$0xff]  ;;  %11140 = vst [vmem:[#allocation55_spill] sm:$0xff] %v8784_v48 }
 0x2f9   :  { %v1188_v41 = vmul.f32 %v6823_v44, %v1187_v50  ;;  %vm1225_vm9 = vcmp.eq.f32.partialorder %v1224_v28, 8.507059e+37  ;;  %v8709_v50 = vld [vmem:[#allocation13 + $0x130] sm:$0xff]  ;;  %v8787_v28 = vld [vmem:[#allocation13 + $0x40] sm:$0xff] }
 0x2fa   :  { %v1203_v39 = vmul.f32 %v6825_v49, %v1202_v14  ;;  %v8712_v14 = vld [vmem:[#allocation13 + $0x138] sm:$0xff]  ;;  %11141 = vst [vmem:[#allocation56_spill] sm:$0xff] %v8787_v28 }
 0x2fb   :  { %v6827_v7 = vpop.eup %6826  ;;  %v1189_v10 = vadd.f32 %v6823_v44, %v1188_v41  ;;  %v8721_v41 = vld [vmem:[#allocation13 + $0x110] sm:$0xff] }
 0x2fc   :  { %v1216_v11 = vmul.f32 %v6827_v7, %v1184_v8  ;;  %v1204_v13 = vadd.f32 %v6825_v49, %v1203_v39  ;;  %v6829_v18 = vpop.eup %6828  ;;  %vm1221_vm6 = vweird.f32 %v6827_v7  ;;  %v8691_v8 = vld [vmem:[#allocation13 + $0x140] sm:$0xff] }
 0x2fd   :  { %v1193_v17 = vsel %vm1192_vm2, %v6823_v44, %v1189_v10  ;;  %vm1222_vm8 = vmor %vm1220_vm7, %vm1221_vm6  ;;  %v8694_v44 = vld [vmem:[#allocation13 + $0x148] sm:$0xff]  ;;  %v8727_v39 = vld [vmem:[#allocation13 + $0xe0] sm:$0xff] }
 0x2fe   :  { %v1217_v19 = vsub.f32 1.0, %v1216_v11  ;;  %v1198_v20 = vsel %vm1195_vm4, %v1197_v12, %v1193_v17  ;;  %v1208_v21 = vsel %vm1207_vm3, %v6825_v49, %v1204_v13  ;;  %v8700_v49 = vld [vmem:[#allocation13 + $0x158] sm:$0xff]  ;;  %v8739_v11 = vld [vmem:[#allocation13 + $0xc0] sm:$0xff]  ;;  %v8742_v12 = vld [vmem:[#allocation13 + $0xc8] sm:$0xff] }
 0x2ff   :  { %v1213_v22 = vsel %vm1210_vm5, %v1212_v16, %v1208_v21  ;;  %v1235_v23 = vmul.f32 %v6829_v18, %v1198_v20  ;;  %v8736_v10 = vld [vmem:[#allocation13 + $0xf8] sm:$0xff]  ;;  %11126 = vst [vmem:[#allocation41_spill] sm:$0xff] %v8742_v12  ;;  %v8745_v13 = vld [vmem:[#allocation13 + $0xd0] sm:$0xff]  ;;  %v8751_v16 = vld [vmem:[#allocation13 + $0xa0] sm:$0xff] }
 0x300   :  { %v1234_v24 = vmul.f32 %v1232_v15, %v1213_v22  ;;  %v1218_v25 = vmul.f32 %v6827_v7, %v1217_v19  ;;  %11127 = vst [vmem:[#allocation42_spill] sm:$0xff] %v8745_v13  ;;  %v8748_v15 = vld [vmem:[#allocation13 + $0xd8] sm:$0xff]  ;;  %v8754_v17 = vld [vmem:[#allocation13 + $0xa8] sm:$0xff]  ;;  %v8757_v18 = vld [vmem:[#allocation13 + $0xb0] sm:$0xff] }
 0x301   :  { %11128 = vst [vmem:[#allocation43_spill] sm:$0xff] %v8748_v15  ;;  %v8760_v19 = vld [vmem:[#allocation13 + $0xb8] sm:$0xff]  ;;  %v8763_v20 = vld [vmem:[#allocation13 + $0x80] sm:$0xff]  ;;  %v8766_v21 = vld [vmem:[#allocation13 + $0x88] sm:$0xff] }
 0x302   :  { %v8648_v26 = vadd.f32 %v1235_v23, %v1234_v24  ;;  %v1219_v27 = vadd.f32 %v6827_v7, %v1218_v25  ;;  %11129 = vst [vmem:[#allocation44_spill] sm:$0xff] %v8751_v16  ;;  %v8769_v22 = vld [vmem:[#allocation13 + $0x90] sm:$0xff]  ;;  %v8772_v23 = vld [vmem:[#allocation13 + $0x98] sm:$0xff]  ;;  %v8775_v24 = vld [vmem:[#allocation13 + $0x60] sm:$0xff] }
 0x303   :  { %11130 = vst [vmem:[#allocation45_spill] sm:$0xff] %v8754_v17  ;;  %v8778_v25 = vld [vmem:[#allocation13 + $0x68] sm:$0xff] }
 0x304   :  { %6830 = vtanh.f32 %v8648_v26  ;;  %v1223_v29 = vsel %vm1222_vm8, %v6827_v7, %v1219_v27  ;;  %v8733_v7 = vld [vmem:[#allocation13 + $0xf0] sm:$0xff]  ;;  %11131 = vst [vmem:[#allocation46_spill] sm:$0xff] %v8757_v18 }
 0x305   :  { %v1228_v34 = vsel %vm1225_vm9, %v1227_v31, %v1223_v29  ;;  %11132 = vst [vmem:[#allocation47_spill] sm:$0xff] %v8760_v19  ;;  %v8781_v27 = vld [vmem:[#allocation13 + $0x70] sm:$0xff]  ;;  %v8790_v29 = vld [vmem:[#allocation13 + $0x48] sm:$0xff] }
 0x306   :  { %11133 = vst [vmem:[#allocation48_spill] sm:$0xff] %v8763_v20  ;;  %v8793_v31 = vld [vmem:[#allocation13 + $0x50] sm:$0xff] }
 0x307   :  { %11134 = vst [vmem:[#allocation49_spill] sm:$0xff] %v8766_v21 }
 0x308   :  { %11135 = vst [vmem:[#allocation50_spill] sm:$0xff] %v8769_v22 }
 0x309   :  { %11136 = vst [vmem:[#allocation51_spill] sm:$0xff] %v8772_v23 }
 0x30a   :  { %v6831_v33 = vpop.eup %6830  ;;  %11137 = vst [vmem:[#allocation52_spill] sm:$0xff] %v8775_v24 }
 0x30b   :  { %v1238_v35 = vmul.f32 %v6831_v33, %v1228_v34  ;;  %11138 = vst [vmem:[#allocation53_spill] sm:$0xff] %v8778_v25  ;;  %v8796_v33 = vld [vmem:[#allocation13 + $0x58] sm:$0xff]  ;;  %v8799_v34 = vld [vmem:[#allocation13 + $0x20] sm:$0xff] }
 0x30c   :  { %11139 = vst [vmem:[#allocation54_spill] sm:$0xff] %v8781_v27 }
 0x30d   :  { %1239 = vst [vmem:[#allocation2] sm:$0x30] %v1238_v35  ;;  %v1241_v36 = vrot.slane %v1238_v35, 4  ;;  %v8802_v35 = vld [vmem:[#allocation13 + $0x28] sm:$0xff] }
 0x30e   :  { %11142 = vst [vmem:[#allocation57_spill] sm:$0xff] %v8790_v29 }
 0x30f   :  { %1259 = vmatmul.f32.vlgmr.msrb.gmra.mxu0 %v1241_v36  ;;  %1279 = vmatmul.f32.vlgmr.msrb.gmra.mxu1 %v1241_v36  ;;  %11143 = vst [vmem:[#allocation58_spill] sm:$0xff] %v8793_v31 }
 0x310   :  { %1299 = vmatmul.f32.vlgmr.msrb.gmra.mxu2 %v1241_v36  ;;  %1319 = vmatmul.f32.vlgmr.msrb.gmra.mxu3 %v1241_v36  ;;  %11144 = vst [vmem:[#allocation59_spill] sm:$0xff] %v8796_v33  ;;  %v8805_v36 = vld [vmem:[#allocation13 + $0x30] sm:$0xff] }
 0x311   :  { %1560 = vmatpush.msrb.mxu0 %v8559_v37  ;;  %1580 = vmatpush.msrb.mxu1 %v8562_v38  ;;  %11145 = vst [vmem:[#allocation60_spill] sm:$0xff] %v8799_v34 }
 0x312   :  { %1600 = vmatpush.msrb.mxu2 %v8565_v5  ;;  %1620 = vmatpush.msrb.mxu3 %v8568_v40  ;;  %11146 = vst [vmem:[#allocation61_spill] sm:$0xff] %v8802_v35 }
 0x313   :  { %1561 = vmatpush.msrb.mxu0 %v8571_v43  ;;  %1581 = vmatpush.msrb.mxu1 %v8574_v56  ;;  %11147 = vst [vmem:[#allocation62_spill] sm:$0xff] %v8805_v36 }
 0x314   :  { %1601 = vmatpush.msrb.mxu2 %v8577_v1  ;;  %1621 = vmatpush.msrb.mxu3 %v8580_v0 }
 0x315   :  { %1562 = vmatpush.msrb.mxu0 %v8583_v51  ;;  %1582 = vmatpush.msrb.mxu1 %v8586_v57 }
 0x316   :  { %1602 = vmatpush.msrb.mxu2 %v8661_v58  ;;  %1622 = vmatpush.msrb.mxu3 %v8664_v60 }
 0x317   :  { %1563 = vmatpush.msrb.mxu0 %v8667_v61  ;;  %1583 = vmatpush.msrb.mxu1 %v8670_v62 }
 0x318   :  { %1603 = vmatpush.msrb.mxu2 %v8673_v63  ;;  %1623 = vmatpush.msrb.mxu3 %v8676_v2 }
 0x319   :  { %1564 = vmatpush.msrb.mxu0 %v8679_v3  ;;  %1584 = vmatpush.msrb.mxu1 %v8682_v4 }
 0x31a   :  { %1604 = vmatpush.msrb.mxu2 %v8685_v45  ;;  %1624 = vmatpush.msrb.mxu3 %v8688_v54 }
 0x31b   :  { %1565 = vmatpush.msrb.mxu0 %v8691_v8  ;;  %1585 = vmatpush.msrb.mxu1 %v8694_v44 }
 0x31c   :  { %1605 = vmatpush.msrb.mxu2 %v8697_v53  ;;  %1625 = vmatpush.msrb.mxu3 %v8700_v49 }
 0x31d   :  { %1566 = vmatpush.msrb.mxu0 %v8703_v55  ;;  %1586 = vmatpush.msrb.mxu1 %v8706_v46 }
 0x31e   :  { %1606 = vmatpush.msrb.mxu2 %v8709_v50  ;;  %1626 = vmatpush.msrb.mxu3 %v8712_v14 }
 0x31f   :  { %1567 = vmatpush.msrb.mxu0 %v8715_v52  ;;  %1587 = vmatpush.msrb.mxu1 %v8718_v42 }
 0x320   :  { %1607 = vmatpush.msrb.mxu2 %v8721_v41  ;;  %1627 = vmatpush.msrb.mxu3 %v8724_v9 }
 0x321   :  { %1568 = vmatpush.msrb.mxu0 %v8727_v39  ;;  %1588 = vmatpush.msrb.mxu1 %v8730_v6 }
 0x322   :  { %1608 = vmatpush.msrb.mxu2 %v8733_v7  ;;  %1628 = vmatpush.msrb.mxu3 %v8736_v10 }
 0x323   :  { %1569 = vmatpush.msrb.mxu0 %v8739_v11  ;;  %1589 = vmatpush.msrb.mxu1 %v8742_v12 }
 0x324   :  { %1609 = vmatpush.msrb.mxu2 %v8745_v13  ;;  %1629 = vmatpush.msrb.mxu3 %v8748_v15 }
 0x325   :  { %1570 = vmatpush.msrb.mxu0 %v8751_v16  ;;  %1590 = vmatpush.msrb.mxu1 %v8754_v17 }
 0x326   :  { %1610 = vmatpush.msrb.mxu2 %v8757_v18  ;;  %1630 = vmatpush.msrb.mxu3 %v8760_v19 }
 0x327   :  { %1571 = vmatpush.msrb.mxu0 %v8763_v20  ;;  %1591 = vmatpush.msrb.mxu1 %v8766_v21 }
 0x328   :  { %1611 = vmatpush.msrb.mxu2 %v8769_v22  ;;  %1631 = vmatpush.msrb.mxu3 %v8772_v23 }
 0x329   :  { %1572 = vmatpush.msrb.mxu0 %v8775_v24  ;;  %1592 = vmatpush.msrb.mxu1 %v8778_v25 }
 0x32a   :  { %1612 = vmatpush.msrb.mxu2 %v8781_v27  ;;  %1632 = vmatpush.msrb.mxu3 %v8784_v48 }
 0x32b   :  { %1573 = vmatpush.msrb.mxu0 %v8787_v28  ;;  %1593 = vmatpush.msrb.mxu1 %v8790_v29  ;;  %v8808_v29 = vld [vmem:[#allocation13 + $0x38] sm:$0xff] }
 0x32c   :  { %1613 = vmatpush.msrb.mxu2 %v8793_v31  ;;  %1633 = vmatpush.msrb.mxu3 %v8796_v33  ;;  %11148 = vst [vmem:[#allocation63_spill] sm:$0xff] %v8808_v29  ;;  %v8811_v31 = vld [vmem:[#allocation13] sm:$0xff]  ;;  %v8814_v33 = vld [vmem:[#allocation13 + $0x8] sm:$0xff] }
 0x32d   :  { %1574 = vmatpush.msrb.mxu0 %v8799_v34  ;;  %1594 = vmatpush.msrb.mxu1 %v8802_v35  ;;  %11149 = vst [vmem:[#allocation64_spill] sm:$0xff] %v8811_v31  ;;  %v8817_v34 = vld [vmem:[#allocation13 + $0x10] sm:$0xff]  ;;  %v8820_v35 = vld [vmem:[#allocation13 + $0x18] sm:$0xff] }
 0x32e   :  { %1614 = vmatpush.msrb.mxu2 %v8805_v36  ;;  %1634 = vmatpush.msrb.mxu3 %v8808_v29  ;;  %11150 = vst [vmem:[#allocation65_spill] sm:$0xff] %v8814_v33 }
 0x32f   :  { %1575 = vmatpush.msrb.mxu0 %v8811_v31  ;;  %1595 = vmatpush.msrb.mxu1 %v8814_v33  ;;  %11151 = vst [vmem:[#allocation66_spill] sm:$0xff] %v8817_v34 }
 0x330   :  { %1615 = vmatpush.msrb.mxu2 %v8817_v34  ;;  %11152 = vst [vmem:[#allocation67_spill] sm:$0xff] %v8820_v35  ;;  %1635 = vmatpush.msrb.mxu3 %v8820_v35 }
 0x38c   :  { %v1260_v36 = vpop.f32.mrf.mxu0  ;;  %v1280_v28 = vpop.f32.mrf.mxu1 }
 0x38d   :  { %v1327_v48 = vrot.slane %v1260_v36, 2  ;;  %v1328_v29 = vrot.slane %v1280_v28, 2 }
 0x38f   :  { %v1335_v27 = vadd.f32 %v1327_v48, %v11122_v30  ;;  %v1336_v31 = vadd.f32 %v1328_v29, %v11123_v32 }
 0x391   :  { %v6589_v25 = vmul.f32 -1.442695, %v1335_v27  ;;  %v6590_v24 = vmul.f32 -1.442695, %v1336_v31 }
 0x393   :  { %6832 = vpow2.f32 %v6589_v25  ;;  %v1300_v33 = vpop.f32.mrf.mxu2  ;;  %v1320_v36 = vpop.f32.mrf.mxu3 }
 0x394   :  { %6834 = vpow2.f32 %v6590_v24  ;;  %v1329_v23 = vrot.slane %v1300_v33, 2  ;;  %v1330_v30 = vrot.slane %v1320_v36, 2 }
 0x396   :  { %v1337_v34 = vadd.f32 %v1329_v23, %v11124_v59  ;;  %v1338_v25 = vadd.f32 %v1330_v30, %v11125_v47 }
 0x398   :  { %v6591_v22 = vmul.f32 -1.442695, %v1337_v34 }
 0x399   :  { %v6833_v21 = vpop.eup %6832 }
 0x39a   :  { %v6835_v20 = vpop.eup %6834  ;;  %v1348_v35 = vadd.f32 1.0, %v6833_v21  ;;  %6836 = vpow2.f32 %v6591_v22 }
 0x39b   :  { %v1349_v19 = vadd.f32 1.0, %v6835_v20 }
 0x39c   :  { %6838 = vrcp.f32 %v1348_v35  ;;  %v1362_v31 = vand.u32 2147483648, %v1348_v35  ;;  %v1360_v20 = vand.u32 2147483647, %v1348_v35  ;;  %vm1356_vm12 = vweird.f32 %v1348_v35 }
 0x39d   :  { %6840 = vrcp.f32 %v1349_v19  ;;  %v1377_v21 = vand.u32 2147483648, %v1349_v19  ;;  %v1375_v34 = vand.u32 2147483647, %v1349_v19  ;;  %vm1371_vm13 = vweird.f32 %v1349_v19 }
 0x39e   :  { %v1363_v30 = vor.u32 1.1754944e-38, %v1362_v31  ;;  %vm1361_vm0 = vcmp.eq.f32.partialorder %v1360_v20, 8.507059e+37 }
 0x39f   :  { %vm1376_vm1 = vcmp.eq.f32.partialorder %v1375_v34, 8.507059e+37  ;;  %v11159_v34 = vld [vmem:[#allocation47_spill] sm:$0xff] }
 0x3a0   :  { %v6837_v48 = vpop.eup %6836 }
 0x3a1   :  { %v1350_v32 = vadd.f32 1.0, %v6837_v48 }
 0x3a2   :  { %v6839_v27 = vpop.eup %6838 }
 0x3a3   :  { %v6841_v28 = vpop.eup %6840  ;;  %v1352_v24 = vmul.f32 %v6839_v27, %v1348_v35  ;;  %6842 = vrcp.f32 %v1350_v32  ;;  %vm1357_vm10 = vweird.f32 %v6839_v27  ;;  %vm1386_vm3 = vweird.f32 %v1350_v32 }
 0x3a4   :  { %v1367_v29 = vmul.f32 %v6841_v28, %v1349_v19  ;;  %6844 = vtanh.f32 %v1338_v25  ;;  %vm1372_vm11 = vweird.f32 %v6841_v28  ;;  %vm1358_vm14 = vmor %vm1356_vm12, %vm1357_vm10  ;;  %v1390_v31 = vand.u32 2147483647, %v1350_v32 }
 0x3a5   :  { %v1353_v59 = vsub.f32 1.0, %v1352_v24  ;;  %v1398_v24 = vrot.slane %v8648_v26, 6  ;;  %vm1373_vm15 = vmor %vm1371_vm13, %vm1372_vm11  ;;  %v1392_v26 = vand.u32 2147483648, %v1350_v32 }
 0x3a6   :  { %v1368_v23 = vsub.f32 1.0, %v1367_v29  ;;  %v1378_v29 = vor.u32 1.1754944e-38, %v1377_v21  ;;  %vm1391_vm5 = vcmp.eq.f32.partialorder %v1390_v31, 8.507059e+37  ;;  %v11172_v31 = vld [vmem:[#allocation60_spill] sm:$0xff] }
 0x3a7   :  { %v1354_v22 = vmul.f32 %v6839_v27, %v1353_v59  ;;  %v1393_v21 = vor.u32 1.1754944e-38, %v1392_v26  ;;  %v11171_v26 = vld [vmem:[#allocation59_spill] sm:$0xff] }
 0x3a8   :  { %v1369_v33 = vmul.f32 %v6841_v28, %v1368_v23 }
 0x3a9   :  { %v6843_v36 = vpop.eup %6842  ;;  %v1355_v48 = vadd.f32 %v6839_v27, %v1354_v22 }
 0x3aa   :  { %v1382_v47 = vmul.f32 %v6843_v36, %v1350_v32  ;;  %v1370_v18 = vadd.f32 %v6841_v28, %v1369_v33  ;;  %v6845_v59 = vpop.eup %6844  ;;  %vm1387_vm2 = vweird.f32 %v6843_v36  ;;  %v11157_v32 = vld [vmem:[#allocation45_spill] sm:$0xff]  ;;  %v11158_v33 = vld [vmem:[#allocation46_spill] sm:$0xff] }
 0x3ab   :  { %v1359_v25 = vsel %vm1358_vm14, %v6839_v27, %v1355_v48  ;;  %vm1388_vm4 = vmor %vm1386_vm3, %vm1387_vm2  ;;  %v11161_v48 = vld [vmem:[#allocation49_spill] sm:$0xff] }
 0x3ac   :  { %v1383_v17 = vsub.f32 1.0, %v1382_v47  ;;  %v1364_v16 = vsel %vm1361_vm0, %v1363_v30, %v1359_v25  ;;  %v1374_v23 = vsel %vm1373_vm15, %v6841_v28, %v1370_v18  ;;  %v11162_v47 = vld [vmem:[#allocation50_spill] sm:$0xff]  ;;  %v11163_v30 = vld [vmem:[#allocation51_spill] sm:$0xff] }
 0x3ad   :  { %v1379_v15 = vsel %vm1376_vm1, %v1378_v29, %v1374_v23  ;;  %v1401_v13 = vmul.f32 %v6845_v59, %v1364_v16  ;;  %v11165_v29 = vld [vmem:[#allocation53_spill] sm:$0xff]  ;;  %v11166_v25 = vld [vmem:[#allocation54_spill] sm:$0xff]  ;;  %v11167_v59 = vld [vmem:[#allocation55_spill] sm:$0xff] }
 0x3ae   :  { %v1400_v22 = vmul.f32 %v1398_v24, %v1379_v15  ;;  %v1384_v35 = vmul.f32 %v6843_v36, %v1383_v17  ;;  %v11155_v15 = vld [vmem:[#allocation43_spill] sm:$0xff]  ;;  %v11156_v17 = vld [vmem:[#allocation44_spill] sm:$0xff] }
 0x3af   :  { %v11164_v24 = vld [vmem:[#allocation52_spill] sm:$0xff] }
 0x3b0   :  { %v8828_v19 = vadd.f32 %v1401_v13, %v1400_v22  ;;  %v1385_v12 = vadd.f32 %v6843_v36, %v1384_v35  ;;  %v11154_v13 = vld [vmem:[#allocation42_spill] sm:$0xff]  ;;  %v11168_v23 = vld [vmem:[#allocation56_spill] sm:$0xff]  ;;  %v11169_v22 = vld [vmem:[#allocation57_spill] sm:$0xff] }
 0x3b1   :  { %v11170_v35 = vld [vmem:[#allocation58_spill] sm:$0xff] }
 0x3b2   :  { %6846 = vtanh.f32 %v8828_v19  ;;  %v1389_v27 = vsel %vm1388_vm4, %v6843_v36, %v1385_v12  ;;  %v11153_v12 = vld [vmem:[#allocation41_spill] sm:$0xff]  ;;  %v11160_v36 = vld [vmem:[#allocation48_spill] sm:$0xff] }
 0x3b3   :  { %v1394_v18 = vsel %vm1391_vm5, %v1393_v21, %v1389_v27  ;;  %v11173_v27 = vld [vmem:[#allocation61_spill] sm:$0xff]  ;;  %v11174_v21 = vld [vmem:[#allocation62_spill] sm:$0xff] }
 0x3b8   :  { %v6847_v20 = vpop.eup %6846 }
 0x3b9   :  { %v1404_v28 = vmul.f32 %v6847_v20, %v1394_v18  ;;  %v11175_v20 = vld [vmem:[#allocation63_spill] sm:$0xff]  ;;  %v11176_v18 = vld [vmem:[#allocation64_spill] sm:$0xff] }
 0x3bb   :  { %1405 = vst [vmem:[#allocation2] sm:$0xc0] %v1404_v28  ;;  %v1407_v16 = vrot.slane %v1404_v28, 6  ;;  %v11177_v28 = vld [vmem:[#allocation65_spill] sm:$0xff] }
 0x3bd   :  { %1425 = vmatmul.f32.vlgmr.msra.gmra.mxu0 %v1407_v16  ;;  %1445 = vmatmul.f32.vlgmr.msra.gmra.mxu1 %v1407_v16 }
 0x3be   :  { %1465 = vmatmul.f32.vlgmr.msra.gmra.mxu2 %v1407_v16  ;;  %1485 = vmatmul.f32.vlgmr.msra.gmra.mxu3 %v1407_v16  ;;  %v11178_v16 = vld [vmem:[#allocation66_spill] sm:$0xff] }
 0x3bf   :  { %1726 = vmatpush.msra.mxu0 %v8559_v37  ;;  %1746 = vmatpush.msra.mxu1 %v8562_v38 }
 0x3c0   :  { %1766 = vmatpush.msra.mxu2 %v8565_v5  ;;  %1786 = vmatpush.msra.mxu3 %v8568_v40 }
 0x3c1   :  { %1727 = vmatpush.msra.mxu0 %v8571_v43  ;;  %1747 = vmatpush.msra.mxu1 %v8574_v56 }
 0x3c2   :  { %1767 = vmatpush.msra.mxu2 %v8577_v1  ;;  %1787 = vmatpush.msra.mxu3 %v8580_v0 }
 0x3c3   :  { %1728 = vmatpush.msra.mxu0 %v8583_v51  ;;  %1748 = vmatpush.msra.mxu1 %v8586_v57 }
 0x3c4   :  { %1768 = vmatpush.msra.mxu2 %v8661_v58  ;;  %1788 = vmatpush.msra.mxu3 %v8664_v60 }
 0x3c5   :  { %1729 = vmatpush.msra.mxu0 %v8667_v61  ;;  %1749 = vmatpush.msra.mxu1 %v8670_v62 }
 0x3c6   :  { %1769 = vmatpush.msra.mxu2 %v8673_v63  ;;  %1789 = vmatpush.msra.mxu3 %v8676_v2 }
 0x3c7   :  { %1730 = vmatpush.msra.mxu0 %v8679_v3  ;;  %1750 = vmatpush.msra.mxu1 %v8682_v4 }
 0x3c8   :  { %1770 = vmatpush.msra.mxu2 %v8685_v45  ;;  %1790 = vmatpush.msra.mxu3 %v8688_v54 }
 0x3c9   :  { %1731 = vmatpush.msra.mxu0 %v8691_v8  ;;  %1751 = vmatpush.msra.mxu1 %v8694_v44 }
 0x3ca   :  { %1771 = vmatpush.msra.mxu2 %v8697_v53  ;;  %1791 = vmatpush.msra.mxu3 %v8700_v49 }
 0x3cb   :  { %1732 = vmatpush.msra.mxu0 %v8703_v55  ;;  %1752 = vmatpush.msra.mxu1 %v8706_v46 }
 0x3cc   :  { %1772 = vmatpush.msra.mxu2 %v8709_v50  ;;  %1792 = vmatpush.msra.mxu3 %v8712_v14 }
 0x3cd   :  { %1733 = vmatpush.msra.mxu0 %v8715_v52  ;;  %1753 = vmatpush.msra.mxu1 %v8718_v42 }
 0x3ce   :  { %1773 = vmatpush.msra.mxu2 %v8721_v41  ;;  %1793 = vmatpush.msra.mxu3 %v8724_v9 }
 0x3cf   :  { %1734 = vmatpush.msra.mxu0 %v8727_v39  ;;  %1754 = vmatpush.msra.mxu1 %v8730_v6 }
 0x3d0   :  { %1774 = vmatpush.msra.mxu2 %v8733_v7  ;;  %1794 = vmatpush.msra.mxu3 %v8736_v10 }
 0x3d1   :  { %1735 = vmatpush.msra.mxu0 %v8739_v11  ;;  %1755 = vmatpush.msra.mxu1 %v11153_v12 }
 0x3d2   :  { %1775 = vmatpush.msra.mxu2 %v11154_v13  ;;  %1795 = vmatpush.msra.mxu3 %v11155_v15 }
 0x3d3   :  { %1736 = vmatpush.msra.mxu0 %v11156_v17  ;;  %1756 = vmatpush.msra.mxu1 %v11157_v32 }
 0x3d4   :  { %1776 = vmatpush.msra.mxu2 %v11158_v33  ;;  %1796 = vmatpush.msra.mxu3 %v11159_v34 }
 0x3d5   :  { %1737 = vmatpush.msra.mxu0 %v11160_v36  ;;  %1757 = vmatpush.msra.mxu1 %v11161_v48 }
 0x3d6   :  { %1777 = vmatpush.msra.mxu2 %v11162_v47  ;;  %1797 = vmatpush.msra.mxu3 %v11163_v30 }
 0x3d7   :  { %1738 = vmatpush.msra.mxu0 %v11164_v24  ;;  %1758 = vmatpush.msra.mxu1 %v11165_v29 }
 0x3d8   :  { %1778 = vmatpush.msra.mxu2 %v11166_v25  ;;  %1798 = vmatpush.msra.mxu3 %v11167_v59  ;;  %v11180_v59 = vld [vmem:[#allocation70_spill] sm:$0xff]  ;;  %v11181_v25 = vld [vmem:[#allocation71_spill] sm:$0xff] }
 0x3d9   :  { %1739 = vmatpush.msra.mxu0 %v11168_v23  ;;  %1759 = vmatpush.msra.mxu1 %v11169_v22  ;;  %v11179_v23 = vld [vmem:[#allocation67_spill] sm:$0xff] }
 0x3da   :  { %1779 = vmatpush.msra.mxu2 %v11170_v35  ;;  %1799 = vmatpush.msra.mxu3 %v11171_v26 }
 0x3db   :  { %1740 = vmatpush.msra.mxu0 %v11172_v31  ;;  %1760 = vmatpush.msra.mxu1 %v11173_v27 }
 0x3dc   :  { %1780 = vmatpush.msra.mxu2 %v11174_v21  ;;  %1800 = vmatpush.msra.mxu3 %v11175_v20  ;;  %v11182_v20 = vld [vmem:[#allocation73_spill] sm:$0xff] }
 0x3dd   :  { %1741 = vmatpush.msra.mxu0 %v11176_v18  ;;  %1761 = vmatpush.msra.mxu1 %v11177_v28 }
 0x3de   :  { %1781 = vmatpush.msra.mxu2 %v11178_v16  ;;  %1801 = vmatpush.msra.mxu3 %v11179_v23 }
 0x43a   :  { %v1426_v22 = vpop.f32.mrf.mxu0  ;;  %v1446_v35 = vpop.f32.mrf.mxu1 }
 0x43b   :  { %v1489_v26 = vadd.f32 %v1426_v22, %v11180_v59  ;;  %v1490_v31 = vadd.f32 %v1446_v35, %v11181_v25  ;;  %v11183_v35 = vld [vmem:[#allocation76_spill] sm:$0xff] }
 0x43d   :  { %v6592_v29 = vmul.f32 -1.442695, %v1489_v26  ;;  %v6593_v27 = vmul.f32 -1.442695, %v1490_v31 }
 0x43f   :  { %6848 = vpow2.f32 %v6592_v29 }
 0x440   :  { %6850 = vpow2.f32 %v6593_v27 }
 0x441   :  { %v1466_v21 = vpop.f32.mrf.mxu2  ;;  %v1486_v23 = vpop.f32.mrf.mxu3 }
 0x442   :  { %v1491_v24 = vadd.f32 %v1466_v21, %v11182_v20  ;;  %v1492_v26 = vadd.f32 %v1486_v23, %v11183_v35 }
 0x444   :  { %v6594_v18 = vmul.f32 -1.442695, %v1491_v24 }
 0x445   :  { %v6849_v30 = vpop.eup %6848 }
 0x446   :  { %v6851_v28 = vpop.eup %6850  ;;  %v1502_v47 = vadd.f32 1.0, %v6849_v30  ;;  %6852 = vpow2.f32 %v6594_v18 }
 0x447   :  { %v1503_v16 = vadd.f32 1.0, %v6851_v28 }
 0x448   :  { %6854 = vrcp.f32 %v1502_v47  ;;  %v1516_v24 = vand.u32 2147483648, %v1502_v47  ;;  %v1514_v18 = vand.u32 2147483647, %v1502_v47  ;;  %vm1510_vm8 = vweird.f32 %v1502_v47 }
 0x449   :  { %6856 = vrcp.f32 %v1503_v16  ;;  %v1531_v20 = vand.u32 2147483648, %v1503_v16  ;;  %v1529_v36 = vand.u32 2147483647, %v1503_v16  ;;  %vm1525_vm9 = vweird.f32 %v1503_v16 }
 0x44a   :  { %v1517_v35 = vor.u32 1.1754944e-38, %v1516_v24  ;;  %vm1515_vm12 = vcmp.eq.f32.partialorder %v1514_v18, 8.507059e+37 }
 0x44b   :  { %vm1530_vm13 = vcmp.eq.f32.partialorder %v1529_v36, 8.507059e+37 }
 0x44c   :  { %v6853_v48 = vpop.eup %6852 }
 0x44d   :  { %v1504_v22 = vadd.f32 1.0, %v6853_v48 }
 0x44e   :  { %v6855_v59 = vpop.eup %6854 }
 0x44f   :  { %v6857_v31 = vpop.eup %6856  ;;  %v1506_v29 = vmul.f32 %v6855_v59, %v1502_v47  ;;  %6858 = vrcp.f32 %v1504_v22  ;;  %vm1511_vm6 = vweird.f32 %v6855_v59  ;;  %v1546_v24 = vand.u32 2147483648, %v1504_v22 }
 0x450   :  { %v1521_v27 = vmul.f32 %v6857_v31, %v1503_v16  ;;  %6860 = vtanh.f32 %v1492_v26  ;;  %vm1526_vm7 = vweird.f32 %v6857_v31  ;;  %vm1512_vm10 = vmor %vm1510_vm8, %vm1511_vm6  ;;  %v1552_v26 = vrot.slane %v8828_v19, 6 }
 0x451   :  { %v1507_v25 = vsub.f32 1.0, %v1506_v29  ;;  %vm1527_vm11 = vmor %vm1525_vm9, %vm1526_vm7  ;;  %v1532_v29 = vor.u32 1.1754944e-38, %v1531_v20  ;;  %vm1540_vm15 = vweird.f32 %v1504_v22  ;;  %v1547_v20 = vor.u32 1.1754944e-38, %v1546_v24 }
 0x452   :  { %v1522_v21 = vsub.f32 1.0, %v1521_v27 }
 0x453   :  { %v1508_v30 = vmul.f32 %v6855_v59, %v1507_v25 }
 0x454   :  { %v1523_v28 = vmul.f32 %v6857_v31, %v1522_v21 }
 0x455   :  { %v6859_v34 = vpop.eup %6858  ;;  %v1509_v48 = vadd.f32 %v6855_v59, %v1508_v30 }
 0x456   :  { %v1536_v23 = vmul.f32 %v6859_v34, %v1504_v22  ;;  %v1524_v33 = vadd.f32 %v6857_v31, %v1523_v28  ;;  %v6861_v25 = vpop.eup %6860  ;;  %vm1541_vm14 = vweird.f32 %v6859_v34 }
 0x457   :  { %v1513_v27 = vsel %vm1512_vm10, %v6855_v59, %v1509_v48  ;;  %v1544_v59 = vand.u32 2147483647, %v1504_v22  ;;  %vm1542_vm0 = vmor %vm1540_vm15, %vm1541_vm14 }
 0x458   :  { %v1537_v32 = vsub.f32 1.0, %v1536_v23  ;;  %v1518_v17 = vsel %vm1515_vm12, %v1517_v35, %v1513_v27  ;;  %v1528_v21 = vsel %vm1527_vm11, %v6857_v31, %v1524_v33 }
 0x459   :  { %v1533_v15 = vsel %vm1530_vm13, %v1532_v29, %v1528_v21  ;;  %v1555_v13 = vmul.f32 %v6861_v25, %v1518_v17  ;;  %vm1545_vm1 = vcmp.eq.f32.partialorder %v1544_v59, 8.507059e+37 }
 0x45a   :  { %v1538_v30 = vmul.f32 %v6859_v34, %v1537_v32  ;;  %v1554_v47 = vmul.f32 %v1552_v26, %v1533_v15  ;;  %v11213_v15 = vld [vmem:[#allocation73_spill] sm:$0xff]  ;;  %v11214_v26 = vld [vmem:[#allocation76_spill] sm:$0xff] }
 0x45c   :  { %v8900_v16 = vadd.f32 %v1555_v13, %v1554_v47  ;;  %v1539_v12 = vadd.f32 %v6859_v34, %v1538_v30 }
 0x45e   :  { %6862 = vtanh.f32 %v8900_v16  ;;  %v1543_v19 = vsel %vm1542_vm0, %v6859_v34, %v1539_v12 }
 0x45f   :  { %v1548_v33 = vsel %vm1545_vm1, %v1547_v20, %v1543_v19 }
 0x464   :  { %v6863_v35 = vpop.eup %6862 }
 0x465   :  { %v1558_v36 = vmul.f32 %v6863_v35, %v1548_v33 }
 0x467   :  { %1559 = vst [vmem:[#allocation2 + $0x8] sm:$0x3] %v1558_v36  ;;  %1576 = vmatmul.f32.vlgmr.msrb.gmra.mxu0 %v1558_v36  ;;  %1596 = vmatmul.f32.vlgmr.msrb.gmra.mxu1 %v1558_v36 }
 0x468   :  { %1616 = vmatmul.f32.vlgmr.msrb.gmra.mxu2 %v1558_v36  ;;  %1636 = vmatmul.f32.vlgmr.msrb.gmra.mxu3 %v1558_v36 }
 0x469   :  { %1892 = vmatpush.msrb.mxu0 %v8559_v37  ;;  %1912 = vmatpush.msrb.mxu1 %v8562_v38  ;;  %v11184_v37 = vld [vmem:[#allocation41_spill] sm:$0xff]  ;;  %v11185_v38 = vld [vmem:[#allocation42_spill] sm:$0xff] }
 0x46a   :  { %1932 = vmatpush.msrb.mxu2 %v8565_v5  ;;  %1952 = vmatpush.msrb.mxu3 %v8568_v40  ;;  %v11186_v5 = vld [vmem:[#allocation43_spill] sm:$0xff]  ;;  %v11187_v40 = vld [vmem:[#allocation44_spill] sm:$0xff] }
 0x46b   :  { %1893 = vmatpush.msrb.mxu0 %v8571_v43  ;;  %1913 = vmatpush.msrb.mxu1 %v8574_v56  ;;  %v11188_v43 = vld [vmem:[#allocation45_spill] sm:$0xff]  ;;  %v11189_v56 = vld [vmem:[#allocation46_spill] sm:$0xff] }
 0x46c   :  { %1933 = vmatpush.msrb.mxu2 %v8577_v1  ;;  %1953 = vmatpush.msrb.mxu3 %v8580_v0  ;;  %v11190_v1 = vld [vmem:[#allocation47_spill] sm:$0xff]  ;;  %v11191_v0 = vld [vmem:[#allocation48_spill] sm:$0xff] }
 0x46d   :  { %1894 = vmatpush.msrb.mxu0 %v8583_v51  ;;  %1914 = vmatpush.msrb.mxu1 %v8586_v57  ;;  %v11192_v51 = vld [vmem:[#allocation49_spill] sm:$0xff]  ;;  %v11193_v57 = vld [vmem:[#allocation50_spill] sm:$0xff] }
 0x46e   :  { %1934 = vmatpush.msrb.mxu2 %v8661_v58  ;;  %1954 = vmatpush.msrb.mxu3 %v8664_v60  ;;  %v11194_v58 = vld [vmem:[#allocation51_spill] sm:$0xff]  ;;  %v11195_v60 = vld [vmem:[#allocation52_spill] sm:$0xff] }
 0x46f   :  { %1895 = vmatpush.msrb.mxu0 %v8667_v61  ;;  %1915 = vmatpush.msrb.mxu1 %v8670_v62  ;;  %v11196_v61 = vld [vmem:[#allocation53_spill] sm:$0xff]  ;;  %v11197_v62 = vld [vmem:[#allocation54_spill] sm:$0xff] }
 0x470   :  { %1935 = vmatpush.msrb.mxu2 %v8673_v63  ;;  %1955 = vmatpush.msrb.mxu3 %v8676_v2  ;;  %v11198_v63 = vld [vmem:[#allocation55_spill] sm:$0xff]  ;;  %v11199_v2 = vld [vmem:[#allocation56_spill] sm:$0xff] }
 0x471   :  { %1896 = vmatpush.msrb.mxu0 %v8679_v3  ;;  %1916 = vmatpush.msrb.mxu1 %v8682_v4  ;;  %v11200_v3 = vld [vmem:[#allocation57_spill] sm:$0xff]  ;;  %v11201_v4 = vld [vmem:[#allocation58_spill] sm:$0xff] }
 0x472   :  { %1936 = vmatpush.msrb.mxu2 %v8685_v45  ;;  %1956 = vmatpush.msrb.mxu3 %v8688_v54  ;;  %v11202_v45 = vld [vmem:[#allocation59_spill] sm:$0xff]  ;;  %v11203_v54 = vld [vmem:[#allocation60_spill] sm:$0xff] }
 0x473   :  { %1897 = vmatpush.msrb.mxu0 %v8691_v8  ;;  %1917 = vmatpush.msrb.mxu1 %v8694_v44  ;;  %v11204_v8 = vld [vmem:[#allocation61_spill] sm:$0xff]  ;;  %v11205_v44 = vld [vmem:[#allocation62_spill] sm:$0xff] }
 0x474   :  { %1937 = vmatpush.msrb.mxu2 %v8697_v53  ;;  %1957 = vmatpush.msrb.mxu3 %v8700_v49  ;;  %v11206_v53 = vld [vmem:[#allocation63_spill] sm:$0xff]  ;;  %v11207_v49 = vld [vmem:[#allocation64_spill] sm:$0xff] }
 0x475   :  { %1898 = vmatpush.msrb.mxu0 %v8703_v55  ;;  %1918 = vmatpush.msrb.mxu1 %v8706_v46  ;;  %v11208_v55 = vld [vmem:[#allocation65_spill] sm:$0xff]  ;;  %v11209_v46 = vld [vmem:[#allocation66_spill] sm:$0xff] }
 0x476   :  { %1938 = vmatpush.msrb.mxu2 %v8709_v50  ;;  %1958 = vmatpush.msrb.mxu3 %v8712_v14  ;;  %v11210_v50 = vld [vmem:[#allocation67_spill] sm:$0xff] }
 0x477   :  { %1899 = vmatpush.msrb.mxu0 %v8715_v52  ;;  %1919 = vmatpush.msrb.mxu1 %v8718_v42 }
 0x478   :  { %1939 = vmatpush.msrb.mxu2 %v8721_v41  ;;  %1959 = vmatpush.msrb.mxu3 %v8724_v9  ;;  %v11211_v9 = vld [vmem:[#allocation70_spill] sm:$0xff] }
 0x479   :  { %1900 = vmatpush.msrb.mxu0 %v8727_v39  ;;  %1920 = vmatpush.msrb.mxu1 %v8730_v6  ;;  %v11212_v6 = vld [vmem:[#allocation71_spill] sm:$0xff] }
 0x47a   :  { %1940 = vmatpush.msrb.mxu2 %v8733_v7  ;;  %1960 = vmatpush.msrb.mxu3 %v8736_v10 }
 0x47b   :  { %1901 = vmatpush.msrb.mxu0 %v8739_v11  ;;  %1921 = vmatpush.msrb.mxu1 %v11184_v37 }
 0x47c   :  { %1941 = vmatpush.msrb.mxu2 %v11185_v38  ;;  %1961 = vmatpush.msrb.mxu3 %v11186_v5 }
 0x47d   :  { %1902 = vmatpush.msrb.mxu0 %v11187_v40  ;;  %1922 = vmatpush.msrb.mxu1 %v11188_v43 }
 0x47e   :  { %1942 = vmatpush.msrb.mxu2 %v11189_v56  ;;  %1962 = vmatpush.msrb.mxu3 %v11190_v1  ;;  %v1715_v1 = vrot.slane %v8900_v16, 6 }
 0x47f   :  { %1903 = vmatpush.msrb.mxu0 %v11191_v0  ;;  %1923 = vmatpush.msrb.mxu1 %v11192_v51 }
 0x480   :  { %1943 = vmatpush.msrb.mxu2 %v11193_v57  ;;  %1963 = vmatpush.msrb.mxu3 %v11194_v58 }
 0x481   :  { %1904 = vmatpush.msrb.mxu0 %v11195_v60  ;;  %1924 = vmatpush.msrb.mxu1 %v11196_v61 }
 0x482   :  { %1944 = vmatpush.msrb.mxu2 %v11197_v62  ;;  %1964 = vmatpush.msrb.mxu3 %v11198_v63 }
 0x483   :  { %1905 = vmatpush.msrb.mxu0 %v11199_v2  ;;  %1925 = vmatpush.msrb.mxu1 %v11200_v3 }
 0x484   :  { %1945 = vmatpush.msrb.mxu2 %v11201_v4  ;;  %1965 = vmatpush.msrb.mxu3 %v11202_v45 }
 0x485   :  { %1906 = vmatpush.msrb.mxu0 %v11203_v54  ;;  %1926 = vmatpush.msrb.mxu1 %v11204_v8 }
 0x486   :  { %1946 = vmatpush.msrb.mxu2 %v11205_v44  ;;  %1966 = vmatpush.msrb.mxu3 %v11206_v53 }
 0x487   :  { %1907 = vmatpush.msrb.mxu0 %v11207_v49  ;;  %1927 = vmatpush.msrb.mxu1 %v11208_v55 }
 0x488   :  { %1947 = vmatpush.msrb.mxu2 %v11209_v46  ;;  %1967 = vmatpush.msrb.mxu3 %v11210_v50 }
 0x4e4   :  { %v1577_v14 = vpop.f32.mrf.mxu0  ;;  %v1597_v52 = vpop.f32.mrf.mxu1 }
 0x4e5   :  { %v1644_v42 = vrot.slane %v1577_v14, 6  ;;  %v1645_v41 = vrot.slane %v1597_v52, 6 }
 0x4e7   :  { %v1652_v39 = vadd.f32 %v1644_v42, %v11211_v9  ;;  %v1653_v7 = vadd.f32 %v1645_v41, %v11212_v6 }
 0x4e9   :  { %v6595_v10 = vmul.f32 -1.442695, %v1652_v39  ;;  %v6596_v11 = vmul.f32 -1.442695, %v1653_v7 }
 0x4eb   :  { %6864 = vpow2.f32 %v6595_v10  ;;  %v1617_v12 = vpop.f32.mrf.mxu2  ;;  %v1637_v28 = vpop.f32.mrf.mxu3 }
 0x4ec   :  { %6866 = vpow2.f32 %v6596_v11  ;;  %v1646_v13 = vrot.slane %v1617_v12, 6  ;;  %v1647_v48 = vrot.slane %v1637_v28, 6 }
 0x4ee   :  { %v1654_v17 = vadd.f32 %v1646_v13, %v11213_v15  ;;  %v1655_v25 = vadd.f32 %v1647_v48, %v11214_v26 }
 0x4f0   :  { %v6597_v32 = vmul.f32 -1.442695, %v1654_v17 }
 0x4f1   :  { %v6865_v34 = vpop.eup %6864 }
 0x4f2   :  { %v6867_v22 = vpop.eup %6866  ;;  %v1665_v31 = vadd.f32 1.0, %v6865_v34  ;;  %6868 = vpow2.f32 %v6597_v32 }
 0x4f3   :  { %v1666_v18 = vadd.f32 1.0, %v6867_v22 }
 0x4f4   :  { %6870 = vrcp.f32 %v1665_v31  ;;  %v1679_v19 = vand.u32 2147483648, %v1665_v31  ;;  %v1677_v33 = vand.u32 2147483647, %v1665_v31  ;;  %vm1673_vm4 = vweird.f32 %v1665_v31 }
 0x4f5   :  { %6872 = vrcp.f32 %v1666_v18  ;;  %v1694_v20 = vand.u32 2147483648, %v1666_v18  ;;  %v1692_v37 = vand.u32 2147483647, %v1666_v18  ;;  %vm1688_vm5 = vweird.f32 %v1666_v18 }
 0x4f6   :  { %v1680_v43 = vor.u32 1.1754944e-38, %v1679_v19  ;;  %vm1678_vm8 = vcmp.eq.f32.partialorder %v1677_v33, 8.507059e+37 }
 0x4f7   :  { %v1695_v0 = vor.u32 1.1754944e-38, %v1694_v20  ;;  %vm1693_vm9 = vcmp.eq.f32.partialorder %v1692_v37, 8.507059e+37 }
 0x4f8   :  { %v6869_v23 = vpop.eup %6868 }
 0x4f9   :  { %v1667_v29 = vadd.f32 1.0, %v6869_v23 }
 0x4fa   :  { %v6871_v27 = vpop.eup %6870 }
 0x4fb   :  { %v6873_v21 = vpop.eup %6872  ;;  %v1669_v30 = vmul.f32 %v6871_v27, %v1665_v31  ;;  %6874 = vrcp.f32 %v1667_v29  ;;  %vm1674_vm2 = vweird.f32 %v6871_v27  ;;  %v1709_v16 = vand.u32 2147483648, %v1667_v29 }
 0x4fc   :  { %v1684_v47 = vmul.f32 %v6873_v21, %v1666_v18  ;;  %6876 = vtanh.f32 %v1655_v25  ;;  %vm1689_vm3 = vweird.f32 %v6873_v21  ;;  %vm1675_vm6 = vmor %vm1673_vm4, %vm1674_vm2  ;;  %vm1703_vm11 = vweird.f32 %v1667_v29 }
 0x4fd   :  { %v1670_v24 = vsub.f32 1.0, %v1669_v30  ;;  %vm1690_vm7 = vmor %vm1688_vm5, %vm1689_vm3  ;;  %v1707_v54 = vand.u32 2147483647, %v1667_v29  ;;  %v1710_v44 = vor.u32 1.1754944e-38, %v1709_v16 }
 0x4fe   :  { %v1685_v59 = vsub.f32 1.0, %v1684_v47 }
 0x4ff   :  { %v1671_v35 = vmul.f32 %v6871_v27, %v1670_v24  ;;  %vm1708_vm13 = vcmp.eq.f32.partialorder %v1707_v54, 8.507059e+37 }
 0x500   :  { %v1686_v36 = vmul.f32 %v6873_v21, %v1685_v59 }
 0x501   :  { %v6875_v38 = vpop.eup %6874  ;;  %v1672_v5 = vadd.f32 %v6871_v27, %v1671_v35 }
 0x502   :  { %v1699_v40 = vmul.f32 %v6875_v38, %v1667_v29  ;;  %v1687_v56 = vadd.f32 %v6873_v21, %v1686_v36  ;;  %v6877_v57 = vpop.eup %6876  ;;  %vm1704_vm10 = vweird.f32 %v6875_v38 }
 0x503   :  { %v1676_v51 = vsel %vm1675_vm6, %v6871_v27, %v1672_v5  ;;  %vm1705_vm12 = vmor %vm1703_vm11, %vm1704_vm10 }
 0x504   :  { %v1700_v58 = vsub.f32 1.0, %v1699_v40  ;;  %v1681_v60 = vsel %vm1678_vm8, %v1680_v43, %v1676_v51  ;;  %v1691_v61 = vsel %vm1690_vm7, %v6873_v21, %v1687_v56 }
 0x505   :  { %v1696_v62 = vsel %vm1693_vm9, %v1695_v0, %v1691_v61  ;;  %v1718_v63 = vmul.f32 %v6877_v57, %v1681_v60 }
 0x506   :  { %v1717_v2 = vmul.f32 %v1715_v1, %v1696_v62  ;;  %v1701_v3 = vmul.f32 %v6875_v38, %v1700_v58 }
 0x508   :  { %v8972_v4 = vadd.f32 %v1718_v63, %v1717_v2  ;;  %v1702_v45 = vadd.f32 %v6875_v38, %v1701_v3 }
 0x50a   :  { %6878 = vtanh.f32 %v8972_v4  ;;  %v1706_v8 = vsel %vm1705_vm12, %v6875_v38, %v1702_v45  ;;  %v1881_v56 = vrot.slane %v8972_v4, 6 }
 0x50b   :  { %v1711_v49 = vsel %vm1708_vm13, %v1710_v44, %v1706_v8 }
 0x510   :  { %v6879_v53 = vpop.eup %6878 }
 0x511   :  { %v1721_v55 = vmul.f32 %v6879_v53, %v1711_v49 }
 0x513   :  { %1722 = vst [vmem:[#allocation2 + $0x8] sm:$0xc] %v1721_v55  ;;  %v1724_v46 = vrot.slane %v1721_v55, 2 }
 0x515   :  { %1742 = vmatmul.f32.vlgmr.msra.gmra.mxu0 %v1724_v46  ;;  %1762 = vmatmul.f32.vlgmr.msra.gmra.mxu1 %v1724_v46 }
 0x516   :  { %1782 = vmatmul.f32.vlgmr.msra.gmra.mxu2 %v1724_v46  ;;  %1802 = vmatmul.f32.vlgmr.msra.gmra.mxu3 %v1724_v46 }
 0x592   :  { %v1743_v50 = vpop.f32.mrf.mxu0  ;;  %v1763_v14 = vpop.f32.mrf.mxu1 }
 0x593   :  { %v1810_v52 = vrot.slane %v1743_v50, 4  ;;  %v1811_v42 = vrot.slane %v1763_v14, 4 }
 0x595   :  { %v1818_v41 = vadd.f32 %v1810_v52, %v11211_v9  ;;  %v1819_v39 = vadd.f32 %v1811_v42, %v11212_v6 }
 0x597   :  { %v6598_v7 = vmul.f32 -1.442695, %v1818_v41  ;;  %v6599_v10 = vmul.f32 -1.442695, %v1819_v39 }
 0x599   :  { %6880 = vpow2.f32 %v6598_v7  ;;  %v1783_v11 = vpop.f32.mrf.mxu2  ;;  %v1803_v18 = vpop.f32.mrf.mxu3 }
 0x59a   :  { %6882 = vpow2.f32 %v6599_v10  ;;  %v1812_v12 = vrot.slane %v1783_v11, 4  ;;  %v1813_v28 = vrot.slane %v1803_v18, 4 }
 0x59c   :  { %v1820_v13 = vadd.f32 %v1812_v12, %v11213_v15  ;;  %v1821_v27 = vadd.f32 %v1813_v28, %v11214_v26 }
 0x59e   :  { %v6600_v17 = vmul.f32 -1.442695, %v1820_v13 }
 0x59f   :  { %v6881_v32 = vpop.eup %6880 }
 0x5a0   :  { %v6883_v34 = vpop.eup %6882  ;;  %v1831_v22 = vadd.f32 1.0, %v6881_v32  ;;  %6884 = vpow2.f32 %v6600_v17 }
 0x5a1   :  { %v1832_v31 = vadd.f32 1.0, %v6883_v34 }
 0x5a2   :  { %6886 = vrcp.f32 %v1831_v22  ;;  %v1845_v59 = vand.u32 2147483648, %v1831_v22  ;;  %v1843_v35 = vand.u32 2147483647, %v1831_v22  ;;  %vm1839_vm0 = vweird.f32 %v1831_v22 }
 0x5a3   :  { %6888 = vrcp.f32 %v1832_v31  ;;  %v1860_v19 = vand.u32 2147483648, %v1832_v31  ;;  %v1858_v36 = vand.u32 2147483647, %v1832_v31  ;;  %vm1854_vm1 = vweird.f32 %v1832_v31 }
 0x5a4   :  { %v1846_v40 = vor.u32 1.1754944e-38, %v1845_v59  ;;  %vm1844_vm4 = vcmp.eq.f32.partialorder %v1843_v35, 8.507059e+37 }
 0x5a5   :  { %v1861_v1 = vor.u32 1.1754944e-38, %v1860_v19  ;;  %vm1859_vm5 = vcmp.eq.f32.partialorder %v1858_v36, 8.507059e+37 }
 0x5a6   :  { %v6885_v48 = vpop.eup %6884 }
 0x5a7   :  { %v1833_v23 = vadd.f32 1.0, %v6885_v48 }
 0x5a8   :  { %v6887_v29 = vpop.eup %6886 }
 0x5a9   :  { %v6889_v25 = vpop.eup %6888  ;;  %v1835_v21 = vmul.f32 %v6887_v29, %v1831_v22  ;;  %6890 = vrcp.f32 %v1833_v23  ;;  %vm1840_vm14 = vweird.f32 %v6887_v29  ;;  %v1875_v4 = vand.u32 2147483648, %v1833_v23 }
 0x5aa   :  { %v1850_v30 = vmul.f32 %v6889_v25, %v1832_v31  ;;  %6892 = vtanh.f32 %v1821_v27  ;;  %vm1855_vm15 = vweird.f32 %v6889_v25  ;;  %vm1841_vm2 = vmor %vm1839_vm0, %vm1840_vm14  ;;  %vm1869_vm7 = vweird.f32 %v1833_v23 }
 0x5ab   :  { %v1836_v47 = vsub.f32 1.0, %v1835_v21  ;;  %vm1856_vm3 = vmor %vm1854_vm1, %vm1855_vm15  ;;  %v1873_v16 = vand.u32 2147483647, %v1833_v23  ;;  %v1876_v8 = vor.u32 1.1754944e-38, %v1875_v4 }
 0x5ac   :  { %v1851_v24 = vsub.f32 1.0, %v1850_v30 }
 0x5ad   :  { %v1837_v20 = vmul.f32 %v6887_v29, %v1836_v47  ;;  %vm1874_vm9 = vcmp.eq.f32.partialorder %v1873_v16, 8.507059e+37  ;;  %v2204_v16 = vld [vmem:[#allocation16 + $0x1a8] sm:$0xff] }
 0x5ae   :  { %v1852_v33 = vmul.f32 %v6889_v25, %v1851_v24 }
 0x5af   :  { %v6891_v37 = vpop.eup %6890  ;;  %v1838_v38 = vadd.f32 %v6887_v29, %v1837_v20 }
 0x5b0   :  { %v1865_v5 = vmul.f32 %v6891_v37, %v1833_v23  ;;  %v1853_v43 = vadd.f32 %v6889_v25, %v1852_v33  ;;  %v6893_v51 = vpop.eup %6892  ;;  %vm1870_vm6 = vweird.f32 %v6891_v37 }
 0x5b1   :  { %v1842_v0 = vsel %vm1841_vm2, %v6887_v29, %v1838_v38  ;;  %vm1871_vm8 = vmor %vm1869_vm7, %vm1870_vm6  ;;  %vm2057_vm6 = vcmask 130048  }
 0x5b2   :  { %v1866_v57 = vsub.f32 1.0, %v1865_v5  ;;  %v1847_v58 = vsel %vm1844_vm4, %v1846_v40, %v1842_v0  ;;  %v1857_v60 = vsel %vm1856_vm3, %v6889_v25, %v1853_v43 }
 0x5b3   :  { %v1862_v61 = vsel %vm1859_vm5, %v1861_v1, %v1857_v60  ;;  %v1884_v62 = vmul.f32 %v6893_v51, %v1847_v58  ;;  %v2212_v60 = vld [vmem:[#allocation16 + $0x1e8] sm:$0xff] }
 0x5b4   :  { %v1883_v63 = vmul.f32 %v1881_v56, %v1862_v61  ;;  %v1867_v2 = vmul.f32 %v6891_v37, %v1866_v57  ;;  %v2213_v61 = vld [vmem:[#allocation16 + $0x1f0] sm:$0xff]  ;;  %2238 = vmatpush.msra.mxu2 %v2212_v60  ;;  %v2195_v60 = vld [vmem:[#allocation16 + $0x160] sm:$0xff] }
 0x5b5   :  { %2261 = vmatpush.msra.mxu3 %v2213_v61  ;;  %v2153_v61 = vld [vmem:[#allocation16 + $0x10] sm:$0xff] }
 0x5b6   :  { %v8980_v3 = vadd.f32 %v1884_v62, %v1883_v63  ;;  %v1868_v45 = vadd.f32 %v6891_v37, %v1867_v2  ;;  %v2214_v62 = vld [vmem:[#allocation16 + $0x1f8] sm:$0xff]  ;;  %v2208_v63 = vld [vmem:[#allocation16 + $0x1c8] sm:$0xff] }
 0x5b7   :  { %2284 = vmatpush.msra.mxu0 %v2214_v62  ;;  %2239 = vmatpush.msra.mxu2 %v2208_v63  ;;  %v2154_v62 = vld [vmem:[#allocation16 + $0x18] sm:$0xff]  ;;  %v2148_v63 = vld [vmem:[#allocation14 + $0x1e8] sm:$0xff] }
 0x5b8   :  { %6894 = vtanh.f32 %v8980_v3  ;;  %v1872_v54 = vsel %vm1871_vm8, %v6891_v37, %v1868_v45  ;;  %v2047_v37 = vrot.slane %v8980_v3, 6  ;;  %v2209_v3 = vld [vmem:[#allocation16 + $0x1d0] sm:$0xff]  ;;  %v2210_v45 = vld [vmem:[#allocation16 + $0x1d8] sm:$0xff] }
 0x5b9   :  { %v1877_v53 = vsel %vm1874_vm9, %v1876_v8, %v1872_v54  ;;  %2262 = vmatpush.msra.mxu3 %v2209_v3  ;;  %v2205_v54 = vld [vmem:[#allocation16 + $0x1b0] sm:$0xff]  ;;  %v2206_v8 = vld [vmem:[#allocation16 + $0x1b8] sm:$0xff]  ;;  %2285 = vmatpush.msra.mxu0 %v2210_v45 }
 0x5ba   :  { %2240 = vmatpush.msra.mxu2 %v2204_v16  ;;  %v2149_v3 = vld [vmem:[#allocation14 + $0x1f0] sm:$0xff]  ;;  %v2150_v45 = vld [vmem:[#allocation14 + $0x1f8] sm:$0xff]  ;;  %v2187_v16 = vld [vmem:[#allocation16 + $0x120] sm:$0xff] }
 0x5bb   :  { %2263 = vmatpush.msra.mxu3 %v2205_v54  ;;  %2286 = vmatpush.msra.mxu0 %v2206_v8  ;;  %v2145_v54 = vld [vmem:[#allocation14 + $0x1d0] sm:$0xff]  ;;  %v2146_v8 = vld [vmem:[#allocation14 + $0x1d8] sm:$0xff] }
 0x5be   :  { %v6895_v44 = vpop.eup %6894 }
 0x5bf   :  { %v1887_v49 = vmul.f32 %v6895_v44, %v1877_v53  ;;  %v2200_v53 = vld [vmem:[#allocation16 + $0x188] sm:$0xff] }
 0x5c0   :  { %2241 = vmatpush.msra.mxu2 %v2200_v53  ;;  %v2183_v53 = vld [vmem:[#allocation16 + $0x100] sm:$0xff] }
 0x5c1   :  { %1888 = vst [vmem:[#allocation2 + $0x8] sm:$0x30] %v1887_v49  ;;  %v1890_v55 = vrot.slane %v1887_v49, 4  ;;  %v2201_v49 = vld [vmem:[#allocation16 + $0x190] sm:$0xff] }
 0x5c2   :  { %2264 = vmatpush.msra.mxu3 %v2201_v49  ;;  %v2141_v49 = vld [vmem:[#allocation14 + $0x1b0] sm:$0xff] }
 0x5c3   :  { %1908 = vmatmul.f32.vlgmr.msrb.gmra.mxu0 %v1890_v55  ;;  %1928 = vmatmul.f32.vlgmr.msrb.gmra.mxu1 %v1890_v55 }
 0x5c4   :  { %1948 = vmatmul.f32.vlgmr.msrb.gmra.mxu2 %v1890_v55  ;;  %1968 = vmatmul.f32.vlgmr.msrb.gmra.mxu3 %v1890_v55 }
 0x640   :  { %v1909_v46 = vpop.f32.mrf.mxu0  ;;  %v1929_v50 = vpop.f32.mrf.mxu1 }
 0x641   :  { %v1976_v14 = vrot.slane %v1909_v46, 2  ;;  %v1977_v52 = vrot.slane %v1929_v50, 2  ;;  %v2202_v46 = vld [vmem:[#allocation16 + $0x198] sm:$0xff]  ;;  %v2179_v50 = vld [vmem:[#allocation16 + $0xe0] sm:$0xff] }
 0x642   :  { %2287 = vmatpush.msra.mxu0 %v2202_v46  ;;  %v2136_v46 = vld [vmem:[#allocation14 + $0x188] sm:$0xff] }
 0x643   :  { %v1984_v42 = vadd.f32 %v1976_v14, %v11211_v9  ;;  %v1985_v41 = vadd.f32 %v1977_v52, %v11212_v6  ;;  %v2196_v14 = vld [vmem:[#allocation16 + $0x168] sm:$0xff]  ;;  %v2197_v52 = vld [vmem:[#allocation16 + $0x170] sm:$0xff] }
 0x644   :  { %2242 = vmatpush.msra.mxu2 %v2196_v14  ;;  %2265 = vmatpush.msra.mxu3 %v2197_v52  ;;  %v2137_v14 = vld [vmem:[#allocation14 + $0x190] sm:$0xff]  ;;  %v2138_v52 = vld [vmem:[#allocation14 + $0x198] sm:$0xff] }
 0x645   :  { %v6601_v39 = vmul.f32 -1.442695, %v1984_v42  ;;  %v6602_v7 = vmul.f32 -1.442695, %v1985_v41  ;;  %v2198_v41 = vld [vmem:[#allocation16 + $0x178] sm:$0xff] }
 0x646   :  { %2288 = vmatpush.msra.mxu0 %v2198_v41  ;;  %v2175_v41 = vld [vmem:[#allocation16 + $0xc0] sm:$0xff] }
 0x647   :  { %6896 = vpow2.f32 %v6601_v39  ;;  %v1949_v10 = vpop.f32.mrf.mxu2  ;;  %v1969_v31 = vpop.f32.mrf.mxu3 }
 0x648   :  { %6898 = vpow2.f32 %v6602_v7  ;;  %v1978_v11 = vrot.slane %v1949_v10, 2  ;;  %v1979_v9 = vrot.slane %v1969_v31, 2  ;;  %v2192_v7 = vld [vmem:[#allocation16 + $0x148] sm:$0xff]  ;;  %v2193_v10 = vld [vmem:[#allocation16 + $0x150] sm:$0xff] }
 0x649   :  { %2243 = vmatpush.msra.mxu2 %v2192_v7  ;;  %2266 = vmatpush.msra.mxu3 %v2193_v10  ;;  %v2184_v31 = vld [vmem:[#allocation16 + $0x108] sm:$0xff]  ;;  %v2134_v7 = vld [vmem:[#allocation14 + $0x178] sm:$0xff] }
 0x64a   :  { %v1986_v12 = vadd.f32 %v1978_v11, %v11213_v15  ;;  %v1987_v48 = vadd.f32 %v1979_v9, %v11214_v26  ;;  %v2194_v11 = vld [vmem:[#allocation16 + $0x158] sm:$0xff]  ;;  %v2185_v9 = vld [vmem:[#allocation16 + $0x110] sm:$0xff]  ;;  %v2128_v10 = vld [vmem:[#allocation14 + $0x148] sm:$0xff] }
 0x64b   :  { %2289 = vmatpush.msra.mxu0 %v2194_v11  ;;  %v2171_v11 = vld [vmem:[#allocation16 + $0xa0] sm:$0xff] }
 0x64c   :  { %v6603_v13 = vmul.f32 -1.442695, %v1986_v12 }
 0x64d   :  { %v6897_v17 = vpop.eup %6896 }
 0x64e   :  { %v6899_v32 = vpop.eup %6898  ;;  %v1997_v34 = vadd.f32 1.0, %v6897_v17  ;;  %6900 = vpow2.f32 %v6603_v13  ;;  %v2188_v17 = vld [vmem:[#allocation16 + $0x128] sm:$0xff] }
 0x64f   :  { %v1998_v22 = vadd.f32 1.0, %v6899_v32  ;;  %v2189_v32 = vld [vmem:[#allocation16 + $0x130] sm:$0xff]  ;;  %2244 = vmatpush.msra.mxu2 %v2188_v17  ;;  %v2124_v17 = vld [vmem:[#allocation14 + $0x128] sm:$0xff] }
 0x650   :  { %6902 = vrcp.f32 %v1997_v34  ;;  %v2011_v21 = vand.u32 2147483648, %v1997_v34  ;;  %v2009_v24 = vand.u32 2147483647, %v1997_v34  ;;  %vm2005_vm12 = vweird.f32 %v1997_v34  ;;  %2267 = vmatpush.msra.mxu3 %v2189_v32  ;;  %v2167_v32 = vld [vmem:[#allocation16 + $0x80] sm:$0xff] }
 0x651   :  { %6904 = vrcp.f32 %v1998_v22  ;;  %v2026_v30 = vand.u32 2147483648, %v1998_v22  ;;  %v2024_v19 = vand.u32 2147483647, %v1998_v22  ;;  %vm2020_vm13 = vweird.f32 %v1998_v22  ;;  %2245 = vmatpush.msra.mxu2 %v2184_v31  ;;  %v2126_v31 = vld [vmem:[#allocation14 + $0x138] sm:$0xff] }
 0x652   :  { %v2012_v33 = vor.u32 1.1754944e-38, %v2011_v21  ;;  %vm2010_vm0 = vcmp.eq.f32.partialorder %v2009_v24, 8.507059e+37  ;;  %2268 = vmatpush.msra.mxu3 %v2185_v9  ;;  %v2174_v21 = vld [vmem:[#allocation16 + $0xb8] sm:$0xff]  ;;  %v342_v24 = vld [vmem:[#allocation6] sm:$0xff]  ;;  %v2120_v9 = vld [vmem:[#allocation14 + $0x108] sm:$0xff] }
 0x653   :  { %v2027_v38 = vor.u32 1.1754944e-38, %v2026_v30  ;;  %vm2025_vm1 = vcmp.eq.f32.partialorder %v2024_v19, 8.507059e+37  ;;  %v9016_v19 = vld [vmem:[#allocation2] sm:$0xff] }
 0x654   :  { %v6901_v18 = vpop.eup %6900 }
 0x655   :  { %v8986_v6 = vadd.f32 1.0, %v6901_v18  ;;  %v2186_v18 = vld [vmem:[#allocation16 + $0x118] sm:$0xff] }
 0x656   :  { %v6903_v28 = vpop.eup %6902 }
 0x657   :  { %v6905_v23 = vpop.eup %6904  ;;  %v2001_v29 = vmul.f32 %v6903_v28, %v1997_v34  ;;  %6906 = vrcp.f32 %v8986_v6  ;;  %vm2006_vm10 = vweird.f32 %v6903_v28  ;;  %v2041_v44 = vand.u32 2147483648, %v8986_v6 }
 0x658   :  { %v2016_v15 = vmul.f32 %v6905_v23, %v1998_v22  ;;  %6908 = vtanh.f32 %v1987_v48  ;;  %vm2021_vm11 = vweird.f32 %v6905_v23  ;;  %vm2007_vm14 = vmor %vm2005_vm12, %vm2006_vm10  ;;  %vm2035_vm3 = vweird.f32 %v8986_v6  ;;  %v2190_v22 = vld [vmem:[#allocation16 + $0x138] sm:$0xff] }
 0x659   :  { %v2002_v27 = vsub.f32 1.0, %v2001_v29  ;;  %vm2022_vm15 = vmor %vm2020_vm13, %vm2021_vm11  ;;  %v2039_v55 = vand.u32 2147483647, %v8986_v6  ;;  %v2042_v39 = vor.u32 1.1754944e-38, %v2041_v44  ;;  %2290 = vmatpush.msra.mxu0 %v2190_v22  ;;  %v2182_v48 = vld [vmem:[#allocation16 + $0xf8] sm:$0xff]  ;;  %v2177_v29 = vld [vmem:[#allocation16 + $0xd0] sm:$0xff] }
 0x65a   :  { %v2017_v25 = vsub.f32 1.0, %v2016_v15  ;;  %v2178_v15 = vld [vmem:[#allocation16 + $0xd8] sm:$0xff]  ;;  %v2140_v44 = vld [vmem:[#allocation14 + $0x1a8] sm:$0xff]  ;;  %v2125_v22 = vld [vmem:[#allocation14 + $0x130] sm:$0xff] }
 0x65b   :  { %v2003_v47 = vmul.f32 %v6903_v28, %v2002_v27  ;;  %vm2040_vm5 = vcmp.eq.f32.partialorder %v2039_v55, 8.507059e+37  ;;  %2291 = vmatpush.msra.mxu0 %v2186_v18  ;;  %v2172_v27 = vld [vmem:[#allocation16 + $0xa8] sm:$0xff]  ;;  %v2142_v55 = vld [vmem:[#allocation14 + $0x1b8] sm:$0xff]  ;;  %v2163_v18 = vld [vmem:[#allocation16 + $0x60] sm:$0xff] }
 0x65c   :  { %v2018_v59 = vmul.f32 %v6905_v23, %v2017_v25  ;;  %v2173_v25 = vld [vmem:[#allocation16 + $0xb0] sm:$0xff] }
 0x65d   :  { %v8990_v20 = vpop.eup %6906  ;;  %v2004_v35 = vadd.f32 %v6903_v28, %v2003_v47  ;;  %2292 = vmatpush.msra.mxu0 %v2182_v48  ;;  %v2168_v47 = vld [vmem:[#allocation16 + $0x88] sm:$0xff] }
 0x65e   :  { %v2031_v26 = vmul.f32 %v8990_v20, %v8986_v6  ;;  %v2019_v36 = vadd.f32 %v6905_v23, %v2018_v59  ;;  %v6909_v40 = vpop.eup %6908  ;;  %vm2036_vm2 = vweird.f32 %v8990_v20  ;;  %v2180_v6 = vld [vmem:[#allocation16 + $0xe8] sm:$0xff]  ;;  %v2169_v59 = vld [vmem:[#allocation16 + $0x90] sm:$0xff] }
 0x65f   :  { %v2008_v5 = vsel %vm2007_vm14, %v6903_v28, %v2004_v35  ;;  %vm9003_vm4 = vmor %vm2035_vm3, %vm2036_vm2  ;;  %v2181_v28 = vld [vmem:[#allocation16 + $0xf0] sm:$0xff]  ;;  %2246 = vmatpush.msra.mxu2 %v2180_v6  ;;  %2293 = vmatpush.msra.mxu0 %v2178_v15  ;;  %v2170_v35 = vld [vmem:[#allocation16 + $0x98] sm:$0xff] }
 0x660   :  { %v2032_v43 = vsub.f32 1.0, %v2031_v26  ;;  %v2013_v56 = vsel %vm2010_vm0, %v2012_v33, %v2008_v5  ;;  %v2023_v1 = vsel %vm2022_vm15, %v6905_v23, %v2019_v36  ;;  %v2176_v23 = vld [vmem:[#allocation16 + $0xc8] sm:$0xff]  ;;  %2269 = vmatpush.msra.mxu3 %v2181_v28  ;;  %v2165_v33 = vld [vmem:[#allocation16 + $0x70] sm:$0xff]  ;;  %v2207_v36 = vld [vmem:[#allocation16 + $0x1c0] sm:$0xff] }
 0x661   :  { %v2028_v0 = vsel %vm2025_vm1, %v2027_v38, %v2023_v1  ;;  %v2050_v51 = vmul.f32 %v6909_v40, %v2013_v56  ;;  %2247 = vmatpush.msra.mxu2 %v2176_v23  ;;  %2294 = vmatpush.msra.mxu0 %v2174_v21  ;;  %v2164_v26 = vld [vmem:[#allocation16 + $0x68] sm:$0xff]  ;;  %v2161_v5 = vld [vmem:[#allocation16 + $0x50] sm:$0xff]  ;;  %v2203_v40 = vld [vmem:[#allocation16 + $0x1a0] sm:$0xff] }
 0x662   :  { %v2033_v57 = vmul.f32 %v8990_v20, %v2032_v43  ;;  %v2049_v58 = vmul.f32 %v2047_v37, %v2028_v0  ;;  %2270 = vmatpush.msra.mxu3 %v2177_v29  ;;  %v2166_v37 = vld [vmem:[#allocation16 + $0x78] sm:$0xff]  ;;  %v2160_v38 = vld [vmem:[#allocation16 + $0x48] sm:$0xff]  ;;  %v2157_v1 = vld [vmem:[#allocation16 + $0x30] sm:$0xff] }
 0x663   :  { %2248 = vmatpush.msra.mxu2 %v2172_v27  ;;  %2295 = vmatpush.msra.mxu0 %v2170_v35  ;;  %v2162_v43 = vld [vmem:[#allocation16 + $0x58] sm:$0xff]  ;;  %v2156_v56 = vld [vmem:[#allocation16 + $0x28] sm:$0xff]  ;;  %v2199_v0 = vld [vmem:[#allocation16 + $0x180] sm:$0xff] }
 0x664   :  { %v2051_v2 = vadd.f32 %v2050_v51, %v2049_v58  ;;  %v2034_v4 = vadd.f32 %v8990_v20, %v2033_v57  ;;  %2271 = vmatpush.msra.mxu3 %v2173_v25  ;;  %v2158_v51 = vld [vmem:[#allocation16 + $0x38] sm:$0xff]  ;;  %v2152_v58 = vld [vmem:[#allocation16 + $0x8] sm:$0xff]  ;;  %v2121_v6 = vld [vmem:[#allocation14 + $0x110] sm:$0xff] }
 0x665   :  { %2249 = vmatpush.msra.mxu2 %v2168_v47  ;;  %2296 = vmatpush.msra.mxu0 %v2166_v37  ;;  %v343_v57 = vld [vmem:[#allocation6 + $0x8] sm:$0xff]  ;;  %v2116_v48 = vld [vmem:[#allocation14 + $0xe8] sm:$0xff]  ;;  %v2159_v23 = vld [vmem:[#allocation16 + $0x40] sm:$0xff] }
 0x666   :  { %6910 = vtanh.f32 %v2051_v2  ;;  %v2038_v42 = vsel %vm9003_vm4, %v8990_v20, %v2034_v4  ;;  %v2211_v20 = vld [vmem:[#allocation16 + $0x1e0] sm:$0xff]  ;;  %2272 = vmatpush.msra.mxu3 %v2169_v59  ;;  %v2144_v4 = vld [vmem:[#allocation14 + $0x1c8] sm:$0xff]  ;;  %v2122_v28 = vld [vmem:[#allocation14 + $0x118] sm:$0xff] }
 0x667   :  { %v2043_v13 = vsel %vm2040_vm5, %v2042_v39, %v2038_v42  ;;  %2250 = vmatpush.msra.mxu2 %v2164_v26  ;;  %2297 = vmatpush.msra.mxu0 %v2162_v43  ;;  %v2191_v2 = vld [vmem:[#allocation16 + $0x140] sm:$0xff]  ;;  %v2132_v42 = vld [vmem:[#allocation14 + $0x168] sm:$0xff]  ;;  %v2133_v39 = vld [vmem:[#allocation14 + $0x170] sm:$0xff] }
 0x668   :  { %2273 = vmatpush.msra.mxu3 %v2165_v33  ;;  %v2117_v29 = vld [vmem:[#allocation14 + $0xf0] sm:$0xff]  ;;  %v2118_v15 = vld [vmem:[#allocation14 + $0xf8] sm:$0xff]  ;;  %v2112_v27 = vld [vmem:[#allocation14 + $0xc8] sm:$0xff] }
 0x669   :  { %2251 = vmatpush.msra.mxu2 %v2160_v38  ;;  %2298 = vmatpush.msra.mxu0 %v2158_v51  ;;  %v2155_v25 = vld [vmem:[#allocation16 + $0x20] sm:$0xff]  ;;  %v2113_v21 = vld [vmem:[#allocation14 + $0xd0] sm:$0xff]  ;;  %v2114_v47 = vld [vmem:[#allocation14 + $0xd8] sm:$0xff] }
 0x66a   :  { %2274 = vmatpush.msra.mxu3 %v2161_v5  ;;  %v2151_v59 = vld [vmem:[#allocation16] sm:$0xff]  ;;  %v2110_v26 = vld [vmem:[#allocation14 + $0xb8] sm:$0xff]  ;;  %v2104_v33 = vld [vmem:[#allocation14 + $0x88] sm:$0xff] }
 0x66b   :  { %2252 = vmatpush.msra.mxu2 %v2156_v56  ;;  %2299 = vmatpush.msra.mxu0 %v2154_v62  ;;  %v2147_v35 = vld [vmem:[#allocation14 + $0x1e0] sm:$0xff]  ;;  %v2106_v38 = vld [vmem:[#allocation14 + $0x98] sm:$0xff]  ;;  %v2100_v5 = vld [vmem:[#allocation14 + $0x68] sm:$0xff] }
 0x66c   :  { %v6911_v12 = vpop.eup %6910  ;;  %2275 = vmatpush.msra.mxu3 %v2157_v1  ;;  %v2143_v37 = vld [vmem:[#allocation14 + $0x1c0] sm:$0xff]  ;;  %v2102_v56 = vld [vmem:[#allocation14 + $0x78] sm:$0xff]  ;;  %v2096_v1 = vld [vmem:[#allocation14 + $0x48] sm:$0xff] }
 0x66d   :  { %v9010_v34 = vmul.f32 %v6911_v12, %v2043_v13  ;;  %2253 = vmatpush.msra.mxu2 %v2152_v58  ;;  %2376 = vmatpush.msrb.mxu0 %v2150_v45  ;;  %v2129_v12 = vld [vmem:[#allocation14 + $0x150] sm:$0xff]  ;;  %v2130_v13 = vld [vmem:[#allocation14 + $0x158] sm:$0xff]  ;;  %v2139_v43 = vld [vmem:[#allocation14 + $0x1a0] sm:$0xff] }
 0x66e   :  { %2276 = vmatpush.msra.mxu3 %v2153_v61  ;;  %v2135_v51 = vld [vmem:[#allocation14 + $0x180] sm:$0xff]  ;;  %v2092_v58 = vld [vmem:[#allocation14 + $0x28] sm:$0xff]  ;;  %v2094_v62 = vld [vmem:[#allocation14 + $0x38] sm:$0xff] }
 0x66f   :  { %11217 = vst [vmem:[#allocation68_spill] sm:$0xff] %v9010_v34  ;;  %2330 = vmatpush.msrb.mxu2 %v2148_v63  ;;  %2377 = vmatpush.msrb.mxu0 %v2146_v8  ;;  %v2131_v61 = vld [vmem:[#allocation14 + $0x160] sm:$0xff] }
 0x670   :  { %2054 = vst [vmem:[#allocation2 + $0x8] sm:$0xc0] %v9010_v34  ;;  %2353 = vmatpush.msrb.mxu3 %v2149_v3  ;;  %v2127_v63 = vld [vmem:[#allocation14 + $0x140] sm:$0xff]  ;;  %v9213_v34 = vld [vmem:[#allocation17 + $0x18] sm:$0xff] }
 0x671   :  { %2331 = vmatpush.msrb.mxu2 %v2144_v4  ;;  %2378 = vmatpush.msrb.mxu0 %v2142_v55  ;;  %v2119_v3 = vld [vmem:[#allocation14 + $0x100] sm:$0xff]  ;;  %v2088_v55 = vld [vmem:[#allocation14 + $0x8] sm:$0xff]  ;;  %11243 = vst [vmem:[#allocation64_spill] sm:$0xff] %v9213_v34 }
 0x672   :  { %2354 = vmatpush.msrb.mxu3 %v2145_v54  ;;  %v2115_v45 = vld [vmem:[#allocation14 + $0xe0] sm:$0xff] }
 0x673   :  { %2332 = vmatpush.msrb.mxu2 %v2140_v44  ;;  %2379 = vmatpush.msrb.mxu0 %v2138_v52  ;;  %v2111_v4 = vld [vmem:[#allocation14 + $0xc0] sm:$0xff] }
 0x674   :  { %2355 = vmatpush.msrb.mxu3 %v2141_v49  ;;  %v2103_v54 = vld [vmem:[#allocation14 + $0x80] sm:$0xff] }
 0x675   :  { %2333 = vmatpush.msrb.mxu2 %v2136_v46  ;;  %2380 = vmatpush.msrb.mxu0 %v2134_v7  ;;  %v2099_v8 = vld [vmem:[#allocation14 + $0x60] sm:$0xff]  ;;  %v2089_v46 = vld [vmem:[#allocation14 + $0x10] sm:$0xff] }
 0x676   :  { %2356 = vmatpush.msrb.mxu3 %v2137_v14  ;;  %v2095_v44 = vld [vmem:[#allocation14 + $0x40] sm:$0xff] }
 0x677   :  { %v9013_v30 = vld [vmem:[#allocation2 + $0x8] sm:$0xff]  ;;  %2334 = vmatpush.msrb.mxu2 %v2132_v42  ;;  %2381 = vmatpush.msrb.mxu0 %v2130_v13  ;;  %v2087_v49 = vld [vmem:[#allocation14] sm:$0xff]  ;;  %v9023_v42 = vld [vmem:[#allocation17 + $0x1e8] sm:$0xff] }
 0x678   :  { %2078 = vmatpush.msra.mxu1 %v9013_v30  ;;  %2357 = vmatpush.msrb.mxu3 %v2133_v39  ;;  %v9021_v52 = vld [vmem:[#allocation17 + $0x1e0] sm:$0xff]  ;;  %v9027_v39 = vld [vmem:[#allocation17 + $0x1f8] sm:$0xff] }
 0x679   :  { %2335 = vmatpush.msrb.mxu2 %v2128_v10  ;;  %2382 = vmatpush.msrb.mxu0 %v2126_v31  ;;  %v9029_v7 = vld [vmem:[#allocation17 + $0x1c0] sm:$0xff]  ;;  %v9031_v10 = vld [vmem:[#allocation17 + $0x1c8] sm:$0xff] }
 0x67a   :  { %2079 = vmatpush.msra.mxu1 %v9016_v19  ;;  %2358 = vmatpush.msrb.mxu3 %v2129_v12  ;;  %v9037_v12 = vld [vmem:[#allocation17 + $0x1d8] sm:$0xff]  ;;  %v9041_v13 = vld [vmem:[#allocation17 + $0x1a0] sm:$0xff] }
 0x67b   :  { %6604 = vmatmul.msk.f32.vlgmr.msra.gmra.mxu1 %vm2057_vm6, %v342_v24  ;;  %2336 = vmatpush.msrb.mxu2 %v2124_v17  ;;  %v2108_v24 = vld [vmem:[#allocation14 + $0xa8] sm:$0xff]  ;;  %v9053_v31 = vld [vmem:[#allocation17 + $0x180] sm:$0xff] }
 0x67c   :  { %2215 = vmatpush.msrb.mxu1 %v2211_v20  ;;  %2359 = vmatpush.msrb.mxu3 %v2125_v22  ;;  %v2109_v20 = vld [vmem:[#allocation14 + $0xb0] sm:$0xff]  ;;  %v9043_v17 = vld [vmem:[#allocation17 + $0x1a8] sm:$0xff]  ;;  %v9049_v22 = vld [vmem:[#allocation17 + $0x1b8] sm:$0xff] }
 0x67d   :  { %2337 = vmatpush.msrb.mxu2 %v2120_v9  ;;  %2383 = vmatpush.msrb.mxu0 %v2122_v28  ;;  %v9055_v9 = vld [vmem:[#allocation17 + $0x188] sm:$0xff] }
 0x67e   :  { %2216 = vmatpush.msrb.mxu1 %v2207_v36  ;;  %2360 = vmatpush.msrb.mxu3 %v2121_v6  ;;  %v2105_v36 = vld [vmem:[#allocation14 + $0x90] sm:$0xff]  ;;  %v9061_v6 = vld [vmem:[#allocation17 + $0x198] sm:$0xff] }
 0x67f   :  { %2338 = vmatpush.msrb.mxu2 %v2116_v48  ;;  %2384 = vmatpush.msrb.mxu0 %v2118_v15  ;;  %v9069_v48 = vld [vmem:[#allocation17 + $0x160] sm:$0xff]  ;;  %v9075_v15 = vld [vmem:[#allocation17 + $0x178] sm:$0xff] }
 0x680   :  { %2217 = vmatpush.msrb.mxu1 %v2203_v40  ;;  %2361 = vmatpush.msrb.mxu3 %v2117_v29  ;;  %v2101_v40 = vld [vmem:[#allocation14 + $0x70] sm:$0xff] }
 0x681   :  { %2339 = vmatpush.msrb.mxu2 %v2112_v27  ;;  %2385 = vmatpush.msrb.mxu0 %v2114_v47  ;;  %v9073_v29 = vld [vmem:[#allocation17 + $0x170] sm:$0xff]  ;;  %v9077_v27 = vld [vmem:[#allocation17 + $0x140] sm:$0xff]  ;;  %v9085_v47 = vld [vmem:[#allocation17 + $0x158] sm:$0xff] }
 0x682   :  { %2218 = vmatpush.msrb.mxu1 %v2199_v0  ;;  %2362 = vmatpush.msrb.mxu3 %v2113_v21  ;;  %v2097_v0 = vld [vmem:[#allocation14 + $0x50] sm:$0xff] }
 0x683   :  { %6605 = vmatmul.msk.f32.gmra.mxu1 %vm2057_vm6, %v343_v57  ;;  %2340 = vmatpush.msrb.mxu2 %v2108_v24  ;;  %v2098_v57 = vld [vmem:[#allocation14 + $0x58] sm:$0xff]  ;;  %v9083_v21 = vld [vmem:[#allocation17 + $0x150] sm:$0xff]  ;;  %v9089_v24 = vld [vmem:[#allocation17 + $0x120] sm:$0xff] }
 0x684   :  { %2219 = vmatpush.msrb.mxu1 %v2195_v60  ;;  %2363 = vmatpush.msrb.mxu3 %v2109_v20  ;;  %v2093_v60 = vld [vmem:[#allocation14 + $0x30] sm:$0xff] }
 0x685   :  { %2386 = vmatpush.msrb.mxu0 %v2110_v26  ;;  %2341 = vmatpush.msrb.mxu2 %v2104_v33  ;;  %v9095_v20 = vld [vmem:[#allocation17 + $0x130] sm:$0xff]  ;;  %v9101_v26 = vld [vmem:[#allocation17 + $0x100] sm:$0xff]  ;;  %v9103_v33 = vld [vmem:[#allocation17 + $0x108] sm:$0xff] }
 0x686   :  { %2220 = vmatpush.msrb.mxu1 %v2191_v2  ;;  %2364 = vmatpush.msrb.mxu3 %v2105_v36  ;;  %v2123_v2 = vld [vmem:[#allocation14 + $0x120] sm:$0xff]  ;;  %v9107_v36 = vld [vmem:[#allocation17 + $0x110] sm:$0xff] }
 0x687   :  { %2387 = vmatpush.msrb.mxu0 %v2106_v38  ;;  %2342 = vmatpush.msrb.mxu2 %v2100_v5  ;;  %v9117_v38 = vld [vmem:[#allocation17 + $0xe0] sm:$0xff]  ;;  %v9119_v5 = vld [vmem:[#allocation17 + $0xe8] sm:$0xff] }
 0x688   :  { %2221 = vmatpush.msrb.mxu1 %v2187_v16  ;;  %2365 = vmatpush.msrb.mxu3 %v2101_v40  ;;  %v2107_v16 = vld [vmem:[#allocation14 + $0xa0] sm:$0xff]  ;;  %v9123_v40 = vld [vmem:[#allocation17 + $0xf0] sm:$0xff] }
 0x689   :  { %2388 = vmatpush.msrb.mxu0 %v2102_v56  ;;  %2343 = vmatpush.msrb.mxu2 %v2096_v1  ;;  %v9129_v56 = vld [vmem:[#allocation17 + $0xc0] sm:$0xff]  ;;  %v9131_v1 = vld [vmem:[#allocation17 + $0xc8] sm:$0xff] }
 0x68a   :  { %2222 = vmatpush.msrb.mxu1 %v2183_v53  ;;  %2366 = vmatpush.msrb.mxu3 %v2097_v0  ;;  %v2091_v53 = vld [vmem:[#allocation14 + $0x20] sm:$0xff]  ;;  %v9135_v0 = vld [vmem:[#allocation17 + $0xd0] sm:$0xff] }
 0x68b   :  { %2389 = vmatpush.msrb.mxu0 %v2098_v57  ;;  %2344 = vmatpush.msrb.mxu2 %v2092_v58  ;;  %11218 = vst [vmem:[#allocation69_spill] sm:$0xff] %v9135_v0  ;;  %v9141_v57 = vld [vmem:[#allocation17 + $0xa0] sm:$0xff]  ;;  %v9143_v58 = vld [vmem:[#allocation17 + $0xa8] sm:$0xff] }
 0x68c   :  { %2223 = vmatpush.msrb.mxu1 %v2179_v50  ;;  %2367 = vmatpush.msrb.mxu3 %v2093_v60  ;;  %v2090_v50 = vld [vmem:[#allocation14 + $0x18] sm:$0xff]  ;;  %11220 = vst [vmem:[#allocation41_spill] sm:$0xff] %v9141_v57 }
 0x68d   :  { %2390 = vmatpush.msrb.mxu0 %v2094_v62  ;;  %2345 = vmatpush.msrb.mxu2 %v2088_v55  ;;  %11221 = vst [vmem:[#allocation42_spill] sm:$0xff] %v9143_v58  ;;  %v9149_v60 = vld [vmem:[#allocation17 + $0xb8] sm:$0xff]  ;;  %v9155_v62 = vld [vmem:[#allocation17 + $0x88] sm:$0xff] }
 0x68e   :  { %2224 = vmatpush.msrb.mxu1 %v2175_v41  ;;  %2368 = vmatpush.msrb.mxu3 %v2089_v46  ;;  %v9025_v41 = vld [vmem:[#allocation17 + $0x1f0] sm:$0xff]  ;;  %11223 = vst [vmem:[#allocation44_spill] sm:$0xff] %v9149_v60  ;;  %v9195_v55 = vld [vmem:[#allocation17 + $0x28] sm:$0xff]  ;;  %v9201_v46 = vld [vmem:[#allocation17 + $0x38] sm:$0xff] }
 0x68f   :  { %2391 = vmatpush.msrb.mxu0 %v2090_v50  ;;  %11225 = vst [vmem:[#allocation46_spill] sm:$0xff] %v9155_v62  ;;  %v9205_v50 = vld [vmem:[#allocation17] sm:$0xff] }
 0x690   :  { %2225 = vmatpush.msrb.mxu1 %v2171_v11  ;;  %v9035_v11 = vld [vmem:[#allocation17 + $0x1d0] sm:$0xff]  ;;  %11237 = vst [vmem:[#allocation58_spill] sm:$0xff] %v9195_v55 }
 0x691   :  { %11239 = vst [vmem:[#allocation60_spill] sm:$0xff] %v9201_v46 }
 0x692   :  { %2226 = vmatpush.msrb.mxu1 %v2167_v32  ;;  %v9047_v32 = vld [vmem:[#allocation17 + $0x1b0] sm:$0xff]  ;;  %11240 = vst [vmem:[#allocation61_spill] sm:$0xff] %v9205_v50 }
 0x694   :  { %2227 = vmatpush.msrb.mxu1 %v2163_v18  ;;  %v9059_v18 = vld [vmem:[#allocation17 + $0x190] sm:$0xff] }
 0x696   :  { %2228 = vmatpush.msrb.mxu1 %v2159_v23  ;;  %v9071_v23 = vld [vmem:[#allocation17 + $0x168] sm:$0xff] }
 0x698   :  { %2229 = vmatpush.msrb.mxu1 %v2155_v25  ;;  %v9079_v25 = vld [vmem:[#allocation17 + $0x148] sm:$0xff] }
 0x69a   :  { %2230 = vmatpush.msrb.mxu1 %v2151_v59  ;;  %v9091_v59 = vld [vmem:[#allocation17 + $0x128] sm:$0xff] }
 0x69c   :  { %2307 = vmatpush.msra.mxu1 %v2147_v35  ;;  %v9097_v35 = vld [vmem:[#allocation17 + $0x138] sm:$0xff] }
 0x69e   :  { %2308 = vmatpush.msra.mxu1 %v2143_v37  ;;  %v9109_v37 = vld [vmem:[#allocation17 + $0x118] sm:$0xff] }
 0x6a0   :  { %2309 = vmatpush.msra.mxu1 %v2139_v43  ;;  %v9125_v43 = vld [vmem:[#allocation17 + $0xf8] sm:$0xff] }
 0x6a2   :  { %2310 = vmatpush.msra.mxu1 %v2135_v51  ;;  %v9137_v51 = vld [vmem:[#allocation17 + $0xd8] sm:$0xff] }
 0x6a3   :  { %11219 = vst [vmem:[#allocation72_spill] sm:$0xff] %v9137_v51 }
 0x6a4   :  { %2311 = vmatpush.msra.mxu1 %v2131_v61  ;;  %v9153_v61 = vld [vmem:[#allocation17 + $0x80] sm:$0xff] }
 0x6a5   :  { %11224 = vst [vmem:[#allocation45_spill] sm:$0xff] %v9153_v61 }
 0x6a6   :  { %2312 = vmatpush.msra.mxu1 %v2127_v63  ;;  %v9159_v63 = vld [vmem:[#allocation17 + $0x90] sm:$0xff] }
 0x6a7   :  { %11226 = vst [vmem:[#allocation47_spill] sm:$0xff] %v9159_v63 }
 0x6a8   :  { %2313 = vmatpush.msra.mxu1 %v2123_v2  ;;  %v9161_v2 = vld [vmem:[#allocation17 + $0x98] sm:$0xff] }
 0x6a9   :  { %11227 = vst [vmem:[#allocation48_spill] sm:$0xff] %v9161_v2 }
 0x6aa   :  { %2314 = vmatpush.msra.mxu1 %v2119_v3  ;;  %v9169_v3 = vld [vmem:[#allocation17 + $0x60] sm:$0xff] }
 0x6ab   :  { %11228 = vst [vmem:[#allocation49_spill] sm:$0xff] %v9169_v3 }
 0x6ac   :  { %2315 = vmatpush.msra.mxu1 %v2115_v45  ;;  %v9171_v45 = vld [vmem:[#allocation17 + $0x68] sm:$0xff] }
 0x6ad   :  { %11229 = vst [vmem:[#allocation50_spill] sm:$0xff] %v9171_v45 }
 0x6ae   :  { %2316 = vmatpush.msra.mxu1 %v2111_v4  ;;  %v9175_v4 = vld [vmem:[#allocation17 + $0x70] sm:$0xff] }
 0x6af   :  { %11230 = vst [vmem:[#allocation51_spill] sm:$0xff] %v9175_v4 }
 0x6b0   :  { %2317 = vmatpush.msra.mxu1 %v2107_v16  ;;  %v9177_v16 = vld [vmem:[#allocation17 + $0x78] sm:$0xff] }
 0x6b1   :  { %11231 = vst [vmem:[#allocation52_spill] sm:$0xff] %v9177_v16 }
 0x6b2   :  { %2318 = vmatpush.msra.mxu1 %v2103_v54  ;;  %v9181_v54 = vld [vmem:[#allocation17 + $0x40] sm:$0xff] }
 0x6b3   :  { %11232 = vst [vmem:[#allocation53_spill] sm:$0xff] %v9181_v54 }
 0x6b4   :  { %2319 = vmatpush.msra.mxu1 %v2099_v8  ;;  %v9183_v8 = vld [vmem:[#allocation17 + $0x48] sm:$0xff] }
 0x6b5   :  { %11233 = vst [vmem:[#allocation54_spill] sm:$0xff] %v9183_v8 }
 0x6b6   :  { %2320 = vmatpush.msra.mxu1 %v2095_v44  ;;  %v9187_v44 = vld [vmem:[#allocation17 + $0x50] sm:$0xff] }
 0x6b7   :  { %11234 = vst [vmem:[#allocation55_spill] sm:$0xff] %v9187_v44 }
 0x6b8   :  { %2321 = vmatpush.msra.mxu1 %v2091_v53  ;;  %v9189_v53 = vld [vmem:[#allocation17 + $0x58] sm:$0xff] }
 0x6b9   :  { %11235 = vst [vmem:[#allocation56_spill] sm:$0xff] %v9189_v53 }
 0x6ba   :  { %2322 = vmatpush.msra.mxu1 %v2087_v49  ;;  %v9193_v49 = vld [vmem:[#allocation17 + $0x20] sm:$0xff] }
 0x6bb   :  { %11236 = vst [vmem:[#allocation57_spill] sm:$0xff] %v9193_v49 }
 0x6f8   :  { %v2081_v14 = vpop.f32.mrf.mxu1 }
 0x6f9   :  { %2231 = vmatmul.f32.vlgmr.msrb.gmra.mxu1 %v2081_v14  ;;  %2254 = vmatmul.f32.vlgmr.msra.gmra.mxu2 %v2081_v14 }
 0x6fa   :  { %2277 = vmatmul.f32.vlgmr.msra.gmra.mxu3 %v2081_v14  ;;  %2300 = vmatmul.f32.vlgmr.msra.gmra.mxu0 %v2081_v14  ;;  %v9207_v14 = vld [vmem:[#allocation17 + $0x8] sm:$0xff] }
 0x6fb   :  { %2481 = vmatpush.msrb.mxu1 %v9021_v52  ;;  %2501 = vmatpush.msra.mxu2 %v9023_v42  ;;  %11241 = vst [vmem:[#allocation62_spill] sm:$0xff] %v9207_v14 }
 0x6fc   :  { %2521 = vmatpush.msra.mxu3 %v9025_v41  ;;  %2541 = vmatpush.msra.mxu0 %v9027_v39 }
 0x6fd   :  { %2482 = vmatpush.msrb.mxu1 %v9029_v7  ;;  %2502 = vmatpush.msra.mxu2 %v9031_v10 }
 0x6fe   :  { %2522 = vmatpush.msra.mxu3 %v9035_v11  ;;  %2542 = vmatpush.msra.mxu0 %v9037_v12 }
 0x6ff   :  { %2483 = vmatpush.msrb.mxu1 %v9041_v13  ;;  %2503 = vmatpush.msra.mxu2 %v9043_v17 }
 0x700   :  { %2523 = vmatpush.msra.mxu3 %v9047_v32  ;;  %2543 = vmatpush.msra.mxu0 %v9049_v22  ;;  %v2084_v28 = vpop.f32.mrf.mxu1 }
 0x701   :  { %2484 = vmatpush.msrb.mxu1 %v9053_v31  ;;  %2504 = vmatpush.msra.mxu2 %v9055_v9 }
 0x702   :  { %2524 = vmatpush.msra.mxu3 %v9059_v18  ;;  %2544 = vmatpush.msra.mxu0 %v9061_v6 }
 0x703   :  { %2234 = vmatmul.f32.gmra.mxu1 %v2084_v28  ;;  %2257 = vmatmul.f32.gmra.mxu2 %v2084_v28 }
 0x704   :  { %2280 = vmatmul.f32.gmra.mxu3 %v2084_v28  ;;  %2303 = vmatmul.f32.gmra.mxu0 %v2084_v28  ;;  %v9211_v28 = vld [vmem:[#allocation17 + $0x10] sm:$0xff] }
 0x705   :  { %2485 = vmatpush.msrb.mxu1 %v9069_v48  ;;  %2505 = vmatpush.msra.mxu2 %v9071_v23  ;;  %11242 = vst [vmem:[#allocation63_spill] sm:$0xff] %v9211_v28 }
 0x706   :  { %2525 = vmatpush.msra.mxu3 %v9073_v29  ;;  %2545 = vmatpush.msra.mxu0 %v9075_v15 }
 0x707   :  { %2486 = vmatpush.msrb.mxu1 %v9077_v27  ;;  %2506 = vmatpush.msra.mxu2 %v9079_v25 }
 0x708   :  { %2526 = vmatpush.msra.mxu3 %v9083_v21  ;;  %2546 = vmatpush.msra.mxu0 %v9085_v47 }
 0x709   :  { %2487 = vmatpush.msrb.mxu1 %v9089_v24  ;;  %2507 = vmatpush.msra.mxu2 %v9091_v59 }
 0x70a   :  { %2527 = vmatpush.msra.mxu3 %v9095_v20  ;;  %2547 = vmatpush.msra.mxu0 %v9097_v35 }
 0x70b   :  { %2488 = vmatpush.msrb.mxu1 %v9101_v26  ;;  %2508 = vmatpush.msra.mxu2 %v9103_v33 }
 0x70c   :  { %2528 = vmatpush.msra.mxu3 %v9107_v36  ;;  %2548 = vmatpush.msra.mxu0 %v9109_v37 }
 0x70d   :  { %2323 = vmatmul.f32.vlgmr.msra.gmra.mxu1 %v9016_v19  ;;  %2346 = vmatmul.f32.vlgmr.msrb.gmra.mxu2 %v9016_v19 }
 0x70e   :  { %2369 = vmatmul.f32.vlgmr.msrb.gmra.mxu3 %v9016_v19  ;;  %2392 = vmatmul.f32.vlgmr.msrb.gmra.mxu0 %v9016_v19  ;;  %v9147_v19 = vld [vmem:[#allocation17 + $0xb0] sm:$0xff] }
 0x70f   :  { %2489 = vmatpush.msrb.mxu1 %v9117_v38  ;;  %2509 = vmatpush.msra.mxu2 %v9119_v5  ;;  %11222 = vst [vmem:[#allocation43_spill] sm:$0xff] %v9147_v19 }
 0x710   :  { %2529 = vmatpush.msra.mxu3 %v9123_v40  ;;  %2549 = vmatpush.msra.mxu0 %v9125_v43 }
 0x711   :  { %2490 = vmatpush.msrb.mxu1 %v9129_v56  ;;  %2510 = vmatpush.msra.mxu2 %v9131_v1 }
 0x712   :  { %2530 = vmatpush.msra.mxu3 %v9135_v0  ;;  %2550 = vmatpush.msra.mxu0 %v9137_v51 }
 0x713   :  { %2491 = vmatpush.msrb.mxu1 %v9141_v57  ;;  %2511 = vmatpush.msra.mxu2 %v9143_v58 }
 0x714   :  { %2531 = vmatpush.msra.mxu3 %v9147_v19  ;;  %2551 = vmatpush.msra.mxu0 %v9149_v60 }
 0x715   :  { %2492 = vmatpush.msrb.mxu1 %v9153_v61  ;;  %2512 = vmatpush.msra.mxu2 %v9155_v62 }
 0x716   :  { %2532 = vmatpush.msra.mxu3 %v9159_v63  ;;  %2552 = vmatpush.msra.mxu0 %v9161_v2 }
 0x717   :  { %2326 = vmatmul.f32.gmra.mxu1 %v9013_v30  ;;  %2349 = vmatmul.f32.gmra.mxu2 %v9013_v30 }
 0x718   :  { %2372 = vmatmul.f32.gmra.mxu3 %v9013_v30  ;;  %2395 = vmatmul.f32.gmra.mxu0 %v9013_v30  ;;  %v9199_v30 = vld [vmem:[#allocation17 + $0x30] sm:$0xff] }
 0x719   :  { %2493 = vmatpush.msrb.mxu1 %v9169_v3  ;;  %2513 = vmatpush.msra.mxu2 %v9171_v45  ;;  %11238 = vst [vmem:[#allocation59_spill] sm:$0xff] %v9199_v30 }
 0x71a   :  { %2533 = vmatpush.msra.mxu3 %v9175_v4  ;;  %2553 = vmatpush.msra.mxu0 %v9177_v16 }
 0x71b   :  { %2494 = vmatpush.msrb.mxu1 %v9181_v54  ;;  %2514 = vmatpush.msra.mxu2 %v9183_v8 }
 0x71c   :  { %2534 = vmatpush.msra.mxu3 %v9187_v44  ;;  %2554 = vmatpush.msra.mxu0 %v9189_v53  ;;  %v11244_v53 = vmov 0.0  }
 0x71d   :  { %2495 = vmatpush.msrb.mxu1 %v9193_v49  ;;  %2515 = vmatpush.msra.mxu2 %v9195_v55 }
 0x71e   :  { %2535 = vmatpush.msra.mxu3 %v9199_v30  ;;  %2555 = vmatpush.msra.mxu0 %v9201_v46 }
 0x71f   :  { %2496 = vmatpush.msrb.mxu1 %v9205_v50  ;;  %2516 = vmatpush.msra.mxu2 %v9207_v14 }
 0x720   :  { %2536 = vmatpush.msra.mxu3 %v9211_v28  ;;  %2556 = vmatpush.msra.mxu0 %v9213_v34 }
 0x721   :  { %2497 = vmatmul.f32.vlgmr.msrb.gmra.mxu1 %v11244_v53  ;;  %2517 = vmatmul.f32.vlgmr.msra.gmra.mxu2 %v11244_v53 }
 0x722   :  { %2537 = vmatmul.f32.vlgmr.msra.gmra.mxu3 %v11244_v53  ;;  %2557 = vmatmul.f32.vlgmr.msra.gmra.mxu0 %v11244_v53  ;;  %v11245_v53 = vld [vmem:[#allocation56_spill] sm:$0xff] }
 0x723   :  { %2629 = vmatpush.msra.mxu1 %v9021_v52  ;;  %2649 = vmatpush.msrb.mxu2 %v9023_v42 }
 0x724   :  { %2669 = vmatpush.msrb.mxu3 %v9025_v41  ;;  %2689 = vmatpush.msrb.mxu0 %v9027_v39 }
 0x725   :  { %2630 = vmatpush.msra.mxu1 %v9029_v7  ;;  %2650 = vmatpush.msrb.mxu2 %v9031_v10 }
 0x726   :  { %2670 = vmatpush.msrb.mxu3 %v9035_v11  ;;  %2690 = vmatpush.msrb.mxu0 %v9037_v12 }
 0x727   :  { %2631 = vmatpush.msra.mxu1 %v9041_v13  ;;  %2651 = vmatpush.msrb.mxu2 %v9043_v17 }
 0x728   :  { %2671 = vmatpush.msrb.mxu3 %v9047_v32  ;;  %2691 = vmatpush.msrb.mxu0 %v9049_v22 }
 0x729   :  { %2632 = vmatpush.msra.mxu1 %v9053_v31  ;;  %2652 = vmatpush.msrb.mxu2 %v9055_v9 }
 0x72a   :  { %2672 = vmatpush.msrb.mxu3 %v9059_v18  ;;  %2692 = vmatpush.msrb.mxu0 %v9061_v6 }
 0x72b   :  { %2633 = vmatpush.msra.mxu1 %v9069_v48  ;;  %2653 = vmatpush.msrb.mxu2 %v9071_v23 }
 0x72c   :  { %2673 = vmatpush.msrb.mxu3 %v9073_v29  ;;  %2693 = vmatpush.msrb.mxu0 %v9075_v15 }
 0x72d   :  { %2634 = vmatpush.msra.mxu1 %v9077_v27  ;;  %2654 = vmatpush.msrb.mxu2 %v9079_v25 }
 0x72e   :  { %2674 = vmatpush.msrb.mxu3 %v9083_v21  ;;  %2694 = vmatpush.msrb.mxu0 %v9085_v47 }
 0x72f   :  { %2635 = vmatpush.msra.mxu1 %v9089_v24  ;;  %2655 = vmatpush.msrb.mxu2 %v9091_v59 }
 0x730   :  { %2675 = vmatpush.msrb.mxu3 %v9095_v20  ;;  %2695 = vmatpush.msrb.mxu0 %v9097_v35 }
 0x731   :  { %2636 = vmatpush.msra.mxu1 %v9101_v26  ;;  %2656 = vmatpush.msrb.mxu2 %v9103_v33 }
 0x732   :  { %2676 = vmatpush.msrb.mxu3 %v9107_v36  ;;  %2696 = vmatpush.msrb.mxu0 %v9109_v37 }
 0x733   :  { %2637 = vmatpush.msra.mxu1 %v9117_v38  ;;  %2657 = vmatpush.msrb.mxu2 %v9119_v5 }
 0x734   :  { %2677 = vmatpush.msrb.mxu3 %v9123_v40  ;;  %2697 = vmatpush.msrb.mxu0 %v9125_v43 }
 0x735   :  { %2638 = vmatpush.msra.mxu1 %v9129_v56  ;;  %2658 = vmatpush.msrb.mxu2 %v9131_v1 }
 0x736   :  { %2678 = vmatpush.msrb.mxu3 %v9135_v0  ;;  %2698 = vmatpush.msrb.mxu0 %v9137_v51 }
 0x737   :  { %2639 = vmatpush.msra.mxu1 %v9141_v57  ;;  %2659 = vmatpush.msrb.mxu2 %v9143_v58 }
 0x738   :  { %2679 = vmatpush.msrb.mxu3 %v9147_v19  ;;  %2699 = vmatpush.msrb.mxu0 %v9149_v60 }
 0x739   :  { %2640 = vmatpush.msra.mxu1 %v9153_v61  ;;  %2660 = vmatpush.msrb.mxu2 %v9155_v62 }
 0x73a   :  { %2680 = vmatpush.msrb.mxu3 %v9159_v63  ;;  %2700 = vmatpush.msrb.mxu0 %v9161_v2 }
 0x73b   :  { %2641 = vmatpush.msra.mxu1 %v9169_v3  ;;  %2661 = vmatpush.msrb.mxu2 %v9171_v45 }
 0x73c   :  { %2681 = vmatpush.msrb.mxu3 %v9175_v4  ;;  %2701 = vmatpush.msrb.mxu0 %v9177_v16 }
 0x73d   :  { %2642 = vmatpush.msra.mxu1 %v9181_v54  ;;  %2662 = vmatpush.msrb.mxu2 %v9183_v8 }
 0x73e   :  { %2682 = vmatpush.msrb.mxu3 %v9187_v44  ;;  %2702 = vmatpush.msrb.mxu0 %v11245_v53 }
 0x73f   :  { %2643 = vmatpush.msra.mxu1 %v9193_v49  ;;  %2663 = vmatpush.msrb.mxu2 %v9195_v55 }
 0x740   :  { %2683 = vmatpush.msrb.mxu3 %v9199_v30  ;;  %2703 = vmatpush.msrb.mxu0 %v9201_v46 }
 0x741   :  { %2644 = vmatpush.msra.mxu1 %v9205_v50  ;;  %2664 = vmatpush.msrb.mxu2 %v9207_v14 }
 0x742   :  { %2684 = vmatpush.msrb.mxu3 %v9211_v28  ;;  %2704 = vmatpush.msrb.mxu0 %v9213_v34 }
 0x743   :  { %2795 = vmatpush.msrb.mxu1 %v9021_v52  ;;  %2815 = vmatpush.msra.mxu2 %v9023_v42 }
 0x744   :  { %2835 = vmatpush.msra.mxu3 %v9025_v41  ;;  %2855 = vmatpush.msra.mxu0 %v9027_v39 }
 0x745   :  { %2796 = vmatpush.msrb.mxu1 %v9029_v7  ;;  %2816 = vmatpush.msra.mxu2 %v9031_v10 }
 0x746   :  { %2836 = vmatpush.msra.mxu3 %v9035_v11  ;;  %2856 = vmatpush.msra.mxu0 %v9037_v12 }
 0x747   :  { %2797 = vmatpush.msrb.mxu1 %v9041_v13  ;;  %2817 = vmatpush.msra.mxu2 %v9043_v17 }
 0x748   :  { %2837 = vmatpush.msra.mxu3 %v9047_v32  ;;  %2857 = vmatpush.msra.mxu0 %v9049_v22 }
 0x749   :  { %2798 = vmatpush.msrb.mxu1 %v9053_v31  ;;  %2818 = vmatpush.msra.mxu2 %v9055_v9 }
 0x74a   :  { %2838 = vmatpush.msra.mxu3 %v9059_v18  ;;  %2858 = vmatpush.msra.mxu0 %v9061_v6 }
 0x74b   :  { %2799 = vmatpush.msrb.mxu1 %v9069_v48  ;;  %2819 = vmatpush.msra.mxu2 %v9071_v23 }
 0x74c   :  { %2839 = vmatpush.msra.mxu3 %v9073_v29  ;;  %2859 = vmatpush.msra.mxu0 %v9075_v15 }
 0x74d   :  { %2800 = vmatpush.msrb.mxu1 %v9077_v27  ;;  %2820 = vmatpush.msra.mxu2 %v9079_v25 }
 0x74e   :  { %2840 = vmatpush.msra.mxu3 %v9083_v21  ;;  %2860 = vmatpush.msra.mxu0 %v9085_v47 }
 0x74f   :  { %2801 = vmatpush.msrb.mxu1 %v9089_v24  ;;  %2821 = vmatpush.msra.mxu2 %v9091_v59 }
 0x750   :  { %2841 = vmatpush.msra.mxu3 %v9095_v20  ;;  %2861 = vmatpush.msra.mxu0 %v9097_v35 }
 0x751   :  { %2802 = vmatpush.msrb.mxu1 %v9101_v26  ;;  %2822 = vmatpush.msra.mxu2 %v9103_v33 }
 0x752   :  { %2842 = vmatpush.msra.mxu3 %v9107_v36  ;;  %2862 = vmatpush.msra.mxu0 %v9109_v37 }
 0x753   :  { %2803 = vmatpush.msrb.mxu1 %v9117_v38  ;;  %2823 = vmatpush.msra.mxu2 %v9119_v5 }
 0x754   :  { %2843 = vmatpush.msra.mxu3 %v9123_v40  ;;  %2863 = vmatpush.msra.mxu0 %v9125_v43 }
 0x755   :  { %2804 = vmatpush.msrb.mxu1 %v9129_v56  ;;  %2824 = vmatpush.msra.mxu2 %v9131_v1 }
 0x756   :  { %2844 = vmatpush.msra.mxu3 %v9135_v0  ;;  %2864 = vmatpush.msra.mxu0 %v9137_v51 }
 0x757   :  { %2805 = vmatpush.msrb.mxu1 %v9141_v57  ;;  %2825 = vmatpush.msra.mxu2 %v9143_v58 }
 0x758   :  { %2845 = vmatpush.msra.mxu3 %v9147_v19  ;;  %2865 = vmatpush.msra.mxu0 %v9149_v60 }
 0x759   :  { %2806 = vmatpush.msrb.mxu1 %v9153_v61  ;;  %2826 = vmatpush.msra.mxu2 %v9155_v62 }
 0x75a   :  { %2846 = vmatpush.msra.mxu3 %v9159_v63  ;;  %2866 = vmatpush.msra.mxu0 %v9161_v2 }
 0x75b   :  { %2807 = vmatpush.msrb.mxu1 %v9169_v3  ;;  %2827 = vmatpush.msra.mxu2 %v9171_v45 }
 0x75c   :  { %2847 = vmatpush.msra.mxu3 %v9175_v4  ;;  %2867 = vmatpush.msra.mxu0 %v9177_v16 }
 0x75d   :  { %2808 = vmatpush.msrb.mxu1 %v9181_v54  ;;  %2828 = vmatpush.msra.mxu2 %v9183_v8 }
 0x75e   :  { %2848 = vmatpush.msra.mxu3 %v9187_v44  ;;  %2868 = vmatpush.msra.mxu0 %v11245_v53 }
 0x75f   :  { %2809 = vmatpush.msrb.mxu1 %v9193_v49  ;;  %2829 = vmatpush.msra.mxu2 %v9195_v55 }
 0x760   :  { %2849 = vmatpush.msra.mxu3 %v9199_v30  ;;  %2869 = vmatpush.msra.mxu0 %v9201_v46 }
 0x761   :  { %2810 = vmatpush.msrb.mxu1 %v9205_v50  ;;  %2830 = vmatpush.msra.mxu2 %v9207_v14 }
 0x762   :  { %2850 = vmatpush.msra.mxu3 %v9211_v28  ;;  %2870 = vmatpush.msra.mxu0 %v9213_v34  ;;  %v9362_v28 = vld [vmem:[%s11249_s14] sm:$0xf] }
 0x763   :  { %11250 = vst [vmem:[#allocation70_spill] sm:$0xff] %v9362_v28  ;;  %v10927_v50 = vperm.slane %v9362_v28, 0  ;;  %v2402_v3 = vperm.slane %v9362_v28, 1 }
 0x776   :  { %v2232_v8 = vpop.f32.mrf.mxu1 }
 0x777   :  { %v2301_v30 = vpop.f32.mrf.mxu0 }
 0x77c   :  { %v2255_v44 = vpop.f32.mrf.mxu2 }
 0x77d   :  { %v2278_v54 = vpop.f32.mrf.mxu3 }
 0x780   :  { %v9353_v53 = vpop.f32.mrf.mxu1 }
 0x781   :  { %11246 = vst [vmem:[#allocation65_spill] sm:$0xff] %v9353_v53  ;;  %v9364_v34 = vpop.f32.mrf.mxu0 }
 0x782   :  { %11251 = vst [vmem:[#allocation71_spill] sm:$0xff] %v9364_v34 }
 0x786   :  { %v2258_v49 = vpop.f32.mrf.mxu2 }
 0x787   :  { %v9355_v16 = vpop.f32.mrf.mxu3 }
 0x788   :  { %11247 = vst [vmem:[#allocation66_spill] sm:$0xff] %v9355_v16 }
 0x78a   :  { %v2324_v55 = vpop.f32.mrf.mxu1 }
 0x78b   :  { %v2325_v14 = vadd.f32 %v2324_v55, %v2232_v8  ;;  %v10926_v8 = vperm.slane %v9362_v28, 2  ;;  %v2393_v55 = vpop.f32.mrf.mxu0 }
 0x78d   :  { %v9372_v63 = vadd.f32 %v10927_v50, %v2325_v14  ;;  %v2394_v50 = vadd.f32 %v2393_v55, %v2301_v30 }
 0x78f   :  { %11253 = vst [vmem:[#allocation76_spill] sm:$0xff] %v9372_v63 }
 0x790   :  { %v2347_v4 = vpop.f32.mrf.mxu2 }
 0x791   :  { %v2370_v46 = vpop.f32.mrf.mxu3  ;;  %v2348_v61 = vadd.f32 %v2347_v4, %v2255_v44 }
 0x792   :  { %v2371_v34 = vadd.f32 %v2370_v46, %v2278_v54 }
 0x793   :  { %v9378_v58 = vadd.f32 %v2402_v3, %v2348_v61 }
 0x794   :  { %v9357_v45 = vpop.f32.mrf.mxu1 }
 0x795   :  { %11248 = vst [vmem:[#allocation67_spill] sm:$0xff] %v9357_v45 }
 0x796   :  { %11255 = vst [vmem:[#allocation84_spill] sm:$0xff] %v9378_v58 }
 0x79a   :  { %v2350_v53 = vpop.f32.mrf.mxu2 }
 0x79b   :  { %v2351_v16 = vadd.f32 %v2350_v53, %v2258_v49  ;;  %v9368_v2 = vpop.f32.mrf.mxu3  ;;  %v9382_v53 = vadd.f32 %v10926_v8, %v2371_v34 }
 0x79c   :  { %11252 = vst [vmem:[#allocation73_spill] sm:$0xff] %v9368_v2 }
 0x79d   :  { %v9374_v45 = vadd.f32 %v2402_v3, %v2351_v16  ;;  %11256 = vst [vmem:[#allocation85_spill] sm:$0xff] %v9382_v53 }
 0x79e   :  { %v2498_v62 = vpop.f32.mrf.mxu1 }
 0x79f   :  { %11254 = vst [vmem:[#allocation83_spill] sm:$0xff] %v9374_v45  ;;  %v2561_v60 = vadd.f32 %v2498_v62, %v9372_v63 }
 0x7a1   :  { %v6606_v19 = vmul.f32 -1.442695, %v2561_v60  ;;  %v9386_v60 = vpop.f32.mrf.mxu0 }
 0x7a2   :  { %11257 = vst [vmem:[#allocation86_spill] sm:$0xff] %v9386_v60 }
 0x7a3   :  { %6912 = vpow2.f32 %v6606_v19 }
 0x7a4   :  { %v2518_v49 = vpop.f32.mrf.mxu2 }
 0x7a5   :  { %v2562_v16 = vadd.f32 %v2518_v49, %v9378_v58  ;;  %v2538_v14 = vpop.f32.mrf.mxu3  ;;  %v10935_v49 = vperm.slane %v9362_v28, 3 }
 0x7a6   :  { %v2563_v4 = vadd.f32 %v2538_v14, %v9382_v53 }
 0x7a7   :  { %v6607_v44 = vmul.f32 -1.442695, %v2562_v16 }
 0x7a8   :  { %v6608_v62 = vmul.f32 -1.442695, %v2563_v4  ;;  %v9391_v4 = vadd.f32 %v10935_v49, %v2394_v50 }
 0x7a9   :  { %v6913_v54 = vpop.eup %6912  ;;  %6914 = vpow2.f32 %v6607_v44  ;;  %v2558_v14 = vpop.f32.mrf.mxu0 }
 0x7aa   :  { %v2574_v46 = vadd.f32 1.0, %v6913_v54  ;;  %6916 = vpow2.f32 %v6608_v62  ;;  %11258 = vst [vmem:[#allocation87_spill] sm:$0xff] %v9391_v4  ;;  %v2564_v54 = vadd.f32 %v2558_v14, %v9391_v4 }
 0x7ac   :  { %6918 = vrcp.f32 %v2574_v46  ;;  %v2588_v30 = vand.u32 2147483648, %v2574_v46  ;;  %vm2582_vm8 = vweird.f32 %v2574_v46  ;;  %v2586_v2 = vand.u32 2147483647, %v2574_v46 }
 0x7ae   :  { %vm2587_vm11 = vcmp.eq.f32.partialorder %v2586_v2, 8.507059e+37 }
 0x7af   :  { %v6915_v19 = vpop.eup %6914 }
 0x7b0   :  { %v6917_v61 = vpop.eup %6916  ;;  %v2575_v3 = vadd.f32 1.0, %v6915_v19 }
 0x7b1   :  { %v2576_v34 = vadd.f32 1.0, %v6917_v61 }
 0x7b2   :  { %v6919_v8 = vpop.eup %6918  ;;  %6920 = vrcp.f32 %v2575_v3  ;;  %v2601_v50 = vand.u32 2147483647, %v2575_v3  ;;  %vm2597_vm12 = vweird.f32 %v2575_v3 }
 0x7b3   :  { %v2578_v45 = vmul.f32 %v6919_v8, %v2574_v46  ;;  %6922 = vrcp.f32 %v2576_v34  ;;  %vm2583_vm7 = vweird.f32 %v6919_v8  ;;  %vm2612_vm0 = vweird.f32 %v2576_v34 }
 0x7b4   :  { %vm2584_vm9 = vmor %vm2582_vm8, %vm2583_vm7  ;;  %6924 = vtanh.f32 %v2564_v54  ;;  %vm2602_vm14 = vcmp.eq.f32.partialorder %v2601_v50, 8.507059e+37  ;;  %v2616_v2 = vand.u32 2147483647, %v2576_v34  ;;  %v11285_v50 = vld [vmem:[#allocation76_spill] sm:$0xff] }
 0x7b5   :  { %v2579_v16 = vsub.f32 1.0, %v2578_v45  ;;  %v2603_v45 = vand.u32 2147483648, %v2575_v3 }
 0x7b6   :  { %vm2617_vm2 = vcmp.eq.f32.partialorder %v2616_v2, 8.507059e+37  ;;  %v11287_v2 = vld [vmem:[#allocation85_spill] sm:$0xff] }
 0x7b7   :  { %v2580_v44 = vmul.f32 %v6919_v8, %v2579_v16  ;;  %v2589_v16 = vor.u32 1.1754944e-38, %v2588_v30  ;;  %v2604_v4 = vor.u32 1.1754944e-38, %v2603_v45  ;;  %v11284_v30 = vld [vmem:[#allocation64_spill] sm:$0xff] }
 0x7b8   :  { %v6921_v62 = vpop.eup %6920 }
 0x7b9   :  { %v6923_v60 = vpop.eup %6922  ;;  %v2581_v19 = vadd.f32 %v6919_v8, %v2580_v44  ;;  %v2593_v61 = vmul.f32 %v6921_v62, %v2575_v3  ;;  %vm2598_vm10 = vweird.f32 %v6921_v62 }
 0x7ba   :  { %v2608_v55 = vmul.f32 %v6923_v60, %v2576_v34  ;;  %vm2599_vm13 = vmor %vm2597_vm12, %vm2598_vm10  ;;  %v6925_v57 = vpop.eup %6924  ;;  %vm2613_vm15 = vweird.f32 %v6923_v60 }
 0x7bb   :  { %v2594_v53 = vsub.f32 1.0, %v2593_v61  ;;  %v2585_v58 = vsel %vm2584_vm9, %v6919_v8, %v2581_v19  ;;  %vm2614_vm1 = vmor %vm2612_vm0, %vm2613_vm15 }
 0x7bc   :  { %v2609_v49 = vsub.f32 1.0, %v2608_v55  ;;  %v2590_v44 = vsel %vm2587_vm11, %v2589_v16, %v2585_v58 }
 0x7bd   :  { %v2595_v28 = vmul.f32 %v6921_v62, %v2594_v53  ;;  %v2624_v51 = vmul.f32 %v6925_v57, %v2590_v44  ;;  %v2618_v53 = vand.u32 2147483648, %v2576_v34  ;;  %v11278_v57 = vld [vmem:[#allocation58_spill] sm:$0xff]  ;;  %v11281_v34 = vld [vmem:[#allocation61_spill] sm:$0xff] }
 0x7be   :  { %v2610_v61 = vmul.f32 %v6923_v60, %v2609_v49  ;;  %v11282_v49 = vld [vmem:[#allocation62_spill] sm:$0xff] }
 0x7bf   :  { %v2596_v14 = vadd.f32 %v6921_v62, %v2595_v28  ;;  %v2619_v28 = vor.u32 1.1754944e-38, %v2618_v53 }
 0x7c0   :  { %v2611_v8 = vadd.f32 %v6923_v60, %v2610_v61 }
 0x7c1   :  { %v2600_v63 = vsel %vm2599_vm13, %v6921_v62, %v2596_v14 }
 0x7c2   :  { %v2605_v46 = vsel %vm2602_vm14, %v2604_v4, %v2600_v63  ;;  %v2615_v58 = vsel %vm2614_vm1, %v6923_v60, %v2611_v8  ;;  %v11279_v63 = vld [vmem:[#allocation59_spill] sm:$0xff]  ;;  %v11280_v60 = vld [vmem:[#allocation60_spill] sm:$0xff] }
 0x7c3   :  { %v2623_v54 = vmul.f32 0.0, %v2605_v46  ;;  %v2620_v62 = vsel %vm2617_vm2, %v2619_v28, %v2615_v58  ;;  %v11283_v4 = vld [vmem:[#allocation63_spill] sm:$0xff]  ;;  %v11286_v8 = vld [vmem:[#allocation84_spill] sm:$0xff] }
 0x7c5   :  { %v9394_v0 = vadd.f32 %v2624_v51, %v2623_v54  ;;  %v11277_v51 = vld [vmem:[#allocation57_spill] sm:$0xff] }
 0x7c7   :  { %6926 = vtanh.f32 %v9394_v0 }
 0x7cd   :  { %v6927_v3 = vpop.eup %6926 }
 0x7ce   :  { %v2627_v19 = vmul.f32 %v6927_v3, %v2620_v62 }
 0x7d0   :  { %2628 = vst [vmem:[#allocation3 + $0x8] sm:$0x3] %v2627_v19  ;;  %2645 = vmatmul.f32.vlgmr.msra.gmra.mxu1 %v2627_v19  ;;  %2665 = vmatmul.f32.vlgmr.msrb.gmra.mxu2 %v2627_v19 }
 0x7d1   :  { %2685 = vmatmul.f32.vlgmr.msrb.gmra.mxu3 %v2627_v19  ;;  %2705 = vmatmul.f32.vlgmr.msrb.gmra.mxu0 %v2627_v19 }
 0x7d2   :  { %2961 = vmatpush.msra.mxu1 %v9021_v52  ;;  %2981 = vmatpush.msrb.mxu2 %v9023_v42  ;;  %v11259_v52 = vld [vmem:[#allocation69_spill] sm:$0xff]  ;;  %v11260_v42 = vld [vmem:[#allocation72_spill] sm:$0xff] }
 0x7d3   :  { %3001 = vmatpush.msrb.mxu3 %v9025_v41  ;;  %3021 = vmatpush.msrb.mxu0 %v9027_v39  ;;  %v11261_v41 = vld [vmem:[#allocation41_spill] sm:$0xff]  ;;  %v11262_v39 = vld [vmem:[#allocation42_spill] sm:$0xff] }
 0x7d4   :  { %2962 = vmatpush.msra.mxu1 %v9029_v7  ;;  %2982 = vmatpush.msrb.mxu2 %v9031_v10  ;;  %v11263_v7 = vld [vmem:[#allocation43_spill] sm:$0xff]  ;;  %v11264_v10 = vld [vmem:[#allocation44_spill] sm:$0xff] }
 0x7d5   :  { %3002 = vmatpush.msrb.mxu3 %v9035_v11  ;;  %3022 = vmatpush.msrb.mxu0 %v9037_v12  ;;  %v11265_v11 = vld [vmem:[#allocation45_spill] sm:$0xff]  ;;  %v11266_v12 = vld [vmem:[#allocation46_spill] sm:$0xff] }
 0x7d6   :  { %2963 = vmatpush.msra.mxu1 %v9041_v13  ;;  %2983 = vmatpush.msrb.mxu2 %v9043_v17  ;;  %v11267_v13 = vld [vmem:[#allocation47_spill] sm:$0xff]  ;;  %v11268_v17 = vld [vmem:[#allocation48_spill] sm:$0xff] }
 0x7d7   :  { %3003 = vmatpush.msrb.mxu3 %v9047_v32  ;;  %3023 = vmatpush.msrb.mxu0 %v9049_v22  ;;  %v11269_v32 = vld [vmem:[#allocation49_spill] sm:$0xff]  ;;  %v11270_v22 = vld [vmem:[#allocation50_spill] sm:$0xff] }
 0x7d8   :  { %2964 = vmatpush.msra.mxu1 %v9053_v31  ;;  %2984 = vmatpush.msrb.mxu2 %v9055_v9  ;;  %v11271_v31 = vld [vmem:[#allocation51_spill] sm:$0xff]  ;;  %v11272_v9 = vld [vmem:[#allocation52_spill] sm:$0xff] }
 0x7d9   :  { %3004 = vmatpush.msrb.mxu3 %v9059_v18  ;;  %3024 = vmatpush.msrb.mxu0 %v9061_v6  ;;  %v11273_v18 = vld [vmem:[#allocation53_spill] sm:$0xff]  ;;  %v11274_v6 = vld [vmem:[#allocation54_spill] sm:$0xff] }
 0x7da   :  { %2965 = vmatpush.msra.mxu1 %v9069_v48  ;;  %2985 = vmatpush.msrb.mxu2 %v9071_v23  ;;  %v11275_v48 = vld [vmem:[#allocation55_spill] sm:$0xff]  ;;  %v11276_v23 = vld [vmem:[#allocation56_spill] sm:$0xff] }
 0x7db   :  { %3005 = vmatpush.msrb.mxu3 %v9073_v29  ;;  %3025 = vmatpush.msrb.mxu0 %v9075_v15 }
 0x7dc   :  { %2966 = vmatpush.msra.mxu1 %v9077_v27  ;;  %2986 = vmatpush.msrb.mxu2 %v9079_v25 }
 0x7dd   :  { %3006 = vmatpush.msrb.mxu3 %v9083_v21  ;;  %3026 = vmatpush.msrb.mxu0 %v9085_v47 }
 0x7de   :  { %2967 = vmatpush.msra.mxu1 %v9089_v24  ;;  %2987 = vmatpush.msrb.mxu2 %v9091_v59 }
 0x7df   :  { %3007 = vmatpush.msrb.mxu3 %v9095_v20  ;;  %3027 = vmatpush.msrb.mxu0 %v9097_v35 }
 0x7e0   :  { %2968 = vmatpush.msra.mxu1 %v9101_v26  ;;  %2988 = vmatpush.msrb.mxu2 %v9103_v33 }
 0x7e1   :  { %3008 = vmatpush.msrb.mxu3 %v9107_v36  ;;  %3028 = vmatpush.msrb.mxu0 %v9109_v37 }
 0x7e2   :  { %2969 = vmatpush.msra.mxu1 %v9117_v38  ;;  %2989 = vmatpush.msrb.mxu2 %v9119_v5 }
 0x7e3   :  { %3009 = vmatpush.msrb.mxu3 %v9123_v40  ;;  %3029 = vmatpush.msrb.mxu0 %v9125_v43 }
 0x7e4   :  { %2970 = vmatpush.msra.mxu1 %v9129_v56  ;;  %2990 = vmatpush.msrb.mxu2 %v9131_v1 }
 0x7e5   :  { %3010 = vmatpush.msrb.mxu3 %v11259_v52  ;;  %3030 = vmatpush.msrb.mxu0 %v11260_v42 }
 0x7e6   :  { %2971 = vmatpush.msra.mxu1 %v11261_v41  ;;  %2991 = vmatpush.msrb.mxu2 %v11262_v39 }
 0x7e7   :  { %3011 = vmatpush.msrb.mxu3 %v11263_v7  ;;  %3031 = vmatpush.msrb.mxu0 %v11264_v10 }
 0x7e8   :  { %2972 = vmatpush.msra.mxu1 %v11265_v11  ;;  %2992 = vmatpush.msrb.mxu2 %v11266_v12 }
 0x7e9   :  { %3012 = vmatpush.msrb.mxu3 %v11267_v13  ;;  %3032 = vmatpush.msrb.mxu0 %v11268_v17 }
 0x7ea   :  { %2973 = vmatpush.msra.mxu1 %v11269_v32  ;;  %2993 = vmatpush.msrb.mxu2 %v11270_v22 }
 0x7eb   :  { %3013 = vmatpush.msrb.mxu3 %v11271_v31  ;;  %3033 = vmatpush.msrb.mxu0 %v11272_v9 }
 0x7ec   :  { %2974 = vmatpush.msra.mxu1 %v11273_v18  ;;  %2994 = vmatpush.msrb.mxu2 %v11274_v6 }
 0x7ed   :  { %3014 = vmatpush.msrb.mxu3 %v11275_v48  ;;  %3034 = vmatpush.msrb.mxu0 %v11276_v23 }
 0x7ee   :  { %2975 = vmatpush.msra.mxu1 %v11277_v51  ;;  %2995 = vmatpush.msrb.mxu2 %v11278_v57 }
 0x7ef   :  { %3015 = vmatpush.msrb.mxu3 %v11279_v63  ;;  %3035 = vmatpush.msrb.mxu0 %v11280_v60 }
 0x7f0   :  { %2976 = vmatpush.msra.mxu1 %v11281_v34  ;;  %2996 = vmatpush.msrb.mxu2 %v11282_v49 }
 0x7f1   :  { %3016 = vmatpush.msrb.mxu3 %v11283_v4  ;;  %3036 = vmatpush.msrb.mxu0 %v11284_v30 }
 0x84d   :  { %v2646_v55 = vpop.f32.mrf.mxu1 }
 0x84e   :  { %v2713_v45 = vrot.slane %v2646_v55, 6 }
 0x850   :  { %v2721_v16 = vadd.f32 %v2713_v45, %v11285_v50 }
 0x852   :  { %v6609_v14 = vmul.f32 -1.442695, %v2721_v16  ;;  %v2706_v16 = vpop.f32.mrf.mxu0 }
 0x853   :  { %v2666_v44 = vpop.f32.mrf.mxu2 }
 0x854   :  { %6928 = vpow2.f32 %v6609_v14  ;;  %v2714_v46 = vrot.slane %v2666_v44, 6  ;;  %v2686_v61 = vpop.f32.mrf.mxu3 }
 0x855   :  { %v2715_v54 = vrot.slane %v2686_v61, 6  ;;  %v2716_v61 = vrot.slane %v2706_v16, 6 }
 0x856   :  { %v2722_v53 = vadd.f32 %v2714_v46, %v11286_v8 }
 0x857   :  { %v2723_v58 = vadd.f32 %v2715_v54, %v11287_v2 }
 0x858   :  { %v6610_v28 = vmul.f32 -1.442695, %v2722_v53  ;;  %v11288_v53 = vld [vmem:[#allocation87_spill] sm:$0xff] }
 0x859   :  { %v6611_v3 = vmul.f32 -1.442695, %v2723_v58  ;;  %v2724_v58 = vadd.f32 %v2716_v61, %v11288_v53 }
 0x85a   :  { %v6929_v62 = vpop.eup %6928  ;;  %6930 = vpow2.f32 %v6610_v28 }
 0x85b   :  { %v2734_v19 = vadd.f32 1.0, %v6929_v62  ;;  %6932 = vpow2.f32 %v6611_v3 }
 0x85d   :  { %6934 = vrcp.f32 %v2734_v19  ;;  %v2748_v62 = vand.u32 2147483648, %v2734_v19  ;;  %vm2742_vm4 = vweird.f32 %v2734_v19 }
 0x860   :  { %v6931_v55 = vpop.eup %6930 }
 0x861   :  { %v6933_v30 = vpop.eup %6932  ;;  %v2735_v45 = vadd.f32 1.0, %v6931_v55  ;;  %v2746_v55 = vand.u32 2147483647, %v2734_v19 }
 0x862   :  { %v2736_v50 = vadd.f32 1.0, %v6933_v30 }
 0x863   :  { %v6935_v14 = vpop.eup %6934  ;;  %6936 = vrcp.f32 %v2735_v45  ;;  %v2763_v30 = vand.u32 2147483648, %v2735_v45  ;;  %v2761_v16 = vand.u32 2147483647, %v2735_v45  ;;  %vm2747_vm8 = vcmp.eq.f32.partialorder %v2746_v55, 8.507059e+37  ;;  %v9484_v55 = vld [vmem:[#allocation17 + $0x1c8] sm:$0xff] }
 0x864   :  { %v2738_v44 = vmul.f32 %v6935_v14, %v2734_v19  ;;  %6938 = vrcp.f32 %v2736_v50  ;;  %vm2743_vm3 = vweird.f32 %v6935_v14  ;;  %vm2757_vm9 = vweird.f32 %v2735_v45 }
 0x865   :  { %vm2744_vm5 = vmor %vm2742_vm4, %vm2743_vm3  ;;  %6940 = vtanh.f32 %v2724_v58  ;;  %v2764_v53 = vor.u32 1.1754944e-38, %v2763_v30  ;;  %vm2762_vm11 = vcmp.eq.f32.partialorder %v2761_v16, 8.507059e+37  ;;  %v2784_v19 = vrot.slane %v9394_v0, 6  ;;  %v9487_v30 = vld [vmem:[#allocation17 + $0x1d0] sm:$0xff]  ;;  %v9490_v16 = vld [vmem:[#allocation17 + $0x1d8] sm:$0xff] }
 0x866   :  { %v2739_v46 = vsub.f32 1.0, %v2738_v44  ;;  %v2749_v44 = vor.u32 1.1754944e-38, %v2748_v62  ;;  %vm2772_vm13 = vweird.f32 %v2736_v50 }
 0x868   :  { %v2740_v8 = vmul.f32 %v6935_v14, %v2739_v46 }
 0x869   :  { %v6937_v54 = vpop.eup %6936 }
 0x86a   :  { %v6939_v2 = vpop.eup %6938  ;;  %v2741_v28 = vadd.f32 %v6935_v14, %v2740_v8  ;;  %v2753_v3 = vmul.f32 %v6937_v54, %v2735_v45  ;;  %vm2758_vm7 = vweird.f32 %v6937_v54 }
 0x86b   :  { %v2768_v4 = vmul.f32 %v6939_v2, %v2736_v50  ;;  %vm2759_vm10 = vmor %vm2757_vm9, %vm2758_vm7  ;;  %vm2773_vm12 = vweird.f32 %v6939_v2 }
 0x86c   :  { %v2754_v49 = vsub.f32 1.0, %v2753_v3  ;;  %v2745_v34 = vsel %vm2744_vm5, %v6935_v14, %v2741_v28  ;;  %v6941_v3 = vpop.eup %6940  ;;  %vm2774_vm14 = vmor %vm2772_vm13, %vm2773_vm12 }
 0x86d   :  { %v2769_v46 = vsub.f32 1.0, %v2768_v4  ;;  %v2750_v8 = vsel %vm2747_vm8, %v2749_v44, %v2745_v34  ;;  %v2778_v4 = vand.u32 2147483648, %v2736_v50  ;;  %v9493_v44 = vld [vmem:[#allocation17 + $0x1a0] sm:$0xff] }
 0x86e   :  { %v2755_v60 = vmul.f32 %v6937_v54, %v2754_v49  ;;  %v2787_v51 = vmul.f32 %v6941_v3, %v2750_v8  ;;  %v9502_v8 = vld [vmem:[#allocation17 + $0x1b8] sm:$0xff]  ;;  %v9508_v3 = vld [vmem:[#allocation17 + $0x188] sm:$0xff] }
 0x86f   :  { %v2770_v58 = vmul.f32 %v6939_v2, %v2769_v46  ;;  %v2779_v45 = vor.u32 1.1754944e-38, %v2778_v4  ;;  %v9496_v46 = vld [vmem:[#allocation17 + $0x1a8] sm:$0xff] }
 0x870   :  { %v2756_v61 = vadd.f32 %v6937_v54, %v2755_v60  ;;  %v2776_v60 = vand.u32 2147483647, %v2736_v50  ;;  %v9475_v50 = vld [vmem:[#allocation17 + $0x1f0] sm:$0xff]  ;;  %v9520_v4 = vld [vmem:[#allocation17 + $0x168] sm:$0xff] }
 0x871   :  { %v2771_v28 = vadd.f32 %v6939_v2, %v2770_v58  ;;  %v9511_v58 = vld [vmem:[#allocation17 + $0x190] sm:$0xff] }
 0x872   :  { %v2760_v63 = vsel %vm2759_vm10, %v6937_v54, %v2756_v61  ;;  %vm2777_vm15 = vcmp.eq.f32.partialorder %v2776_v60, 8.507059e+37  ;;  %v9499_v61 = vld [vmem:[#allocation17 + $0x1b0] sm:$0xff] }
 0x873   :  { %v2765_v57 = vsel %vm2762_vm11, %v2764_v53, %v2760_v63  ;;  %v2775_v34 = vsel %vm2774_vm14, %v6939_v2, %v2771_v28  ;;  %v9478_v2 = vld [vmem:[#allocation17 + $0x1f8] sm:$0xff]  ;;  %v9481_v53 = vld [vmem:[#allocation17 + $0x1c0] sm:$0xff] }
 0x874   :  { %v2786_v14 = vmul.f32 %v2784_v19, %v2765_v57  ;;  %v2780_v0 = vsel %vm2777_vm15, %v2779_v45, %v2775_v34  ;;  %v9472_v57 = vld [vmem:[#allocation17 + $0x1e8] sm:$0xff]  ;;  %v9505_v19 = vld [vmem:[#allocation17 + $0x180] sm:$0xff] }
 0x875   :  { %v9517_v28 = vld [vmem:[#allocation17 + $0x160] sm:$0xff] }
 0x876   :  { %v9466_v49 = vadd.f32 %v2787_v51, %v2786_v14  ;;  %v9469_v51 = vld [vmem:[#allocation17 + $0x1e0] sm:$0xff]  ;;  %v9514_v14 = vld [vmem:[#allocation17 + $0x198] sm:$0xff] }
 0x878   :  { %6942 = vtanh.f32 %v9466_v49 }
 0x87e   :  { %v6943_v54 = vpop.eup %6942 }
 0x87f   :  { %v2790_v62 = vmul.f32 %v6943_v54, %v2780_v0 }
 0x881   :  { %2791 = vst [vmem:[#allocation3 + $0x8] sm:$0xc] %v2790_v62  ;;  %v2793_v63 = vrot.slane %v2790_v62, 2 }
 0x883   :  { %2811 = vmatmul.f32.vlgmr.msrb.gmra.mxu1 %v2793_v63  ;;  %2831 = vmatmul.f32.vlgmr.msra.gmra.mxu2 %v2793_v63 }
 0x884   :  { %2851 = vmatmul.f32.vlgmr.msra.gmra.mxu3 %v2793_v63  ;;  %2871 = vmatmul.f32.vlgmr.msra.gmra.mxu0 %v2793_v63 }
 0x885   :  { %3127 = vmatpush.msrb.mxu1 %v9469_v51  ;;  %3147 = vmatpush.msra.mxu2 %v9472_v57 }
 0x886   :  { %3167 = vmatpush.msra.mxu3 %v9475_v50  ;;  %3187 = vmatpush.msra.mxu0 %v9478_v2 }
 0x887   :  { %3128 = vmatpush.msrb.mxu1 %v9481_v53  ;;  %3148 = vmatpush.msra.mxu2 %v9484_v55 }
 0x888   :  { %3168 = vmatpush.msra.mxu3 %v9487_v30  ;;  %3188 = vmatpush.msra.mxu0 %v9490_v16 }
 0x889   :  { %3129 = vmatpush.msrb.mxu1 %v9493_v44  ;;  %3149 = vmatpush.msra.mxu2 %v9496_v46 }
 0x88a   :  { %3169 = vmatpush.msra.mxu3 %v9499_v61  ;;  %3189 = vmatpush.msra.mxu0 %v9502_v8 }
 0x88b   :  { %3130 = vmatpush.msrb.mxu1 %v9505_v19  ;;  %3150 = vmatpush.msra.mxu2 %v9508_v3 }
 0x88c   :  { %3170 = vmatpush.msra.mxu3 %v9511_v58  ;;  %3190 = vmatpush.msra.mxu0 %v9514_v14 }
 0x88d   :  { %3131 = vmatpush.msrb.mxu1 %v9517_v28  ;;  %3151 = vmatpush.msra.mxu2 %v9520_v4 }
 0x88e   :  { %3171 = vmatpush.msra.mxu3 %v9073_v29  ;;  %3191 = vmatpush.msra.mxu0 %v9075_v15  ;;  %v11289_v29 = vld [vmem:[#allocation57_spill] sm:$0xff]  ;;  %v11290_v15 = vld [vmem:[#allocation58_spill] sm:$0xff] }
 0x88f   :  { %3132 = vmatpush.msrb.mxu1 %v9077_v27  ;;  %3152 = vmatpush.msra.mxu2 %v9079_v25  ;;  %v11291_v27 = vld [vmem:[#allocation59_spill] sm:$0xff]  ;;  %v11292_v25 = vld [vmem:[#allocation60_spill] sm:$0xff] }
 0x890   :  { %3172 = vmatpush.msra.mxu3 %v9083_v21  ;;  %3192 = vmatpush.msra.mxu0 %v9085_v47  ;;  %v11293_v21 = vld [vmem:[#allocation61_spill] sm:$0xff]  ;;  %v11294_v47 = vld [vmem:[#allocation62_spill] sm:$0xff] }
 0x891   :  { %3133 = vmatpush.msrb.mxu1 %v9089_v24  ;;  %3153 = vmatpush.msra.mxu2 %v9091_v59  ;;  %v11295_v24 = vld [vmem:[#allocation63_spill] sm:$0xff]  ;;  %v11296_v59 = vld [vmem:[#allocation64_spill] sm:$0xff] }
 0x892   :  { %3173 = vmatpush.msra.mxu3 %v9095_v20  ;;  %3193 = vmatpush.msra.mxu0 %v9097_v35 }
 0x893   :  { %3134 = vmatpush.msrb.mxu1 %v9101_v26  ;;  %3154 = vmatpush.msra.mxu2 %v9103_v33  ;;  %v11297_v26 = vld [vmem:[#allocation76_spill] sm:$0xff] }
 0x894   :  { %3174 = vmatpush.msra.mxu3 %v9107_v36  ;;  %3194 = vmatpush.msra.mxu0 %v9109_v37 }
 0x895   :  { %3135 = vmatpush.msrb.mxu1 %v9117_v38  ;;  %3155 = vmatpush.msra.mxu2 %v9119_v5 }
 0x896   :  { %3175 = vmatpush.msra.mxu3 %v9123_v40  ;;  %3195 = vmatpush.msra.mxu0 %v9125_v43  ;;  %v11298_v43 = vld [vmem:[#allocation84_spill] sm:$0xff] }
 0x897   :  { %3136 = vmatpush.msrb.mxu1 %v9129_v56  ;;  %3156 = vmatpush.msra.mxu2 %v9131_v1  ;;  %v11299_v1 = vld [vmem:[#allocation85_spill] sm:$0xff] }
 0x898   :  { %3176 = vmatpush.msra.mxu3 %v11259_v52  ;;  %3196 = vmatpush.msra.mxu0 %v11260_v42 }
 0x899   :  { %3137 = vmatpush.msrb.mxu1 %v11261_v41  ;;  %3157 = vmatpush.msra.mxu2 %v11262_v39 }
 0x89a   :  { %3177 = vmatpush.msra.mxu3 %v11263_v7  ;;  %3197 = vmatpush.msra.mxu0 %v11264_v10 }
 0x89b   :  { %3138 = vmatpush.msrb.mxu1 %v11265_v11  ;;  %3158 = vmatpush.msra.mxu2 %v11266_v12 }
 0x89c   :  { %3178 = vmatpush.msra.mxu3 %v11267_v13  ;;  %3198 = vmatpush.msra.mxu0 %v11268_v17 }
 0x89d   :  { %3139 = vmatpush.msrb.mxu1 %v11269_v32  ;;  %3159 = vmatpush.msra.mxu2 %v11270_v22 }
 0x89e   :  { %3179 = vmatpush.msra.mxu3 %v11271_v31  ;;  %3199 = vmatpush.msra.mxu0 %v11272_v9 }
 0x89f   :  { %3140 = vmatpush.msrb.mxu1 %v11273_v18  ;;  %3160 = vmatpush.msra.mxu2 %v11274_v6 }
 0x8a0   :  { %3180 = vmatpush.msra.mxu3 %v11275_v48  ;;  %3200 = vmatpush.msra.mxu0 %v11276_v23  ;;  %v11300_v48 = vld [vmem:[#allocation87_spill] sm:$0xff] }
 0x8a1   :  { %3141 = vmatpush.msrb.mxu1 %v11289_v29  ;;  %3161 = vmatpush.msra.mxu2 %v11290_v15 }
 0x8a2   :  { %3181 = vmatpush.msra.mxu3 %v11291_v27  ;;  %3201 = vmatpush.msra.mxu0 %v11292_v25 }
 0x8a3   :  { %3142 = vmatpush.msrb.mxu1 %v11293_v21  ;;  %3162 = vmatpush.msra.mxu2 %v11294_v47 }
 0x8a4   :  { %3182 = vmatpush.msra.mxu3 %v11295_v24  ;;  %3202 = vmatpush.msra.mxu0 %v11296_v59 }
 0x900   :  { %v2812_v20 = vpop.f32.mrf.mxu1 }
 0x901   :  { %v2879_v35 = vrot.slane %v2812_v20, 4  ;;  %v2872_v13 = vpop.f32.mrf.mxu0 }
 0x902   :  { %v2882_v31 = vrot.slane %v2872_v13, 4  ;;  %v9595_v13 = vld [vmem:[#allocation17 + $0x170] sm:$0xff] }
 0x903   :  { %v2887_v33 = vadd.f32 %v2879_v35, %v11297_v26  ;;  %v2950_v35 = vrot.slane %v9466_v49, 6 }
 0x904   :  { %v2890_v23 = vadd.f32 %v2882_v31, %v11300_v48  ;;  %v9607_v31 = vld [vmem:[#allocation17 + $0x150] sm:$0xff] }
 0x905   :  { %v6612_v36 = vmul.f32 -1.442695, %v2887_v33 }
 0x906   :  { %v2832_v37 = vpop.f32.mrf.mxu2 }
 0x907   :  { %6944 = vpow2.f32 %v6612_v36  ;;  %v2880_v38 = vrot.slane %v2832_v37, 4  ;;  %v2852_v5 = vpop.f32.mrf.mxu3 }
 0x908   :  { %v2881_v40 = vrot.slane %v2852_v5, 4 }
 0x909   :  { %v2888_v56 = vadd.f32 %v2880_v38, %v11298_v43 }
 0x90a   :  { %v2889_v52 = vadd.f32 %v2881_v40, %v11299_v1 }
 0x90b   :  { %v6613_v42 = vmul.f32 -1.442695, %v2888_v56 }
 0x90c   :  { %v6614_v41 = vmul.f32 -1.442695, %v2889_v52 }
 0x90d   :  { %v6945_v39 = vpop.eup %6944  ;;  %6946 = vpow2.f32 %v6613_v42 }
 0x90e   :  { %v2900_v7 = vadd.f32 1.0, %v6945_v39  ;;  %6948 = vpow2.f32 %v6614_v41 }
 0x910   :  { %6950 = vrcp.f32 %v2900_v7  ;;  %v2914_v54 = vand.u32 2147483648, %v2900_v7  ;;  %vm2908_vm1 = vweird.f32 %v2900_v7  ;;  %v2912_v62 = vand.u32 2147483647, %v2900_v7 }
 0x912   :  { %v2915_v21 = vor.u32 1.1754944e-38, %v2914_v54  ;;  %vm2913_vm4 = vcmp.eq.f32.partialorder %v2912_v62, 8.507059e+37  ;;  %v9631_v54 = vld [vmem:[#allocation17 + $0x110] sm:$0xff]  ;;  %v9637_v62 = vld [vmem:[#allocation17 + $0xe0] sm:$0xff] }
 0x913   :  { %v6947_v10 = vpop.eup %6946 }
 0x914   :  { %v6949_v11 = vpop.eup %6948  ;;  %v2901_v12 = vadd.f32 1.0, %v6947_v10 }
 0x915   :  { %v2902_v17 = vadd.f32 1.0, %v6949_v11 }
 0x916   :  { %v6951_v32 = vpop.eup %6950  ;;  %6952 = vrcp.f32 %v2901_v12  ;;  %v2929_v29 = vand.u32 2147483648, %v2901_v12  ;;  %v2927_v25 = vand.u32 2147483647, %v2901_v12  ;;  %vm2923_vm5 = vweird.f32 %v2901_v12 }
 0x917   :  { %v2904_v22 = vmul.f32 %v6951_v32, %v2900_v7  ;;  %6954 = vrcp.f32 %v2902_v17  ;;  %vm2909_vm0 = vweird.f32 %v6951_v32  ;;  %v2944_v42 = vand.u32 2147483648, %v2902_v17 }
 0x918   :  { %vm2910_vm2 = vmor %vm2908_vm1, %vm2909_vm0  ;;  %6956 = vtanh.f32 %v2890_v23  ;;  %v2930_v20 = vor.u32 1.1754944e-38, %v2929_v29  ;;  %vm2928_vm8 = vcmp.eq.f32.partialorder %v2927_v25, 8.507059e+37  ;;  %vm2938_vm10 = vweird.f32 %v2902_v17  ;;  %v9619_v23 = vld [vmem:[#allocation17 + $0x130] sm:$0xff]  ;;  %v9652_v25 = vld [vmem:[#allocation17 + $0xc8] sm:$0xff] }
 0x919   :  { %v2905_v9 = vsub.f32 1.0, %v2904_v22  ;;  %v2942_v41 = vand.u32 2147483647, %v2902_v17  ;;  %v2945_v7 = vor.u32 1.1754944e-38, %v2944_v42  ;;  %v9604_v22 = vld [vmem:[#allocation17 + $0x148] sm:$0xff]  ;;  %v9643_v29 = vld [vmem:[#allocation17 + $0xf0] sm:$0xff] }
 0x91a   :  { %11301 = vst [vmem:[#allocation69_spill] sm:$0xff] %v9652_v25  ;;  %v9694_v42 = vld [vmem:[#allocation17 + $0x78] sm:$0xff] }
 0x91b   :  { %v2906_v18 = vmul.f32 %v6951_v32, %v2905_v9  ;;  %vm2943_vm12 = vcmp.eq.f32.partialorder %v2942_v41, 8.507059e+37  ;;  %v9610_v9 = vld [vmem:[#allocation17 + $0x158] sm:$0xff]  ;;  %11315 = vst [vmem:[#allocation53_spill] sm:$0xff] %v9694_v42  ;;  %v9697_v41 = vld [vmem:[#allocation17 + $0x40] sm:$0xff] }
 0x91c   :  { %v6953_v6 = vpop.eup %6952  ;;  %11316 = vst [vmem:[#allocation54_spill] sm:$0xff] %v9697_v41 }
 0x91d   :  { %v6955_v60 = vpop.eup %6954  ;;  %v2907_v34 = vadd.f32 %v6951_v32, %v2906_v18  ;;  %v2919_v45 = vmul.f32 %v6953_v6, %v2901_v12  ;;  %vm2924_vm3 = vweird.f32 %v6953_v6  ;;  %v9613_v18 = vld [vmem:[#allocation17 + $0x120] sm:$0xff] }
 0x91e   :  { %v2934_v0 = vmul.f32 %v6955_v60, %v2902_v17  ;;  %vm2925_vm7 = vmor %vm2923_vm5, %vm2924_vm3  ;;  %v6957_v36 = vpop.eup %6956  ;;  %vm2939_vm9 = vweird.f32 %v6955_v60  ;;  %v9598_v17 = vld [vmem:[#allocation17 + $0x178] sm:$0xff] }
 0x91f   :  { %v2920_v63 = vsub.f32 1.0, %v2919_v45  ;;  %v2911_v15 = vsel %vm2910_vm2, %v6951_v32, %v2907_v34  ;;  %vm2940_vm11 = vmor %vm2938_vm10, %vm2939_vm9  ;;  %v9601_v32 = vld [vmem:[#allocation17 + $0x140] sm:$0xff]  ;;  %v9628_v45 = vld [vmem:[#allocation17 + $0x108] sm:$0xff] }
 0x920   :  { %v2935_v47 = vsub.f32 1.0, %v2934_v0  ;;  %v2916_v59 = vsel %vm2913_vm4, %v2915_v21, %v2911_v15  ;;  %v9625_v34 = vld [vmem:[#allocation17 + $0x100] sm:$0xff]  ;;  %v9634_v0 = vld [vmem:[#allocation17 + $0x118] sm:$0xff]  ;;  %v9655_v21 = vld [vmem:[#allocation17 + $0xd0] sm:$0xff] }
 0x921   :  { %v2921_v27 = vmul.f32 %v6953_v6, %v2920_v63  ;;  %v2953_v5 = vmul.f32 %v6957_v36, %v2916_v59  ;;  %v9640_v63 = vld [vmem:[#allocation17 + $0xe8] sm:$0xff]  ;;  %v9646_v15 = vld [vmem:[#allocation17 + $0xf8] sm:$0xff]  ;;  %11302 = vst [vmem:[#allocation72_spill] sm:$0xff] %v9655_v21 }
 0x922   :  { %v2936_v38 = vmul.f32 %v6955_v60, %v2935_v47  ;;  %v9658_v47 = vld [vmem:[#allocation17 + $0xd8] sm:$0xff]  ;;  %v9664_v59 = vld [vmem:[#allocation17 + $0xa8] sm:$0xff] }
 0x923   :  { %v2922_v24 = vadd.f32 %v6953_v6, %v2921_v27  ;;  %v9649_v27 = vld [vmem:[#allocation17 + $0xc0] sm:$0xff]  ;;  %11303 = vst [vmem:[#allocation41_spill] sm:$0xff] %v9658_v47  ;;  %v9676_v36 = vld [vmem:[#allocation17 + $0x88] sm:$0xff] }
 0x924   :  { %v2937_v52 = vadd.f32 %v6955_v60, %v2936_v38  ;;  %11305 = vst [vmem:[#allocation43_spill] sm:$0xff] %v9664_v59  ;;  %v9682_v38 = vld [vmem:[#allocation17 + $0x98] sm:$0xff] }
 0x925   :  { %v2926_v33 = vsel %vm2925_vm7, %v6953_v6, %v2922_v24  ;;  %v9616_v6 = vld [vmem:[#allocation17 + $0x128] sm:$0xff]  ;;  %v9661_v24 = vld [vmem:[#allocation17 + $0xa0] sm:$0xff]  ;;  %11309 = vst [vmem:[#allocation47_spill] sm:$0xff] %v9676_v36 }
 0x926   :  { %v2931_v37 = vsel %vm2928_vm8, %v2930_v20, %v2926_v33  ;;  %v2941_v39 = vsel %vm2940_vm11, %v6955_v60, %v2937_v52  ;;  %v9622_v60 = vld [vmem:[#allocation17 + $0x138] sm:$0xff]  ;;  %11304 = vst [vmem:[#allocation42_spill] sm:$0xff] %v9661_v24  ;;  %v9667_v20 = vld [vmem:[#allocation17 + $0xb0] sm:$0xff]  ;;  %v9673_v33 = vld [vmem:[#allocation17 + $0x80] sm:$0xff] }
 0x927   :  { %v2952_v40 = vmul.f32 %v2950_v35, %v2931_v37  ;;  %v2946_v10 = vsel %vm2943_vm12, %v2945_v7, %v2941_v39  ;;  %11306 = vst [vmem:[#allocation44_spill] sm:$0xff] %v9667_v20  ;;  %v9670_v35 = vld [vmem:[#allocation17 + $0xb8] sm:$0xff]  ;;  %v9679_v37 = vld [vmem:[#allocation17 + $0x90] sm:$0xff]  ;;  %v9700_v39 = vld [vmem:[#allocation17 + $0x48] sm:$0xff] }
 0x928   :  { %11307 = vst [vmem:[#allocation45_spill] sm:$0xff] %v9670_v35  ;;  %v9691_v52 = vld [vmem:[#allocation17 + $0x70] sm:$0xff] }
 0x929   :  { %v9574_v56 = vadd.f32 %v2953_v5, %v2952_v40  ;;  %11308 = vst [vmem:[#allocation46_spill] sm:$0xff] %v9673_v33  ;;  %v9685_v5 = vld [vmem:[#allocation17 + $0x60] sm:$0xff]  ;;  %v9688_v40 = vld [vmem:[#allocation17 + $0x68] sm:$0xff]  ;;  %v9703_v7 = vld [vmem:[#allocation17 + $0x50] sm:$0xff] }
 0x92a   :  { %11310 = vst [vmem:[#allocation48_spill] sm:$0xff] %v9679_v37 }
 0x92b   :  { %6958 = vtanh.f32 %v9574_v56  ;;  %11311 = vst [vmem:[#allocation49_spill] sm:$0xff] %v9682_v38 }
 0x92c   :  { %11312 = vst [vmem:[#allocation50_spill] sm:$0xff] %v9685_v5 }
 0x92d   :  { %11313 = vst [vmem:[#allocation51_spill] sm:$0xff] %v9688_v40 }
 0x92e   :  { %11314 = vst [vmem:[#allocation52_spill] sm:$0xff] %v9691_v52 }
 0x92f   :  { %11317 = vst [vmem:[#allocation55_spill] sm:$0xff] %v9700_v39 }
 0x930   :  { %11318 = vst [vmem:[#allocation56_spill] sm:$0xff] %v9703_v7 }
 0x931   :  { %v6959_v49 = vpop.eup %6958 }
 0x932   :  { %v2956_v11 = vmul.f32 %v6959_v49, %v2946_v10  ;;  %v9706_v49 = vld [vmem:[#allocation17 + $0x58] sm:$0xff]  ;;  %v9709_v10 = vld [vmem:[#allocation17 + $0x20] sm:$0xff] }
 0x933   :  { %11319 = vst [vmem:[#allocation57_spill] sm:$0xff] %v9706_v49 }
 0x934   :  { %2957 = vst [vmem:[#allocation3 + $0x8] sm:$0x30] %v2956_v11  ;;  %v2959_v12 = vrot.slane %v2956_v11, 4  ;;  %v9712_v11 = vld [vmem:[#allocation17 + $0x28] sm:$0xff] }
 0x935   :  { %11320 = vst [vmem:[#allocation58_spill] sm:$0xff] %v9709_v10 }
 0x936   :  { %2977 = vmatmul.f32.vlgmr.msra.gmra.mxu1 %v2959_v12  ;;  %2997 = vmatmul.f32.vlgmr.msrb.gmra.mxu2 %v2959_v12  ;;  %11321 = vst [vmem:[#allocation59_spill] sm:$0xff] %v9712_v11 }
 0x937   :  { %3017 = vmatmul.f32.vlgmr.msrb.gmra.mxu3 %v2959_v12  ;;  %3037 = vmatmul.f32.vlgmr.msrb.gmra.mxu0 %v2959_v12  ;;  %v9715_v12 = vld [vmem:[#allocation17 + $0x30] sm:$0xff] }
 0x938   :  { %3278 = vmatpush.msra.mxu1 %v9469_v51  ;;  %3298 = vmatpush.msrb.mxu2 %v9472_v57  ;;  %11322 = vst [vmem:[#allocation60_spill] sm:$0xff] %v9715_v12 }
 0x939   :  { %3318 = vmatpush.msrb.mxu3 %v9475_v50  ;;  %3338 = vmatpush.msrb.mxu0 %v9478_v2 }
 0x93a   :  { %3279 = vmatpush.msra.mxu1 %v9481_v53  ;;  %3299 = vmatpush.msrb.mxu2 %v9484_v55 }
 0x93b   :  { %3319 = vmatpush.msrb.mxu3 %v9487_v30  ;;  %3339 = vmatpush.msrb.mxu0 %v9490_v16 }
 0x93c   :  { %3280 = vmatpush.msra.mxu1 %v9493_v44  ;;  %3300 = vmatpush.msrb.mxu2 %v9496_v46 }
 0x93d   :  { %3320 = vmatpush.msrb.mxu3 %v9499_v61  ;;  %3340 = vmatpush.msrb.mxu0 %v9502_v8 }
 0x93e   :  { %3281 = vmatpush.msra.mxu1 %v9505_v19  ;;  %3301 = vmatpush.msrb.mxu2 %v9508_v3 }
 0x93f   :  { %3321 = vmatpush.msrb.mxu3 %v9511_v58  ;;  %3341 = vmatpush.msrb.mxu0 %v9514_v14 }
 0x940   :  { %3282 = vmatpush.msra.mxu1 %v9517_v28  ;;  %3302 = vmatpush.msrb.mxu2 %v9520_v4 }
 0x941   :  { %3322 = vmatpush.msrb.mxu3 %v9595_v13  ;;  %3342 = vmatpush.msrb.mxu0 %v9598_v17 }
 0x942   :  { %3283 = vmatpush.msra.mxu1 %v9601_v32  ;;  %3303 = vmatpush.msrb.mxu2 %v9604_v22 }
 0x943   :  { %3323 = vmatpush.msrb.mxu3 %v9607_v31  ;;  %3343 = vmatpush.msrb.mxu0 %v9610_v9 }
 0x944   :  { %3284 = vmatpush.msra.mxu1 %v9613_v18  ;;  %3304 = vmatpush.msrb.mxu2 %v9616_v6 }
 0x945   :  { %3324 = vmatpush.msrb.mxu3 %v9619_v23  ;;  %3344 = vmatpush.msrb.mxu0 %v9622_v60 }
 0x946   :  { %3285 = vmatpush.msra.mxu1 %v9625_v34  ;;  %3305 = vmatpush.msrb.mxu2 %v9628_v45 }
 0x947   :  { %3325 = vmatpush.msrb.mxu3 %v9631_v54  ;;  %3345 = vmatpush.msrb.mxu0 %v9634_v0 }
 0x948   :  { %3286 = vmatpush.msra.mxu1 %v9637_v62  ;;  %3306 = vmatpush.msrb.mxu2 %v9640_v63 }
 0x949   :  { %3326 = vmatpush.msrb.mxu3 %v9643_v29  ;;  %3346 = vmatpush.msrb.mxu0 %v9646_v15 }
 0x94a   :  { %3287 = vmatpush.msra.mxu1 %v9649_v27  ;;  %3307 = vmatpush.msrb.mxu2 %v9652_v25 }
 0x94b   :  { %3327 = vmatpush.msrb.mxu3 %v9655_v21  ;;  %3347 = vmatpush.msrb.mxu0 %v9658_v47 }
 0x94c   :  { %3288 = vmatpush.msra.mxu1 %v9661_v24  ;;  %3308 = vmatpush.msrb.mxu2 %v9664_v59  ;;  %v3116_v24 = vrot.slane %v9574_v56, 6 }
 0x94d   :  { %3328 = vmatpush.msrb.mxu3 %v9667_v20  ;;  %3348 = vmatpush.msrb.mxu0 %v9670_v35 }
 0x94e   :  { %3289 = vmatpush.msra.mxu1 %v9673_v33  ;;  %3309 = vmatpush.msrb.mxu2 %v9676_v36 }
 0x94f   :  { %3329 = vmatpush.msrb.mxu3 %v9679_v37  ;;  %3349 = vmatpush.msrb.mxu0 %v9682_v38 }
 0x950   :  { %3290 = vmatpush.msra.mxu1 %v9685_v5  ;;  %3310 = vmatpush.msrb.mxu2 %v9688_v40 }
 0x951   :  { %3330 = vmatpush.msrb.mxu3 %v9691_v52  ;;  %3350 = vmatpush.msrb.mxu0 %v9694_v42 }
 0x952   :  { %3291 = vmatpush.msra.mxu1 %v9697_v41  ;;  %3311 = vmatpush.msrb.mxu2 %v9700_v39  ;;  %v9718_v39 = vld [vmem:[#allocation17 + $0x38] sm:$0xff] }
 0x953   :  { %3331 = vmatpush.msrb.mxu3 %v9703_v7  ;;  %3351 = vmatpush.msrb.mxu0 %v9706_v49  ;;  %11323 = vst [vmem:[#allocation61_spill] sm:$0xff] %v9718_v39  ;;  %v9721_v7 = vld [vmem:[#allocation17] sm:$0xff]  ;;  %v9724_v49 = vld [vmem:[#allocation17 + $0x8] sm:$0xff] }
 0x954   :  { %3292 = vmatpush.msra.mxu1 %v9709_v10  ;;  %3312 = vmatpush.msrb.mxu2 %v9712_v11  ;;  %11324 = vst [vmem:[#allocation62_spill] sm:$0xff] %v9721_v7  ;;  %v9727_v10 = vld [vmem:[#allocation17 + $0x10] sm:$0xff]  ;;  %v9730_v11 = vld [vmem:[#allocation17 + $0x18] sm:$0xff] }
 0x955   :  { %3332 = vmatpush.msrb.mxu3 %v9715_v12  ;;  %3352 = vmatpush.msrb.mxu0 %v9718_v39  ;;  %11325 = vst [vmem:[#allocation63_spill] sm:$0xff] %v9724_v49 }
 0x956   :  { %3293 = vmatpush.msra.mxu1 %v9721_v7  ;;  %3313 = vmatpush.msrb.mxu2 %v9724_v49  ;;  %11326 = vst [vmem:[#allocation64_spill] sm:$0xff] %v9727_v10 }
 0x957   :  { %3333 = vmatpush.msrb.mxu3 %v9727_v10  ;;  %11327 = vst [vmem:[#allocation76_spill] sm:$0xff] %v9730_v11  ;;  %3353 = vmatpush.msrb.mxu0 %v9730_v11 }
 0x9b3   :  { %v2978_v12 = vpop.f32.mrf.mxu1 }
 0x9b4   :  { %v3045_v41 = vrot.slane %v2978_v12, 2 }
 0x9b6   :  { %v3053_v39 = vadd.f32 %v3045_v41, %v11297_v26  ;;  %v3038_v41 = vpop.f32.mrf.mxu0 }
 0x9b8   :  { %v6615_v42 = vmul.f32 -1.442695, %v3053_v39 }
 0x9b9   :  { %v2998_v52 = vpop.f32.mrf.mxu2 }
 0x9ba   :  { %6960 = vpow2.f32 %v6615_v42  ;;  %v3046_v7 = vrot.slane %v2998_v52, 2  ;;  %v3018_v40 = vpop.f32.mrf.mxu3 }
 0x9bb   :  { %v3047_v5 = vrot.slane %v3018_v40, 2  ;;  %v3048_v40 = vrot.slane %v3038_v41, 2 }
 0x9bc   :  { %v3054_v49 = vadd.f32 %v3046_v7, %v11298_v43 }
 0x9bd   :  { %v3055_v38 = vadd.f32 %v3047_v5, %v11299_v1 }
 0x9be   :  { %v6616_v37 = vmul.f32 -1.442695, %v3054_v49 }
 0x9bf   :  { %v6617_v10 = vmul.f32 -1.442695, %v3055_v38  ;;  %v3056_v38 = vadd.f32 %v3048_v40, %v11300_v48 }
 0x9c0   :  { %v6961_v36 = vpop.eup %6960  ;;  %6962 = vpow2.f32 %v6616_v37 }
 0x9c1   :  { %v3066_v33 = vadd.f32 1.0, %v6961_v36  ;;  %6964 = vpow2.f32 %v6617_v10 }
 0x9c3   :  { %6966 = vrcp.f32 %v3066_v33  ;;  %v3080_v49 = vand.u32 2147483648, %v3066_v33  ;;  %vm3074_vm14 = vweird.f32 %v3066_v33 }
 0x9c6   :  { %v6963_v12 = vpop.eup %6962 }
 0x9c7   :  { %v6965_v11 = vpop.eup %6964  ;;  %v3067_v26 = vadd.f32 1.0, %v6963_v12  ;;  %v3078_v12 = vand.u32 2147483647, %v3066_v33 }
 0x9c8   :  { %v3068_v39 = vadd.f32 1.0, %v6965_v11 }
 0x9c9   :  { %v6967_v42 = vpop.eup %6966  ;;  %6968 = vrcp.f32 %v3067_v26  ;;  %v3095_v11 = vand.u32 2147483648, %v3067_v26  ;;  %v3093_v41 = vand.u32 2147483647, %v3067_v26  ;;  %vm3079_vm1 = vcmp.eq.f32.partialorder %v3078_v12, 8.507059e+37  ;;  %v11332_v12 = vld [vmem:[#allocation44_spill] sm:$0xff] }
 0x9ca   :  { %v3070_v52 = vmul.f32 %v6967_v42, %v3066_v33  ;;  %6970 = vrcp.f32 %v3068_v39  ;;  %vm3075_vm13 = vweird.f32 %v6967_v42  ;;  %vm3089_vm2 = vweird.f32 %v3067_v26 }
 0x9cb   :  { %vm3076_vm15 = vmor %vm3074_vm14, %vm3075_vm13  ;;  %6972 = vtanh.f32 %v3056_v38  ;;  %vm3094_vm4 = vcmp.eq.f32.partialorder %v3093_v41, 8.507059e+37  ;;  %vm3104_vm7 = vweird.f32 %v3068_v39  ;;  %v11334_v41 = vld [vmem:[#allocation46_spill] sm:$0xff] }
 0x9cc   :  { %v3071_v43 = vsub.f32 1.0, %v3070_v52  ;;  %v3081_v52 = vor.u32 1.1754944e-38, %v3080_v49  ;;  %v3110_v49 = vand.u32 2147483648, %v3068_v39 }
 0x9ce   :  { %v3072_v7 = vmul.f32 %v6967_v42, %v3071_v43 }
 0x9cf   :  { %v6969_v1 = vpop.eup %6968 }
 0x9d0   :  { %v6971_v5 = vpop.eup %6970  ;;  %v3073_v37 = vadd.f32 %v6967_v42, %v3072_v7  ;;  %v3085_v36 = vmul.f32 %v6969_v1, %v3067_v26  ;;  %vm3090_vm0 = vweird.f32 %v6969_v1  ;;  %v3096_v7 = vor.u32 1.1754944e-38, %v3095_v11  ;;  %v11333_v11 = vld [vmem:[#allocation45_spill] sm:$0xff] }
 0x9d1   :  { %v3100_v10 = vmul.f32 %v6971_v5, %v3068_v39  ;;  %vm3091_vm3 = vmor %vm3089_vm2, %vm3090_vm0  ;;  %v6973_v33 = vpop.eup %6972  ;;  %vm3105_vm5 = vweird.f32 %v6971_v5  ;;  %v3111_v26 = vor.u32 1.1754944e-38, %v3110_v49  ;;  %v11345_v49 = vld [vmem:[#allocation57_spill] sm:$0xff] }
 0x9d2   :  { %v3086_v35 = vsub.f32 1.0, %v3085_v36  ;;  %v3077_v20 = vsel %vm3076_vm15, %v6967_v42, %v3073_v37  ;;  %vm3106_vm8 = vmor %vm3104_vm7, %vm3105_vm5 }
 0x9d3   :  { %v3101_v43 = vsub.f32 1.0, %v3100_v10  ;;  %v3082_v40 = vsel %vm3079_vm1, %v3081_v52, %v3077_v20  ;;  %v11335_v52 = vld [vmem:[#allocation47_spill] sm:$0xff] }
 0x9d4   :  { %v3087_v59 = vmul.f32 %v6969_v1, %v3086_v35  ;;  %v3119_v21 = vmul.f32 %v6973_v33, %v3082_v40  ;;  %v11338_v40 = vld [vmem:[#allocation50_spill] sm:$0xff]  ;;  %v11340_v33 = vld [vmem:[#allocation52_spill] sm:$0xff] }
 0x9d5   :  { %v3102_v38 = vmul.f32 %v6971_v5, %v3101_v43  ;;  %v11336_v43 = vld [vmem:[#allocation48_spill] sm:$0xff] }
 0x9d6   :  { %v3088_v48 = vadd.f32 %v6969_v1, %v3087_v59  ;;  %v3108_v59 = vand.u32 2147483647, %v3068_v39  ;;  %v11330_v39 = vld [vmem:[#allocation42_spill] sm:$0xff] }
 0x9d7   :  { %v3103_v37 = vadd.f32 %v6971_v5, %v3102_v38  ;;  %v11342_v38 = vld [vmem:[#allocation54_spill] sm:$0xff] }
 0x9d8   :  { %v3092_v47 = vsel %vm3091_vm3, %v6969_v1, %v3088_v48  ;;  %vm3109_vm9 = vcmp.eq.f32.partialorder %v3108_v59, 8.507059e+37  ;;  %v11337_v48 = vld [vmem:[#allocation49_spill] sm:$0xff]  ;;  %v11346_v59 = vld [vmem:[#allocation58_spill] sm:$0xff] }
 0x9d9   :  { %v3097_v36 = vsel %vm3094_vm4, %v3096_v7, %v3092_v47  ;;  %v3107_v20 = vsel %vm3106_vm8, %v6971_v5, %v3103_v37  ;;  %v11331_v5 = vld [vmem:[#allocation43_spill] sm:$0xff]  ;;  %v11344_v37 = vld [vmem:[#allocation56_spill] sm:$0xff] }
 0x9da   :  { %v3118_v42 = vmul.f32 %v3116_v24, %v3097_v36  ;;  %v3112_v1 = vsel %vm3109_vm9, %v3111_v26, %v3107_v20  ;;  %v11329_v24 = vld [vmem:[#allocation41_spill] sm:$0xff]  ;;  %v11339_v7 = vld [vmem:[#allocation51_spill] sm:$0xff]  ;;  %v11348_v26 = vld [vmem:[#allocation60_spill] sm:$0xff] }
 0x9db   :  { %v11341_v36 = vld [vmem:[#allocation53_spill] sm:$0xff]  ;;  %v11347_v20 = vld [vmem:[#allocation59_spill] sm:$0xff] }
 0x9dc   :  { %v9738_v35 = vadd.f32 %v3119_v21, %v3118_v42  ;;  %v11328_v21 = vld [vmem:[#allocation72_spill] sm:$0xff]  ;;  %v11343_v42 = vld [vmem:[#allocation55_spill] sm:$0xff] }
 0x9de   :  { %6974 = vtanh.f32 %v9738_v35 }
 0x9e4   :  { %v6975_v56 = vpop.eup %6974 }
 0x9e5   :  { %v3122_v10 = vmul.f32 %v6975_v56, %v3112_v1  ;;  %v11349_v56 = vld [vmem:[#allocation61_spill] sm:$0xff]  ;;  %v11350_v1 = vld [vmem:[#allocation62_spill] sm:$0xff] }
 0x9e7   :  { %3123 = vst [vmem:[#allocation3 + $0x8] sm:$0xc0] %v3122_v10  ;;  %v3125_v47 = vrot.slane %v3122_v10, 6  ;;  %v11351_v10 = vld [vmem:[#allocation63_spill] sm:$0xff] }
 0x9e9   :  { %3143 = vmatmul.f32.vlgmr.msrb.gmra.mxu1 %v3125_v47  ;;  %3163 = vmatmul.f32.vlgmr.msra.gmra.mxu2 %v3125_v47 }
 0x9ea   :  { %3183 = vmatmul.f32.vlgmr.msra.gmra.mxu3 %v3125_v47  ;;  %3203 = vmatmul.f32.vlgmr.msra.gmra.mxu0 %v3125_v47  ;;  %v11352_v47 = vld [vmem:[#allocation64_spill] sm:$0xff] }
 0x9eb   :  { %3444 = vmatpush.msrb.mxu1 %v9469_v51  ;;  %3464 = vmatpush.msra.mxu2 %v9472_v57 }
 0x9ec   :  { %3484 = vmatpush.msra.mxu3 %v9475_v50  ;;  %3504 = vmatpush.msra.mxu0 %v9478_v2 }
 0x9ed   :  { %3445 = vmatpush.msrb.mxu1 %v9481_v53  ;;  %3465 = vmatpush.msra.mxu2 %v9484_v55 }
 0x9ee   :  { %3485 = vmatpush.msra.mxu3 %v9487_v30  ;;  %3505 = vmatpush.msra.mxu0 %v9490_v16 }
 0x9ef   :  { %3446 = vmatpush.msrb.mxu1 %v9493_v44  ;;  %3466 = vmatpush.msra.mxu2 %v9496_v46 }
 0x9f0   :  { %3486 = vmatpush.msra.mxu3 %v9499_v61  ;;  %3506 = vmatpush.msra.mxu0 %v9502_v8 }
 0x9f1   :  { %3447 = vmatpush.msrb.mxu1 %v9505_v19  ;;  %3467 = vmatpush.msra.mxu2 %v9508_v3 }
 0x9f2   :  { %3487 = vmatpush.msra.mxu3 %v9511_v58  ;;  %3507 = vmatpush.msra.mxu0 %v9514_v14 }
 0x9f3   :  { %3448 = vmatpush.msrb.mxu1 %v9517_v28  ;;  %3468 = vmatpush.msra.mxu2 %v9520_v4 }
 0x9f4   :  { %3488 = vmatpush.msra.mxu3 %v9595_v13  ;;  %3508 = vmatpush.msra.mxu0 %v9598_v17 }
 0x9f5   :  { %3449 = vmatpush.msrb.mxu1 %v9601_v32  ;;  %3469 = vmatpush.msra.mxu2 %v9604_v22 }
 0x9f6   :  { %3489 = vmatpush.msra.mxu3 %v9607_v31  ;;  %3509 = vmatpush.msra.mxu0 %v9610_v9 }
 0x9f7   :  { %3450 = vmatpush.msrb.mxu1 %v9613_v18  ;;  %3470 = vmatpush.msra.mxu2 %v9616_v6 }
 0x9f8   :  { %3490 = vmatpush.msra.mxu3 %v9619_v23  ;;  %3510 = vmatpush.msra.mxu0 %v9622_v60 }
 0x9f9   :  { %3451 = vmatpush.msrb.mxu1 %v9625_v34  ;;  %3471 = vmatpush.msra.mxu2 %v9628_v45 }
 0x9fa   :  { %3491 = vmatpush.msra.mxu3 %v9631_v54  ;;  %3511 = vmatpush.msra.mxu0 %v9634_v0 }
 0x9fb   :  { %3452 = vmatpush.msrb.mxu1 %v9637_v62  ;;  %3472 = vmatpush.msra.mxu2 %v9640_v63 }
 0x9fc   :  { %3492 = vmatpush.msra.mxu3 %v9643_v29  ;;  %3512 = vmatpush.msra.mxu0 %v9646_v15 }
 0x9fd   :  { %3453 = vmatpush.msrb.mxu1 %v9649_v27  ;;  %3473 = vmatpush.msra.mxu2 %v9652_v25 }
 0x9fe   :  { %3493 = vmatpush.msra.mxu3 %v11328_v21  ;;  %3513 = vmatpush.msra.mxu0 %v11329_v24 }
 0x9ff   :  { %3454 = vmatpush.msrb.mxu1 %v11330_v39  ;;  %3474 = vmatpush.msra.mxu2 %v11331_v5 }
 0xa00   :  { %3494 = vmatpush.msra.mxu3 %v11332_v12  ;;  %3514 = vmatpush.msra.mxu0 %v11333_v11  ;;  %v3270_v12 = vrot.slane %v9738_v35, 6 }
 0xa01   :  { %3455 = vmatpush.msrb.mxu1 %v11334_v41  ;;  %3475 = vmatpush.msra.mxu2 %v11335_v52 }
 0xa02   :  { %3495 = vmatpush.msra.mxu3 %v11336_v43  ;;  %3515 = vmatpush.msra.mxu0 %v11337_v48  ;;  %v11363_v48 = vld [vmem:[#allocation83_spill] sm:$0xff] }
 0xa03   :  { %3456 = vmatpush.msrb.mxu1 %v11338_v40  ;;  %3476 = vmatpush.msra.mxu2 %v11339_v7  ;;  %v11359_v40 = vld [vmem:[#allocation66_spill] sm:$0xff] }
 0xa04   :  { %3496 = vmatpush.msra.mxu3 %v11340_v33  ;;  %3516 = vmatpush.msra.mxu0 %v11341_v36 }
 0xa05   :  { %3457 = vmatpush.msrb.mxu1 %v11342_v38  ;;  %3477 = vmatpush.msra.mxu2 %v11343_v42  ;;  %v11353_v38 = vld [vmem:[#allocation76_spill] sm:$0xff]  ;;  %v11354_v42 = vld [vmem:[#allocation65_spill] sm:$0xff] }
 0xa06   :  { %3497 = vmatpush.msra.mxu3 %v11344_v37  ;;  %3517 = vmatpush.msra.mxu0 %v11345_v49  ;;  %v11355_v37 = vld [vmem:[#allocation67_spill] sm:$0xff]  ;;  %v11356_v49 = vld [vmem:[#allocation70_spill] sm:$0xff] }
 0xa07   :  { %3458 = vmatpush.msrb.mxu1 %v11346_v59  ;;  %3478 = vmatpush.msra.mxu2 %v11347_v20  ;;  %v2328_v36 = vadd.f32 %v11355_v37, %v11354_v42  ;;  %v11357_v7 = vperm.slane %v11356_v49, 0 }
 0xa08   :  { %3498 = vmatpush.msra.mxu3 %v11348_v26  ;;  %3518 = vmatpush.msra.mxu0 %v11349_v56  ;;  %v11360_v56 = vld [vmem:[#allocation73_spill] sm:$0xff] }
 0xa09   :  { %3459 = vmatpush.msrb.mxu1 %v11350_v1  ;;  %3479 = vmatpush.msra.mxu2 %v11351_v10  ;;  %v9809_v59 = vadd.f32 %v11357_v7, %v2328_v36  ;;  %v2374_v33 = vadd.f32 %v11360_v56, %v11359_v40  ;;  %v11361_v10 = vperm.slane %v11356_v49, 2 }
 0xa0a   :  { %3499 = vmatpush.msra.mxu3 %v11352_v47  ;;  %3519 = vmatpush.msra.mxu0 %v11353_v38 }
 0xa0b   :  { %11358 = vst [vmem:[#allocation84_spill] sm:$0xff] %v9809_v59  ;;  %v9816_v47 = vadd.f32 %v11361_v10, %v2374_v33  ;;  %v11364_v33 = vld [vmem:[#allocation71_spill] sm:$0xff]  ;;  %v11365_v10 = vld [vmem:[#allocation86_spill] sm:$0xff] }
 0xa0c   :  { %v2397_v43 = vadd.f32 %v11365_v10, %v11364_v33 }
 0xa0d   :  { %11362 = vst [vmem:[#allocation85_spill] sm:$0xff] %v9816_v47 }
 0xa66   :  { %v3144_v20 = vpop.f32.mrf.mxu1 }
 0xa67   :  { %v3207_v26 = vadd.f32 %v3144_v20, %v9809_v59 }
 0xa69   :  { %v6618_v1 = vmul.f32 -1.442695, %v3207_v26 }
 0xa6b   :  { %6976 = vpow2.f32 %v6618_v1 }
 0xa6c   :  { %v3164_v38 = vpop.f32.mrf.mxu2 }
 0xa6d   :  { %v3208_v52 = vadd.f32 %v3164_v38, %v11363_v48  ;;  %v3184_v42 = vpop.f32.mrf.mxu3 }
 0xa6e   :  { %v3209_v37 = vadd.f32 %v3184_v42, %v9816_v47  ;;  %v3204_v42 = vpop.f32.mrf.mxu0 }
 0xa6f   :  { %v6619_v7 = vmul.f32 -1.442695, %v3208_v52  ;;  %v11366_v52 = vperm.slane %v11356_v49, 3 }
 0xa70   :  { %v6620_v36 = vmul.f32 -1.442695, %v3209_v37 }
 0xa71   :  { %v6977_v41 = vpop.eup %6976  ;;  %6978 = vpow2.f32 %v6619_v7  ;;  %v9824_v37 = vadd.f32 %v11366_v52, %v2397_v43 }
 0xa72   :  { %v3220_v20 = vadd.f32 1.0, %v6977_v41  ;;  %6980 = vpow2.f32 %v6620_v36 }
 0xa73   :  { %11367 = vst [vmem:[#allocation87_spill] sm:$0xff] %v9824_v37  ;;  %v3210_v36 = vadd.f32 %v3204_v42, %v9824_v37 }
 0xa74   :  { %6982 = vrcp.f32 %v3220_v20  ;;  %v3234_v11 = vand.u32 2147483648, %v3220_v20  ;;  %vm3228_vm11 = vweird.f32 %v3220_v20  ;;  %v3232_v33 = vand.u32 2147483647, %v3220_v20 }
 0xa76   :  { %vm3233_vm14 = vcmp.eq.f32.partialorder %v3232_v33, 8.507059e+37 }
 0xa77   :  { %v6979_v40 = vpop.eup %6978 }
 0xa78   :  { %v6981_v26 = vpop.eup %6980  ;;  %v3221_v56 = vadd.f32 1.0, %v6979_v40 }
 0xa79   :  { %v3222_v1 = vadd.f32 1.0, %v6981_v26 }
 0xa7a   :  { %v6983_v59 = vpop.eup %6982  ;;  %6984 = vrcp.f32 %v3221_v56  ;;  %v3247_v43 = vand.u32 2147483647, %v3221_v56  ;;  %vm3243_vm15 = vweird.f32 %v3221_v56 }
 0xa7b   :  { %v3224_v38 = vmul.f32 %v6983_v59, %v3220_v20  ;;  %6986 = vrcp.f32 %v3222_v1  ;;  %vm3229_vm10 = vweird.f32 %v6983_v59  ;;  %vm3258_vm3 = vweird.f32 %v3222_v1 }
 0xa7c   :  { %vm3230_vm12 = vmor %vm3228_vm11, %vm3229_vm10  ;;  %6988 = vtanh.f32 %v3210_v36  ;;  %vm3248_vm1 = vcmp.eq.f32.partialorder %v3247_v43, 8.507059e+37 }
 0xa7d   :  { %v3225_v48 = vsub.f32 1.0, %v3224_v38  ;;  %v3249_v38 = vand.u32 2147483648, %v3221_v56 }
 0xa7f   :  { %v3226_v41 = vmul.f32 %v6983_v59, %v3225_v48  ;;  %v3235_v48 = vor.u32 1.1754944e-38, %v3234_v11  ;;  %v3250_v37 = vor.u32 1.1754944e-38, %v3249_v38 }
 0xa80   :  { %v6985_v7 = vpop.eup %6984 }
 0xa81   :  { %v6987_v47 = vpop.eup %6986  ;;  %v3227_v40 = vadd.f32 %v6983_v59, %v3226_v41  ;;  %v3239_v26 = vmul.f32 %v6985_v7, %v3221_v56  ;;  %vm3244_vm13 = vweird.f32 %v6985_v7 }
 0xa82   :  { %v3254_v5 = vmul.f32 %v6987_v47, %v3222_v1  ;;  %vm3245_vm0 = vmor %vm3243_vm15, %vm3244_vm13  ;;  %v6989_v20 = vpop.eup %6988  ;;  %vm3259_vm2 = vweird.f32 %v6987_v47 }
 0xa83   :  { %v3240_v10 = vsub.f32 1.0, %v3239_v26  ;;  %v3231_v39 = vsel %vm3230_vm12, %v6983_v59, %v3227_v40  ;;  %vm3260_vm4 = vmor %vm3258_vm3, %vm3259_vm2 }
 0xa84   :  { %v3255_v52 = vsub.f32 1.0, %v3254_v5  ;;  %v3236_v41 = vsel %vm3233_vm14, %v3235_v48, %v3231_v39  ;;  %v3264_v5 = vand.u32 2147483648, %v3222_v1  ;;  %v3262_v39 = vand.u32 2147483647, %v3222_v1 }
 0xa85   :  { %v3241_v49 = vmul.f32 %v6985_v7, %v3240_v10  ;;  %v3273_v25 = vmul.f32 %v6989_v20, %v3236_v41 }
 0xa86   :  { %v3256_v36 = vmul.f32 %v6987_v47, %v3255_v52  ;;  %v3265_v33 = vor.u32 1.1754944e-38, %v3264_v5  ;;  %vm3263_vm5 = vcmp.eq.f32.partialorder %v3262_v39, 8.507059e+37 }
 0xa87   :  { %v3242_v42 = vadd.f32 %v6985_v7, %v3241_v49 }
 0xa88   :  { %v3257_v11 = vadd.f32 %v6987_v47, %v3256_v36 }
 0xa89   :  { %v3246_v24 = vsel %vm3245_vm0, %v6985_v7, %v3242_v42 }
 0xa8a   :  { %v3251_v26 = vsel %vm3248_vm1, %v3250_v37, %v3246_v24  ;;  %v3261_v56 = vsel %vm3260_vm4, %v6987_v47, %v3257_v11 }
 0xa8b   :  { %v3272_v59 = vmul.f32 %v3270_v12, %v3251_v26  ;;  %v3266_v7 = vsel %vm3263_vm5, %v3265_v33, %v3261_v56 }
 0xa8d   :  { %v9828_v40 = vadd.f32 %v3273_v25, %v3272_v59  ;;  %v11396_v25 = vld [vmem:[#allocation85_spill] sm:$0xff]  ;;  %v11397_v59 = vld [vmem:[#allocation87_spill] sm:$0xff] }
 0xa8f   :  { %6990 = vtanh.f32 %v9828_v40 }
 0xa95   :  { %v6991_v35 = vpop.eup %6990 }
 0xa96   :  { %v3276_v10 = vmul.f32 %v6991_v35, %v3266_v7 }
 0xa98   :  { %3277 = vst [vmem:[#allocation3] sm:$0x3] %v3276_v10  ;;  %3294 = vmatmul.f32.vlgmr.msra.gmra.mxu1 %v3276_v10  ;;  %3314 = vmatmul.f32.vlgmr.msrb.gmra.mxu2 %v3276_v10 }
 0xa99   :  { %3334 = vmatmul.f32.vlgmr.msrb.gmra.mxu3 %v3276_v10  ;;  %3354 = vmatmul.f32.vlgmr.msrb.gmra.mxu0 %v3276_v10 }
 0xa9a   :  { %3650 = vmatpush.msrb.mxu3 %v9475_v50  ;;  %3610 = vmatpush.msra.mxu1 %v9469_v51  ;;  %v11368_v51 = vld [vmem:[#allocation69_spill] sm:$0xff]  ;;  %v11370_v50 = vld [vmem:[#allocation44_spill] sm:$0xff] }
 0xa9b   :  { %3630 = vmatpush.msrb.mxu2 %v9472_v57  ;;  %3670 = vmatpush.msrb.mxu0 %v9478_v2  ;;  %v11369_v57 = vld [vmem:[#allocation41_spill] sm:$0xff]  ;;  %v11371_v2 = vld [vmem:[#allocation42_spill] sm:$0xff] }
 0xa9c   :  { %3651 = vmatpush.msrb.mxu3 %v9487_v30  ;;  %3611 = vmatpush.msra.mxu1 %v9481_v53  ;;  %v11372_v53 = vld [vmem:[#allocation43_spill] sm:$0xff]  ;;  %v11374_v30 = vld [vmem:[#allocation48_spill] sm:$0xff] }
 0xa9d   :  { %3631 = vmatpush.msrb.mxu2 %v9484_v55  ;;  %3671 = vmatpush.msrb.mxu0 %v9490_v16  ;;  %v11373_v55 = vld [vmem:[#allocation45_spill] sm:$0xff]  ;;  %v11375_v16 = vld [vmem:[#allocation46_spill] sm:$0xff] }
 0xa9e   :  { %3652 = vmatpush.msrb.mxu3 %v9499_v61  ;;  %3612 = vmatpush.msra.mxu1 %v9493_v44  ;;  %v11376_v44 = vld [vmem:[#allocation47_spill] sm:$0xff]  ;;  %v11378_v61 = vld [vmem:[#allocation52_spill] sm:$0xff] }
 0xa9f   :  { %3632 = vmatpush.msrb.mxu2 %v9496_v46  ;;  %3672 = vmatpush.msrb.mxu0 %v9502_v8  ;;  %v11377_v46 = vld [vmem:[#allocation49_spill] sm:$0xff]  ;;  %v11379_v8 = vld [vmem:[#allocation50_spill] sm:$0xff] }
 0xaa0   :  { %3653 = vmatpush.msrb.mxu3 %v9511_v58  ;;  %3613 = vmatpush.msra.mxu1 %v9505_v19  ;;  %v11380_v19 = vld [vmem:[#allocation51_spill] sm:$0xff]  ;;  %v11382_v58 = vld [vmem:[#allocation56_spill] sm:$0xff] }
 0xaa1   :  { %3633 = vmatpush.msrb.mxu2 %v9508_v3  ;;  %3673 = vmatpush.msrb.mxu0 %v9514_v14  ;;  %v11381_v3 = vld [vmem:[#allocation53_spill] sm:$0xff]  ;;  %v11383_v14 = vld [vmem:[#allocation54_spill] sm:$0xff] }
 0xaa2   :  { %3654 = vmatpush.msrb.mxu3 %v9595_v13  ;;  %3614 = vmatpush.msra.mxu1 %v9517_v28  ;;  %v11384_v28 = vld [vmem:[#allocation55_spill] sm:$0xff]  ;;  %v11386_v13 = vld [vmem:[#allocation60_spill] sm:$0xff] }
 0xaa3   :  { %3634 = vmatpush.msrb.mxu2 %v9520_v4  ;;  %3674 = vmatpush.msrb.mxu0 %v9598_v17  ;;  %v11385_v4 = vld [vmem:[#allocation57_spill] sm:$0xff]  ;;  %v11387_v17 = vld [vmem:[#allocation58_spill] sm:$0xff] }
 0xaa4   :  { %3655 = vmatpush.msrb.mxu3 %v9607_v31  ;;  %3615 = vmatpush.msra.mxu1 %v9601_v32  ;;  %v11388_v32 = vld [vmem:[#allocation59_spill] sm:$0xff]  ;;  %v11390_v31 = vld [vmem:[#allocation64_spill] sm:$0xff] }
 0xaa5   :  { %3635 = vmatpush.msrb.mxu2 %v9604_v22  ;;  %3675 = vmatpush.msrb.mxu0 %v9610_v9  ;;  %v11389_v22 = vld [vmem:[#allocation61_spill] sm:$0xff]  ;;  %v11391_v9 = vld [vmem:[#allocation62_spill] sm:$0xff] }
 0xaa6   :  { %3656 = vmatpush.msrb.mxu3 %v9619_v23  ;;  %3616 = vmatpush.msra.mxu1 %v9613_v18  ;;  %v11392_v18 = vld [vmem:[#allocation63_spill] sm:$0xff] }
 0xaa7   :  { %3636 = vmatpush.msrb.mxu2 %v9616_v6  ;;  %3676 = vmatpush.msrb.mxu0 %v9622_v60  ;;  %v11393_v6 = vld [vmem:[#allocation76_spill] sm:$0xff] }
 0xaa8   :  { %3657 = vmatpush.msrb.mxu3 %v9631_v54  ;;  %3617 = vmatpush.msra.mxu1 %v9625_v34  ;;  %v11394_v34 = vld [vmem:[#allocation84_spill] sm:$0xff] }
 0xaa9   :  { %3637 = vmatpush.msrb.mxu2 %v9628_v45  ;;  %3677 = vmatpush.msrb.mxu0 %v9634_v0 }
 0xaaa   :  { %3658 = vmatpush.msrb.mxu3 %v9643_v29  ;;  %3618 = vmatpush.msra.mxu1 %v9637_v62 }
 0xaab   :  { %3638 = vmatpush.msrb.mxu2 %v9640_v63  ;;  %3678 = vmatpush.msrb.mxu0 %v9646_v15  ;;  %v11395_v15 = vld [vmem:[#allocation83_spill] sm:$0xff] }
 0xaac   :  { %3659 = vmatpush.msrb.mxu3 %v11328_v21  ;;  %3619 = vmatpush.msra.mxu1 %v9649_v27 }
 0xaad   :  { %3639 = vmatpush.msrb.mxu2 %v11368_v51  ;;  %3679 = vmatpush.msrb.mxu0 %v11369_v57 }
 0xaae   :  { %3660 = vmatpush.msrb.mxu3 %v11370_v50  ;;  %3620 = vmatpush.msra.mxu1 %v11371_v2 }
 0xaaf   :  { %3640 = vmatpush.msrb.mxu2 %v11372_v53  ;;  %3680 = vmatpush.msrb.mxu0 %v11373_v55 }
 0xab0   :  { %3661 = vmatpush.msrb.mxu3 %v11374_v30  ;;  %3621 = vmatpush.msra.mxu1 %v11375_v16 }
 0xab1   :  { %3641 = vmatpush.msrb.mxu2 %v11376_v44  ;;  %3681 = vmatpush.msrb.mxu0 %v11377_v46  ;;  %v3433_v46 = vrot.slane %v9828_v40, 6 }
 0xab2   :  { %3662 = vmatpush.msrb.mxu3 %v11378_v61  ;;  %3622 = vmatpush.msra.mxu1 %v11379_v8 }
 0xab3   :  { %3642 = vmatpush.msrb.mxu2 %v11380_v19  ;;  %3682 = vmatpush.msrb.mxu0 %v11381_v3 }
 0xab4   :  { %3663 = vmatpush.msrb.mxu3 %v11382_v58  ;;  %3623 = vmatpush.msra.mxu1 %v11383_v14 }
 0xab5   :  { %3643 = vmatpush.msrb.mxu2 %v11384_v28  ;;  %3683 = vmatpush.msrb.mxu0 %v11385_v4 }
 0xab6   :  { %3664 = vmatpush.msrb.mxu3 %v11386_v13  ;;  %3624 = vmatpush.msra.mxu1 %v11387_v17 }
 0xab7   :  { %3644 = vmatpush.msrb.mxu2 %v11388_v32  ;;  %3684 = vmatpush.msrb.mxu0 %v11389_v22 }
 0xab8   :  { %3665 = vmatpush.msrb.mxu3 %v11390_v31  ;;  %3625 = vmatpush.msra.mxu1 %v11391_v9 }
 0xab9   :  { %3645 = vmatpush.msrb.mxu2 %v11392_v18  ;;  %3685 = vmatpush.msrb.mxu0 %v11393_v6 }
 0xb15   :  { %v3295_v23 = vpop.f32.mrf.mxu1 }
 0xb16   :  { %v3362_v60 = vrot.slane %v3295_v23, 6  ;;  %v3355_v43 = vpop.f32.mrf.mxu0  ;;  %v3840_v23 = vld [vmem:[#allocation25 + $0x78] sm:$0xff] }
 0xb17   :  { %v3365_v41 = vrot.slane %v3355_v43, 6 }
 0xb18   :  { %v3370_v45 = vadd.f32 %v3362_v60, %v11394_v34 }
 0xb19   :  { %v3373_v11 = vadd.f32 %v3365_v41, %v11397_v59  ;;  %v3832_v41 = vld [vmem:[#allocation25 + $0x38] sm:$0xff] }
 0xb1a   :  { %v6621_v54 = vmul.f32 -1.442695, %v3370_v45  ;;  %v3839_v45 = vld [vmem:[#allocation25 + $0x70] sm:$0xff] }
 0xb1b   :  { %v3315_v0 = vpop.f32.mrf.mxu2 }
 0xb1c   :  { %6992 = vpow2.f32 %v6621_v54  ;;  %v3363_v62 = vrot.slane %v3315_v0, 6  ;;  %v3335_v63 = vpop.f32.mrf.mxu3  ;;  %v3838_v0 = vld [vmem:[#allocation25 + $0x68] sm:$0xff] }
 0xb1d   :  { %v3364_v29 = vrot.slane %v3335_v63, 6 }
 0xb1e   :  { %v3371_v27 = vadd.f32 %v3363_v62, %v11395_v15 }
 0xb1f   :  { %v3372_v21 = vadd.f32 %v3364_v29, %v11396_v25  ;;  %v3837_v29 = vld [vmem:[#allocation25 + $0x60] sm:$0xff] }
 0xb20   :  { %v6622_v24 = vmul.f32 -1.442695, %v3371_v27 }
 0xb21   :  { %v6623_v12 = vmul.f32 -1.442695, %v3372_v21 }
 0xb22   :  { %v6993_v47 = vpop.eup %6992  ;;  %6994 = vpow2.f32 %v6622_v24  ;;  %v3836_v24 = vld [vmem:[#allocation25 + $0x58] sm:$0xff] }
 0xb23   :  { %v3383_v1 = vadd.f32 1.0, %v6993_v47  ;;  %6996 = vpow2.f32 %v6623_v12  ;;  %v3835_v47 = vld [vmem:[#allocation25 + $0x50] sm:$0xff] }
 0xb25   :  { %6998 = vrcp.f32 %v3383_v1  ;;  %v3397_v33 = vand.u32 2147483648, %v3383_v1  ;;  %vm3391_vm8 = vweird.f32 %v3383_v1  ;;  %v3395_v7 = vand.u32 2147483647, %v3383_v1 }
 0xb27   :  { %v3398_v53 = vor.u32 1.1754944e-38, %v3397_v33  ;;  %vm3396_vm11 = vcmp.eq.f32.partialorder %v3395_v7, 8.507059e+37 }
 0xb28   :  { %v6995_v37 = vpop.eup %6994 }
 0xb29   :  { %v6997_v38 = vpop.eup %6996  ;;  %v3384_v49 = vadd.f32 1.0, %v6995_v37 }
 0xb2a   :  { %v3385_v48 = vadd.f32 1.0, %v6997_v38  ;;  %v3834_v38 = vld [vmem:[#allocation25 + $0x48] sm:$0xff] }
 0xb2b   :  { %v6999_v52 = vpop.eup %6998  ;;  %7000 = vrcp.f32 %v3384_v49  ;;  %v3412_v51 = vand.u32 2147483648, %v3384_v49  ;;  %v3410_v2 = vand.u32 2147483647, %v3384_v49  ;;  %vm3406_vm12 = vweird.f32 %v3384_v49 }
 0xb2c   :  { %v3387_v42 = vmul.f32 %v6999_v52, %v3383_v1  ;;  %7002 = vrcp.f32 %v3385_v48  ;;  %vm3392_vm7 = vweird.f32 %v6999_v52  ;;  %v3427_v13 = vand.u32 2147483648, %v3385_v48 }
 0xb2d   :  { %vm3393_vm9 = vmor %vm3391_vm8, %vm3392_vm7  ;;  %7004 = vtanh.f32 %v3373_v11  ;;  %v3413_v44 = vor.u32 1.1754944e-38, %v3412_v51  ;;  %vm3411_vm14 = vcmp.eq.f32.partialorder %v3410_v2, 8.507059e+37  ;;  %vm3421_vm0 = vweird.f32 %v3385_v48  ;;  %v3826_v2 = vld [vmem:[#allocation25 + $0x8] sm:$0xff] }
 0xb2e   :  { %v3388_v20 = vsub.f32 1.0, %v3387_v42  ;;  %v3425_v17 = vand.u32 2147483647, %v3385_v48  ;;  %v3428_v22 = vor.u32 1.1754944e-38, %v3427_v13 }
 0xb30   :  { %v3389_v26 = vmul.f32 %v6999_v52, %v3388_v20  ;;  %vm3426_vm2 = vcmp.eq.f32.partialorder %v3425_v17, 8.507059e+37  ;;  %v3831_v20 = vld [vmem:[#allocation25 + $0x30] sm:$0xff] }
 0xb31   :  { %v7001_v36 = vpop.eup %7000 }
 0xb32   :  { %v7003_v5 = vpop.eup %7002  ;;  %v3390_v39 = vadd.f32 %v6999_v52, %v3389_v26  ;;  %v3402_v56 = vmul.f32 %v7001_v36, %v3384_v49  ;;  %vm3407_vm10 = vweird.f32 %v7001_v36  ;;  %v3830_v26 = vld [vmem:[#allocation25 + $0x28] sm:$0xff] }
 0xb33   :  { %v3417_v35 = vmul.f32 %v7003_v5, %v3385_v48  ;;  %vm3408_vm13 = vmor %vm3406_vm12, %vm3407_vm10  ;;  %v7005_v8 = vpop.eup %7004  ;;  %vm3422_vm15 = vweird.f32 %v7003_v5  ;;  %v3833_v48 = vld [vmem:[#allocation25 + $0x40] sm:$0xff] }
 0xb34   :  { %v3403_v10 = vsub.f32 1.0, %v3402_v56  ;;  %v3394_v57 = vsel %vm3393_vm9, %v6999_v52, %v3390_v39  ;;  %vm3423_vm1 = vmor %vm3421_vm0, %vm3422_vm15  ;;  %v3829_v39 = vld [vmem:[#allocation25 + $0x20] sm:$0xff] }
 0xb35   :  { %v3418_v55 = vsub.f32 1.0, %v3417_v35  ;;  %v3399_v16 = vsel %vm3396_vm11, %v3398_v53, %v3394_v57  ;;  %v3827_v57 = vld [vmem:[#allocation25 + $0x10] sm:$0xff] }
 0xb36   :  { %v3404_v50 = vmul.f32 %v7001_v36, %v3403_v10  ;;  %v3436_v58 = vmul.f32 %v7005_v8, %v3399_v16  ;;  %v3828_v10 = vld [vmem:[#allocation25 + $0x18] sm:$0xff]  ;;  %v3825_v16 = vld [vmem:[#allocation25] sm:$0xff] }
 0xb37   :  { %v3419_v3 = vmul.f32 %v7003_v5, %v3418_v55 }
 0xb38   :  { %v3405_v30 = vadd.f32 %v7001_v36, %v3404_v50 }
 0xb39   :  { %v3420_v4 = vadd.f32 %v7003_v5, %v3419_v3 }
 0xb3a   :  { %v3409_v61 = vsel %vm3408_vm13, %v7001_v36, %v3405_v30 }
 0xb3b   :  { %v3414_v19 = vsel %vm3411_vm14, %v3413_v44, %v3409_v61  ;;  %v3424_v32 = vsel %vm3423_vm1, %v7003_v5, %v3420_v4 }
 0xb3c   :  { %v3435_v14 = vmul.f32 %v3433_v46, %v3414_v19  ;;  %v3429_v31 = vsel %vm3426_vm2, %v3428_v22, %v3424_v32 }
 0xb3e   :  { %v9900_v28 = vadd.f32 %v3436_v58, %v3435_v14 }
 0xb40   :  { %7006 = vtanh.f32 %v9900_v28 }
 0xb46   :  { %v7007_v40 = vpop.eup %7006 }
 0xb47   :  { %v3439_v9 = vmul.f32 %v7007_v40, %v3429_v31 }
 0xb49   :  { %3440 = vst [vmem:[#allocation3] sm:$0xc] %v3439_v9  ;;  %v3442_v18 = vrot.slane %v3439_v9, 2 }
 0xb4b   :  { %3460 = vmatmul.f32.vlgmr.msrb.gmra.mxu1 %v3442_v18  ;;  %3480 = vmatmul.f32.vlgmr.msra.gmra.mxu2 %v3442_v18 }
 0xb4c   :  { %3500 = vmatmul.f32.vlgmr.msra.gmra.mxu3 %v3442_v18  ;;  %3520 = vmatmul.f32.vlgmr.msra.gmra.mxu0 %v3442_v18 }
 0xb4d   :  { %3883 = vmatpush.msra.mxu3 %v3840_v23 }
 0xb4f   :  { %3884 = vmatpush.msra.mxu3 %v3839_v45 }
 0xb51   :  { %3885 = vmatpush.msra.mxu3 %v3838_v0 }
 0xb53   :  { %3886 = vmatpush.msra.mxu3 %v3837_v29 }
 0xb55   :  { %3887 = vmatpush.msra.mxu3 %v3836_v24 }
 0xb57   :  { %3888 = vmatpush.msra.mxu3 %v3835_v47 }
 0xb59   :  { %3889 = vmatpush.msra.mxu3 %v3834_v38 }
 0xb5b   :  { %3890 = vmatpush.msra.mxu3 %v3833_v48  ;;  %v3854_v48 = vld [vmem:[#allocation26 + $0x68] sm:$0xff] }
 0xb5d   :  { %3891 = vmatpush.msra.mxu3 %v3832_v41  ;;  %v3852_v41 = vld [vmem:[#allocation26 + $0x58] sm:$0xff] }
 0xb5f   :  { %3892 = vmatpush.msra.mxu3 %v3831_v20 }
 0xb61   :  { %3893 = vmatpush.msra.mxu3 %v3830_v26  ;;  %v3851_v26 = vld [vmem:[#allocation26 + $0x50] sm:$0xff] }
 0xb63   :  { %3894 = vmatpush.msra.mxu3 %v3829_v39 }
 0xb65   :  { %3895 = vmatpush.msra.mxu3 %v3828_v10 }
 0xb67   :  { %3896 = vmatpush.msra.mxu3 %v3827_v57 }
 0xb69   :  { %3897 = vmatpush.msra.mxu3 %v3826_v2  ;;  %v3846_v2 = vld [vmem:[#allocation26 + $0x28] sm:$0xff] }
 0xb6b   :  { %3898 = vmatpush.msra.mxu3 %v3825_v16 }
 0xbc8   :  { %v3461_v6 = vpop.f32.mrf.mxu1 }
 0xbc9   :  { %v3528_v60 = vrot.slane %v3461_v6, 4  ;;  %v3521_v56 = vpop.f32.mrf.mxu0  ;;  %v3599_v6 = vrot.slane %v9900_v28, 6 }
 0xbca   :  { %v3531_v51 = vrot.slane %v3521_v56, 4  ;;  %v3849_v56 = vld [vmem:[#allocation26 + $0x40] sm:$0xff] }
 0xbcb   :  { %v3536_v54 = vadd.f32 %v3528_v60, %v11394_v34 }
 0xbcc   :  { %v3539_v30 = vadd.f32 %v3531_v51, %v11397_v59  ;;  %v3847_v51 = vld [vmem:[#allocation26 + $0x30] sm:$0xff] }
 0xbcd   :  { %v6624_v62 = vmul.f32 -1.442695, %v3536_v54 }
 0xbce   :  { %v3481_v63 = vpop.f32.mrf.mxu2 }
 0xbcf   :  { %7008 = vpow2.f32 %v6624_v62  ;;  %v3529_v27 = vrot.slane %v3481_v63, 4  ;;  %v3501_v21 = vpop.f32.mrf.mxu3 }
 0xbd0   :  { %v3530_v12 = vrot.slane %v3501_v21, 4 }
 0xbd1   :  { %v3537_v1 = vadd.f32 %v3529_v27, %v11395_v15 }
 0xbd2   :  { %v3538_v37 = vadd.f32 %v3530_v12, %v11396_v25 }
 0xbd3   :  { %v6625_v49 = vmul.f32 -1.442695, %v3537_v1 }
 0xbd4   :  { %v6626_v43 = vmul.f32 -1.442695, %v3538_v37  ;;  %v11398_v37 = vld [vmem:[#allocation68_spill] sm:$0xff] }
 0xbd5   :  { %v7009_v52 = vpop.eup %7008  ;;  %7010 = vpow2.f32 %v6625_v49  ;;  %v3881_v38 = vrot.slane %v11398_v37, 6  ;;  %v3856_v49 = vld [vmem:[#allocation26 + $0x78] sm:$0xff] }
 0xbd6   :  { %v3549_v42 = vadd.f32 1.0, %v7009_v52  ;;  %7012 = vpow2.f32 %v6626_v43  ;;  %3860 = vmatpush.msra.mxu2 %v3856_v49  ;;  %v3855_v43 = vld [vmem:[#allocation26 + $0x70] sm:$0xff]  ;;  %v3853_v52 = vld [vmem:[#allocation26 + $0x60] sm:$0xff] }
 0xbd8   :  { %7014 = vrcp.f32 %v3549_v42  ;;  %v3563_v8 = vand.u32 2147483648, %v3549_v42  ;;  %vm3557_vm4 = vweird.f32 %v3549_v42  ;;  %v3561_v3 = vand.u32 2147483647, %v3549_v42  ;;  %3861 = vmatpush.msra.mxu2 %v3855_v43 }
 0xbda   :  { %v3564_v32 = vor.u32 1.1754944e-38, %v3563_v8  ;;  %vm3562_vm8 = vcmp.eq.f32.partialorder %v3561_v3, 8.507059e+37  ;;  %3862 = vmatpush.msra.mxu2 %v3854_v48 }
 0xbdb   :  { %v7011_v36 = vpop.eup %7010 }
 0xbdc   :  { %v7013_v11 = vpop.eup %7012  ;;  %v3550_v5 = vadd.f32 1.0, %v7011_v36  ;;  %3863 = vmatpush.msra.mxu2 %v3853_v52 }
 0xbdd   :  { %v3551_v33 = vadd.f32 1.0, %v7013_v11  ;;  %v3850_v11 = vld [vmem:[#allocation26 + $0x48] sm:$0xff] }
 0xbde   :  { %v7015_v35 = vpop.eup %7014  ;;  %7016 = vrcp.f32 %v3550_v5  ;;  %v3578_v14 = vand.u32 2147483648, %v3550_v5  ;;  %v3576_v17 = vand.u32 2147483647, %v3550_v5  ;;  %vm3572_vm9 = vweird.f32 %v3550_v5  ;;  %3864 = vmatpush.msra.mxu2 %v3852_v41 }
 0xbdf   :  { %v3553_v7 = vmul.f32 %v7015_v35, %v3549_v42  ;;  %7018 = vrcp.f32 %v3551_v33  ;;  %vm3558_vm3 = vweird.f32 %v7015_v35  ;;  %v3593_v29 = vand.u32 2147483648, %v3551_v33 }
 0xbe0   :  { %vm3559_vm5 = vmor %vm3557_vm4, %vm3558_vm3  ;;  %7020 = vtanh.f32 %v3539_v30  ;;  %v3579_v9 = vor.u32 1.1754944e-38, %v3578_v14  ;;  %vm3577_vm11 = vcmp.eq.f32.partialorder %v3576_v17, 8.507059e+37  ;;  %vm3587_vm13 = vweird.f32 %v3551_v33  ;;  %3865 = vmatpush.msra.mxu2 %v3851_v26 }
 0xbe1   :  { %v3554_v50 = vsub.f32 1.0, %v3553_v7  ;;  %v3591_v27 = vand.u32 2147483647, %v3551_v33  ;;  %v3594_v24 = vor.u32 1.1754944e-38, %v3593_v29  ;;  %v3848_v7 = vld [vmem:[#allocation26 + $0x38] sm:$0xff] }
 0xbe2   :  { %3866 = vmatpush.msra.mxu2 %v3850_v11 }
 0xbe3   :  { %v3555_v53 = vmul.f32 %v7015_v35, %v3554_v50  ;;  %vm3592_vm15 = vcmp.eq.f32.partialorder %v3591_v27, 8.507059e+37 }
 0xbe4   :  { %v7017_v55 = vpop.eup %7016  ;;  %3867 = vmatpush.msra.mxu2 %v3849_v56  ;;  %v3773_v56 = vld [vmem:[#allocation3 + $0x8] sm:$0xff] }
 0xbe5   :  { %v7019_v44 = vpop.eup %7018  ;;  %v3556_v46 = vadd.f32 %v7015_v35, %v3555_v53  ;;  %v3568_v61 = vmul.f32 %v7017_v55, %v3550_v5  ;;  %vm3573_vm7 = vweird.f32 %v7017_v55 }
 0xbe6   :  { %v3583_v19 = vmul.f32 %v7019_v44, %v3551_v33  ;;  %vm3574_vm10 = vmor %vm3572_vm9, %vm3573_vm7  ;;  %v7021_v23 = vpop.eup %7020  ;;  %vm3588_vm12 = vweird.f32 %v7019_v44  ;;  %3868 = vmatpush.msra.mxu2 %v3848_v7 }
 0xbe7   :  { %v3569_v58 = vsub.f32 1.0, %v3568_v61  ;;  %v3560_v4 = vsel %vm3559_vm5, %v7015_v35, %v3556_v46  ;;  %vm3589_vm14 = vmor %vm3587_vm13, %vm3588_vm12  ;;  %v3843_v46 = vld [vmem:[#allocation26 + $0x10] sm:$0xff]  ;;  %v3842_v61 = vld [vmem:[#allocation26 + $0x8] sm:$0xff]  ;;  %vm3910_vm13 = vcmask 1041408  }
 0xbe8   :  { %v3584_v22 = vsub.f32 1.0, %v3583_v19  ;;  %v3565_v31 = vsel %vm3562_vm8, %v3564_v32, %v3560_v4  ;;  %3869 = vmatpush.msra.mxu2 %v3847_v51  ;;  %v3841_v19 = vld [vmem:[#allocation26] sm:$0xff] }
 0xbe9   :  { %v3570_v13 = vmul.f32 %v7017_v55, %v3569_v58  ;;  %v3602_v54 = vmul.f32 %v7021_v23, %v3565_v31 }
 0xbea   :  { %v3585_v45 = vmul.f32 %v7019_v44, %v3584_v22  ;;  %3870 = vmatpush.msra.mxu2 %v3846_v2  ;;  %v9931_v2 = vld [vmem:[#allocation8 + $0x8] sm:$0xff] }
 0xbeb   :  { %v3571_v40 = vadd.f32 %v7017_v55, %v3570_v13 }
 0xbec   :  { %v3586_v63 = vadd.f32 %v7019_v44, %v3585_v45 }
 0xbed   :  { %v3575_v18 = vsel %vm3574_vm10, %v7017_v55, %v3571_v40  ;;  %v3845_v55 = vld [vmem:[#allocation26 + $0x20] sm:$0xff] }
 0xbee   :  { %v3580_v60 = vsel %vm3577_vm11, %v3579_v9, %v3575_v18  ;;  %v3590_v21 = vsel %vm3589_vm14, %v7019_v44, %v3586_v63  ;;  %v3844_v44 = vld [vmem:[#allocation26 + $0x18] sm:$0xff]  ;;  %3871 = vmatpush.msra.mxu2 %v3845_v55  ;;  %vm3903_vm14 = vcmask 15360  }
 0xbef   :  { %v3601_v0 = vmul.f32 %v3599_v6, %v3580_v60  ;;  %v3595_v28 = vsel %vm3592_vm15, %v3594_v24, %v3590_v21  ;;  %vm3806_vm15 = vcmask 261120  }
 0xbf0   :  { %3872 = vmatpush.msra.mxu2 %v3844_v44 }
 0xbf1   :  { %v9908_v62 = vadd.f32 %v3602_v54, %v3601_v0 }
 0xbf2   :  { %3873 = vmatpush.msra.mxu2 %v3843_v46 }
 0xbf3   :  { %7022 = vtanh.f32 %v9908_v62 }
 0xbf4   :  { %3874 = vmatpush.msra.mxu2 %v3842_v61 }
 0xbf6   :  { %3875 = vmatpush.msra.mxu2 %v3841_v19 }
 0xbf9   :  { %v7023_v12 = vpop.eup %7022 }
 0xbfa   :  { %v3605_v47 = vmul.f32 %v7023_v12, %v3595_v28 }
 0xbfc   :  { %3606 = vst [vmem:[#allocation3] sm:$0x30] %v3605_v47  ;;  %v3608_v1 = vrot.slane %v3605_v47, 4  ;;  %v3765_v47 = vrot.slane %v9908_v62, 6 }
 0xbfe   :  { %3626 = vmatmul.f32.vlgmr.msra.gmra.mxu1 %v3608_v1  ;;  %3646 = vmatmul.f32.vlgmr.msrb.gmra.mxu2 %v3608_v1 }
 0xbff   :  { %3666 = vmatmul.f32.vlgmr.msrb.gmra.mxu3 %v3608_v1  ;;  %3686 = vmatmul.f32.vlgmr.msrb.gmra.mxu0 %v3608_v1 }
 0xc07   :  { %3899 = vmatmul.f32.vlgmr.msra.gmra.mxu3 %v3881_v38 }
 0xc7b   :  { %v3627_v42 = vpop.f32.mrf.mxu1 }
 0xc7c   :  { %v3694_v20 = vrot.slane %v3627_v42, 2  ;;  %v3687_v3 = vpop.f32.mrf.mxu0 }
 0xc7d   :  { %v3697_v13 = vrot.slane %v3687_v3, 2 }
 0xc7e   :  { %v3702_v36 = vadd.f32 %v3694_v20, %v11394_v34 }
 0xc7f   :  { %v3705_v40 = vadd.f32 %v3697_v13, %v11397_v59 }
 0xc80   :  { %v6627_v5 = vmul.f32 -1.442695, %v3702_v36 }
 0xc81   :  { %v3647_v39 = vpop.f32.mrf.mxu2 }
 0xc82   :  { %7024 = vpow2.f32 %v6627_v5  ;;  %v3695_v33 = vrot.slane %v3647_v39, 2  ;;  %v3667_v35 = vpop.f32.mrf.mxu3 }
 0xc83   :  { %v3696_v10 = vrot.slane %v3667_v35, 2  ;;  %v9921_v35 = vld [vmem:[#allocation6 + $0x8] sm:$0xff] }
 0xc84   :  { %v3703_v57 = vadd.f32 %v3695_v33, %v11395_v15  ;;  %v9917_v33 = vld [vmem:[#allocation6] sm:$0xff] }
 0xc85   :  { %v3704_v50 = vadd.f32 %v3696_v10, %v11396_v25 }
 0xc86   :  { %v6628_v34 = vmul.f32 -1.442695, %v3703_v57  ;;  %v9925_v57 = vld [vmem:[#allocation8] sm:$0xff] }
 0xc87   :  { %v6629_v53 = vmul.f32 -1.442695, %v3704_v50 }
 0xc88   :  { %v7025_v30 = vpop.eup %7024  ;;  %7026 = vpow2.f32 %v6628_v34 }
 0xc89   :  { %v3715_v16 = vadd.f32 1.0, %v7025_v30  ;;  %7028 = vpow2.f32 %v6629_v53 }
 0xc8a   :  { %v3900_v7 = vpop.f32.mrf.mxu3 }
 0xc8b   :  { %7030 = vrcp.f32 %v3715_v16  ;;  %v3729_v6 = vand.u32 2147483648, %v3715_v16  ;;  %vm3723_vm1 = vweird.f32 %v3715_v16  ;;  %v3727_v60 = vand.u32 2147483647, %v3715_v16 }
 0xc8d   :  { %v3730_v27 = vor.u32 1.1754944e-38, %v3729_v6  ;;  %vm3728_vm4 = vcmp.eq.f32.partialorder %v3727_v60, 8.507059e+37 }
 0xc8e   :  { %v7027_v15 = vpop.eup %7026 }
 0xc8f   :  { %v7029_v8 = vpop.eup %7028  ;;  %v3716_v25 = vadd.f32 1.0, %v7027_v15 }
 0xc90   :  { %v3717_v58 = vadd.f32 1.0, %v7029_v8 }
 0xc91   :  { %v7031_v14 = vpop.eup %7030  ;;  %7032 = vrcp.f32 %v3716_v25  ;;  %v3744_v54 = vand.u32 2147483648, %v3716_v25  ;;  %v3742_v29 = vand.u32 2147483647, %v3716_v25  ;;  %vm3738_vm5 = vweird.f32 %v3716_v25 }
 0xc92   :  { %v3719_v4 = vmul.f32 %v7031_v14, %v3715_v16  ;;  %7034 = vrcp.f32 %v3717_v58  ;;  %vm3724_vm0 = vweird.f32 %v7031_v14  ;;  %v3759_v42 = vand.u32 2147483648, %v3717_v58 }
 0xc93   :  { %vm3725_vm2 = vmor %vm3723_vm1, %vm3724_vm0  ;;  %7036 = vtanh.f32 %v3705_v40  ;;  %v3745_v12 = vor.u32 1.1754944e-38, %v3744_v54  ;;  %vm3743_vm8 = vcmp.eq.f32.partialorder %v3742_v29, 8.507059e+37  ;;  %vm3753_vm10 = vweird.f32 %v3717_v58  ;;  %v4098_v54 = vld [vmem:[#allocation28 + $0x30] sm:$0xff] }
 0xc94   :  { %v3720_v17 = vsub.f32 1.0, %v3719_v4  ;;  %v3757_v41 = vand.u32 2147483647, %v3717_v58  ;;  %v3760_v26 = vor.u32 1.1754944e-38, %v3759_v42  ;;  %vm3939_vm0 = vcmask 523264  }
 0xc95   :  { %vm3946_vm1 = vcmp.gt.f32.partialorder %v9925_v57, 0.5 }
 0xc96   :  { %v3721_v32 = vmul.f32 %v7031_v14, %v3720_v17  ;;  %vm3758_vm12 = vcmp.eq.f32.partialorder %v3757_v41, 8.507059e+37 }
 0xc97   :  { %v7033_v22 = vpop.eup %7032 }
 0xc98   :  { %v7035_v31 = vpop.eup %7034  ;;  %v3722_v9 = vadd.f32 %v7031_v14, %v3721_v32  ;;  %v3734_v18 = vmul.f32 %v7033_v22, %v3716_v25  ;;  %vm3739_vm3 = vweird.f32 %v7033_v22 }
 0xc99   :  { %v3749_v23 = vmul.f32 %v7035_v31, %v3717_v58  ;;  %vm3740_vm7 = vmor %vm3738_vm5, %vm3739_vm3  ;;  %v7037_v1 = vpop.eup %7036  ;;  %vm3754_vm9 = vweird.f32 %v7035_v31  ;;  %vm3950_vm3 = vcmask 7168   ;;  %vm3974_vm5 = vcmask 1040384  }
 0xc9a   :  { %v3735_v45 = vsub.f32 1.0, %v3734_v18  ;;  %v3726_v0 = vsel %vm3725_vm2, %v7031_v14, %v3722_v9  ;;  %vm3755_vm11 = vmor %vm3753_vm10, %vm3754_vm9  ;;  %vm3947_vm2 = vcmp.gt.f32.partialorder %v9931_v2, 0.5 }
 0xc9b   :  { %v3750_v21 = vsub.f32 1.0, %v3749_v23  ;;  %v3731_v24 = vsel %vm3728_vm4, %v3730_v27, %v3726_v0  ;;  %vm3960_vm4 = vcmask 15368   ;;  %v4097_v0 = vld [vmem:[#allocation28 + $0x28] sm:$0xff]  ;;  %v4095_v27 = vld [vmem:[#allocation28 + $0x18] sm:$0xff] }
 0xc9c   :  { %v3736_v63 = vmul.f32 %v7033_v22, %v3735_v45  ;;  %v3768_v49 = vmul.f32 %v7037_v1, %v3731_v24  ;;  %v4099_v45 = vld [vmem:[#allocation28 + $0x38] sm:$0xff] }
 0xc9d   :  { %v3751_v38 = vmul.f32 %v7035_v31, %v3750_v21  ;;  %4118 = vmatpush.msrb.mxu2 %v4099_v45  ;;  %v4094_v21 = vld [vmem:[#allocation28 + $0x10] sm:$0xff] }
 0xc9e   :  { %v3737_v59 = vadd.f32 %v7033_v22, %v3736_v63  ;;  %v4096_v63 = vld [vmem:[#allocation28 + $0x20] sm:$0xff] }
 0xc9f   :  { %v3752_v52 = vadd.f32 %v7035_v31, %v3751_v38  ;;  %4119 = vmatpush.msrb.mxu2 %v4098_v54 }
 0xca0   :  { %v3741_v28 = vsel %vm3740_vm7, %v7033_v22, %v3737_v59  ;;  %v4093_v59 = vld [vmem:[#allocation28 + $0x8] sm:$0xff] }
 0xca1   :  { %v3746_v37 = vsel %vm3743_vm8, %v3745_v12, %v3741_v28  ;;  %v3756_v20 = vsel %vm3755_vm11, %v7035_v31, %v3752_v52  ;;  %4120 = vmatpush.msrb.mxu2 %v4097_v0  ;;  %v4092_v12 = vld [vmem:[#allocation28] sm:$0xff]  ;;  %vm6424_vm11 = vcmask 1045504  }
 0xca2   :  { %v3767_v43 = vmul.f32 %v3765_v47, %v3746_v37  ;;  %v3761_v11 = vsel %vm3758_vm12, %v3760_v26, %v3756_v20  ;;  %vm6431_vm12 = vcmask 13320  }
 0xca3   :  { %4121 = vmatpush.msrb.mxu2 %v4096_v63 }
 0xca4   :  { %v3769_v48 = vadd.f32 %v3768_v49, %v3767_v43 }
 0xca5   :  { %4122 = vmatpush.msrb.mxu2 %v4095_v27 }
 0xca6   :  { %7038 = vtanh.f32 %v3769_v48 }
 0xca7   :  { %4123 = vmatpush.msrb.mxu2 %v4094_v21 }
 0xca9   :  { %4124 = vmatpush.msrb.mxu2 %v4093_v59 }
 0xcab   :  { %4125 = vmatpush.msrb.mxu2 %v4092_v12 }
 0xcac   :  { %v7039_v36 = vpop.eup %7038 }
 0xcad   :  { %v3771_v5 = vmul.f32 %v7039_v36, %v3761_v11 }
 0xcaf   :  { %3772 = vst [vmem:[#allocation3] sm:$0xc0] %v3771_v5  ;;  %v3858_v62 = vrot.slane %v3771_v5, 6 }
 0xcb1   :  { %3876 = vmatmul.f32.vlgmr.msra.gmra.mxu2 %v3858_v62 }
 0xcb6   :  { %v3774_v39 = vld [vmem:[#allocation3] sm:$0xff] }
 0xcb7   :  { %3789 = vmatpush.msrb.mxu1 %v3774_v39 }
 0xcb9   :  { %3790 = vmatpush.msrb.mxu1 %v3773_v56 }
 0xcba   :  { %6630 = vmatmul.msk.f32.vlgmr.msrb.gmra.mxu1 %vm2057_vm6, %v9917_v33 }
 0xcc2   :  { %6631 = vmatmul.msk.f32.gmra.mxu1 %vm2057_vm6, %v9921_v35 }
 0xd34   :  { %v3877_v10 = vpop.f32.mrf.mxu2 }
 0xd35   :  { %v3901_v51 = vadd.f32 %v3900_v7, %v3877_v10  ;;  %v9982_v10 = vld [vmem:[%s11400_s15] sm:$0x3] }
 0xd37   :  { %v3792_v50 = vpop.f32.mrf.mxu1  ;;  %6632 = vmatpush.msk.msra.mxu0 %vm3910_vm13, %v3901_v51 }
 0xd38   :  { %6633 = vmatmul.msk.f32.vlgmr.msra.gmra.mxu0 %vm3903_vm14, %v9925_v57  ;;  %3800 = vrot.lane.b32.xlu2 %v3792_v50, %s7820_s26 }
 0xd3f   :  { %v3795_v34 = vpop.f32.mrf.mxu1 }
 0xd40   :  { %6634 = vmatmul.msk.f32.gmra.mxu0 %vm3903_vm14, %v9931_v2  ;;  %3802 = vrot.lane.b32.xlu2 %v3795_v34, %s7820_s26 }
 0xd92   :  { %v3801_v53 = vpop.permute.xlu2 %3800 }
 0xd93   :  { %v9937_v55 = vsel %vm3806_vm15, %v3773_v56, %v3801_v53 }
 0xd9a   :  { %v3803_v46 = vpop.permute.xlu2 %3802 }
 0xd9b   :  { %v9942_v61 = vsel %vm3806_vm15, %v3774_v39, %v3803_v46  ;;  %v7384_v46 = vld [vmem:[%s11029_s0 + $0x8] sm:$0xff] }
 0xd9c   :  { %vm337_vm7 = vcmp.ne.s32.totalorder %v7384_v46, 0  ;;  %v10050_v46 = vld [vmem:[#allocation19 + $0x70] sm:$0xff] }
 0xdb5   :  { %v3931_v30 = vpop.f32.mrf.mxu0 }
 0xdb6   :  { %v3937_v16 = vmul.f32 %v3931_v30, %v9937_v55 }
 0xdb8   :  { %v3940_v44 = vsel %vm3939_vm0, %v3937_v16, 0.0 }
 0xdb9   :  { %3941 = vadd.xlane.f32.xlu1 %v3940_v44 }
 0xdbd   :  { %v3934_v15 = vpop.f32.mrf.mxu0 }
 0xdbe   :  { %v3938_v8 = vmul.f32 %v3934_v15, %v9942_v61  ;;  %v7385_v15 = vld [vmem:[%s11029_s0] sm:$0xff] }
 0xdbf   :  { %vm336_vm8 = vcmp.ne.s32.totalorder %v7385_v15, 0  ;;  %v10053_v15 = vld [vmem:[#allocation19 + $0x60] sm:$0xff] }
 0xdc0   :  { %v3943_v25 = vsel %vm3939_vm0, %v3938_v8, 0.0  ;;  %v11401_v8 = vmov 0.0  }
 0xdc1   :  { %3944 = vadd.xlane.f32.xlu2 %v3943_v25  ;;  %v9995_v25 = vsel %vm336_vm8, 1.0, %v11401_v8 }
 0xe2c   :  { %v9947_v19 = vpop.xlane.xlu1 %3941 }
 0xe2d   :  { %v3948_v3 = vsel %vm3946_vm1, %v9947_v19, -1e+30 }
 0xe2e   :  { %v3951_v4 = vsel %vm3950_vm3, %v3948_v3, -inf  ;;  %v3961_v13 = vsel %vm3960_vm4, %v3948_v3, -inf }
 0xe34   :  { %v3945_v58 = vpop.xlane.xlu2 %3944 }
 0xe35   :  { %v3949_v14 = vsel %vm3947_vm2, %v3945_v58, -1e+30 }
 0xe36   :  { %v3952_v17 = vsel %vm3950_vm3, %v3949_v14, -inf  ;;  %v3962_v32 = vsel %vm3960_vm4, %v3949_v14, -inf }
 0xe37   :  { %v3953_v22 = vmax.f32 %v3951_v4, %v3952_v17  ;;  %v3963_v40 = vmax.f32 %v3961_v13, %v3962_v32 }
 0xe39   :  { %v3964_v31 = vrot.slane %v3963_v40, 4  ;;  %v3954_v29 = vrot.slane %v3953_v22, 4 }
 0xe3b   :  { %v3965_v9 = vmax.f32 %v3963_v40, %v3964_v31  ;;  %v3955_v24 = vmax.f32 %v3953_v22, %v3954_v29 }
 0xe3d   :  { %v3966_v18 = vrot.slane %v3965_v9, 2  ;;  %v3956_v28 = vrot.slane %v3955_v24, 2 }
 0xe3f   :  { %v3967_v6 = vmax.f32 %v3965_v9, %v3966_v18  ;;  %v3957_v47 = vmax.f32 %v3955_v24, %v3956_v28 }
 0xe41   :  { %v3968_v23 = vrot.slane %v3967_v6, 1  ;;  %v3958_v1 = vrot.slane %v3957_v47, 1 }
 0xe43   :  { %v3969_v60 = vmax.f32 %v3967_v6, %v3968_v23  ;;  %v3959_v37 = vmax.f32 %v3957_v47, %v3958_v1 }
 0xe45   :  { %3971 = vrot.lane.b32.xlu0 %v3969_v60, %s7821_s13 }
 0xe4d   :  { %3811 = vrot.lane.b32.xlu0 %v3773_v56, %s7820_s26  ;;  %v6781_v56 = vld [vmem:[%s10737_s21] ss:$0 sm:$0xff]  ;;  %s11412_s21 = sld [smem:[#allocation101_spill]] }
 0xe55   :  { %3817 = vrot.lane.b32.xlu0 %v3792_v50, %s11399_s2 }
 0xe5d   :  { %3813 = vrot.lane.b32.xlu0 %v3774_v39, %s7820_s26 }
 0xe65   :  { %3819 = vrot.lane.b32.xlu0 %v3795_v34, %s11399_s2 }
 0xeb7   :  { %v3972_v38 = vpop.permute.xlu0 %3971 }
 0xeb8   :  { %v3975_v49 = vsel %vm3974_vm5, %v3959_v37, %v3972_v38 }
 0xeb9   :  { %6635 = vmatpush.msk.msra.mxu1 %vm3910_vm13, %v3975_v49  ;;  %v11402_v49 = vmov 0  }
 0xeba   :  { %6636 = vmatmul.msk.f32.vlgmr.msra.gmra.mxu1 %vm3903_vm14, %v9925_v57 }
 0xebf   :  { %v3812_v43 = vpop.permute.xlu0 %3811 }
 0xec2   :  { %6637 = vmatmul.msk.f32.gmra.mxu1 %vm3903_vm14, %v9931_v2 }
 0xec7   :  { %v3818_v48 = vpop.permute.xlu0 %3817 }
 0xec8   :  { %v3823_v52 = vsel %vm3806_vm15, %v3812_v43, %v3818_v48 }
 0xec9   :  { %6643 = vmatmul.msk.f32.vlgmr.msrb.gmra.mxu2 %vm3939_vm0, %v3823_v52 }
 0xecf   :  { %v3814_v42 = vpop.permute.xlu0 %3813 }
 0xed7   :  { %v3820_v41 = vpop.permute.xlu0 %3819 }
 0xed8   :  { %v3824_v20 = vsel %vm3806_vm15, %v3814_v42, %v3820_v41 }
 0xed9   :  { %6644 = vmatmul.msk.f32.gmra.mxu2 %vm3939_vm0, %v3824_v20 }
 0xf37   :  { %v3996_v26 = vpop.f32.mrf.mxu1 }
 0xf38   :  { %v4002_v36 = vsub.f32 %v9947_v19, %v3996_v26  ;;  %v9998_v19 = vsel %vm337_vm7, 1.0, %v11401_v8 }
 0xf39   :  { %v6768_v3 = vpack.i.bf16 %v9995_v25, %v9998_v19 }
 0xf3a   :  { %v4004_v62 = vmul.f32 1.442695, %v4002_v36 }
 0xf3f   :  { %v3999_v11 = vpop.f32.mrf.mxu1 }
 0xf40   :  { %v4003_v5 = vsub.f32 %v3945_v58, %v3999_v11 }
 0xf42   :  { %v4006_v39 = vmul.f32 1.442695, %v4003_v5 }
 0xf44   :  { %7040 = vpow2.f32 %v4006_v39 }
 0xf45   :  { %7042 = vpow2.f32 %v4004_v62 }
 0xf4a   :  { %v9976_v7 = vpop.eup %7040 }
 0xf4b   :  { %4025 = vmatpush.msrb.mxu0 %v9976_v7  ;;  %v7043_v51 = vpop.eup %7042 }
 0xf4c   :  { %v4127_v50 = vpop.f32.mrf.mxu2 }
 0xf4d   :  { %v4128_v34 = vadd.f32 %v6781_v56, %v4127_v50  ;;  %4026 = vmatpush.msrb.mxu0 %v7043_v51 }
 0xf4e   :  { %6638 = vmatmul.msk.f32.vlgmr.msrb.gmra.mxu0 %vm2057_vm6, %v9982_v10 }
 0xf4f   :  { %v4133_v53 = vsel %vm3903_vm14, %v4128_v34, -inf }
 0xf50   :  { %4134 = vmax.xlane.f32.xlu1 %v4133_v53 }
 0xf5c   :  { %v4130_v30 = vpop.f32.mrf.mxu2 }
 0xf5d   :  { %v4131_v16 = vadd.f32 %v6781_v56, %v4130_v30 }
 0xf5f   :  { %v4136_v44 = vsel %vm3903_vm14, %v4131_v16, -inf }
 0xf60   :  { %4137 = vmax.xlane.f32.xlu2 %v4136_v44  ;;  %v11403_v44 = vmov 1  }
 0xf69   :  { %6769 = vrot.lane.b32.xlu1 %v6768_v3, %s7822_s18  ;;  %v10059_v3 = vld [vmem:[#allocation19 + $0x40] sm:$0xff] }
 0xfc3   :  { %v4135_v58 = vpop.xlane.xlu1 %4134 }
 0xfc4   :  { %v4139_v14 = vsub.f32 %v4128_v34, %v4135_v58  ;;  %v10061_v58 = vld [vmem:[#allocation19 + $0x78] sm:$0xff] }
 0xfc5   :  { %4405 = vmatpush.msra.mxu2 %v10061_v58 }
 0xfc6   :  { %v4141_v4 = vmul.f32 1.442695, %v4139_v14 }
 0xfc8   :  { %7044 = vpow2.f32 %v4141_v4  ;;  %v10067_v4 = vld [vmem:[#allocation19 + $0x68] sm:$0xff] }
 0xfc9   :  { %4406 = vmatpush.msra.mxu2 %v10067_v4 }
 0xfcb   :  { %v4028_v13 = vpop.f32.mrf.mxu0 }
 0xfcc   :  { %7046 = vrcp.f32 %v4028_v13  ;;  %v10069_v13 = vld [vmem:[#allocation19 + $0x20] sm:$0xff] }
 0xfce   :  { %v7045_v17 = vpop.eup %7044 }
 0xfcf   :  { %v4145_v32 = vsel %vm3903_vm14, %v7045_v17, 0.0  ;;  %v10074_v17 = vld [vmem:[#allocation19 + $0x58] sm:$0xff] }
 0xfd0   :  { %4146 = vadd.xlane.f32.xlu2 %v4145_v32  ;;  %v10076_v32 = vld [vmem:[#allocation19 + $0x10] sm:$0xff]  ;;  %4407 = vmatpush.msra.mxu2 %v10074_v17 }
 0xfd2   :  { %v7047_v22 = vpop.eup %7046 }
 0xfd3   :  { %v4138_v40 = vpop.xlane.xlu2 %4137  ;;  %6639 = vmatpush.msk.msra.mxu0 %vm3910_vm13, %v7047_v22  ;;  %v10080_v22 = vld [vmem:[#allocation19 + $0x48] sm:$0xff] }
 0xfd4   :  { %v4140_v31 = vsub.f32 %v4131_v16, %v4138_v40  ;;  %6640 = vmatmul.msk.f32.vlgmr.msra.gmra.mxu0 %vm3903_vm14, %v9925_v57  ;;  %4408 = vmatpush.msra.mxu2 %v10080_v22  ;;  %v10083_v40 = vld [vmem:[#allocation19] sm:$0xff] }
 0xfd5   :  { %4282 = vmatpush.msrb.mxu0 %v10050_v46 }
 0xfd6   :  { %v4143_v9 = vmul.f32 1.442695, %v4140_v31 }
 0xfd7   :  { %4283 = vmatpush.msrb.mxu0 %v10053_v15 }
 0xfd8   :  { %7048 = vpow2.f32 %v4143_v9  ;;  %v10090_v9 = vld [vmem:[#allocation19 + $0x28] sm:$0xff] }
 0xfdb   :  { %v10013_v29 = vpop.permute.xlu1 %6769 }
 0xfdc   :  { %6641 = vmatmul.msk.f32.gmra.mxu0 %vm3903_vm14, %v9931_v2  ;;  %v6772_v27 = vunpack.i.h.bf16 %v10013_v29  ;;  %v6771_v52 = vunpack.i.l.bf16 %v10013_v29 }
 0xfde   :  { %v7049_v18 = vpop.eup %7048 }
 0xfdf   :  { %v4148_v6 = vsel %vm3903_vm14, %v7049_v18, 0.0  ;;  %v10094_v18 = vld [vmem:[#allocation19 + $0x18] sm:$0xff] }
 0xfe0   :  { %4149 = vadd.xlane.f32.xlu0 %v4148_v6  ;;  %v10098_v6 = vld [vmem:[#allocation19 + $0x8] sm:$0xff] }
0x1043   :  { %v4147_v23 = vpop.xlane.xlu2 %4146 }
0x1044   :  { %7050 = vlog2.f32 %v4147_v23 }
0x104a   :  { %v7051_v60 = vpop.eup %7050 }
0x104b   :  { %v4152_v45 = vmul.f32 0.6931472, %v7051_v60  ;;  %v11404_v60 = vld [vmem:[#allocation81_spill] sm:$0xff] }
0x104d   :  { %v10010_v54 = vsub.f32 %v4139_v14, %v4152_v45  ;;  %v10063_v14 = vld [vmem:[#allocation19 + $0x30] sm:$0xff] }
0x104f   :  { %v4157_v0 = vmul.f32 1.442695, %v10010_v54 }
0x1051   :  { %7052 = vpow2.f32 %v4157_v0  ;;  %v4052_v37 = vpop.f32.mrf.mxu0 }
0x1052   :  { %v4058_v38 = vmul.f32 %v7043_v51, %v4052_v37  ;;  %v11406_v37 = vld [vmem:[#allocation82_spill] sm:$0xff] }
0x1053   :  { %v4150_v63 = vpop.xlane.xlu0 %4149 }
0x1054   :  { %7054 = vlog2.f32 %v4150_v63 }
0x1057   :  { %v10016_v21 = vpop.eup %7052 }
0x1058   :  { %vm4161_vm9 = vcmp.gt.f32.partialorder %v10016_v21, 0.5 }
0x1059   :  { %v6645_v59 = vsel %vm4161_vm9, 1.0, %v11401_v8  ;;  %v4055_v62 = vpop.f32.mrf.mxu0 }
0x105a   :  { %v7055_v24 = vpop.eup %7054  ;;  %v10022_v12 = vmul.f32 %v6772_v27, %v6645_v59  ;;  %v4059_v50 = vmul.f32 %v9976_v7, %v4055_v62  ;;  %v10056_v7 = vld [vmem:[#allocation19 + $0x50] sm:$0xff]  ;;  %v11405_v59 = vld [vmem:[#allocation77_spill] sm:$0xff] }
0x105b   :  { %v4154_v28 = vmul.f32 0.6931472, %v7055_v24  ;;  %4284 = vmatpush.msrb.mxu0 %v10056_v7 }
0x105c   :  { %4179 = vperm.xlu1 %6767, %v10022_v12   ;;  %v6413_v48 = vrot.slane %v10022_v12, 6 }
0x105d   :  { %v10025_v47 = vsub.f32 %v4140_v31, %v4154_v28  ;;  %4285 = vmatpush.msrb.mxu0 %v10059_v3  ;;  %v10085_v31 = vld [vmem:[#allocation19 + $0x38] sm:$0xff] }
0x105e   :  { %v6418_v20 = vsub.f32 %v10022_v12, %v6413_v48  ;;  %4409 = vmatpush.msra.mxu2 %v10085_v31 }
0x105f   :  { %v4159_v1 = vmul.f32 1.442695, %v10025_v47  ;;  %4286 = vmatpush.msrb.mxu0 %v10063_v14 }
0x1060   :  { %v6420_v11 = vand.u32 2147483647, %v6418_v20  ;;  %4410 = vmatpush.msra.mxu2 %v10090_v9 }
0x1061   :  { %7056 = vpow2.f32 %v4159_v1  ;;  %4287 = vmatpush.msrb.mxu0 %v10069_v13 }
0x1062   :  { %v6425_v56 = vrot.slane %v6420_v11, 2  ;;  %4411 = vmatpush.msra.mxu2 %v10094_v18 }
0x1063   :  { %4288 = vmatpush.msrb.mxu0 %v10076_v32 }
0x1064   :  { %6775 = vset.pattern.permute.xlu1 %v11402_v49  ;;  %4412 = vmatpush.msra.mxu2 %v10098_v6 }
0x1065   :  { %4062 = vperm.xlu1 %6775, %v4058_v38   ;;  %4289 = vmatpush.msrb.mxu0 %v10083_v40 }
0x1066   :  { %4290 = vmatmul.f32.vlgmr.msrb.gmra.mxu0 %v11401_v8  ;;  %4631 = vmatpush.msrb.mxu2 %v10061_v58 }
0x1067   :  { %v10029_v43 = vpop.eup %7056  ;;  %4498 = vmatpush.msra.mxu0 %v10050_v46 }
0x1068   :  { %vm4162_vm10 = vcmp.gt.f32.partialorder %v10029_v43, 0.5  ;;  %4632 = vmatpush.msrb.mxu2 %v10067_v4 }
0x1069   :  { %v6646_v42 = vsel %vm4162_vm10, 1.0, %v11401_v8  ;;  %4499 = vmatpush.msra.mxu0 %v10053_v15 }
0x106a   :  { %v10037_v41 = vmul.f32 %v6771_v52, %v6646_v42  ;;  %4633 = vmatpush.msrb.mxu2 %v10074_v17 }
0x106b   :  { %4500 = vmatpush.msra.mxu0 %v10056_v7 }
0x106c   :  { %v6414_v26 = vrot.slane %v10037_v41, 6  ;;  %4184 = vperm.xlu2 %6773, %v10037_v41   ;;  %4634 = vmatpush.msrb.mxu2 %v10080_v22 }
0x106d   :  { %4501 = vmatpush.msra.mxu0 %v10059_v3 }
0x106e   :  { %v6415_v36 = vsel %vm3910_vm13, %v6413_v48, %v6414_v26  ;;  %4635 = vmatpush.msrb.mxu2 %v10085_v31  ;;  %v11407_v48 = vld [vmem:[#allocation80_spill] sm:$0xff] }
0x106f   :  { %v6419_v5 = vsub.f32 %v10037_v41, %v6415_v36  ;;  %4502 = vmatpush.msra.mxu0 %v10063_v14 }
0x1070   :  { %4636 = vmatpush.msrb.mxu2 %v10090_v9 }
0x1071   :  { %v6421_v39 = vand.u32 2147483647, %v6419_v5  ;;  %4503 = vmatpush.msra.mxu0 %v10069_v13  ;;  %v11409_v5 = vld [vmem:[#allocation78_spill] sm:$0xff] }
0x1072   :  { %4637 = vmatpush.msrb.mxu2 %v10094_v18 }
0x1073   :  { %v6426_v51 = vrot.slane %v6421_v39, 2  ;;  %4504 = vmatpush.msra.mxu0 %v10076_v32 }
0x1074   :  { %6774 = vset.pattern.permute.xlu2 %v11402_v49  ;;  %4638 = vmatpush.msrb.mxu2 %v10098_v6 }
0x1075   :  { %4067 = vperm.xlu2 %6774, %v4059_v50   ;;  %v6427_v34 = vsel %vm6424_vm11, %v6425_v56, %v6426_v51  ;;  %v6432_v53 = vsel %vm6431_vm12, %v6426_v51, 0.0  ;;  %4505 = vmatpush.msra.mxu0 %v10083_v40  ;;  %v11410_v51 = vld [vmem:[#allocation75_spill] sm:$0xff]  ;;  %vm4372_vm12 = vcmask 517120  }
0x1076   :  { %v6430_v30 = vsel %vm3960_vm4, %v6427_v34, 0.0 }
0x1077   :  { %v10047_v16 = vadd.f32 %v6432_v53, %v6430_v30  ;;  %4724 = vmatpush.msrb.mxu0 %v10050_v46 }
0x1079   :  { %4725 = vmatpush.msrb.mxu0 %v10053_v15 }
0x107b   :  { %4726 = vmatpush.msrb.mxu0 %v10056_v7 }
0x107d   :  { %6777 = vset.pattern.permute.xlu2 %v11403_v44  ;;  %4727 = vmatpush.msrb.mxu0 %v10059_v3 }
0x107f   :  { %4728 = vmatpush.msrb.mxu0 %v10063_v14 }
0x1081   :  { %4729 = vmatpush.msrb.mxu0 %v10069_v13 }
0x1083   :  { %4730 = vmatpush.msrb.mxu0 %v10076_v32 }
0x1085   :  { %4731 = vmatpush.msrb.mxu0 %v10083_v40 }
0x10c6   :  { %v10104_v23 = vpop.permute.xlu2 %4184 }
0x10c7   :  { %v4193_v45 = vmul.f32 %v10104_v23, %v11404_v60  ;;  %v4194_v38 = vmul.f32 %v10104_v23, %v11406_v37  ;;  %v4189_v62 = vmul.f32 %v10104_v23, %v11409_v5 }
0x10c9   :  { %4209 = vmatpush.msrb.mxu3 %v4193_v45 }
0x10ce   :  { %v10116_v0 = vpop.permute.xlu1 %4179 }
0x10cf   :  { %v4068_v63 = vpop.permute.xlu2 %4067  ;;  %v4191_v24 = vmul.f32 %v10116_v0, %v11405_v59  ;;  %v4188_v50 = vmul.f32 %v10116_v0, %v11410_v51 }
0x10d0   :  { %v4071_v28 = vmul.f32 %v4068_v63, %v9942_v61 }
0x10d1   :  { %4210 = vmatpush.msrb.mxu3 %v4191_v24  ;;  %v11411_v24 = vld [vmem:[#allocation79_spill] sm:$0xff] }
0x10d2   :  { %4086 = vmatpush.msrb.mxu1 %v4071_v28  ;;  %6647 = vmatmul.msk.f32.vlgmr.msrb.gmra.mxu3 %vm2057_vm6, %v9917_v33  ;;  %v4190_v28 = vmul.f32 %v10104_v23, %v11411_v24 }
0x10d3   :  { %4302 = vmatpush.msra.mxu3 %v10061_v58 }
0x10d5   :  { %4303 = vmatpush.msra.mxu3 %v10067_v4 }
0x10d7   :  { %v4063_v61 = vpop.permute.xlu1 %4062  ;;  %4304 = vmatpush.msra.mxu3 %v10074_v17 }
0x10d8   :  { %v4070_v1 = vmul.f32 %v4063_v61, %v9937_v55  ;;  %v4192_v55 = vmul.f32 %v10116_v0, %v11407_v48 }
0x10d9   :  { %4305 = vmatpush.msra.mxu3 %v10080_v22 }
0x10da   :  { %4087 = vmatpush.msrb.mxu1 %v4070_v1  ;;  %6648 = vmatmul.msk.f32.gmra.mxu3 %vm2057_vm6, %v9921_v35 }
0x10db   :  { %6642 = vmatmul.msk.f32.vlgmr.msrb.gmra.mxu1 %vm2057_vm6, %v9982_v10  ;;  %4306 = vmatpush.msra.mxu3 %v10085_v31 }
0x10dc   :  { %4232 = vmatpush.msra.mxu1 %v4194_v38 }
0x10dd   :  { %4307 = vmatpush.msra.mxu3 %v10090_v9 }
0x10de   :  { %4233 = vmatpush.msra.mxu1 %v4192_v55 }
0x10df   :  { %4308 = vmatpush.msra.mxu3 %v10094_v18 }
0x10e0   :  { %4385 = vmatpush.msrb.mxu1 %v10050_v46 }
0x10e1   :  { %4309 = vmatpush.msra.mxu3 %v10098_v6 }
0x10e2   :  { %4386 = vmatpush.msrb.mxu1 %v10053_v15  ;;  %4310 = vmatmul.f32.vlgmr.msra.gmra.mxu3 %v11401_v8 }
0x10e3   :  { %6649 = vmatmul.msk.f32.vlgmr.msra.gmra.mxu1 %vm2057_vm6, %v9917_v33  ;;  %4518 = vmatpush.msrb.mxu3 %v10061_v58  ;;  %v4245_v33 = vld [vmem:[%s10728_s12] sm:$0x3]  ;;  %s7823_s12 = smov 10  }
0x10e4   :  { %4387 = vmatpush.msrb.mxu1 %v10056_v7  ;;  %v4247_v42 = vperm.slane %v4245_v33, 0  ;;  %v4248_v34 = vperm.slane %v4245_v33, 1 }
0x10e5   :  { %4519 = vmatpush.msrb.mxu3 %v10067_v4 }
0x10e6   :  { %4388 = vmatpush.msrb.mxu1 %v10059_v3 }
0x10e7   :  { %4520 = vmatpush.msrb.mxu3 %v10074_v17 }
0x10e8   :  { %4389 = vmatpush.msrb.mxu1 %v10063_v14 }
0x10e9   :  { %4521 = vmatpush.msrb.mxu3 %v10080_v22 }
0x10ea   :  { %4390 = vmatpush.msrb.mxu1 %v10069_v13 }
0x10eb   :  { %6650 = vmatmul.msk.f32.gmra.mxu1 %vm2057_vm6, %v9921_v35  ;;  %4522 = vmatpush.msrb.mxu3 %v10085_v31  ;;  %v11408_v35 = vld [vmem:[#allocation74_spill] sm:$0xff] }
0x10ec   :  { %4391 = vmatpush.msrb.mxu1 %v10076_v32  ;;  %v4187_v10 = vmul.f32 %v10116_v0, %v11408_v35  ;;  %v4291_v0 = vpop.f32.mrf.mxu0 }
0x10ed   :  { %4523 = vmatpush.msrb.mxu3 %v10090_v9 }
0x10ee   :  { %4392 = vmatpush.msrb.mxu1 %v10083_v40 }
0x10ef   :  { %4524 = vmatpush.msrb.mxu3 %v10094_v18 }
0x10f0   :  { %4611 = vmatpush.msra.mxu1 %v10050_v46 }
0x10f1   :  { %4525 = vmatpush.msrb.mxu3 %v10098_v6 }
0x10f2   :  { %4612 = vmatpush.msra.mxu1 %v10053_v15 }
0x10f3   :  { %4744 = vmatpush.msra.mxu3 %v10061_v58 }
0x10f4   :  { %4613 = vmatpush.msra.mxu1 %v10056_v7 }
0x10f5   :  { %4745 = vmatpush.msra.mxu3 %v10067_v4 }
0x10f6   :  { %4614 = vmatpush.msra.mxu1 %v10059_v3 }
0x10f7   :  { %4746 = vmatpush.msra.mxu3 %v10074_v17 }
0x10f8   :  { %4615 = vmatpush.msra.mxu1 %v10063_v14 }
0x10f9   :  { %4747 = vmatpush.msra.mxu3 %v10080_v22 }
0x10fa   :  { %4616 = vmatpush.msra.mxu1 %v10069_v13 }
0x10fb   :  { %4748 = vmatpush.msra.mxu3 %v10085_v31 }
0x10fc   :  { %4617 = vmatpush.msra.mxu1 %v10076_v32 }
0x10fd   :  { %4749 = vmatpush.msra.mxu3 %v10090_v9 }
0x10fe   :  { %4618 = vmatpush.msra.mxu1 %v10083_v40 }
0x10ff   :  { %4750 = vmatpush.msra.mxu3 %v10094_v18 }
0x1101   :  { %4751 = vmatpush.msra.mxu3 %v10098_v6 }
0x1155   :  { %v4212_v20 = vpop.f32.mrf.mxu3 }
0x1156   :  { %v4241_v26 = vadd.f32 %v4212_v20, %v4187_v10 }
0x1158   :  { %v10193_v36 = vadd.f32 %v4247_v42, %v4241_v26  ;;  %v10195_v11 = vpop.f32.mrf.mxu1 }
0x115a   :  { %v4314_v48 = vadd.f32 %v4291_v0, %v10193_v36 }
0x115c   :  { %v6651_v55 = vmul.f32 -1.442695, %v4314_v48 }
0x115d   :  { %v4215_v39 = vpop.f32.mrf.mxu3 }
0x115e   :  { %v4243_v56 = vadd.f32 %v4215_v39, %v4189_v62 }
0x1160   :  { %v10201_v53 = vadd.f32 %v4247_v42, %v4243_v56  ;;  %v4235_v30 = vpop.f32.mrf.mxu1 }
0x1161   :  { %v4242_v60 = vadd.f32 %v4235_v30, %v4188_v50 }
0x1163   :  { %v10203_v45 = vadd.f32 %v4248_v34, %v4242_v60 }
0x1165   :  { %v4311_v63 = vpop.f32.mrf.mxu3 }
0x1166   :  { %v4315_v59 = vadd.f32 %v4311_v63, %v10203_v45 }
0x1168   :  { %7058 = vtanh.f32 %v4315_v59  ;;  %v4238_v61 = vpop.f32.mrf.mxu1 }
0x1169   :  { %v4244_v1 = vadd.f32 %v4238_v61, %v4190_v28  ;;  %7060 = vpow2.f32 %v6651_v55  ;;  %v6652_v28 = vmul.f32 -1.442695, %v4315_v59 }
0x116b   :  { %v10208_v37 = vadd.f32 %v4248_v34, %v4244_v1 }
0x116e   :  { %v7059_v38 = vpop.eup %7058 }
0x116f   :  { %4357 = vrot.lane.b32.xlu2 %v7059_v38, %s11399_s2  ;;  %v7061_v33 = vpop.eup %7060 }
0x1170   :  { %v4322_v35 = vadd.f32 1.0, %v7061_v33 }
0x1172   :  { %7062 = vrcp.f32 %v4322_v35  ;;  %v4335_v5 = vand.u32 2147483648, %v4322_v35  ;;  %vm4329_vm3 = vweird.f32 %v4322_v35  ;;  %v4333_v62 = vand.u32 2147483647, %v4322_v35 }
0x1174   :  { %v4336_v56 = vor.u32 1.1754944e-38, %v4335_v5  ;;  %vm4334_vm7 = vcmp.eq.f32.partialorder %v4333_v62, 8.507059e+37 }
0x1178   :  { %v7063_v10 = vpop.eup %7062 }
0x1179   :  { %v4325_v42 = vmul.f32 %v7063_v10, %v4322_v35  ;;  %vm4330_vm14 = vweird.f32 %v7063_v10 }
0x117a   :  { %vm4331_vm4 = vmor %vm4329_vm3, %vm4330_vm14 }
0x117b   :  { %v4326_v20 = vsub.f32 1.0, %v4325_v42 }
0x117d   :  { %v4327_v23 = vmul.f32 %v7063_v10, %v4326_v20 }
0x117f   :  { %v4328_v26 = vadd.f32 %v7063_v10, %v4327_v23 }
0x1181   :  { %v4332_v39 = vsel %vm4331_vm4, %v7063_v10, %v4328_v26 }
0x1182   :  { %v4337_v51 = vsel %vm4334_vm7, %v4336_v56, %v4332_v39 }
0x1183   :  { %v4355_v30 = vmul.f32 0.0, %v4337_v51 }
0x11c9   :  { %v4358_v50 = vpop.permute.xlu2 %4357 }
0x11ca   :  { %v4360_v34 = vmul.f32 %v4358_v50, %v4337_v51 }
0x11cc   :  { %4362 = vrot.lane.b32.xlu0 %v4360_v34, %s11399_s2 }
0x123e   :  { %v4363_v60 = vpop.permute.xlu0 %4362 }
0x123f   :  { %v10213_v63 = vadd.f32 %v4363_v60, %v4355_v30 }
0x1241   :  { %7064 = vtanh.f32 %v10213_v63 }
0x1242   :  { %7066 = vpow2.f32 %v6652_v28 }
0x1247   :  { %v7065_v24 = vpop.eup %7064 }
0x1248   :  { %4368 = vrot.lane.b32.xlu1 %v7065_v24, %s11399_s2  ;;  %v7067_v61 = vpop.eup %7066 }
0x1249   :  { %v4323_v1 = vadd.f32 1.0, %v7067_v61 }
0x124b   :  { %7068 = vrcp.f32 %v4323_v1  ;;  %v4350_v35 = vand.u32 2147483648, %v4323_v1  ;;  %vm4344_vm9 = vweird.f32 %v4323_v1  ;;  %v4348_v10 = vand.u32 2147483647, %v4323_v1 }
0x124d   :  { %v4351_v20 = vor.u32 1.1754944e-38, %v4350_v35  ;;  %vm4349_vm11 = vcmp.eq.f32.partialorder %v4348_v10, 8.507059e+37 }
0x1251   :  { %v7069_v38 = vpop.eup %7068 }
0x1252   :  { %v4340_v0 = vmul.f32 %v7069_v38, %v4323_v1  ;;  %vm4345_vm8 = vweird.f32 %v7069_v38 }
0x1253   :  { %vm4346_vm10 = vmor %vm4344_vm9, %vm4345_vm8 }
0x1254   :  { %v4341_v48 = vsub.f32 1.0, %v4340_v0 }
0x1256   :  { %v4342_v55 = vmul.f32 %v7069_v38, %v4341_v48 }
0x1258   :  { %v4343_v33 = vadd.f32 %v7069_v38, %v4342_v55 }
0x125a   :  { %v4347_v42 = vsel %vm4346_vm10, %v7069_v38, %v4343_v33 }
0x125b   :  { %v4352_v59 = vsel %vm4349_vm11, %v4351_v20, %v4347_v42 }
0x12ba   :  { %v4369_v23 = vpop.permute.xlu1 %4368 }
0x12bb   :  { %v4371_v26 = vmul.f32 %v4369_v23, %v4352_v59  ;;  %v4465_v23 = vrot.slane %v10213_v63, 6 }
0x12bd   :  { %4373 = vst.msk [vmem:[#allocation4] sm:$0x3] %vm4372_vm12, %v4371_v26  ;;  %6653 = vmatmul.msk.f32.vlgmr.msrb.gmra.mxu1 %vm3939_vm0, %v4371_v26  ;;  %6654 = vmatmul.msk.f32.vlgmr.msra.gmra.mxu2 %vm3939_vm0, %v4371_v26 }
0x12be   :  { %4829 = vmatpush.msrb.mxu1 %v10050_v46  ;;  %4849 = vmatpush.msra.mxu2 %v10061_v58 }
0x12c0   :  { %4830 = vmatpush.msrb.mxu1 %v10053_v15  ;;  %4850 = vmatpush.msra.mxu2 %v10067_v4 }
0x12c2   :  { %4831 = vmatpush.msrb.mxu1 %v10056_v7  ;;  %4851 = vmatpush.msra.mxu2 %v10074_v17 }
0x12c4   :  { %4832 = vmatpush.msrb.mxu1 %v10059_v3  ;;  %4852 = vmatpush.msra.mxu2 %v10080_v22 }
0x12c6   :  { %4833 = vmatpush.msrb.mxu1 %v10063_v14  ;;  %4853 = vmatpush.msra.mxu2 %v10085_v31 }
0x12c8   :  { %4834 = vmatpush.msrb.mxu1 %v10069_v13  ;;  %4854 = vmatpush.msra.mxu2 %v10090_v9 }
0x12ca   :  { %4835 = vmatpush.msrb.mxu1 %v10076_v32  ;;  %4855 = vmatpush.msra.mxu2 %v10094_v18 }
0x12cc   :  { %4836 = vmatpush.msrb.mxu1 %v10083_v40  ;;  %4856 = vmatpush.msra.mxu2 %v10098_v6 }
0x133a   :  { %v4394_v51 = vpop.f32.mrf.mxu1 }
0x133b   :  { %v4419_v50 = vrot.slane %v4394_v51, 6 }
0x133d   :  { %v4423_v34 = vadd.f32 %v4419_v50, %v10193_v36 }
0x133f   :  { %v6655_v30 = vmul.f32 -1.442695, %v4423_v34 }
0x1340   :  { %v4414_v5 = vpop.f32.mrf.mxu2 }
0x1341   :  { %v4420_v62 = vrot.slane %v4414_v5, 6 }
0x1343   :  { %v4424_v39 = vadd.f32 %v4420_v62, %v10203_v45 }
0x1345   :  { %7070 = vtanh.f32 %v4424_v39 }
0x1346   :  { %7072 = vpow2.f32 %v6655_v30 }
0x134b   :  { %v7071_v56 = vpop.eup %7070 }
0x134c   :  { %4469 = vrot.lane.b32.xlu2 %v7071_v56, %s11399_s2  ;;  %v7073_v60 = vpop.eup %7072  ;;  %v6656_v56 = vmul.f32 -1.442695, %v4424_v39 }
0x134d   :  { %v4431_v24 = vadd.f32 1.0, %v7073_v60 }
0x134f   :  { %7074 = vrcp.f32 %v4431_v24  ;;  %v4444_v48 = vand.u32 2147483648, %v4431_v24  ;;  %vm4438_vm3 = vweird.f32 %v4431_v24  ;;  %v4442_v55 = vand.u32 2147483647, %v4431_v24 }
0x1351   :  { %v4445_v35 = vor.u32 1.1754944e-38, %v4444_v48  ;;  %vm4443_vm7 = vcmp.eq.f32.partialorder %v4442_v55, 8.507059e+37 }
0x1355   :  { %v7075_v28 = vpop.eup %7074 }
0x1356   :  { %v4434_v61 = vmul.f32 %v7075_v28, %v4431_v24  ;;  %vm4439_vm14 = vweird.f32 %v7075_v28 }
0x1357   :  { %vm4440_vm4 = vmor %vm4438_vm3, %vm4439_vm14  ;;  %vm4484_vm14 = vcmask 519170  }
0x1358   :  { %v4435_v1 = vsub.f32 1.0, %v4434_v61 }
0x135a   :  { %v4436_v38 = vmul.f32 %v7075_v28, %v4435_v1 }
0x135c   :  { %v4437_v0 = vadd.f32 %v7075_v28, %v4436_v38 }
0x135e   :  { %v4441_v33 = vsel %vm4440_vm4, %v7075_v28, %v4437_v0 }
0x135f   :  { %v4446_v42 = vsel %vm4443_vm7, %v4445_v35, %v4441_v33 }
0x1360   :  { %v4467_v59 = vmul.f32 %v4465_v23, %v4446_v42 }
0x13a6   :  { %v4470_v10 = vpop.permute.xlu2 %4469 }
0x13a7   :  { %v4472_v20 = vmul.f32 %v4470_v10, %v4446_v42 }
0x13a9   :  { %4474 = vrot.lane.b32.xlu1 %v4472_v20, %s11399_s2 }
0x141b   :  { %v4475_v26 = vpop.permute.xlu1 %4474 }
0x141c   :  { %v10241_v5 = vadd.f32 %v4475_v26, %v4467_v59 }
0x141e   :  { %7076 = vtanh.f32 %v10241_v5 }
0x141f   :  { %7078 = vpow2.f32 %v6656_v56 }
0x1424   :  { %v7077_v62 = vpop.eup %7076 }
0x1425   :  { %4480 = vrot.lane.b32.xlu2 %v7077_v62, %s11399_s2  ;;  %v7079_v51 = vpop.eup %7078 }
0x1426   :  { %v4432_v50 = vadd.f32 1.0, %v7079_v51 }
0x1428   :  { %7080 = vrcp.f32 %v4432_v50  ;;  %v4459_v63 = vand.u32 2147483648, %v4432_v50  ;;  %vm4453_vm9 = vweird.f32 %v4432_v50  ;;  %v4457_v61 = vand.u32 2147483647, %v4432_v50 }
0x142a   :  { %v4460_v38 = vor.u32 1.1754944e-38, %v4459_v63  ;;  %vm4458_vm11 = vcmp.eq.f32.partialorder %v4457_v61, 8.507059e+37 }
0x142e   :  { %v7081_v34 = vpop.eup %7080 }
0x142f   :  { %v4449_v30 = vmul.f32 %v7081_v34, %v4432_v50  ;;  %vm4454_vm8 = vweird.f32 %v7081_v34 }
0x1430   :  { %vm4455_vm10 = vmor %vm4453_vm9, %vm4454_vm8 }
0x1431   :  { %v4450_v60 = vsub.f32 1.0, %v4449_v30 }
0x1433   :  { %v4451_v24 = vmul.f32 %v7081_v34, %v4450_v60 }
0x1435   :  { %v4452_v28 = vadd.f32 %v7081_v34, %v4451_v24 }
0x1437   :  { %v4456_v1 = vsel %vm4455_vm10, %v7081_v34, %v4452_v28 }
0x1438   :  { %v4461_v0 = vsel %vm4458_vm11, %v4460_v38, %v4456_v1 }
0x147f   :  { %v4481_v39 = vpop.permute.xlu2 %4480 }
0x1480   :  { %v4483_v48 = vmul.f32 %v4481_v39, %v4461_v0  ;;  %v4578_v39 = vrot.slane %v10241_v5, 6 }
0x1482   :  { %4485 = vst.msk [vmem:[#allocation4] sm:$0xc] %vm4484_vm14, %v4483_v48  ;;  %v4487_v55 = vrot.slane %v4483_v48, 2 }
0x1484   :  { %6657 = vmatmul.msk.f32.vlgmr.msra.gmra.mxu0 %vm3939_vm0, %v4487_v55  ;;  %6658 = vmatmul.msk.f32.vlgmr.msrb.gmra.mxu3 %vm3939_vm0, %v4487_v55 }
0x1485   :  { %4941 = vmatpush.msra.mxu0 %v10050_v46  ;;  %4961 = vmatpush.msrb.mxu3 %v10061_v58 }
0x1487   :  { %4942 = vmatpush.msra.mxu0 %v10053_v15  ;;  %4962 = vmatpush.msrb.mxu3 %v10067_v4 }
0x1489   :  { %4943 = vmatpush.msra.mxu0 %v10056_v7  ;;  %4963 = vmatpush.msrb.mxu3 %v10074_v17 }
0x148b   :  { %4944 = vmatpush.msra.mxu0 %v10059_v3  ;;  %4964 = vmatpush.msrb.mxu3 %v10080_v22 }
0x148d   :  { %4945 = vmatpush.msra.mxu0 %v10063_v14  ;;  %4965 = vmatpush.msrb.mxu3 %v10085_v31 }
0x148f   :  { %4946 = vmatpush.msra.mxu0 %v10069_v13  ;;  %4966 = vmatpush.msrb.mxu3 %v10090_v9 }
0x1491   :  { %4947 = vmatpush.msra.mxu0 %v10076_v32  ;;  %4967 = vmatpush.msrb.mxu3 %v10094_v18 }
0x1493   :  { %4948 = vmatpush.msra.mxu0 %v10083_v40  ;;  %4968 = vmatpush.msrb.mxu3 %v10098_v6 }
0x1501   :  { %v4507_v20 = vpop.f32.mrf.mxu0 }
0x1502   :  { %v4532_v23 = vrot.slane %v4507_v20, 4 }
0x1504   :  { %v4536_v59 = vadd.f32 %v4532_v23, %v10193_v36 }
0x1506   :  { %v6659_v26 = vmul.f32 -1.442695, %v4536_v59 }
0x1507   :  { %v4527_v33 = vpop.f32.mrf.mxu3 }
0x1508   :  { %v4533_v35 = vrot.slane %v4527_v33, 4 }
0x150a   :  { %v4537_v10 = vadd.f32 %v4533_v35, %v10203_v45 }
0x150c   :  { %7082 = vtanh.f32 %v4537_v10 }
0x150d   :  { %7084 = vpow2.f32 %v6659_v26 }
0x1512   :  { %v7083_v42 = vpop.eup %7082 }
0x1513   :  { %4582 = vrot.lane.b32.xlu1 %v7083_v42, %s11399_s2  ;;  %v7085_v62 = vpop.eup %7084  ;;  %v6660_v42 = vmul.f32 -1.442695, %v4537_v10 }
0x1514   :  { %v4544_v56 = vadd.f32 1.0, %v7085_v62 }
0x1516   :  { %7086 = vrcp.f32 %v4544_v56  ;;  %v4557_v24 = vand.u32 2147483648, %v4544_v56  ;;  %vm4551_vm4 = vweird.f32 %v4544_v56  ;;  %v4555_v28 = vand.u32 2147483647, %v4544_v56 }
0x1518   :  { %v4558_v61 = vor.u32 1.1754944e-38, %v4557_v24  ;;  %vm4556_vm8 = vcmp.eq.f32.partialorder %v4555_v28, 8.507059e+37 }
0x151c   :  { %v7087_v51 = vpop.eup %7086 }
0x151d   :  { %v4547_v50 = vmul.f32 %v7087_v51, %v4544_v56  ;;  %vm4552_vm3 = vweird.f32 %v7087_v51 }
0x151e   :  { %vm4553_vm7 = vmor %vm4551_vm4, %vm4552_vm3  ;;  %vm4597_vm4 = vcmask 521220  }
0x151f   :  { %v4548_v34 = vsub.f32 1.0, %v4547_v50 }
0x1521   :  { %v4549_v30 = vmul.f32 %v7087_v51, %v4548_v34 }
0x1523   :  { %v4550_v60 = vadd.f32 %v7087_v51, %v4549_v30 }
0x1525   :  { %v4554_v63 = vsel %vm4553_vm7, %v7087_v51, %v4550_v60 }
0x1526   :  { %v4559_v38 = vsel %vm4556_vm8, %v4558_v61, %v4554_v63 }
0x1527   :  { %v4580_v48 = vmul.f32 %v4578_v39, %v4559_v38 }
0x1585   :  { %v4583_v1 = vpop.permute.xlu1 %4582 }
0x1586   :  { %v4585_v0 = vmul.f32 %v4583_v1, %v4559_v38 }
0x1588   :  { %4587 = vrot.lane.b32.xlu0 %v4585_v0, %s11399_s2 }
0x15fa   :  { %v4588_v55 = vpop.permute.xlu0 %4587 }
0x15fb   :  { %v10269_v33 = vadd.f32 %v4588_v55, %v4580_v48 }
0x15fd   :  { %7088 = vtanh.f32 %v10269_v33  ;;  %v4691_v0 = vrot.slane %v10269_v33, 6 }
0x15fe   :  { %7090 = vpow2.f32 %v6660_v42 }
0x1603   :  { %v7089_v35 = vpop.eup %7088 }
0x1604   :  { %4593 = vrot.lane.b32.xlu2 %v7089_v35, %s11399_s2  ;;  %v7091_v20 = vpop.eup %7090 }
0x1605   :  { %v4545_v23 = vadd.f32 1.0, %v7091_v20 }
0x1607   :  { %7092 = vrcp.f32 %v4545_v23  ;;  %v4572_v5 = vand.u32 2147483648, %v4545_v23  ;;  %vm4566_vm10 = vweird.f32 %v4545_v23  ;;  %v4570_v50 = vand.u32 2147483647, %v4545_v23 }
0x1609   :  { %v4573_v30 = vor.u32 1.1754944e-38, %v4572_v5  ;;  %vm4571_vm3 = vcmp.eq.f32.partialorder %v4570_v50, 8.507059e+37 }
0x160d   :  { %v7093_v59 = vpop.eup %7092 }
0x160e   :  { %v4562_v26 = vmul.f32 %v7093_v59, %v4545_v23  ;;  %vm4567_vm9 = vweird.f32 %v7093_v59 }
0x160f   :  { %vm4568_vm11 = vmor %vm4566_vm10, %vm4567_vm9 }
0x1610   :  { %v4563_v62 = vsub.f32 1.0, %v4562_v26 }
0x1612   :  { %v4564_v56 = vmul.f32 %v7093_v59, %v4563_v62 }
0x1614   :  { %v4565_v51 = vadd.f32 %v7093_v59, %v4564_v56 }
0x1616   :  { %v4569_v34 = vsel %vm4568_vm11, %v7093_v59, %v4565_v51 }
0x1617   :  { %v4574_v60 = vsel %vm4571_vm3, %v4573_v30, %v4569_v34 }
0x165e   :  { %v4594_v10 = vpop.permute.xlu2 %4593 }
0x165f   :  { %v4596_v24 = vmul.f32 %v4594_v10, %v4574_v60 }
0x1661   :  { %4598 = vst.msk [vmem:[#allocation4] sm:$0x30] %vm4597_vm4, %v4596_v24  ;;  %v4600_v28 = vrot.slane %v4596_v24, 4 }
0x1663   :  { %6661 = vmatmul.msk.f32.vlgmr.msra.gmra.mxu1 %vm3939_vm0, %v4600_v28  ;;  %6662 = vmatmul.msk.f32.vlgmr.msrb.gmra.mxu2 %vm3939_vm0, %v4600_v28 }
0x1664   :  { %5053 = vmatpush.msra.mxu1 %v10050_v46  ;;  %5073 = vmatpush.msrb.mxu2 %v10061_v58 }
0x1666   :  { %5054 = vmatpush.msra.mxu1 %v10053_v15  ;;  %5074 = vmatpush.msrb.mxu2 %v10067_v4 }
0x1668   :  { %5055 = vmatpush.msra.mxu1 %v10056_v7  ;;  %5075 = vmatpush.msrb.mxu2 %v10074_v17 }
0x166a   :  { %5056 = vmatpush.msra.mxu1 %v10059_v3  ;;  %5076 = vmatpush.msrb.mxu2 %v10080_v22 }
0x166c   :  { %5057 = vmatpush.msra.mxu1 %v10063_v14  ;;  %5077 = vmatpush.msrb.mxu2 %v10085_v31 }
0x166e   :  { %5058 = vmatpush.msra.mxu1 %v10069_v13  ;;  %5078 = vmatpush.msrb.mxu2 %v10090_v9 }
0x1670   :  { %5059 = vmatpush.msra.mxu1 %v10076_v32  ;;  %5079 = vmatpush.msrb.mxu2 %v10094_v18 }
0x1672   :  { %5060 = vmatpush.msra.mxu1 %v10083_v40  ;;  %5080 = vmatpush.msrb.mxu2 %v10098_v6 }
0x16e0   :  { %v4620_v58 = vpop.f32.mrf.mxu1 }
0x16e1   :  { %v4645_v14 = vrot.slane %v4620_v58, 2 }
0x16e3   :  { %v4649_v4 = vadd.f32 %v4645_v14, %v10193_v36 }
0x16e5   :  { %v6663_v13 = vmul.f32 -1.442695, %v4649_v4 }
0x16e6   :  { %v4640_v46 = vpop.f32.mrf.mxu2 }
0x16e7   :  { %v4646_v15 = vrot.slane %v4640_v46, 2 }
0x16e9   :  { %v4650_v7 = vadd.f32 %v4646_v15, %v10203_v45 }
0x16eb   :  { %7094 = vtanh.f32 %v4650_v7  ;;  %v6664_v42 = vmul.f32 -1.442695, %v4650_v7 }
0x16ec   :  { %7096 = vpow2.f32 %v6663_v13 }
0x16f1   :  { %v7095_v3 = vpop.eup %7094 }
0x16f2   :  { %4695 = vrot.lane.b32.xlu1 %v7095_v3, %s11399_s2  ;;  %v7097_v17 = vpop.eup %7096 }
0x16f3   :  { %v4657_v32 = vadd.f32 1.0, %v7097_v17 }
0x16f5   :  { %7098 = vrcp.f32 %v4657_v32  ;;  %v4670_v6 = vand.u32 2147483648, %v4657_v32  ;;  %vm4664_vm8 = vweird.f32 %v4657_v32  ;;  %v4668_v45 = vand.u32 2147483647, %v4657_v32 }
0x16f7   :  { %v4671_v61 = vor.u32 1.1754944e-38, %v4670_v6  ;;  %vm4669_vm10 = vcmp.eq.f32.partialorder %v4668_v45, 8.507059e+37 }
0x16fb   :  { %v7099_v22 = vpop.eup %7098 }
0x16fc   :  { %v4660_v40 = vmul.f32 %v7099_v22, %v4657_v32  ;;  %vm4665_vm7 = vweird.f32 %v7099_v22 }
0x16fd   :  { %vm4666_vm9 = vmor %vm4664_vm8, %vm4665_vm7 }
0x16fe   :  { %v4661_v31 = vsub.f32 1.0, %v4660_v40 }
0x1700   :  { %v4662_v9 = vmul.f32 %v7099_v22, %v4661_v31 }
0x1702   :  { %v4663_v18 = vadd.f32 %v7099_v22, %v4662_v9 }
0x1704   :  { %v4667_v63 = vsel %vm4666_vm9, %v7099_v22, %v4663_v18  ;;  %vm4710_vm9 = vcmask 523270  }
0x1705   :  { %v4672_v36 = vsel %vm4669_vm10, %v4671_v61, %v4667_v63 }
0x1706   :  { %v4693_v39 = vmul.f32 %v4691_v0, %v4672_v36 }
0x1764   :  { %v4696_v1 = vpop.permute.xlu1 %4695 }
0x1765   :  { %v4698_v38 = vmul.f32 %v4696_v1, %v4672_v36 }
0x1767   :  { %4700 = vrot.lane.b32.xlu0 %v4698_v38, %s11399_s2 }
0x17d9   :  { %v4701_v48 = vpop.permute.xlu0 %4700 }
0x17da   :  { %v4703_v55 = vadd.f32 %v4701_v48, %v4693_v39 }
0x17dc   :  { %7100 = vtanh.f32 %v4703_v55  ;;  %v4798_v1 = vrot.slane %v4703_v55, 6 }
0x17dd   :  { %7102 = vpow2.f32 %v6664_v42 }
0x17e2   :  { %v7101_v35 = vpop.eup %7100 }
0x17e3   :  { %4706 = vrot.lane.b32.xlu2 %v7101_v35, %s11399_s2  ;;  %v7103_v20 = vpop.eup %7102 }
0x17e4   :  { %v4658_v23 = vadd.f32 1.0, %v7103_v20 }
0x17e6   :  { %7104 = vrcp.f32 %v4658_v23  ;;  %v4685_v5 = vand.u32 2147483648, %v4658_v23  ;;  %vm4679_vm3 = vweird.f32 %v4658_v23  ;;  %v4683_v33 = vand.u32 2147483647, %v4658_v23 }
0x17e8   :  { %v4686_v34 = vor.u32 1.1754944e-38, %v4685_v5  ;;  %vm4684_vm8 = vcmp.eq.f32.partialorder %v4683_v33, 8.507059e+37 }
0x17ec   :  { %v7105_v59 = vpop.eup %7104 }
0x17ed   :  { %v4675_v26 = vmul.f32 %v7105_v59, %v4658_v23  ;;  %vm4680_vm11 = vweird.f32 %v7105_v59 }
0x17ee   :  { %vm4681_vm7 = vmor %vm4679_vm3, %vm4680_vm11 }
0x17ef   :  { %v4676_v62 = vsub.f32 1.0, %v4675_v26 }
0x17f1   :  { %v4677_v56 = vmul.f32 %v7105_v59, %v4676_v62 }
0x17f3   :  { %v4678_v51 = vadd.f32 %v7105_v59, %v4677_v56 }
0x17f5   :  { %v4682_v50 = vsel %vm4681_vm7, %v7105_v59, %v4678_v51 }
0x17f6   :  { %v4687_v30 = vsel %vm4684_vm8, %v4686_v34, %v4682_v50 }
0x183d   :  { %v4707_v60 = vpop.permute.xlu2 %4706 }
0x183e   :  { %v4709_v10 = vmul.f32 %v4707_v60, %v4687_v30 }
0x1840   :  { %4711 = vst.msk [vmem:[#allocation4] sm:$0xc0] %vm4710_vm9, %v4709_v10  ;;  %v4713_v24 = vrot.slane %v4709_v10, 6 }
0x1842   :  { %6665 = vmatmul.msk.f32.vlgmr.msrb.gmra.mxu0 %vm3939_vm0, %v4713_v24  ;;  %6666 = vmatmul.msk.f32.vlgmr.msra.gmra.mxu3 %vm3939_vm0, %v4713_v24 }
0x18bf   :  { %v4733_v7 = vpop.f32.mrf.mxu0 }
0x18c0   :  { %v4756_v3 = vadd.f32 %v4733_v7, %v10201_v53 }
0x18c2   :  { %v6667_v58 = vmul.f32 -1.442695, %v4756_v3 }
0x18c5   :  { %v4753_v28 = vpop.f32.mrf.mxu3 }
0x18c6   :  { %v4757_v46 = vadd.f32 %v4753_v28, %v10208_v37 }
0x18c8   :  { %7106 = vtanh.f32 %v4757_v46  ;;  %v6668_v48 = vmul.f32 -1.442695, %v4757_v46 }
0x18c9   :  { %7108 = vpow2.f32 %v6667_v58 }
0x18ce   :  { %v7107_v15 = vpop.eup %7106 }
0x18cf   :  { %4802 = vrot.lane.b32.xlu1 %v7107_v15, %s11399_s2  ;;  %v7109_v14 = vpop.eup %7108 }
0x18d0   :  { %v4764_v4 = vadd.f32 1.0, %v7109_v14 }
0x18d2   :  { %7110 = vrcp.f32 %v4764_v4  ;;  %v4777_v31 = vand.u32 2147483648, %v4764_v4  ;;  %vm4771_vm11 = vweird.f32 %v4764_v4  ;;  %v4775_v9 = vand.u32 2147483647, %v4764_v4 }
0x18d4   :  { %v4778_v6 = vor.u32 1.1754944e-38, %v4777_v31  ;;  %vm4776_vm7 = vcmp.eq.f32.partialorder %v4775_v9, 8.507059e+37 }
0x18d8   :  { %v7111_v13 = vpop.eup %7110 }
0x18d9   :  { %v4767_v17 = vmul.f32 %v7111_v13, %v4764_v4  ;;  %vm4772_vm10 = vweird.f32 %v7111_v13 }
0x18da   :  { %vm4773_vm3 = vmor %vm4771_vm11, %vm4772_vm10 }
0x18db   :  { %v4768_v32 = vsub.f32 1.0, %v4767_v17 }
0x18dd   :  { %v4769_v22 = vmul.f32 %v7111_v13, %v4768_v32 }
0x18df   :  { %v4770_v40 = vadd.f32 %v7111_v13, %v4769_v22 }
0x18e1   :  { %v4774_v18 = vsel %vm4773_vm3, %v7111_v13, %v4770_v40 }
0x18e2   :  { %v4779_v45 = vsel %vm4776_vm7, %v4778_v6, %v4774_v18 }
0x18e3   :  { %v4800_v36 = vmul.f32 %v4798_v1, %v4779_v45 }
0x1941   :  { %v4803_v63 = vpop.permute.xlu1 %4802 }
0x1942   :  { %v4805_v61 = vmul.f32 %v4803_v63, %v4779_v45 }
0x1944   :  { %4807 = vrot.lane.b32.xlu0 %v4805_v61, %s11399_s2 }
0x19b6   :  { %v4808_v38 = vpop.permute.xlu0 %4807 }
0x19b7   :  { %v4810_v0 = vadd.f32 %v4808_v38, %v4800_v36 }
0x19b9   :  { %7112 = vtanh.f32 %v4810_v0  ;;  %v4909_v63 = vrot.slane %v4810_v0, 6 }
0x19ba   :  { %7114 = vpow2.f32 %v6668_v48 }
0x19bf   :  { %v7113_v39 = vpop.eup %7112 }
0x19c0   :  { %4813 = vrot.lane.b32.xlu2 %v7113_v39, %s11399_s2  ;;  %v7115_v35 = vpop.eup %7114 }
0x19c1   :  { %v4765_v42 = vadd.f32 1.0, %v7115_v35 }
0x19c3   :  { %7116 = vrcp.f32 %v4765_v42  ;;  %v4792_v56 = vand.u32 2147483648, %v4765_v42  ;;  %vm4786_vm10 = vweird.f32 %v4765_v42  ;;  %v4790_v55 = vand.u32 2147483647, %v4765_v42 }
0x19c5   :  { %v4793_v5 = vor.u32 1.1754944e-38, %v4792_v56  ;;  %vm4791_vm3 = vcmp.eq.f32.partialorder %v4790_v55, 8.507059e+37 }
0x19c9   :  { %v7117_v20 = vpop.eup %7116 }
0x19ca   :  { %v4782_v23 = vmul.f32 %v7117_v20, %v4765_v42  ;;  %vm4787_vm8 = vweird.f32 %v7117_v20 }
0x19cb   :  { %vm4788_vm11 = vmor %vm4786_vm10, %vm4787_vm8 }
0x19cc   :  { %v4783_v59 = vsub.f32 1.0, %v4782_v23 }
0x19ce   :  { %v4784_v26 = vmul.f32 %v7117_v20, %v4783_v59 }
0x19d0   :  { %v4785_v62 = vadd.f32 %v7117_v20, %v4784_v26 }
0x19d2   :  { %v4789_v51 = vsel %vm4788_vm11, %v7117_v20, %v4785_v62 }
0x19d3   :  { %v4794_v50 = vsel %vm4791_vm3, %v4793_v5, %v4789_v51 }
0x1a1a   :  { %v4814_v33 = vpop.permute.xlu2 %4813 }
0x1a1b   :  { %v4816_v34 = vmul.f32 %v4814_v33, %v4794_v50 }
0x1a1d   :  { %4817 = vst.msk [vmem:[#allocation4 + $0x8] sm:$0x3] %vm4372_vm12, %v4816_v34  ;;  %6669 = vmatmul.msk.f32.vlgmr.msrb.gmra.mxu1 %vm3939_vm0, %v4816_v34  ;;  %6670 = vmatmul.msk.f32.vlgmr.msra.gmra.mxu2 %vm3939_vm0, %v4816_v34 }
0x1a9a   :  { %v4838_v28 = vpop.f32.mrf.mxu1 }
0x1a9b   :  { %v4863_v46 = vrot.slane %v4838_v28, 6 }
0x1a9d   :  { %v4867_v15 = vadd.f32 %v4863_v46, %v10201_v53 }
0x1a9f   :  { %v6671_v7 = vmul.f32 -1.442695, %v4867_v15 }
0x1aa0   :  { %v4858_v30 = vpop.f32.mrf.mxu2 }
0x1aa1   :  { %v4864_v60 = vrot.slane %v4858_v30, 6 }
0x1aa3   :  { %v4868_v10 = vadd.f32 %v4864_v60, %v10208_v37 }
0x1aa5   :  { %7118 = vtanh.f32 %v4868_v10  ;;  %v6672_v39 = vmul.f32 -1.442695, %v4868_v10 }
0x1aa6   :  { %7120 = vpow2.f32 %v6671_v7 }
0x1aab   :  { %v7119_v24 = vpop.eup %7118 }
0x1aac   :  { %4913 = vrot.lane.b32.xlu1 %v7119_v24, %s11399_s2  ;;  %v7121_v3 = vpop.eup %7120 }
0x1aad   :  { %v4875_v58 = vadd.f32 1.0, %v7121_v3 }
0x1aaf   :  { %7122 = vrcp.f32 %v4875_v58  ;;  %v4888_v22 = vand.u32 2147483648, %v4875_v58  ;;  %vm4882_vm8 = vweird.f32 %v4875_v58  ;;  %v4886_v40 = vand.u32 2147483647, %v4875_v58 }
0x1ab1   :  { %v4889_v9 = vor.u32 1.1754944e-38, %v4888_v22  ;;  %vm4887_vm11 = vcmp.eq.f32.partialorder %v4886_v40, 8.507059e+37 }
0x1ab5   :  { %v7123_v14 = vpop.eup %7122 }
0x1ab6   :  { %v4878_v4 = vmul.f32 %v7123_v14, %v4875_v58  ;;  %vm4883_vm7 = vweird.f32 %v7123_v14 }
0x1ab7   :  { %vm4884_vm10 = vmor %vm4882_vm8, %vm4883_vm7 }
0x1ab8   :  { %v4879_v13 = vsub.f32 1.0, %v4878_v4 }
0x1aba   :  { %v4880_v17 = vmul.f32 %v7123_v14, %v4879_v13 }
0x1abc   :  { %v4881_v32 = vadd.f32 %v7123_v14, %v4880_v17 }
0x1abe   :  { %v4885_v31 = vsel %vm4884_vm10, %v7123_v14, %v4881_v32 }
0x1abf   :  { %v4890_v6 = vsel %vm4887_vm11, %v4889_v9, %v4885_v31 }
0x1ac0   :  { %v4911_v61 = vmul.f32 %v4909_v63, %v4890_v6  ;;  %v5193_v63 = vld [vmem:[#allocation20 + $0x78] sm:$0xff] }
0x1ac1   :  { %5299 = vmatpush.msra.mxu2 %v5193_v63 }
0x1b1e   :  { %v4914_v18 = vpop.permute.xlu1 %4913 }
0x1b1f   :  { %v4916_v45 = vmul.f32 %v4914_v18, %v4890_v6 }
0x1b21   :  { %4918 = vrot.lane.b32.xlu0 %v4916_v45, %s11399_s2  ;;  %v5192_v45 = vld [vmem:[#allocation20 + $0x70] sm:$0xff] }
0x1b22   :  { %5276 = vmatpush.msrb.mxu1 %v5192_v45 }
0x1b93   :  { %v4919_v1 = vpop.permute.xlu0 %4918 }
0x1b94   :  { %v10313_v36 = vadd.f32 %v4919_v1, %v4911_v61  ;;  %v5190_v61 = vld [vmem:[#allocation20 + $0x60] sm:$0xff]  ;;  %v5191_v1 = vld [vmem:[#allocation20 + $0x68] sm:$0xff] }
0x1b95   :  { %5277 = vmatpush.msrb.mxu1 %v5190_v61  ;;  %5300 = vmatpush.msra.mxu2 %v5191_v1 }
0x1b96   :  { %7124 = vtanh.f32 %v10313_v36 }
0x1b97   :  { %7126 = vpow2.f32 %v6672_v39 }
0x1b9c   :  { %v7125_v38 = vpop.eup %7124 }
0x1b9d   :  { %4924 = vrot.lane.b32.xlu2 %v7125_v38, %s11399_s2  ;;  %v7127_v48 = vpop.eup %7126  ;;  %v5021_v38 = vrot.slane %v10313_v36, 6  ;;  %v5187_v36 = vld [vmem:[#allocation20 + $0x48] sm:$0xff] }
0x1b9e   :  { %v4876_v35 = vadd.f32 1.0, %v7127_v48 }
0x1ba0   :  { %7128 = vrcp.f32 %v4876_v35  ;;  %v4903_v0 = vand.u32 2147483648, %v4876_v35  ;;  %vm4897_vm7 = vweird.f32 %v4876_v35  ;;  %v4901_v62 = vand.u32 2147483647, %v4876_v35 }
0x1ba2   :  { %v4904_v55 = vor.u32 1.1754944e-38, %v4903_v0  ;;  %vm4902_vm10 = vcmp.eq.f32.partialorder %v4901_v62, 8.507059e+37  ;;  %v5189_v0 = vld [vmem:[#allocation20 + $0x58] sm:$0xff]  ;;  %v5186_v62 = vld [vmem:[#allocation20 + $0x40] sm:$0xff] }
0x1ba3   :  { %5301 = vmatpush.msra.mxu2 %v5189_v0 }
0x1ba5   :  { %5302 = vmatpush.msra.mxu2 %v5187_v36 }
0x1ba6   :  { %v7129_v42 = vpop.eup %7128 }
0x1ba7   :  { %v4893_v20 = vmul.f32 %v7129_v42, %v4876_v35  ;;  %vm4898_vm3 = vweird.f32 %v7129_v42 }
0x1ba8   :  { %vm4899_vm8 = vmor %vm4897_vm7, %vm4898_vm3 }
0x1ba9   :  { %v4894_v23 = vsub.f32 1.0, %v4893_v20 }
0x1bab   :  { %v4895_v59 = vmul.f32 %v7129_v42, %v4894_v23 }
0x1bad   :  { %v4896_v26 = vadd.f32 %v7129_v42, %v4895_v59 }
0x1baf   :  { %v4900_v56 = vsel %vm4899_vm8, %v7129_v42, %v4896_v26  ;;  %v5188_v26 = vld [vmem:[#allocation20 + $0x50] sm:$0xff] }
0x1bb0   :  { %v4905_v51 = vsel %vm4902_vm10, %v4904_v55, %v4900_v56  ;;  %5278 = vmatpush.msrb.mxu1 %v5188_v26  ;;  %v5184_v56 = vld [vmem:[#allocation20 + $0x30] sm:$0xff]  ;;  %v5185_v55 = vld [vmem:[#allocation20 + $0x38] sm:$0xff] }
0x1bb1   :  { %5303 = vmatpush.msra.mxu2 %v5185_v55 }
0x1bb2   :  { %5279 = vmatpush.msrb.mxu1 %v5186_v62 }
0x1bb4   :  { %5280 = vmatpush.msrb.mxu1 %v5184_v56 }
0x1bf7   :  { %v4925_v5 = vpop.permute.xlu2 %4924 }
0x1bf8   :  { %v4927_v33 = vmul.f32 %v4925_v5, %v4905_v51  ;;  %v5182_v51 = vld [vmem:[#allocation20 + $0x20] sm:$0xff]  ;;  %v5183_v5 = vld [vmem:[#allocation20 + $0x28] sm:$0xff] }
0x1bf9   :  { %5281 = vmatpush.msrb.mxu1 %v5182_v51  ;;  %5304 = vmatpush.msra.mxu2 %v5183_v5 }
0x1bfa   :  { %4928 = vst.msk [vmem:[#allocation4 + $0x8] sm:$0xc] %vm4484_vm14, %v4927_v33  ;;  %v4930_v50 = vrot.slane %v4927_v33, 2  ;;  %v5180_v33 = vld [vmem:[#allocation20 + $0x10] sm:$0xff] }
0x1bfb   :  { %5282 = vmatpush.msrb.mxu1 %v5180_v33 }
0x1bfc   :  { %6673 = vmatmul.msk.f32.vlgmr.msra.gmra.mxu0 %vm3939_vm0, %v4930_v50  ;;  %6674 = vmatmul.msk.f32.vlgmr.msrb.gmra.mxu3 %vm3939_vm0, %v4930_v50  ;;  %v5181_v50 = vld [vmem:[#allocation20 + $0x18] sm:$0xff] }
0x1bfd   :  { %5305 = vmatpush.msra.mxu2 %v5181_v50 }
0x1c79   :  { %v4950_v24 = vpop.f32.mrf.mxu0 }
0x1c7a   :  { %v4975_v28 = vrot.slane %v4950_v24, 4 }
0x1c7c   :  { %v4979_v46 = vadd.f32 %v4975_v28, %v10201_v53 }
0x1c7e   :  { %v6675_v15 = vmul.f32 -1.442695, %v4979_v46 }
0x1c7f   :  { %v4970_v34 = vpop.f32.mrf.mxu3 }
0x1c80   :  { %v4976_v30 = vrot.slane %v4970_v34, 4 }
0x1c82   :  { %v4980_v60 = vadd.f32 %v4976_v30, %v10208_v37  ;;  %v5178_v30 = vld [vmem:[#allocation20] sm:$0xff] }
0x1c83   :  { %5283 = vmatpush.msrb.mxu1 %v5178_v30 }
0x1c84   :  { %7130 = vtanh.f32 %v4980_v60  ;;  %v6676_v20 = vmul.f32 -1.442695, %v4980_v60  ;;  %v5179_v60 = vld [vmem:[#allocation20 + $0x8] sm:$0xff] }
0x1c85   :  { %7132 = vpow2.f32 %v6675_v15  ;;  %5306 = vmatpush.msra.mxu2 %v5179_v60 }
0x1c8a   :  { %v7131_v10 = vpop.eup %7130 }
0x1c8b   :  { %5025 = vrot.lane.b32.xlu1 %v7131_v10, %s11399_s2  ;;  %v7133_v7 = vpop.eup %7132 }
0x1c8c   :  { %v4987_v3 = vadd.f32 1.0, %v7133_v7 }
0x1c8e   :  { %7134 = vrcp.f32 %v4987_v3  ;;  %v5000_v32 = vand.u32 2147483648, %v4987_v3  ;;  %vm4994_vm3 = vweird.f32 %v4987_v3  ;;  %v4998_v22 = vand.u32 2147483647, %v4987_v3 }
0x1c90   :  { %v5001_v31 = vor.u32 1.1754944e-38, %v5000_v32  ;;  %vm4999_vm8 = vcmp.eq.f32.partialorder %v4998_v22, 8.507059e+37  ;;  %v10332_v32 = vld [vmem:[#allocation4] sm:$0xff] }
0x1c94   :  { %v7135_v58 = vpop.eup %7134 }
0x1c95   :  { %v4990_v14 = vmul.f32 %v7135_v58, %v4987_v3  ;;  %vm4995_vm11 = vweird.f32 %v7135_v58 }
0x1c96   :  { %vm4996_vm7 = vmor %vm4994_vm3, %vm4995_vm11 }
0x1c97   :  { %v4991_v4 = vsub.f32 1.0, %v4990_v14 }
0x1c99   :  { %v4992_v13 = vmul.f32 %v7135_v58, %v4991_v4 }
0x1c9b   :  { %v4993_v17 = vadd.f32 %v7135_v58, %v4992_v13 }
0x1c9d   :  { %v4997_v40 = vsel %vm4996_vm7, %v7135_v58, %v4993_v17 }
0x1c9e   :  { %v5002_v18 = vsel %vm4999_vm8, %v5001_v31, %v4997_v40 }
0x1c9f   :  { %v5023_v39 = vmul.f32 %v5021_v38, %v5002_v18 }
0x1cfd   :  { %v5026_v9 = vpop.permute.xlu1 %5025 }
0x1cfe   :  { %v5028_v6 = vmul.f32 %v5026_v9, %v5002_v18 }
0x1d00   :  { %5030 = vrot.lane.b32.xlu0 %v5028_v6, %s11399_s2 }
0x1d72   :  { %v5031_v48 = vpop.permute.xlu0 %5030 }
0x1d73   :  { %v10325_v35 = vadd.f32 %v5031_v48, %v5023_v39 }
0x1d75   :  { %7136 = vtanh.f32 %v10325_v35  ;;  %v5133_v36 = vrot.slane %v10325_v35, 6  ;;  %v5204_v35 = vld [vmem:[#allocation22 + $0x50] sm:$0xff] }
0x1d76   :  { %7138 = vpow2.f32 %v6676_v20 }
0x1d7b   :  { %v7137_v42 = vpop.eup %7136 }
0x1d7c   :  { %5036 = vrot.lane.b32.xlu2 %v7137_v42, %s11399_s2  ;;  %v7139_v23 = vpop.eup %7138 }
0x1d7d   :  { %v4988_v59 = vadd.f32 1.0, %v7139_v23 }
0x1d7f   :  { %7140 = vrcp.f32 %v4988_v59  ;;  %v5015_v15 = vand.u32 2147483648, %v4988_v59  ;;  %vm5009_vm11 = vweird.f32 %v4988_v59  ;;  %v5013_v7 = vand.u32 2147483647, %v4988_v59 }
0x1d81   :  { %v5016_v58 = vor.u32 1.1754944e-38, %v5015_v15  ;;  %vm5014_vm7 = vcmp.eq.f32.partialorder %v5013_v7, 8.507059e+37 }
0x1d85   :  { %v7141_v34 = vpop.eup %7140 }
0x1d86   :  { %v5005_v10 = vmul.f32 %v7141_v34, %v4988_v59  ;;  %vm5010_vm10 = vweird.f32 %v7141_v34 }
0x1d87   :  { %vm5011_vm3 = vmor %vm5009_vm11, %vm5010_vm10 }
0x1d88   :  { %v5006_v24 = vsub.f32 1.0, %v5005_v10 }
0x1d8a   :  { %v5007_v28 = vmul.f32 %v7141_v34, %v5006_v24 }
0x1d8c   :  { %v5008_v46 = vadd.f32 %v7141_v34, %v5007_v28  ;;  %v5208_v28 = vld [vmem:[#allocation22 + $0x70] sm:$0xff] }
0x1d8d   :  { %5224 = vmatpush.msra.mxu3 %v5208_v28 }
0x1d8e   :  { %v5012_v3 = vsel %vm5011_vm3, %v7141_v34, %v5008_v46  ;;  %v5206_v46 = vld [vmem:[#allocation22 + $0x60] sm:$0xff] }
0x1d8f   :  { %v5017_v14 = vsel %vm5014_vm7, %v5016_v58, %v5012_v3  ;;  %5225 = vmatpush.msra.mxu3 %v5206_v46  ;;  %v5202_v3 = vld [vmem:[#allocation22 + $0x40] sm:$0xff] }
0x1d91   :  { %5226 = vmatpush.msra.mxu3 %v5204_v35  ;;  %v5314_v35 = vld [vmem:[%s10732_s16] sm:$0x3] }
0x1d93   :  { %5227 = vmatpush.msra.mxu3 %v5202_v3 }
0x1dd6   :  { %v5037_v4 = vpop.permute.xlu2 %5036 }
0x1dd7   :  { %v5039_v13 = vmul.f32 %v5037_v4, %v5017_v14  ;;  %v5200_v14 = vld [vmem:[#allocation22 + $0x30] sm:$0xff] }
0x1dd8   :  { %5228 = vmatpush.msra.mxu3 %v5200_v14 }
0x1dd9   :  { %5040 = vst.msk [vmem:[#allocation4 + $0x8] sm:$0x30] %vm4597_vm4, %v5039_v13  ;;  %v5042_v17 = vrot.slane %v5039_v13, 4 }
0x1ddb   :  { %6677 = vmatmul.msk.f32.vlgmr.msra.gmra.mxu1 %vm3939_vm0, %v5042_v17  ;;  %6678 = vmatmul.msk.f32.vlgmr.msrb.gmra.mxu2 %vm3939_vm0, %v5042_v17  ;;  %v5198_v17 = vld [vmem:[#allocation22 + $0x20] sm:$0xff] }
0x1ddc   :  { %5229 = vmatpush.msra.mxu3 %v5198_v17 }
0x1de3   :  { %6687 = vmatmul.msk.f32.vlgmr.msrb.gmra.mxu1 %vm3939_vm0, %v10332_v32  ;;  %6689 = vmatmul.msk.f32.vlgmr.msra.gmra.mxu2 %vm3939_vm0, %v10332_v32 }
0x1e58   :  { %v5062_v18 = vpop.f32.mrf.mxu1 }
0x1e59   :  { %v5087_v6 = vrot.slane %v5062_v18, 2  ;;  %v5209_v18 = vld [vmem:[#allocation22 + $0x78] sm:$0xff] }
0x1e5b   :  { %v5091_v45 = vadd.f32 %v5087_v6, %v10201_v53  ;;  %v7386_v6 = vld [vmem:[#allocation6] sm:$0xff] }
0x1e5d   :  { %v6679_v63 = vmul.f32 -1.442695, %v5091_v45  ;;  %v5207_v45 = vld [vmem:[#allocation22 + $0x68] sm:$0xff] }
0x1e5e   :  { %v5082_v22 = vpop.f32.mrf.mxu2 }
0x1e5f   :  { %v5088_v40 = vrot.slane %v5082_v22, 2 }
0x1e60   :  { %v5285_v46 = vpop.f32.mrf.mxu1 }
0x1e61   :  { %v5092_v31 = vadd.f32 %v5088_v40, %v10208_v37 }
0x1e63   :  { %7142 = vtanh.f32 %v5092_v31  ;;  %v6680_v33 = vmul.f32 -1.442695, %v5092_v31 }
0x1e64   :  { %7144 = vpow2.f32 %v6679_v63  ;;  %v5205_v63 = vld [vmem:[#allocation22 + $0x58] sm:$0xff] }
0x1e69   :  { %v7143_v9 = vpop.eup %7142 }
0x1e6a   :  { %5137 = vrot.lane.b32.xlu1 %v7143_v9, %s11399_s2  ;;  %v7145_v61 = vpop.eup %7144 }
0x1e6b   :  { %v5099_v1 = vadd.f32 1.0, %v7145_v61  ;;  %v5203_v61 = vld [vmem:[#allocation22 + $0x48] sm:$0xff] }
0x1e6d   :  { %7146 = vrcp.f32 %v5099_v1  ;;  %v5112_v37 = vand.u32 2147483648, %v5099_v1  ;;  %vm5106_vm10 = vweird.f32 %v5099_v1  ;;  %v5110_v23 = vand.u32 2147483647, %v5099_v1 }
0x1e6f   :  { %v5113_v26 = vor.u32 1.1754944e-38, %v5112_v37  ;;  %vm5111_vm3 = vcmp.eq.f32.partialorder %v5110_v23, 8.507059e+37  ;;  %v10350_v37 = vld [vmem:[#allocation23 + $0x70] sm:$0xff]  ;;  %v10352_v23 = vld [vmem:[#allocation23 + $0x78] sm:$0xff] }
0x1e70   :  { %5450 = vmatpush.msra.mxu1 %v10350_v37  ;;  %5470 = vmatpush.msrb.mxu2 %v10352_v23 }
0x1e73   :  { %v7147_v38 = vpop.eup %7146 }
0x1e74   :  { %v5102_v39 = vmul.f32 %v7147_v38, %v5099_v1  ;;  %vm5107_vm8 = vweird.f32 %v7147_v38  ;;  %v5201_v1 = vld [vmem:[#allocation22 + $0x38] sm:$0xff] }
0x1e75   :  { %vm5108_vm11 = vmor %vm5106_vm10, %vm5107_vm8 }
0x1e76   :  { %v5103_v48 = vsub.f32 1.0, %v5102_v39  ;;  %v5199_v39 = vld [vmem:[#allocation22 + $0x28] sm:$0xff] }
0x1e78   :  { %v5104_v42 = vmul.f32 %v7147_v38, %v5103_v48  ;;  %v5196_v48 = vld [vmem:[#allocation22 + $0x10] sm:$0xff] }
0x1e79   :  { %5230 = vmatpush.msra.mxu3 %v5196_v48 }
0x1e7a   :  { %v5105_v20 = vadd.f32 %v7147_v38, %v5104_v42  ;;  %v5197_v42 = vld [vmem:[#allocation22 + $0x18] sm:$0xff] }
0x1e7c   :  { %v5109_v59 = vsel %vm5108_vm11, %v7147_v38, %v5105_v20  ;;  %v7387_v38 = vld [vmem:[#allocation6 + $0x8] sm:$0xff]  ;;  %v5195_v20 = vld [vmem:[#allocation22 + $0x8] sm:$0xff] }
0x1e7d   :  { %v5114_v53 = vsel %vm5111_vm3, %v5113_v26, %v5109_v59  ;;  %v10358_v59 = vld [vmem:[#allocation23 + $0x60] sm:$0xff]  ;;  %v10360_v26 = vld [vmem:[#allocation23 + $0x68] sm:$0xff] }
0x1e7e   :  { %v5135_v56 = vmul.f32 %v5133_v36, %v5114_v53  ;;  %5451 = vmatpush.msra.mxu1 %v10358_v59  ;;  %5471 = vmatpush.msrb.mxu2 %v10360_v26  ;;  %v10374_v36 = vld [vmem:[#allocation23 + $0x48] sm:$0xff] }
0x1edc   :  { %v5138_v0 = vpop.permute.xlu1 %5137 }
0x1edd   :  { %v5140_v62 = vmul.f32 %v5138_v0, %v5114_v53  ;;  %v10362_v0 = vld [vmem:[#allocation23 + $0x50] sm:$0xff]  ;;  %v10366_v53 = vld [vmem:[#allocation23 + $0x58] sm:$0xff] }
0x1ede   :  { %5452 = vmatpush.msra.mxu1 %v10362_v0  ;;  %5472 = vmatpush.msrb.mxu2 %v10366_v53 }
0x1edf   :  { %5142 = vrot.lane.b32.xlu0 %v5140_v62, %s11399_s2  ;;  %v10372_v62 = vld [vmem:[#allocation23 + $0x40] sm:$0xff] }
0x1ee0   :  { %5453 = vmatpush.msra.mxu1 %v10372_v62  ;;  %5473 = vmatpush.msrb.mxu2 %v10374_v36 }
0x1f51   :  { %v5143_v55 = vpop.permute.xlu0 %5142 }
0x1f52   :  { %v5145_v51 = vadd.f32 %v5143_v55, %v5135_v56  ;;  %v10380_v56 = vld [vmem:[#allocation23 + $0x30] sm:$0xff]  ;;  %v10382_v55 = vld [vmem:[#allocation23 + $0x38] sm:$0xff] }
0x1f53   :  { %5454 = vmatpush.msra.mxu1 %v10380_v56  ;;  %5474 = vmatpush.msrb.mxu2 %v10382_v55 }
0x1f54   :  { %7148 = vtanh.f32 %v5145_v51  ;;  %v10384_v51 = vld [vmem:[#allocation23 + $0x20] sm:$0xff] }
0x1f55   :  { %7150 = vpow2.f32 %v6680_v33  ;;  %v10392_v33 = vld [vmem:[#allocation23 + $0x10] sm:$0xff]  ;;  %5455 = vmatpush.msra.mxu1 %v10384_v51 }
0x1f57   :  { %5456 = vmatpush.msra.mxu1 %v10392_v33 }
0x1f5a   :  { %v7149_v5 = vpop.eup %7148 }
0x1f5b   :  { %5148 = vrot.lane.b32.xlu2 %v7149_v5, %s11399_s2  ;;  %v7151_v50 = vpop.eup %7150  ;;  %v10386_v5 = vld [vmem:[#allocation23 + $0x28] sm:$0xff] }
0x1f5c   :  { %v5100_v34 = vadd.f32 1.0, %v7151_v50  ;;  %v10394_v50 = vld [vmem:[#allocation23 + $0x18] sm:$0xff]  ;;  %5475 = vmatpush.msrb.mxu2 %v10386_v5 }
0x1f5e   :  { %7152 = vrcp.f32 %v5100_v34  ;;  %v5127_v7 = vand.u32 2147483648, %v5100_v34  ;;  %vm5121_vm8 = vweird.f32 %v5100_v34  ;;  %v5125_v58 = vand.u32 2147483647, %v5100_v34  ;;  %5476 = vmatpush.msrb.mxu2 %v10394_v50 }
0x1f60   :  { %v5128_v13 = vor.u32 1.1754944e-38, %v5127_v7  ;;  %vm5126_vm11 = vcmp.eq.f32.partialorder %v5125_v58, 8.507059e+37  ;;  %v5317_v58 = vperm.slane %v5314_v35, 1 }
0x1f64   :  { %v7153_v30 = vpop.eup %7152 }
0x1f65   :  { %v5117_v60 = vmul.f32 %v7153_v30, %v5100_v34  ;;  %vm5122_vm7 = vweird.f32 %v7153_v30  ;;  %v10400_v34 = vld [vmem:[#allocation23] sm:$0xff] }
0x1f66   :  { %vm5123_vm10 = vmor %vm5121_vm8, %vm5122_vm7  ;;  %5457 = vmatpush.msra.mxu1 %v10400_v34 }
0x1f67   :  { %v5118_v10 = vsub.f32 1.0, %v5117_v60 }
0x1f68   :  { %5674 = vmatpush.msrb.mxu1 %v10350_v37 }
0x1f69   :  { %v5119_v24 = vmul.f32 %v7153_v30, %v5118_v10 }
0x1f6a   :  { %5675 = vmatpush.msrb.mxu1 %v10358_v59 }
0x1f6b   :  { %v5120_v15 = vadd.f32 %v7153_v30, %v5119_v24  ;;  %v5308_v24 = vpop.f32.mrf.mxu2 }
0x1f6c   :  { %5676 = vmatpush.msrb.mxu1 %v10362_v0 }
0x1f6d   :  { %v5124_v4 = vsel %vm5123_vm10, %v7153_v30, %v5120_v15  ;;  %v10402_v30 = vld [vmem:[#allocation23 + $0x8] sm:$0xff] }
0x1f6e   :  { %v5129_v22 = vsel %vm5126_vm11, %v5128_v13, %v5124_v4  ;;  %5477 = vmatpush.msrb.mxu2 %v10402_v30  ;;  %5677 = vmatpush.msrb.mxu1 %v10372_v62 }
0x1f70   :  { %5694 = vmatpush.msra.mxu2 %v10352_v23  ;;  %5678 = vmatpush.msrb.mxu1 %v10380_v56 }
0x1f72   :  { %5695 = vmatpush.msra.mxu2 %v10360_v26  ;;  %5679 = vmatpush.msrb.mxu1 %v10384_v51 }
0x1f74   :  { %5696 = vmatpush.msra.mxu2 %v10366_v53  ;;  %5680 = vmatpush.msrb.mxu1 %v10392_v33 }
0x1f76   :  { %5697 = vmatpush.msra.mxu2 %v10374_v36  ;;  %5681 = vmatpush.msrb.mxu1 %v10400_v34 }
0x1f78   :  { %5698 = vmatpush.msra.mxu2 %v10382_v55 }
0x1f7a   :  { %5699 = vmatpush.msra.mxu2 %v10386_v5 }
0x1f7c   :  { %5700 = vmatpush.msra.mxu2 %v10394_v50 }
0x1f7e   :  { %5701 = vmatpush.msra.mxu2 %v10402_v30 }
0x1fb5   :  { %v5149_v40 = vpop.permute.xlu2 %5148 }
0x1fb6   :  { %v5151_v31 = vmul.f32 %v5149_v40, %v5129_v22 }
0x1fb8   :  { %5152 = vst.msk [vmem:[#allocation4 + $0x8] sm:$0xc0] %vm4710_vm9, %v5151_v31  ;;  %v5316_v31 = vperm.slane %v5314_v35, 0 }
0x1fbf   :  { %v5154_v9 = vld [vmem:[#allocation4 + $0x8] sm:$0xff] }
0x1fc0   :  { %5169 = vmatpush.msrb.mxu0 %v5154_v9  ;;  %6688 = vmatmul.msk.f32.gmra.mxu1 %vm3939_vm0, %v5154_v9 }
0x1fc1   :  { %6690 = vmatmul.msk.f32.gmra.mxu2 %vm3939_vm0, %v5154_v9 }
0x1fc2   :  { %5170 = vmatpush.msrb.mxu0 %v10332_v32  ;;  %v5194_v32 = vld [vmem:[#allocation22] sm:$0xff] }
0x1fc3   :  { %6681 = vmatmul.msk.f32.vlgmr.msrb.gmra.mxu0 %vm2057_vm6, %v7386_v6  ;;  %5231 = vmatpush.msra.mxu3 %v5194_v32 }
0x1fc4   :  { %5247 = vmatpush.msra.mxu0 %v5209_v18 }
0x1fc5   :  { %5348 = vmatpush.msrb.mxu3 %v10350_v37 }
0x1fc6   :  { %5248 = vmatpush.msra.mxu0 %v5207_v45 }
0x1fc7   :  { %5349 = vmatpush.msrb.mxu3 %v10358_v59 }
0x1fc8   :  { %5249 = vmatpush.msra.mxu0 %v5205_v63 }
0x1fc9   :  { %5350 = vmatpush.msrb.mxu3 %v10362_v0 }
0x1fca   :  { %5250 = vmatpush.msra.mxu0 %v5203_v61 }
0x1fcb   :  { %6682 = vmatmul.msk.f32.gmra.mxu0 %vm2057_vm6, %v7387_v38  ;;  %5351 = vmatpush.msrb.mxu3 %v10372_v62 }
0x1fcc   :  { %5251 = vmatpush.msra.mxu0 %v5201_v1 }
0x1fcd   :  { %5352 = vmatpush.msrb.mxu3 %v10380_v56 }
0x1fce   :  { %5252 = vmatpush.msra.mxu0 %v5199_v39 }
0x1fcf   :  { %5353 = vmatpush.msrb.mxu3 %v10384_v51 }
0x1fd0   :  { %5253 = vmatpush.msra.mxu0 %v5197_v42 }
0x1fd1   :  { %5354 = vmatpush.msrb.mxu3 %v10392_v33 }
0x1fd2   :  { %5254 = vmatpush.msra.mxu0 %v5195_v20 }
0x1fd3   :  { %5355 = vmatpush.msrb.mxu3 %v10400_v34 }
0x1fd4   :  { %5368 = vmatpush.msrb.mxu0 %v10352_v23 }
0x1fd6   :  { %5369 = vmatpush.msrb.mxu0 %v10360_v26 }
0x1fd8   :  { %5370 = vmatpush.msrb.mxu0 %v10366_v53 }
0x1fda   :  { %5371 = vmatpush.msrb.mxu0 %v10374_v36 }
0x1fdc   :  { %5372 = vmatpush.msrb.mxu0 %v10382_v55 }
0x1fde   :  { %5373 = vmatpush.msrb.mxu0 %v10386_v5 }
0x1fe0   :  { %5374 = vmatpush.msrb.mxu0 %v10394_v50 }
0x1fe2   :  { %5375 = vmatpush.msrb.mxu0 %v10402_v30 }
0x203d   :  { %v5288_v17 = vpop.f32.mrf.mxu1 }
0x2040   :  { %v5172_v60 = vpop.f32.mrf.mxu0 }
0x2041   :  { %6683 = vmatmul.msk.f32.vlgmr.msra.gmra.mxu3 %vm3939_vm0, %v5172_v60  ;;  %6685 = vmatmul.msk.f32.vlgmr.msra.gmra.mxu0 %vm3939_vm0, %v5172_v60 }
0x2042   :  { %5562 = vmatpush.msra.mxu3 %v10350_v37  ;;  %5582 = vmatpush.msra.mxu0 %v10352_v23 }
0x2044   :  { %5563 = vmatpush.msra.mxu3 %v10358_v59  ;;  %5583 = vmatpush.msra.mxu0 %v10360_v26  ;;  %v5311_v7 = vpop.f32.mrf.mxu2 }
0x2046   :  { %5564 = vmatpush.msra.mxu3 %v10362_v0  ;;  %5584 = vmatpush.msra.mxu0 %v10366_v53 }
0x2048   :  { %v5175_v10 = vpop.f32.mrf.mxu0  ;;  %5565 = vmatpush.msra.mxu3 %v10372_v62  ;;  %5585 = vmatpush.msra.mxu0 %v10374_v36 }
0x2049   :  { %6684 = vmatmul.msk.f32.gmra.mxu3 %vm3939_vm0, %v5175_v10  ;;  %6686 = vmatmul.msk.f32.gmra.mxu0 %vm3939_vm0, %v5175_v10 }
0x204a   :  { %5566 = vmatpush.msra.mxu3 %v10380_v56  ;;  %5586 = vmatpush.msra.mxu0 %v10382_v55 }
0x204c   :  { %5567 = vmatpush.msra.mxu3 %v10384_v51  ;;  %5587 = vmatpush.msra.mxu0 %v10386_v5 }
0x204e   :  { %5568 = vmatpush.msra.mxu3 %v10392_v33  ;;  %5588 = vmatpush.msra.mxu0 %v10394_v50 }
0x2050   :  { %5569 = vmatpush.msra.mxu3 %v10400_v34  ;;  %5589 = vmatpush.msra.mxu0 %v10402_v30 }
0x2051   :  { %5356 = vmatmul.f32.vlgmr.msrb.gmra.mxu3 %v11401_v8  ;;  %5376 = vmatmul.f32.vlgmr.msrb.gmra.mxu0 %v11401_v8 }
0x2052   :  { %5786 = vmatpush.msrb.mxu3 %v10350_v37  ;;  %5806 = vmatpush.msrb.mxu0 %v10352_v23 }
0x2054   :  { %5787 = vmatpush.msrb.mxu3 %v10358_v59  ;;  %5807 = vmatpush.msrb.mxu0 %v10360_v26 }
0x2056   :  { %5788 = vmatpush.msrb.mxu3 %v10362_v0  ;;  %5808 = vmatpush.msrb.mxu0 %v10366_v53 }
0x2058   :  { %5789 = vmatpush.msrb.mxu3 %v10372_v62  ;;  %5809 = vmatpush.msrb.mxu0 %v10374_v36 }
0x205a   :  { %5790 = vmatpush.msrb.mxu3 %v10380_v56  ;;  %5810 = vmatpush.msrb.mxu0 %v10382_v55 }
0x205c   :  { %5791 = vmatpush.msrb.mxu3 %v10384_v51  ;;  %5811 = vmatpush.msrb.mxu0 %v10386_v5 }
0x205e   :  { %5792 = vmatpush.msrb.mxu3 %v10392_v33  ;;  %5812 = vmatpush.msrb.mxu0 %v10394_v50 }
0x2060   :  { %5793 = vmatpush.msrb.mxu3 %v10400_v34  ;;  %5813 = vmatpush.msrb.mxu0 %v10402_v30 }
0x20be   :  { %v5256_v28 = vpop.f32.mrf.mxu0 }
0x20bf   :  { %v5309_v4 = vadd.f32 %v5308_v24, %v5256_v28 }
0x20c1   :  { %v10473_v40 = vadd.f32 %v5317_v58, %v5309_v4 }
0x20c4   :  { %v5233_v15 = vpop.f32.mrf.mxu3 }
0x20c5   :  { %v5286_v61 = vadd.f32 %v5285_v46, %v5233_v15 }
0x20c6   :  { %v5259_v3 = vpop.f32.mrf.mxu0 }
0x20c7   :  { %v5312_v14 = vadd.f32 %v5311_v7, %v5259_v3  ;;  %v10479_v38 = vadd.f32 %v5316_v31, %v5286_v61 }
0x20c9   :  { %v10471_v13 = vadd.f32 %v5317_v58, %v5312_v14 }
0x20cc   :  { %v5236_v22 = vpop.f32.mrf.mxu3 }
0x20cd   :  { %v5289_v9 = vadd.f32 %v5288_v17, %v5236_v22 }
0x20ce   :  { %v5377_v18 = vpop.f32.mrf.mxu0 }
0x20cf   :  { %v10475_v6 = vadd.f32 %v5316_v31, %v5289_v9  ;;  %v5381_v45 = vadd.f32 %v5377_v18, %v10473_v40 }
0x20d1   :  { %7154 = vtanh.f32 %v5381_v45  ;;  %v6692_v9 = vmul.f32 -1.442695, %v5381_v45 }
0x20d4   :  { %v5357_v1 = vpop.f32.mrf.mxu3 }
0x20d5   :  { %v5380_v39 = vadd.f32 %v5357_v1, %v10479_v38 }
0x20d7   :  { %v7155_v63 = vpop.eup %7154  ;;  %v6691_v48 = vmul.f32 -1.442695, %v5380_v39 }
0x20d8   :  { %5423 = vrot.lane.b32.xlu1 %v7155_v63, %s11399_s2 }
0x20d9   :  { %7156 = vpow2.f32 %v6691_v48 }
0x20df   :  { %v7157_v42 = vpop.eup %7156 }
0x20e0   :  { %v5388_v32 = vadd.f32 1.0, %v7157_v42 }
0x20e2   :  { %7158 = vrcp.f32 %v5388_v32  ;;  %v5401_v35 = vand.u32 2147483648, %v5388_v32  ;;  %vm5395_vm7 = vweird.f32 %v5388_v32  ;;  %v5399_v7 = vand.u32 2147483647, %v5388_v32 }
0x20e4   :  { %v5402_v15 = vor.u32 1.1754944e-38, %v5401_v35  ;;  %vm5400_vm10 = vcmp.eq.f32.partialorder %v5399_v7, 8.507059e+37 }
0x20e8   :  { %v7159_v20 = vpop.eup %7158 }
0x20e9   :  { %v5391_v60 = vmul.f32 %v7159_v20, %v5388_v32  ;;  %vm5396_vm3 = vweird.f32 %v7159_v20 }
0x20ea   :  { %vm5397_vm8 = vmor %vm5395_vm7, %vm5396_vm3 }
0x20eb   :  { %v5392_v10 = vsub.f32 1.0, %v5391_v60 }
0x20ed   :  { %v5393_v24 = vmul.f32 %v7159_v20, %v5392_v10 }
0x20ef   :  { %v5394_v28 = vadd.f32 %v7159_v20, %v5393_v24 }
0x20f1   :  { %v5398_v46 = vsel %vm5397_vm8, %v7159_v20, %v5394_v28 }
0x20f2   :  { %v5403_v58 = vsel %vm5400_vm10, %v5402_v15, %v5398_v46 }
0x20f3   :  { %v5421_v4 = vmul.f32 0.0, %v5403_v58 }
0x214a   :  { %v5424_v3 = vpop.permute.xlu1 %5423 }
0x214b   :  { %v5426_v14 = vmul.f32 %v5424_v3, %v5403_v58 }
0x214d   :  { %5428 = vrot.lane.b32.xlu0 %v5426_v14, %s11399_s2 }
0x21bf   :  { %v5429_v17 = vpop.permute.xlu0 %5428 }
0x21c0   :  { %v10483_v22 = vadd.f32 %v5429_v17, %v5421_v4 }
0x21c2   :  { %7160 = vtanh.f32 %v10483_v22 }
0x21c3   :  { %7162 = vpow2.f32 %v6692_v9 }
0x21c8   :  { %v7161_v31 = vpop.eup %7160 }
0x21c9   :  { %5434 = vrot.lane.b32.xlu2 %v7161_v31, %s11399_s2  ;;  %v7163_v18 = vpop.eup %7162 }
0x21ca   :  { %v5389_v63 = vadd.f32 1.0, %v7163_v18 }
0x21cc   :  { %7164 = vrcp.f32 %v5389_v63  ;;  %v5416_v32 = vand.u32 2147483648, %v5389_v63  ;;  %vm5410_vm3 = vweird.f32 %v5389_v63  ;;  %v5414_v20 = vand.u32 2147483647, %v5389_v63 }
0x21ce   :  { %v5417_v10 = vor.u32 1.1754944e-38, %v5416_v32  ;;  %vm5415_vm8 = vcmp.eq.f32.partialorder %v5414_v20, 8.507059e+37 }
0x21d2   :  { %v7165_v61 = vpop.eup %7164 }
0x21d3   :  { %v5406_v1 = vmul.f32 %v7165_v61, %v5389_v63  ;;  %vm5411_vm11 = vweird.f32 %v7165_v61 }
0x21d4   :  { %vm5412_vm7 = vmor %vm5410_vm3, %vm5411_vm11 }
0x21d5   :  { %v5407_v39 = vsub.f32 1.0, %v5406_v1 }
0x21d7   :  { %v5408_v48 = vmul.f32 %v7165_v61, %v5407_v39 }
0x21d9   :  { %v5409_v42 = vadd.f32 %v7165_v61, %v5408_v48 }
0x21db   :  { %v5413_v60 = vsel %vm5412_vm7, %v7165_v61, %v5409_v42 }
0x21dc   :  { %v5418_v24 = vsel %vm5415_vm8, %v5417_v10, %v5413_v60 }
0x2223   :  { %v5435_v28 = vpop.permute.xlu2 %5434 }
0x2224   :  { %v5437_v45 = vmul.f32 %v5435_v28, %v5418_v24  ;;  %v5530_v24 = vrot.slane %v10483_v22, 6 }
0x2226   :  { %5438 = vst.msk [vmem:[#allocation5] sm:$0x3] %vm4372_vm12, %v5437_v45  ;;  %6693 = vmatmul.msk.f32.vlgmr.msra.gmra.mxu1 %vm3939_vm0, %v5437_v45  ;;  %6694 = vmatmul.msk.f32.vlgmr.msrb.gmra.mxu2 %vm3939_vm0, %v5437_v45 }
0x2227   :  { %5891 = vmatpush.msra.mxu1 %v10350_v37  ;;  %5911 = vmatpush.msrb.mxu2 %v10352_v23 }
0x2229   :  { %5892 = vmatpush.msra.mxu1 %v10358_v59  ;;  %5912 = vmatpush.msrb.mxu2 %v10360_v26 }
0x222b   :  { %5893 = vmatpush.msra.mxu1 %v10362_v0  ;;  %5913 = vmatpush.msrb.mxu2 %v10366_v53 }
0x222d   :  { %5894 = vmatpush.msra.mxu1 %v10372_v62  ;;  %5914 = vmatpush.msrb.mxu2 %v10374_v36 }
0x222f   :  { %5895 = vmatpush.msra.mxu1 %v10380_v56  ;;  %5915 = vmatpush.msrb.mxu2 %v10382_v55 }
0x2231   :  { %5896 = vmatpush.msra.mxu1 %v10384_v51  ;;  %5916 = vmatpush.msrb.mxu2 %v10386_v5 }
0x2233   :  { %5897 = vmatpush.msra.mxu1 %v10392_v33  ;;  %5917 = vmatpush.msrb.mxu2 %v10394_v50 }
0x2235   :  { %5898 = vmatpush.msra.mxu1 %v10400_v34  ;;  %5918 = vmatpush.msrb.mxu2 %v10402_v30 }
0x22a3   :  { %v5459_v3 = vpop.f32.mrf.mxu1 }
0x22a4   :  { %v5484_v58 = vrot.slane %v5459_v3, 6 }
0x22a6   :  { %v5488_v14 = vadd.f32 %v5484_v58, %v10479_v38 }
0x22a8   :  { %v6695_v4 = vmul.f32 -1.442695, %v5488_v14 }
0x22a9   :  { %v5479_v35 = vpop.f32.mrf.mxu2 }
0x22aa   :  { %v5485_v7 = vrot.slane %v5479_v35, 6 }
0x22ac   :  { %v5489_v46 = vadd.f32 %v5485_v7, %v10473_v40 }
0x22ae   :  { %7166 = vtanh.f32 %v5489_v46 }
0x22af   :  { %7168 = vpow2.f32 %v6695_v4 }
0x22b4   :  { %v7167_v15 = vpop.eup %7166 }
0x22b5   :  { %5534 = vrot.lane.b32.xlu1 %v7167_v15, %s11399_s2  ;;  %v7169_v17 = vpop.eup %7168  ;;  %v6696_v15 = vmul.f32 -1.442695, %v5489_v46 }
0x22b6   :  { %v5496_v31 = vadd.f32 1.0, %v7169_v17 }
0x22b8   :  { %7170 = vrcp.f32 %v5496_v31  ;;  %v5509_v39 = vand.u32 2147483648, %v5496_v31  ;;  %vm5503_vm11 = vweird.f32 %v5496_v31  ;;  %v5507_v48 = vand.u32 2147483647, %v5496_v31 }
0x22ba   :  { %v5510_v32 = vor.u32 1.1754944e-38, %v5509_v39  ;;  %vm5508_vm7 = vcmp.eq.f32.partialorder %v5507_v48, 8.507059e+37 }
0x22be   :  { %v7171_v9 = vpop.eup %7170 }
0x22bf   :  { %v5499_v18 = vmul.f32 %v7171_v9, %v5496_v31  ;;  %vm5504_vm10 = vweird.f32 %v7171_v9 }
0x22c0   :  { %vm5505_vm3 = vmor %vm5503_vm11, %vm5504_vm10 }
0x22c1   :  { %v5500_v63 = vsub.f32 1.0, %v5499_v18 }
0x22c3   :  { %v5501_v61 = vmul.f32 %v7171_v9, %v5500_v63 }
0x22c5   :  { %v5502_v1 = vadd.f32 %v7171_v9, %v5501_v61 }
0x22c7   :  { %v5506_v42 = vsel %vm5505_vm3, %v7171_v9, %v5502_v1 }
0x22c8   :  { %v5511_v60 = vsel %vm5508_vm7, %v5510_v32, %v5506_v42 }
0x22c9   :  { %v5532_v28 = vmul.f32 %v5530_v24, %v5511_v60 }
0x2327   :  { %v5535_v20 = vpop.permute.xlu1 %5534 }
0x2328   :  { %v5537_v10 = vmul.f32 %v5535_v20, %v5511_v60 }
0x232a   :  { %5539 = vrot.lane.b32.xlu0 %v5537_v10, %s11399_s2 }
0x239c   :  { %v5540_v45 = vpop.permute.xlu0 %5539 }
0x239d   :  { %v10511_v35 = vadd.f32 %v5540_v45, %v5532_v28 }
0x239f   :  { %7172 = vtanh.f32 %v10511_v35 }
0x23a0   :  { %7174 = vpow2.f32 %v6696_v15 }
0x23a5   :  { %v7173_v7 = vpop.eup %7172 }
0x23a6   :  { %5545 = vrot.lane.b32.xlu2 %v7173_v7, %s11399_s2  ;;  %v7175_v3 = vpop.eup %7174 }
0x23a7   :  { %v5497_v58 = vadd.f32 1.0, %v7175_v3 }
0x23a9   :  { %7176 = vrcp.f32 %v5497_v58  ;;  %v5524_v22 = vand.u32 2147483648, %v5497_v58  ;;  %vm5518_vm10 = vweird.f32 %v5497_v58  ;;  %v5522_v18 = vand.u32 2147483647, %v5497_v58 }
0x23ab   :  { %v5525_v61 = vor.u32 1.1754944e-38, %v5524_v22  ;;  %vm5523_vm3 = vcmp.eq.f32.partialorder %v5522_v18, 8.507059e+37 }
0x23af   :  { %v7177_v14 = vpop.eup %7176 }
0x23b0   :  { %v5514_v4 = vmul.f32 %v7177_v14, %v5497_v58  ;;  %vm5519_vm8 = vweird.f32 %v7177_v14 }
0x23b1   :  { %vm5520_vm11 = vmor %vm5518_vm10, %vm5519_vm8 }
0x23b2   :  { %v5515_v17 = vsub.f32 1.0, %v5514_v4 }
0x23b4   :  { %v5516_v31 = vmul.f32 %v7177_v14, %v5515_v17 }
0x23b6   :  { %v5517_v9 = vadd.f32 %v7177_v14, %v5516_v31 }
0x23b8   :  { %v5521_v63 = vsel %vm5520_vm11, %v7177_v14, %v5517_v9 }
0x23b9   :  { %v5526_v1 = vsel %vm5523_vm3, %v5525_v61, %v5521_v63 }
0x2400   :  { %v5546_v39 = vpop.permute.xlu2 %5545 }
0x2401   :  { %v5548_v46 = vmul.f32 %v5546_v39, %v5526_v1  ;;  %v5642_v39 = vrot.slane %v10511_v35, 6 }
0x2403   :  { %5549 = vst.msk [vmem:[#allocation5] sm:$0xc] %vm4484_vm14, %v5548_v46  ;;  %v5551_v48 = vrot.slane %v5548_v46, 2 }
0x2405   :  { %6697 = vmatmul.msk.f32.vlgmr.msra.gmra.mxu3 %vm3939_vm0, %v5551_v48  ;;  %6698 = vmatmul.msk.f32.vlgmr.msra.gmra.mxu0 %vm3939_vm0, %v5551_v48 }
0x2406   :  { %6003 = vmatpush.msra.mxu3 %v10350_v37  ;;  %6023 = vmatpush.msra.mxu0 %v10352_v23 }
0x2408   :  { %6004 = vmatpush.msra.mxu3 %v10358_v59  ;;  %6024 = vmatpush.msra.mxu0 %v10360_v26 }
0x240a   :  { %6005 = vmatpush.msra.mxu3 %v10362_v0  ;;  %6025 = vmatpush.msra.mxu0 %v10366_v53 }
0x240c   :  { %6006 = vmatpush.msra.mxu3 %v10372_v62  ;;  %6026 = vmatpush.msra.mxu0 %v10374_v36 }
0x240e   :  { %6007 = vmatpush.msra.mxu3 %v10380_v56  ;;  %6027 = vmatpush.msra.mxu0 %v10382_v55 }
0x2410   :  { %6008 = vmatpush.msra.mxu3 %v10384_v51  ;;  %6028 = vmatpush.msra.mxu0 %v10386_v5 }
0x2412   :  { %6009 = vmatpush.msra.mxu3 %v10392_v33  ;;  %6029 = vmatpush.msra.mxu0 %v10394_v50 }
0x2414   :  { %6010 = vmatpush.msra.mxu3 %v10400_v34  ;;  %6030 = vmatpush.msra.mxu0 %v10402_v30 }
0x2482   :  { %v5591_v42 = vpop.f32.mrf.mxu0 }
0x2483   :  { %v5597_v32 = vrot.slane %v5591_v42, 4 }
0x2485   :  { %v5601_v20 = vadd.f32 %v5597_v32, %v10473_v40 }
0x2487   :  { %7178 = vtanh.f32 %v5601_v20 }
0x2488   :  { %v5571_v10 = vpop.f32.mrf.mxu3 }
0x2489   :  { %v5596_v24 = vrot.slane %v5571_v10, 4 }
0x248b   :  { %v5600_v28 = vadd.f32 %v5596_v24, %v10479_v38 }
0x248d   :  { %v7179_v60 = vpop.eup %7178  ;;  %v6699_v45 = vmul.f32 -1.442695, %v5600_v28 }
0x248e   :  { %5646 = vrot.lane.b32.xlu1 %v7179_v60, %s11399_s2  ;;  %v6700_v60 = vmul.f32 -1.442695, %v5601_v20 }
0x248f   :  { %7180 = vpow2.f32 %v6699_v45 }
0x2495   :  { %v7181_v7 = vpop.eup %7180 }
0x2496   :  { %v5608_v15 = vadd.f32 1.0, %v7181_v7 }
0x2498   :  { %7182 = vrcp.f32 %v5608_v15  ;;  %v5621_v31 = vand.u32 2147483648, %v5608_v15  ;;  %vm5615_vm8 = vweird.f32 %v5608_v15  ;;  %v5619_v9 = vand.u32 2147483647, %v5608_v15 }
0x249a   :  { %v5622_v18 = vor.u32 1.1754944e-38, %v5621_v31  ;;  %vm5620_vm11 = vcmp.eq.f32.partialorder %v5619_v9, 8.507059e+37 }
0x249e   :  { %v7183_v3 = vpop.eup %7182 }
0x249f   :  { %v5611_v58 = vmul.f32 %v7183_v3, %v5608_v15  ;;  %vm5616_vm7 = vweird.f32 %v7183_v3 }
0x24a0   :  { %vm5617_vm10 = vmor %vm5615_vm8, %vm5616_vm7 }
0x24a1   :  { %v5612_v14 = vsub.f32 1.0, %v5611_v58 }
0x24a3   :  { %v5613_v4 = vmul.f32 %v7183_v3, %v5612_v14 }
0x24a5   :  { %v5614_v17 = vadd.f32 %v7183_v3, %v5613_v4 }
0x24a7   :  { %v5618_v22 = vsel %vm5617_vm10, %v7183_v3, %v5614_v17 }
0x24a8   :  { %v5623_v61 = vsel %vm5620_vm11, %v5622_v18, %v5618_v22 }
0x24a9   :  { %v5644_v46 = vmul.f32 %v5642_v39, %v5623_v61 }
0x2500   :  { %v5647_v63 = vpop.permute.xlu1 %5646 }
0x2501   :  { %v5649_v1 = vmul.f32 %v5647_v63, %v5623_v61 }
0x2503   :  { %5651 = vrot.lane.b32.xlu0 %v5649_v1, %s11399_s2 }
0x2575   :  { %v5652_v48 = vpop.permute.xlu0 %5651 }
0x2576   :  { %v10539_v42 = vadd.f32 %v5652_v48, %v5644_v46 }
0x2578   :  { %7184 = vtanh.f32 %v10539_v42  ;;  %v5754_v1 = vrot.slane %v10539_v42, 6 }
0x2579   :  { %7186 = vpow2.f32 %v6700_v60 }
0x257e   :  { %v7185_v32 = vpop.eup %7184 }
0x257f   :  { %5657 = vrot.lane.b32.xlu2 %v7185_v32, %s11399_s2  ;;  %v7187_v10 = vpop.eup %7186 }
0x2580   :  { %v5609_v24 = vadd.f32 1.0, %v7187_v10 }
0x2582   :  { %7188 = vrcp.f32 %v5609_v24  ;;  %v5636_v35 = vand.u32 2147483648, %v5609_v24  ;;  %vm5630_vm7 = vweird.f32 %v5609_v24  ;;  %v5634_v58 = vand.u32 2147483647, %v5609_v24 }
0x2584   :  { %v5637_v4 = vor.u32 1.1754944e-38, %v5636_v35  ;;  %vm5635_vm10 = vcmp.eq.f32.partialorder %v5634_v58, 8.507059e+37 }
0x2588   :  { %v7189_v28 = vpop.eup %7188 }
0x2589   :  { %v5626_v45 = vmul.f32 %v7189_v28, %v5609_v24  ;;  %vm5631_vm3 = vweird.f32 %v7189_v28 }
0x258a   :  { %vm5632_vm8 = vmor %vm5630_vm7, %vm5631_vm3 }
0x258b   :  { %v5627_v7 = vsub.f32 1.0, %v5626_v45 }
0x258d   :  { %v5628_v15 = vmul.f32 %v7189_v28, %v5627_v7 }
0x258f   :  { %v5629_v3 = vadd.f32 %v7189_v28, %v5628_v15 }
0x2591   :  { %v5633_v14 = vsel %vm5632_vm8, %v7189_v28, %v5629_v3 }
0x2592   :  { %v5638_v17 = vsel %vm5635_vm10, %v5637_v4, %v5633_v14 }
0x25d9   :  { %v5658_v31 = vpop.permute.xlu2 %5657 }
0x25da   :  { %v5660_v20 = vmul.f32 %v5658_v31, %v5638_v17 }
0x25dc   :  { %5661 = vst.msk [vmem:[#allocation5] sm:$0x30] %vm4597_vm4, %v5660_v20  ;;  %v5663_v9 = vrot.slane %v5660_v20, 4 }
0x25de   :  { %6701 = vmatmul.msk.f32.vlgmr.msrb.gmra.mxu1 %vm3939_vm0, %v5663_v9  ;;  %6702 = vmatmul.msk.f32.vlgmr.msra.gmra.mxu2 %vm3939_vm0, %v5663_v9 }
0x25df   :  { %6115 = vmatpush.msrb.mxu1 %v10350_v37  ;;  %6135 = vmatpush.msra.mxu2 %v10352_v23 }
0x25e1   :  { %6116 = vmatpush.msrb.mxu1 %v10358_v59  ;;  %6136 = vmatpush.msra.mxu2 %v10360_v26 }
0x25e3   :  { %6117 = vmatpush.msrb.mxu1 %v10362_v0  ;;  %6137 = vmatpush.msra.mxu2 %v10366_v53 }
0x25e5   :  { %6118 = vmatpush.msrb.mxu1 %v10372_v62  ;;  %6138 = vmatpush.msra.mxu2 %v10374_v36 }
0x25e7   :  { %6119 = vmatpush.msrb.mxu1 %v10380_v56  ;;  %6139 = vmatpush.msra.mxu2 %v10382_v55 }
0x25e9   :  { %6120 = vmatpush.msrb.mxu1 %v10384_v51  ;;  %6140 = vmatpush.msra.mxu2 %v10386_v5 }
0x25eb   :  { %6121 = vmatpush.msrb.mxu1 %v10392_v33  ;;  %6141 = vmatpush.msra.mxu2 %v10394_v50 }
0x25ed   :  { %6122 = vmatpush.msrb.mxu1 %v10400_v34  ;;  %6142 = vmatpush.msra.mxu2 %v10402_v30 }
0x265b   :  { %v5683_v0 = vpop.f32.mrf.mxu1 }
0x265c   :  { %v5708_v53 = vrot.slane %v5683_v0, 2 }
0x265e   :  { %v5712_v62 = vadd.f32 %v5708_v53, %v10479_v38 }
0x2660   :  { %v6703_v36 = vmul.f32 -1.442695, %v5712_v62 }
0x2661   :  { %v5703_v37 = vpop.f32.mrf.mxu2 }
0x2662   :  { %v5709_v23 = vrot.slane %v5703_v37, 2 }
0x2664   :  { %v5713_v59 = vadd.f32 %v5709_v23, %v10473_v40 }
0x2666   :  { %7190 = vtanh.f32 %v5713_v59  ;;  %v6704_v60 = vmul.f32 -1.442695, %v5713_v59 }
0x2667   :  { %7192 = vpow2.f32 %v6703_v36 }
0x266c   :  { %v7191_v26 = vpop.eup %7190 }
0x266d   :  { %5758 = vrot.lane.b32.xlu1 %v7191_v26, %s11399_s2  ;;  %v7193_v56 = vpop.eup %7192 }
0x266e   :  { %v5720_v55 = vadd.f32 1.0, %v7193_v56 }
0x2670   :  { %7194 = vrcp.f32 %v5720_v55  ;;  %v5733_v30 = vand.u32 2147483648, %v5720_v55  ;;  %vm5727_vm3 = vweird.f32 %v5720_v55  ;;  %v5731_v40 = vand.u32 2147483647, %v5720_v55 }
0x2672   :  { %v5734_v18 = vor.u32 1.1754944e-38, %v5733_v30  ;;  %vm5732_vm8 = vcmp.eq.f32.partialorder %v5731_v40, 8.507059e+37 }
0x2676   :  { %v7195_v51 = vpop.eup %7194 }
0x2677   :  { %v5723_v5 = vmul.f32 %v7195_v51, %v5720_v55  ;;  %vm5728_vm11 = vweird.f32 %v7195_v51 }
0x2678   :  { %vm5729_vm7 = vmor %vm5727_vm3, %vm5728_vm11 }
0x2679   :  { %v5724_v33 = vsub.f32 1.0, %v5723_v5 }
0x267b   :  { %v5725_v50 = vmul.f32 %v7195_v51, %v5724_v33 }
0x267d   :  { %v5726_v34 = vadd.f32 %v7195_v51, %v5725_v50 }
0x267f   :  { %v5730_v22 = vsel %vm5729_vm7, %v7195_v51, %v5726_v34 }
0x2680   :  { %v5735_v38 = vsel %vm5732_vm8, %v5734_v18, %v5730_v22 }
0x2681   :  { %v5756_v39 = vmul.f32 %v5754_v1, %v5735_v38 }
0x26df   :  { %v5759_v63 = vpop.permute.xlu1 %5758 }
0x26e0   :  { %v5761_v61 = vmul.f32 %v5759_v63, %v5735_v38 }
0x26e2   :  { %5763 = vrot.lane.b32.xlu0 %v5761_v61, %s11399_s2 }
0x2754   :  { %v5764_v46 = vpop.permute.xlu0 %5763 }
0x2755   :  { %v5766_v48 = vadd.f32 %v5764_v46, %v5756_v39 }
0x2757   :  { %7196 = vtanh.f32 %v5766_v48  ;;  %v5860_v63 = vrot.slane %v5766_v48, 6 }
0x2758   :  { %7198 = vpow2.f32 %v6704_v60 }
0x275d   :  { %v7197_v32 = vpop.eup %7196 }
0x275e   :  { %5769 = vrot.lane.b32.xlu2 %v7197_v32, %s11399_s2  ;;  %v7199_v10 = vpop.eup %7198 }
0x275f   :  { %v5721_v24 = vadd.f32 1.0, %v7199_v10 }
0x2761   :  { %7200 = vrcp.f32 %v5721_v24  ;;  %v5748_v35 = vand.u32 2147483648, %v5721_v24  ;;  %vm5742_vm11 = vweird.f32 %v5721_v24  ;;  %v5746_v42 = vand.u32 2147483647, %v5721_v24 }
0x2763   :  { %v5749_v14 = vor.u32 1.1754944e-38, %v5748_v35  ;;  %vm5747_vm7 = vcmp.eq.f32.partialorder %v5746_v42, 8.507059e+37 }
0x2767   :  { %v7201_v28 = vpop.eup %7200 }
0x2768   :  { %v5738_v45 = vmul.f32 %v7201_v28, %v5721_v24  ;;  %vm5743_vm10 = vweird.f32 %v7201_v28 }
0x2769   :  { %vm5744_vm3 = vmor %vm5742_vm11, %vm5743_vm10 }
0x276a   :  { %v5739_v7 = vsub.f32 1.0, %v5738_v45 }
0x276c   :  { %v5740_v15 = vmul.f32 %v7201_v28, %v5739_v7 }
0x276e   :  { %v5741_v3 = vadd.f32 %v7201_v28, %v5740_v15 }
0x2770   :  { %v5745_v58 = vsel %vm5744_vm3, %v7201_v28, %v5741_v3 }
0x2771   :  { %v5750_v4 = vsel %vm5747_vm7, %v5749_v14, %v5745_v58 }
0x27b8   :  { %v5770_v17 = vpop.permute.xlu2 %5769 }
0x27b9   :  { %v5772_v31 = vmul.f32 %v5770_v17, %v5750_v4 }
0x27bb   :  { %5773 = vst.msk [vmem:[#allocation5] sm:$0xc0] %vm4710_vm9, %v5772_v31  ;;  %v5775_v20 = vrot.slane %v5772_v31, 6 }
0x27bd   :  { %6705 = vmatmul.msk.f32.vlgmr.msrb.gmra.mxu3 %vm3939_vm0, %v5775_v20  ;;  %6706 = vmatmul.msk.f32.vlgmr.msrb.gmra.mxu0 %vm3939_vm0, %v5775_v20 }
0x283a   :  { %v5815_v9 = vpop.f32.mrf.mxu0 }
0x283b   :  { %v5819_v37 = vadd.f32 %v5815_v9, %v10471_v13 }
0x283d   :  { %7202 = vtanh.f32 %v5819_v37  ;;  %v6708_v46 = vmul.f32 -1.442695, %v5819_v37 }
0x2840   :  { %v5795_v59 = vpop.f32.mrf.mxu3 }
0x2841   :  { %v5818_v26 = vadd.f32 %v5795_v59, %v10475_v6 }
0x2843   :  { %v7203_v23 = vpop.eup %7202  ;;  %v6707_v0 = vmul.f32 -1.442695, %v5818_v26 }
0x2844   :  { %5864 = vrot.lane.b32.xlu1 %v7203_v23, %s11399_s2 }
0x2845   :  { %7204 = vpow2.f32 %v6707_v0 }
0x284b   :  { %v7205_v53 = vpop.eup %7204 }
0x284c   :  { %v5826_v62 = vadd.f32 1.0, %v7205_v53 }
0x284e   :  { %7206 = vrcp.f32 %v5826_v62  ;;  %v5839_v33 = vand.u32 2147483648, %v5826_v62  ;;  %vm5833_vm10 = vweird.f32 %v5826_v62  ;;  %v5837_v50 = vand.u32 2147483647, %v5826_v62 }
0x2850   :  { %v5840_v30 = vor.u32 1.1754944e-38, %v5839_v33  ;;  %vm5838_vm3 = vcmp.eq.f32.partialorder %v5837_v50, 8.507059e+37 }
0x2854   :  { %v7207_v36 = vpop.eup %7206 }
0x2855   :  { %v5829_v56 = vmul.f32 %v7207_v36, %v5826_v62  ;;  %vm5834_vm8 = vweird.f32 %v7207_v36 }
0x2856   :  { %vm5835_vm11 = vmor %vm5833_vm10, %vm5834_vm8 }
0x2857   :  { %v5830_v55 = vsub.f32 1.0, %v5829_v56 }
0x2859   :  { %v5831_v51 = vmul.f32 %v7207_v36, %v5830_v55 }
0x285b   :  { %v5832_v5 = vadd.f32 %v7207_v36, %v5831_v51 }
0x285d   :  { %v5836_v34 = vsel %vm5835_vm11, %v7207_v36, %v5832_v5 }
0x285e   :  { %v5841_v22 = vsel %vm5838_vm3, %v5840_v30, %v5836_v34 }
0x285f   :  { %v5862_v38 = vmul.f32 %v5860_v63, %v5841_v22 }
0x28b6   :  { %v5865_v40 = vpop.permute.xlu1 %5864 }
0x28b7   :  { %v5867_v18 = vmul.f32 %v5865_v40, %v5841_v22 }
0x28b9   :  { %5869 = vrot.lane.b32.xlu0 %v5867_v18, %s11399_s2 }
0x292b   :  { %v5870_v61 = vpop.permute.xlu0 %5869 }
0x292c   :  { %v5872_v1 = vadd.f32 %v5870_v61, %v5862_v38 }
0x292e   :  { %7208 = vtanh.f32 %v5872_v1  ;;  %v5971_v22 = vrot.slane %v5872_v1, 6 }
0x292f   :  { %7210 = vpow2.f32 %v6708_v46 }
0x2934   :  { %v7209_v39 = vpop.eup %7208 }
0x2935   :  { %5875 = vrot.lane.b32.xlu2 %v7209_v39, %s11399_s2  ;;  %v7211_v32 = vpop.eup %7210 }
0x2936   :  { %v5827_v60 = vadd.f32 1.0, %v7211_v32 }
0x2938   :  { %7212 = vrcp.f32 %v5827_v60  ;;  %v5854_v15 = vand.u32 2147483648, %v5827_v60  ;;  %vm5848_vm8 = vweird.f32 %v5827_v60  ;;  %v5852_v48 = vand.u32 2147483647, %v5827_v60 }
0x293a   :  { %v5855_v35 = vor.u32 1.1754944e-38, %v5854_v15  ;;  %vm5853_vm11 = vcmp.eq.f32.partialorder %v5852_v48, 8.507059e+37 }
0x293e   :  { %v7213_v10 = vpop.eup %7212 }
0x293f   :  { %v5844_v24 = vmul.f32 %v7213_v10, %v5827_v60  ;;  %vm5849_vm7 = vweird.f32 %v7213_v10 }
0x2940   :  { %vm5850_vm10 = vmor %vm5848_vm8, %vm5849_vm7 }
0x2941   :  { %v5845_v28 = vsub.f32 1.0, %v5844_v24 }
0x2943   :  { %v5846_v45 = vmul.f32 %v7213_v10, %v5845_v28 }
0x2945   :  { %v5847_v7 = vadd.f32 %v7213_v10, %v5846_v45 }
0x2947   :  { %v5851_v3 = vsel %vm5850_vm10, %v7213_v10, %v5847_v7 }
0x2948   :  { %v5856_v42 = vsel %vm5853_vm11, %v5855_v35, %v5851_v3 }
0x298f   :  { %v5876_v58 = vpop.permute.xlu2 %5875 }
0x2990   :  { %v5878_v14 = vmul.f32 %v5876_v58, %v5856_v42 }
0x2992   :  { %5879 = vst.msk [vmem:[#allocation5 + $0x8] sm:$0x3] %vm4372_vm12, %v5878_v14  ;;  %6709 = vmatmul.msk.f32.vlgmr.msra.gmra.mxu1 %vm3939_vm0, %v5878_v14  ;;  %6710 = vmatmul.msk.f32.vlgmr.msrb.gmra.mxu2 %vm3939_vm0, %v5878_v14 }
0x2a0f   :  { %v5900_v9 = vpop.f32.mrf.mxu1 }
0x2a10   :  { %v5925_v37 = vrot.slane %v5900_v9, 6 }
0x2a12   :  { %v5929_v23 = vadd.f32 %v5925_v37, %v10475_v6 }
0x2a14   :  { %v6711_v59 = vmul.f32 -1.442695, %v5929_v23 }
0x2a15   :  { %v5920_v4 = vpop.f32.mrf.mxu2 }
0x2a16   :  { %v5926_v17 = vrot.slane %v5920_v4, 6 }
0x2a18   :  { %v5930_v31 = vadd.f32 %v5926_v17, %v10471_v13 }
0x2a1a   :  { %7214 = vtanh.f32 %v5930_v31  ;;  %v6712_v39 = vmul.f32 -1.442695, %v5930_v31 }
0x2a1b   :  { %7216 = vpow2.f32 %v6711_v59 }
0x2a20   :  { %v7215_v20 = vpop.eup %7214 }
0x2a21   :  { %5975 = vrot.lane.b32.xlu1 %v7215_v20, %s11399_s2  ;;  %v7217_v26 = vpop.eup %7216 }
0x2a22   :  { %v5937_v0 = vadd.f32 1.0, %v7217_v26 }
0x2a24   :  { %7218 = vrcp.f32 %v5937_v0  ;;  %v5950_v51 = vand.u32 2147483648, %v5937_v0  ;;  %vm5944_vm3 = vweird.f32 %v5937_v0  ;;  %v5948_v5 = vand.u32 2147483647, %v5937_v0 }
0x2a26   :  { %v5951_v50 = vor.u32 1.1754944e-38, %v5950_v51  ;;  %vm5949_vm8 = vcmp.eq.f32.partialorder %v5948_v5, 8.507059e+37 }
0x2a2a   :  { %v7219_v53 = vpop.eup %7218 }
0x2a2b   :  { %v5940_v62 = vmul.f32 %v7219_v53, %v5937_v0  ;;  %vm5945_vm12 = vweird.f32 %v7219_v53 }
0x2a2c   :  { %vm5946_vm7 = vmor %vm5944_vm3, %vm5945_vm12 }
0x2a2d   :  { %v5941_v36 = vsub.f32 1.0, %v5940_v62 }
0x2a2f   :  { %v5942_v56 = vmul.f32 %v7219_v53, %v5941_v36 }
0x2a31   :  { %v5943_v55 = vadd.f32 %v7219_v53, %v5942_v56 }
0x2a33   :  { %v5947_v33 = vsel %vm5946_vm7, %v7219_v53, %v5943_v55 }
0x2a34   :  { %v5952_v30 = vsel %vm5949_vm8, %v5951_v50, %v5947_v33 }
0x2a35   :  { %v5973_v18 = vmul.f32 %v5971_v22, %v5952_v30 }
0x2a93   :  { %v5976_v34 = vpop.permute.xlu1 %5975 }
0x2a94   :  { %v5978_v40 = vmul.f32 %v5976_v34, %v5952_v30 }
0x2a96   :  { %5980 = vrot.lane.b32.xlu0 %v5978_v40, %s11399_s2 }
0x2b08   :  { %v5981_v63 = vpop.permute.xlu0 %5980 }
0x2b09   :  { %v5983_v38 = vadd.f32 %v5981_v63, %v5973_v18 }
0x2b0b   :  { %7220 = vtanh.f32 %v5983_v38  ;;  %v6083_v40 = vrot.slane %v5983_v38, 6 }
0x2b0c   :  { %7222 = vpow2.f32 %v6712_v39 }
0x2b11   :  { %v7221_v61 = vpop.eup %7220 }
0x2b12   :  { %5986 = vrot.lane.b32.xlu2 %v7221_v61, %s11399_s2  ;;  %v7223_v46 = vpop.eup %7222 }
0x2b13   :  { %v5938_v32 = vadd.f32 1.0, %v7223_v46 }
0x2b15   :  { %7224 = vrcp.f32 %v5938_v32  ;;  %v5965_v7 = vand.u32 2147483648, %v5938_v32  ;;  %vm5959_vm11 = vweird.f32 %v5938_v32  ;;  %v5963_v1 = vand.u32 2147483647, %v5938_v32 }
0x2b17   :  { %v5966_v48 = vor.u32 1.1754944e-38, %v5965_v7  ;;  %vm5964_vm3 = vcmp.eq.f32.partialorder %v5963_v1, 8.507059e+37 }
0x2b1b   :  { %v7225_v60 = vpop.eup %7224 }
0x2b1c   :  { %v5955_v10 = vmul.f32 %v7225_v60, %v5938_v32  ;;  %vm5960_vm10 = vweird.f32 %v7225_v60 }
0x2b1d   :  { %vm5961_vm12 = vmor %vm5959_vm11, %vm5960_vm10 }
0x2b1e   :  { %v5956_v24 = vsub.f32 1.0, %v5955_v10 }
0x2b20   :  { %v5957_v28 = vmul.f32 %v7225_v60, %v5956_v24 }
0x2b22   :  { %v5958_v45 = vadd.f32 %v7225_v60, %v5957_v28 }
0x2b24   :  { %v5962_v15 = vsel %vm5961_vm12, %v7225_v60, %v5958_v45 }
0x2b25   :  { %v5967_v3 = vsel %vm5964_vm3, %v5966_v48, %v5962_v15 }
0x2b6c   :  { %v5987_v35 = vpop.permute.xlu2 %5986 }
0x2b6d   :  { %v5989_v42 = vmul.f32 %v5987_v35, %v5967_v3 }
0x2b6f   :  { %5990 = vst.msk [vmem:[#allocation5 + $0x8] sm:$0xc] %vm4484_vm14, %v5989_v42  ;;  %v5992_v58 = vrot.slane %v5989_v42, 2 }
0x2b71   :  { %6713 = vmatmul.msk.f32.vlgmr.msra.gmra.mxu3 %vm3939_vm0, %v5992_v58  ;;  %6714 = vmatmul.msk.f32.vlgmr.msra.gmra.mxu0 %vm3939_vm0, %v5992_v58 }
0x2bee   :  { %v6032_v14 = vpop.f32.mrf.mxu0 }
0x2bef   :  { %v6038_v4 = vrot.slane %v6032_v14, 4 }
0x2bf1   :  { %v6042_v17 = vadd.f32 %v6038_v4, %v10471_v13 }
0x2bf3   :  { %7226 = vtanh.f32 %v6042_v17  ;;  %v6716_v39 = vmul.f32 -1.442695, %v6042_v17 }
0x2bf4   :  { %v6012_v20 = vpop.f32.mrf.mxu3 }
0x2bf5   :  { %v6037_v9 = vrot.slane %v6012_v20, 4  ;;  %v6284_v20 = vsel %vm3947_vm2, 1, %v11402_v49 }
0x2bf7   :  { %v6041_v37 = vadd.f32 %v6037_v9, %v10475_v6  ;;  %v6728_v9 = vadd.f32 9.2103405, %v10010_v54 }
0x2bf9   :  { %v7227_v31 = vpop.eup %7226  ;;  %v6715_v23 = vmul.f32 -1.442695, %v6041_v37 }
0x2bfa   :  { %6087 = vrot.lane.b32.xlu1 %v7227_v31, %s11399_s2  ;;  %v6283_v31 = vsel %vm3946_vm1, 1, %v11402_v49 }
0x2bfb   :  { %7228 = vpow2.f32 %v6715_v23 }
0x2c01   :  { %v7229_v59 = vpop.eup %7228 }
0x2c02   :  { %v6049_v26 = vadd.f32 1.0, %v7229_v59 }
0x2c04   :  { %7230 = vrcp.f32 %v6049_v26  ;;  %v6062_v55 = vand.u32 2147483648, %v6049_v26  ;;  %vm6056_vm7 = vweird.f32 %v6049_v26  ;;  %v6060_v51 = vand.u32 2147483647, %v6049_v26 }
0x2c06   :  { %v6063_v33 = vor.u32 1.1754944e-38, %v6062_v55  ;;  %vm6061_vm10 = vcmp.eq.f32.partialorder %v6060_v51, 8.507059e+37 }
0x2c0a   :  { %v7231_v0 = vpop.eup %7230 }
0x2c0b   :  { %v6052_v53 = vmul.f32 %v7231_v0, %v6049_v26  ;;  %vm6057_vm14 = vweird.f32 %v7231_v0 }
0x2c0c   :  { %vm6058_vm8 = vmor %vm6056_vm7, %vm6057_vm14 }
0x2c0d   :  { %v6053_v62 = vsub.f32 1.0, %v6052_v53 }
0x2c0f   :  { %v6054_v36 = vmul.f32 %v7231_v0, %v6053_v62 }
0x2c11   :  { %v6055_v56 = vadd.f32 %v7231_v0, %v6054_v36 }
0x2c13   :  { %v6059_v5 = vsel %vm6058_vm8, %v7231_v0, %v6055_v56  ;;  %vm6325_vm8 = vcmp.eq.f32.partialorder %v10037_v41, 0.0 }
0x2c14   :  { %v6064_v34 = vsel %vm6061_vm10, %v6063_v33, %v6059_v5 }
0x2c15   :  { %v6085_v22 = vmul.f32 %v6083_v40, %v6064_v34 }
0x2c6c   :  { %v6088_v50 = vpop.permute.xlu1 %6087 }
0x2c6d   :  { %v6090_v30 = vmul.f32 %v6088_v50, %v6064_v34 }
0x2c6f   :  { %6092 = vrot.lane.b32.xlu0 %v6090_v30, %s11399_s2 }
0x2ce1   :  { %v6093_v18 = vpop.permute.xlu0 %6092 }
0x2ce2   :  { %v10591_v63 = vadd.f32 %v6093_v18, %v6085_v22 }
0x2ce4   :  { %7232 = vtanh.f32 %v10591_v63  ;;  %v6195_v30 = vrot.slane %v10591_v63, 6 }
0x2ce5   :  { %7234 = vpow2.f32 %v6716_v39 }
0x2cea   :  { %v7233_v61 = vpop.eup %7232 }
0x2ceb   :  { %6098 = vrot.lane.b32.xlu2 %v7233_v61, %s11399_s2  ;;  %v7235_v46 = vpop.eup %7234 }
0x2cec   :  { %v6050_v32 = vadd.f32 1.0, %v7235_v46 }
0x2cee   :  { %7236 = vrcp.f32 %v6050_v32  ;;  %v6077_v38 = vand.u32 2147483648, %v6050_v32  ;;  %vm6071_vm12 = vweird.f32 %v6050_v32  ;;  %v6075_v7 = vand.u32 2147483647, %v6050_v32 }
0x2cf0   :  { %v6078_v15 = vor.u32 1.1754944e-38, %v6077_v38  ;;  %vm6076_vm14 = vcmp.eq.f32.partialorder %v6075_v7, 8.507059e+37 }
0x2cf4   :  { %v7237_v60 = vpop.eup %7236 }
0x2cf5   :  { %v6067_v10 = vmul.f32 %v7237_v60, %v6050_v32  ;;  %vm6072_vm11 = vweird.f32 %v7237_v60 }
0x2cf6   :  { %vm6073_vm3 = vmor %vm6071_vm12, %vm6072_vm11 }
0x2cf7   :  { %v6068_v24 = vsub.f32 1.0, %v6067_v10 }
0x2cf9   :  { %v6069_v28 = vmul.f32 %v7237_v60, %v6068_v24 }
0x2cfb   :  { %v6070_v45 = vadd.f32 %v7237_v60, %v6069_v28 }
0x2cfd   :  { %v6074_v1 = vsel %vm6073_vm3, %v7237_v60, %v6070_v45 }
0x2cfe   :  { %v6079_v48 = vsel %vm6076_vm14, %v6078_v15, %v6074_v1 }
0x2d45   :  { %v6099_v3 = vpop.permute.xlu2 %6098 }
0x2d46   :  { %v6101_v35 = vmul.f32 %v6099_v3, %v6079_v48 }
0x2d48   :  { %6102 = vst.msk [vmem:[#allocation5 + $0x8] sm:$0x30] %vm4597_vm4, %v6101_v35  ;;  %v6104_v42 = vrot.slane %v6101_v35, 4 }
0x2d4a   :  { %6717 = vmatmul.msk.f32.vlgmr.msrb.gmra.mxu1 %vm3939_vm0, %v6104_v42  ;;  %6718 = vmatmul.msk.f32.vlgmr.msra.gmra.mxu2 %vm3939_vm0, %v6104_v42 }
0x2dc7   :  { %v6124_v37 = vpop.f32.mrf.mxu1 }
0x2dc8   :  { %v6149_v23 = vrot.slane %v6124_v37, 2 }
0x2dca   :  { %v6153_v59 = vadd.f32 %v6149_v23, %v10475_v6  ;;  %v6726_v23 = vadd.f32 0.000100005, %v10010_v54 }
0x2dcc   :  { %v6719_v57 = vmul.f32 -1.442695, %v6153_v59  ;;  %v6245_v59 = vld [vmem:[#allocation29 + $0x18] sm:$0xff] }
0x2dcd   :  { %v6144_v58 = vpop.f32.mrf.mxu2 }
0x2dce   :  { %v6150_v14 = vrot.slane %v6144_v58, 2 }
0x2dd0   :  { %v6154_v4 = vadd.f32 %v6150_v14, %v10471_v13  ;;  %v6376_v13 = vmul.f32 %v10016_v21, %v6728_v9 }
0x2dd2   :  { %7238 = vtanh.f32 %v6154_v4  ;;  %v6720_v10 = vmul.f32 -1.442695, %v6154_v4 }
0x2dd3   :  { %7240 = vpow2.f32 %v6719_v57 }
0x2dd8   :  { %v7239_v17 = vpop.eup %7238 }
0x2dd9   :  { %6199 = vrot.lane.b32.xlu1 %v7239_v17, %s11399_s2  ;;  %v7241_v26 = vpop.eup %7240  ;;  %v6249_v17 = vld [vmem:[#allocation29 + $0x38] sm:$0xff] }
0x2dda   :  { %v6161_v0 = vadd.f32 1.0, %v7241_v26  ;;  %6268 = vmatpush.msrb.mxu0 %v6249_v17  ;;  %v6215_v26 = vld [vmem:[#allocation5] sm:$0xff] }
0x2ddc   :  { %7242 = vrcp.f32 %v6161_v0  ;;  %v6174_v55 = vand.u32 2147483648, %v6161_v0  ;;  %vm6168_vm2 = vweird.f32 %v6161_v0  ;;  %v6172_v51 = vand.u32 2147483647, %v6161_v0 }
0x2dde   :  { %v6175_v33 = vor.u32 1.1754944e-38, %v6174_v55  ;;  %vm6173_vm7 = vcmp.eq.f32.partialorder %v6172_v51, 8.507059e+37 }
0x2de1   :  { %6286 = vperm.xlu1 %6775, %v6283_v31  }
0x2de2   :  { %v7243_v2 = vpop.eup %7242 }
0x2de3   :  { %v6164_v53 = vmul.f32 %v7243_v2, %v6161_v0  ;;  %vm6169_vm1 = vweird.f32 %v7243_v2  ;;  %v6372_v0 = vmul.f32 %v10016_v21, %v6726_v23  ;;  %v7389_v21 = vld [vmem:[#allocation6 + $0x8] sm:$0xff] }
0x2de4   :  { %vm6170_vm4 = vmor %vm6168_vm2, %vm6169_vm1  ;;  %vm6510_vm2 = vcmask 519168  }
0x2de5   :  { %v6165_v62 = vsub.f32 1.0, %v6164_v53  ;;  %v6244_v53 = vld [vmem:[#allocation29 + $0x10] sm:$0xff] }
0x2de7   :  { %v6166_v36 = vmul.f32 %v7243_v2, %v6165_v62  ;;  %v7388_v62 = vld [vmem:[#allocation6] sm:$0xff] }
0x2de9   :  { %6778 = vset.pattern.permute.xlu1 %v11403_v44  ;;  %v6167_v56 = vadd.f32 %v7243_v2, %v6166_v36 }
0x2dea   :  { %6308 = vperm.xlu1 %6778, %v6284_v20  }
0x2deb   :  { %v6171_v5 = vsel %vm6170_vm4, %v7243_v2, %v6167_v56  ;;  %v6727_v2 = vadd.f32 0.000100005, %v10025_v47  ;;  %vm6481_vm4 = vcmask 19456  }
0x2dec   :  { %v6176_v6 = vsel %vm6173_vm7, %v6175_v33, %v6171_v5  ;;  %vm6525_vm7 = vcmask 72704  }
0x2ded   :  { %v6197_v40 = vmul.f32 %v6195_v30, %v6176_v6  ;;  %v6373_v56 = vmul.f32 %v10029_v43, %v6727_v2 }
0x2df2   :  { %6380 = vrot.lane.b32.xlu1 %v6376_v13, %s7821_s13  ;;  %v6246_v13 = vld [vmem:[#allocation29 + $0x20] sm:$0xff] }
0x2e4b   :  { %v6200_v50 = vpop.permute.xlu1 %6199 }
0x2e4c   :  { %v6202_v34 = vmul.f32 %v6200_v50, %v6176_v6 }
0x2e4e   :  { %6204 = vrot.lane.b32.xlu0 %v6202_v34, %s11399_s2 }
0x2e53   :  { %v10628_v7 = vpop.permute.xlu1 %6286 }
0x2e56   :  { %6289 = vperm.xlu0 %6776, %v6284_v20   ;;  %v6247_v20 = vld [vmem:[#allocation29 + $0x28] sm:$0xff] }
0x2e5c   :  { %v10630_v4 = vpop.permute.xlu1 %6308 }
0x2e5d   :  { %vm6311_vm14 = vcmp.eq.s32.totalorder %v10630_v4, 1 }
0x2e5e   :  { %6330 = vrot.lane.b32.xlu0 %v10025_v47, %s7822_s18 }
0x2e5f   :  { %6779 = vset.pattern.permute.xlu0 %v11403_v44  ;;  %v6729_v44 = vadd.f32 9.2103405, %v10025_v47 }
0x2e61   :  { %v6377_v63 = vmul.f32 %v10029_v43, %v6729_v44  ;;  %v6451_v44 = vld [vmem:[%s10740_s24 + $0x28] sm:$0xff] }
0x2e64   :  { %v6381_v57 = vpop.permute.xlu1 %6380 }
0x2e65   :  { %v6386_v36 = vadd.f32 %v6381_v57, %v6372_v0 }
0x2e67   :  { %v6388_v5 = vmul.f32 %v9995_v25, %v6386_v36  ;;  %v7390_v25 = vld [vmem:[%s11400_s15] sm:$0x3] }
0x2ec0   :  { %v6205_v22 = vpop.permute.xlu0 %6204 }
0x2ec1   :  { %v6207_v18 = vadd.f32 %v6205_v22, %v6197_v40  ;;  %v347_v22 = vld [vmem:[#allocation10] sm:$0xff] }
0x2ec3   :  { %7244 = vtanh.f32 %v6207_v18 }
0x2ec4   :  { %7246 = vpow2.f32 %v6720_v10  ;;  %v6449_v10 = vld [vmem:[%s10740_s24 + $0x18] sm:$0xff] }
0x2ec8   :  { %v10616_v61 = vpop.permute.xlu0 %6289 }
0x2ec9   :  { %v7245_v39 = vpop.eup %7244  ;;  %vm6292_vm1 = vcmp.eq.s32.totalorder %v10616_v61, 1 }
0x2eca   :  { %6210 = vrot.lane.b32.xlu2 %v7245_v39, %s11399_s2  ;;  %v7247_v24 = vpop.eup %7246 }
0x2ecb   :  { %v6162_v41 = vadd.f32 1.0, %v7247_v24  ;;  %v6448_v24 = vld [vmem:[%s10740_s24 + $0x10] sm:$0xff] }
0x2ecd   :  { %7248 = vrcp.f32 %v6162_v41  ;;  %v6189_v15 = vand.u32 2147483648, %v6162_v41  ;;  %vm6183_vm11 = vweird.f32 %v6162_v41  ;;  %v6187_v48 = vand.u32 2147483647, %v6162_v41 }
0x2ecf   :  { %v6190_v35 = vor.u32 1.1754944e-38, %v6189_v15  ;;  %vm6188_vm3 = vcmp.eq.f32.partialorder %v6187_v48, 8.507059e+37 }
0x2ed0   :  { %v6331_v46 = vpop.permute.xlu0 %6330 }
0x2ed1   :  { %v6335_v32 = vsel %vm6325_vm8, %v6331_v46, %v10025_v47  ;;  %v6390_v47 = vadd.f32 2e-06, %v6388_v5  ;;  %vm6527_vm8 = vcmask 80896  }
0x2ed2   :  { %v6337_v60 = vmul.f32 %v6771_v52, %v6335_v32  ;;  %6305 = vperm.xlu2 %6777, %v6283_v31   ;;  %v6248_v31 = vld [vmem:[#allocation29 + $0x30] sm:$0xff] }
0x2ed3   :  { %v7249_v28 = vpop.eup %7248  ;;  %6269 = vmatpush.msrb.mxu0 %v6248_v31 }
0x2ed4   :  { %6345 = vperm.xlu1 %6778, %v6337_v60   ;;  %v6179_v45 = vmul.f32 %v7249_v28, %v6162_v41  ;;  %vm6184_vm10 = vweird.f32 %v7249_v28  ;;  %v6452_v60 = vld [vmem:[%s10740_s24 + $0x30] sm:$0xff]  ;;  %v6447_v41 = vld [vmem:[%s10740_s24 + $0x8] sm:$0xff] }
0x2ed5   :  { %vm6185_vm12 = vmor %vm6183_vm11, %vm6184_vm10  ;;  %6270 = vmatpush.msrb.mxu0 %v6247_v20  ;;  %vm6529_vm10 = vcmask 89088   ;;  %vm6531_vm11 = vcmask 91136  }
0x2ed6   :  { %v6180_v38 = vsub.f32 1.0, %v6179_v45 }
0x2ed7   :  { %6271 = vmatpush.msrb.mxu0 %v6246_v13 }
0x2ed8   :  { %v6181_v52 = vmul.f32 %v7249_v28, %v6180_v38  ;;  %v6782_v38 = vld [vmem:[%s10739_s23] ss:$0 sm:$0xff] }
0x2ed9   :  { %6272 = vmatpush.msrb.mxu0 %v6245_v59 }
0x2eda   :  { %6382 = vrot.lane.b32.xlu2 %v6377_v63, %s7821_s13  ;;  %v6182_v1 = vadd.f32 %v7249_v28, %v6181_v52  ;;  %v6450_v63 = vld [vmem:[%s10740_s24 + $0x20] sm:$0xff] }
0x2edb   :  { %6273 = vmatpush.msrb.mxu0 %v6244_v53 }
0x2edc   :  { %v6186_v3 = vsel %vm6185_vm12, %v7249_v28, %v6182_v1  ;;  %v6446_v28 = vld [vmem:[%s10740_s24] sm:$0xff] }
0x2edd   :  { %v6191_v42 = vsel %vm6188_vm3, %v6190_v35, %v6186_v3 }
0x2ee2   :  { %6328 = vrot.lane.b32.xlu2 %v10010_v54, %s7822_s18 }
0x2f24   :  { %v6211_v58 = vpop.permute.xlu2 %6210 }
0x2f25   :  { %v6213_v14 = vmul.f32 %v6211_v58, %v6191_v42 }
0x2f27   :  { %6214 = vst.msk [vmem:[#allocation5 + $0x8] sm:$0xc0] %vm4710_vm9, %v6213_v14  ;;  %vm6324_vm9 = vcmp.eq.f32.partialorder %v10022_v12, 0.0  ;;  %v6243_v12 = vld [vmem:[#allocation29 + $0x8] sm:$0xff] }
0x2f28   :  { %6274 = vmatpush.msrb.mxu0 %v6243_v12 }
0x2f2c   :  { %v10633_v9 = vpop.permute.xlu2 %6305 }
0x2f2e   :  { %v6216_v37 = vld [vmem:[#allocation5 + $0x8] sm:$0xff] }
0x2f2f   :  { %6231 = vmatpush.msrb.mxu3 %v6216_v37 }
0x2f31   :  { %6232 = vmatpush.msrb.mxu3 %v6215_v26 }
0x2f32   :  { %6721 = vmatmul.msk.f32.vlgmr.msrb.gmra.mxu3 %vm2057_vm6, %v7388_v62 }
0x2f34   :  { %v6383_v55 = vpop.permute.xlu2 %6382 }
0x2f35   :  { %v6387_v51 = vadd.f32 %v6383_v55, %v6373_v56  ;;  %v6783_v55 = vld [vmem:[%s11413_s25] ss:$0 sm:$0xff] }
0x2f37   :  { %v6389_v33 = vmul.f32 %v9998_v19, %v6387_v51  ;;  %v348_v19 = vld [vmem:[#allocation10 + $0x8] sm:$0xff] }
0x2f39   :  { %v6391_v50 = vadd.f32 2e-06, %v6389_v33 }
0x2f3a   :  { %6722 = vmatmul.msk.f32.gmra.mxu3 %vm2057_vm6, %v7389_v21 }
0x2f3b   :  { %6406 = vmatpush.msrb.mxu2 %v6391_v50 }
0x2f3c   :  { %v6329_v6 = vpop.permute.xlu2 %6328 }
0x2f3d   :  { %v6334_v34 = vsel %vm6324_vm9, %v6329_v6, %v10010_v54  ;;  %6407 = vmatpush.msrb.mxu2 %v6390_v47  ;;  %v6242_v54 = vld [vmem:[#allocation29] sm:$0xff] }
0x2f3e   :  { %v6336_v43 = vmul.f32 %v6772_v27, %v6334_v34  ;;  %6730 = vmatmul.msk.f32.vlgmr.msrb.gmra.mxu2 %vm2057_vm6, %v7390_v25  ;;  %6275 = vmatpush.msrb.mxu0 %v6242_v54 }
0x2f40   :  { %6340 = vperm.xlu0 %6779, %v6336_v43   ;;  %v6434_v43 = vrot.slane %v10047_v16, 4 }
0x2f46   :  { %v6346_v30 = vpop.permute.xlu1 %6345 }
0x2f47   :  { %v6349_v40 = vmul.f32 %v6346_v30, %v348_v19 }
0x2f48   :  { %6780 = vset.pattern.permute.xlu0 %v11402_v49  ;;  %v6453_v49 = vld [vmem:[%s10740_s24 + $0x38] sm:$0xff] }
0x2f49   :  { %6364 = vmatpush.msra.mxu1 %v6349_v40  ;;  %6469 = vmatpush.msra.mxu3 %v6453_v49 }
0x2f4b   :  { %6470 = vmatpush.msra.mxu3 %v6452_v60 }
0x2f4d   :  { %6471 = vmatpush.msra.mxu3 %v6451_v44 }
0x2f4f   :  { %6472 = vmatpush.msra.mxu3 %v6450_v63 }
0x2f51   :  { %6473 = vmatpush.msra.mxu3 %v6449_v10 }
0x2f53   :  { %6474 = vmatpush.msra.mxu3 %v6448_v24 }
0x2f55   :  { %6475 = vmatpush.msra.mxu3 %v6447_v41 }
0x2f57   :  { %6476 = vmatpush.msra.mxu3 %v6446_v28 }
0x2fb2   :  { %v6341_v29 = vpop.permute.xlu0 %6340 }
0x2fb3   :  { %v6348_v27 = vmul.f32 %v6341_v29, %v347_v22 }
0x2fb5   :  { %v6234_v18 = vpop.f32.mrf.mxu3  ;;  %6365 = vmatpush.msra.mxu1 %v6348_v27 }
0x2fb6   :  { %v6240_v39 = vsel %vm3806_vm15, %v6215_v26, %v6234_v18  ;;  %6725 = vmatmul.msk.f32.vlgmr.msra.gmra.mxu1 %vm2057_vm6, %v7390_v25  ;;  %vm6310_vm6 = vcmp.eq.s32.totalorder %v10633_v9, 1  ;;  %v6435_v25 = vadd.f32 %v6434_v43, %v10047_v16 }
0x2fb7   :  { %6723 = vmatmul.msk.f32.vlgmr.msrb.gmra.mxu0 %vm3939_vm0, %v6240_v39  ;;  %v11415_v39 = vld [vmem:[#allocation40_spill] sm:$0xff] }
0x2fb8   :  { %v6436_v19 = vrot.slane %v6435_v25, 2 }
0x2fba   :  { %v6437_v30 = vadd.f32 %v6436_v19, %v6435_v25 }
0x2fbc   :  { %v6438_v40 = vrot.slane %v6437_v30, 1 }
0x2fbd   :  { %v6237_v46 = vpop.f32.mrf.mxu3 }
0x2fbe   :  { %v6241_v32 = vsel %vm3806_vm15, %v6216_v37, %v6237_v46  ;;  %vm6291_vm15 = vcmp.eq.s32.totalorder %v10628_v7, 1  ;;  %v6439_v12 = vadd.f32 %v6438_v40, %v6437_v30 }
0x2fbf   :  { %6724 = vmatmul.msk.f32.gmra.mxu0 %vm3939_vm0, %v6241_v32 }
0x2fc0   :  { %v6440_v54 = vmul.f32 0.5, %v6439_v12 }
0x2fc1   :  { %v6409_v22 = vpop.f32.mrf.mxu2 }
0x2fc2   :  { %v6412_v29 = vmul.f32 0.01, %v6409_v22 }
0x3033   :  { %v6367_v28 = vpop.f32.mrf.mxu1 }
0x3034   :  { %v6277_v45 = vpop.f32.mrf.mxu0 }
0x3035   :  { %v6278_v52 = vadd.f32 %v6782_v38, %v6277_v45 }
0x3037   :  { %v6293_v15 = vsel %vm6291_vm15, %v6278_v52, -1e+30  ;;  %v6312_v48 = vsel %vm6310_vm6, %v6278_v52, -1e+30 }
0x3038   :  { %v6295_v58 = vsel %vm3939_vm0, %v6293_v15, -inf  ;;  %v6314_v14 = vsel %vm3939_vm0, %v6312_v48, -inf }
0x303c   :  { %v6280_v1 = vpop.f32.mrf.mxu0 }
0x303d   :  { %v6281_v3 = vadd.f32 %v6782_v38, %v6280_v1 }
0x303f   :  { %v6294_v35 = vsel %vm6292_vm1, %v6281_v3, -1e+30  ;;  %v6313_v42 = vsel %vm6311_vm14, %v6281_v3, -1e+30 }
0x3040   :  { %v6296_v17 = vsel %vm3939_vm0, %v6294_v35, -inf  ;;  %v6315_v31 = vsel %vm3939_vm0, %v6313_v42, -inf }
0x3041   :  { %v6297_v20 = vmax.f32 %v6295_v58, %v6296_v17  ;;  %v6316_v7 = vmax.f32 %v6314_v14, %v6315_v31 }
0x3043   :  { %v6298_v9 = vrot.slane %v6297_v20, 4  ;;  %v6317_v4 = vrot.slane %v6316_v7, 4 }
0x3045   :  { %v6299_v13 = vmax.f32 %v6297_v20, %v6298_v9  ;;  %v6318_v61 = vmax.f32 %v6316_v7, %v6317_v4 }
0x3047   :  { %v6300_v37 = vrot.slane %v6299_v13, 2  ;;  %v6319_v23 = vrot.slane %v6318_v61, 2 }
0x3049   :  { %v6301_v59 = vmax.f32 %v6299_v13, %v6300_v37  ;;  %v6320_v57 = vmax.f32 %v6318_v61, %v6319_v23 }
0x304b   :  { %v6302_v26 = vrot.slane %v6301_v59, 1  ;;  %v6321_v0 = vrot.slane %v6320_v57, 1 }
0x304d   :  { %v6303_v2 = vmax.f32 %v6301_v59, %v6302_v26  ;;  %v6322_v53 = vmax.f32 %v6320_v57, %v6321_v0 }
0x304f   :  { %v6323_v62 = vsel %vm3974_vm5, %v6303_v2, %v6322_v53  ;;  %vm6523_vm5 = vcmask 64512  }
0x3050   :  { %v6443_v36 = vrot.slane %v6323_v62, 6 }
0x3052   :  { %v6445_v56 = vsel %vm3910_vm13, %v10195_v11, %v6443_v36  ;;  %v6494_v11 = vld [vmem:[%s11414_s27] sm:$0x3] }
0x3053   :  { %6731 = vmatmul.msk.f32.vlgmr.msra.gmra.mxu3 %vm3939_vm0, %v6445_v56  ;;  %6511 = vst.msk [vmem:[%s11412_s21] sm:$0xf] %vm6510_vm2, %v6445_v56  ;;  %6496 = vperm.xlu0 %6780, %v6494_v11  }
0x30c5   :  { %v6497_v27 = vpop.permute.xlu0 %6496 }
0x30c6   :  { %vm6498_vm0 = vcmp.eq.s32.totalorder %v6497_v27, %v11415_v39 }
0x30c7   :  { %v6732_v46 = vsel %vm6498_vm0, 1.0, %v11401_v8 }
0x30c8   :  { %v6502_v49 = vrot.slane %v6732_v46, 6 }
0x30ca   :  { %v6504_v44 = vsel %vm3910_vm13, %v6732_v46, %v6502_v49 }
0x30d6   :  { %v6478_v51 = vpop.f32.mrf.mxu3 }
0x30d7   :  { %v6479_v5 = vadd.f32 %v6783_v55, %v6478_v51 }
0x30d9   :  { %v6482_v33 = vsel %vm6481_vm4, %v6479_v5, -inf }
0x30da   :  { %6483 = vmax.xlane.f32.xlu2 %v6482_v33 }
0x30f2   :  { %6516 = vrot.lane.b32.xlu2 %v6412_v29, %s7823_s12 }
0x314d   :  { %v6484_v50 = vpop.xlane.xlu2 %6483 }
0x314e   :  { %v6485_v21 = vsub.f32 %v6479_v5, %v6484_v50 }
0x3150   :  { %v6486_v47 = vmul.f32 1.442695, %v6485_v21 }
0x3152   :  { %7250 = vpow2.f32 %v6486_v47 }
0x3155   :  { %v6517_v38 = vpop.permute.xlu2 %6516 }
0x3158   :  { %v7251_v6 = vpop.eup %7250 }
0x3159   :  { %v6488_v34 = vsel %vm6481_vm4, %v7251_v6, 0.0 }
0x315a   :  { %6489 = vadd.xlane.f32.xlu1 %v6488_v34 }
0x3173   :  { %6520 = vrot.lane.b32.xlu1 %v6440_v54, %s7823_s12 }
0x31cd   :  { %v6490_v18 = vpop.xlane.xlu1 %6489 }
0x31ce   :  { %7252 = vlog2.f32 %v6490_v18 }
0x31d4   :  { %v7253_v32 = vpop.eup %7252 }
0x31d5   :  { %v6492_v16 = vmul.f32 0.6931472, %v7253_v32 }
0x31d7   :  { %v6493_v60 = vsub.f32 %v6485_v21, %v6492_v16 }
0x31d9   :  { %v6505_v63 = vmul.f32 %v6504_v44, %v6493_v60 }
0x31db   :  { %v6506_v10 = vsel %vm6481_vm4, %v6505_v63, 0.0 }
0x31dc   :  { %6507 = vadd.xlane.f32.xlu0 %v6506_v10 }
0x31e5   :  { %v6521_v1 = vpop.permute.xlu1 %6520 }
0x324f   :  { %v6508_v24 = vpop.xlane.xlu0 %6507 }
0x3250   :  { %v6509_v41 = vsub.f32 0.0, %v6508_v24 }
0x3252   :  { %v6513_v45 = vrot.slane %v6509_v41, 2 }
0x3254   :  { %v6524_v52 = vsel %vm6523_vm5, %v6367_v28, %v6513_v45 }
0x3255   :  { %v6526_v8 = vsel %vm6525_vm7, %v6524_v52, %v6509_v41 }
0x3256   :  { %v6528_v15 = vsel %vm6527_vm8, %v6526_v8, %v6517_v38 }
0x3257   :  { %v6530_v48 = vsel %vm6529_vm10, %v6528_v15, %v6521_v1 }
0x3258   :  { %6532 = vst.msk [vmem:[%s11416_s17] sm:$0x3] %vm6531_vm11, %v6530_v48 }
0x3259   :  { %6541 = vsyncpa [#allocation7], 1 }
0x325a   :  { %6542 = vsyncpa [#allocation9], 1 }
0x325b   :  { %6543 = vsyncpa [#allocation12], 1 }
0x325c   :  { %6544 = vsyncpa [#allocation15], 1 }
0x325d   :  { %6545 = vsyncpa [#allocation18], 1 }
0x325e   :  { %6546 = vsyncpa [#allocation21], 1 }
0x325f   :  { %6547 = vsyncpa [#allocation24], 1 }
0x3260   :  { %6548 = vsyncpa [#allocation27], 1 }
0x3261   :  { %6549 = vsyncpa [#allocation30], 1 }

</bundles_post_ra>
